<compile_context>
chip_gen: v6e
topology: v6e:2x2x1
jax: 0.10.0
libtpu: 0.0.40
codegen_flags: <defaults>
</compile_context>

<pallas_src>
import functools

import jax
import jax.numpy as jnp
from jax.experimental import pallas as pl
from jax.experimental.pallas import tpu as pltpu

_VMEM_LIMIT = 32 * 1024 * 1024   # v7x-safe ceiling; tiles here use only a few MiB
_BN_EPS = 1e-5


# ----------------------------- tile pickers ----------------------------------

def _pick_gemm_rows(m, target=2304):
    """Row tile for the conv GEMMs: big contiguous DMAs, >=2 blocks when easy."""
    if m <= target:
        half = m // 2
        if m % 2 == 0 and half % 8 == 0:
            return half                       # 2 blocks -> both v7x TCs busy
        return m
    best = m
    for d in range(8, target + 1, 8):
        if m % d == 0:
            best = d
    return best


def _pick_affine_rows(m, w, itemsize, budget=2 * 1024 * 1024):
    """Row tile for the affine kernel: >=2 blocks (v7x) within a VMEM budget."""
    if m % 16 == 0:
        best = None
        for d in range(8, m // 2 + 1, 8):
            if m % d == 0 and d * w * itemsize <= budget:
                best = d
        if best is not None:
            return best
    return m


# ----------------------------- Pallas kernels --------------------------------

def _matmul_fullk_kernel(a_ref, b_ref, o_ref):
    # K fits a single block -> no accumulator scratch, write the dot directly.
    o_ref[...] = jnp.dot(a_ref[...], b_ref[...],
                         preferred_element_type=jnp.float32).astype(o_ref.dtype)


def pallas_matmul_fullk(a, b, *, tm, tn, out_dtype=jnp.bfloat16):
    """C = A @ B with a full-K block per grid point (no K padding ever:
    a block dim equal to the full array dim is exempt from the (8,128) rule)."""
    M, K = a.shape
    K2, N = b.shape
    assert K == K2 and M % tm == 0 and N % tn == 0
    return pl.pallas_call(
        _matmul_fullk_kernel,
        out_shape=jax.ShapeDtypeStruct((M, N), out_dtype),
        grid_spec=pltpu.PrefetchScalarGridSpec(
            num_scalar_prefetch=0,
            grid=(M // tm, N // tn),
            in_specs=[pl.BlockSpec((tm, K), lambda i, j: (i, 0)),
                      pl.BlockSpec((K, tn), lambda i, j: (0, j))],
            out_specs=pl.BlockSpec((tm, tn), lambda i, j: (i, j)),
        ),
        compiler_params=pltpu.CompilerParams(
            dimension_semantics=("parallel", "parallel"),
            vmem_limit_bytes=_VMEM_LIMIT),
    )(a, b)


def _affine_kernel(x_ref, scale_ref, shift_ref, o_ref, *, relu):
    y = x_ref[...].astype(jnp.float32) * scale_ref[...] + shift_ref[...]
    if relu:
        y = jnp.maximum(y, 0.0)
    o_ref[...] = y.astype(o_ref.dtype)


def pallas_affine(x, scale, shift, relu):
    """y = x * scale + shift (per column) with optional fused ReLU.

    x is a lane-dense 2D slab (last dim = full width, multiple of 128);
    scale / shift are 1D of length x.shape[1].  bf16 in/out, f32 math."""
    M, W = x.shape
    tm = _pick_affine_rows(M, W, x.dtype.itemsize)
    return pl.pallas_call(
        functools.partial(_affine_kernel, relu=relu),
        out_shape=jax.ShapeDtypeStruct((M, W), x.dtype),
        grid=(M // tm,),
        in_specs=[pl.BlockSpec((tm, W), lambda i: (i, 0)),
                  pl.BlockSpec((1, W), lambda i: (0, 0)),
                  pl.BlockSpec((1, W), lambda i: (0, 0))],
        out_specs=pl.BlockSpec((tm, W), lambda i: (i, 0)),
        compiler_params=pltpu.CompilerParams(
            dimension_semantics=("parallel",),
            vmem_limit_bytes=_VMEM_LIMIT),
    )(x, scale.reshape(1, W).astype(jnp.float32),
      shift.reshape(1, W).astype(jnp.float32))


def _projector_kernel(x_ref, w1_ref, w2_ref, g1_ref, b1_ref, g2_ref, b2_ref,
                      o_ref, acc_ref, *, eps):
    # Streams W1 over the K grid; everything after the first GEMM runs once on
    # the last K step: BN1d (batch stats over the tiny row dim), ReLU, the
    # second GEMM against the VMEM-resident W2, and the final BN1d.
    k = pl.program_id(0)

    @pl.when(k == 0)
    def _():
        acc_ref[...] = jnp.zeros_like(acc_ref)

    acc_ref[...] += jnp.dot(x_ref[...], w1_ref[...],
                            preferred_element_type=jnp.float32)

    @pl.when(k == pl.num_programs(0) - 1)
    def _():
        h1 = acc_ref[...]                                   # (B, 512) f32
        m1 = jnp.mean(h1, axis=0, keepdims=True)
        v1 = jnp.mean(jnp.square(h1 - m1), axis=0, keepdims=True)
        s1 = g1_ref[...] * jax.lax.rsqrt(v1 + eps)
        h1 = jnp.maximum((h1 - m1) * s1 + b1_ref[...], 0.0)
        h2 = jnp.dot(h1.astype(jnp.bfloat16), w2_ref[...],
                     preferred_element_type=jnp.float32)    # (B, 512) f32
        m2 = jnp.mean(h2, axis=0, keepdims=True)
        v2 = jnp.mean(jnp.square(h2 - m2), axis=0, keepdims=True)
        s2 = g2_ref[...] * jax.lax.rsqrt(v2 + eps)
        o_ref[...] = ((h2 - m2) * s2 + b2_ref[...]).astype(o_ref.dtype)


def pallas_projector(feat, w1, w2, g1, b1, g2, b2, *, tk=2304, eps=_BN_EPS):
    """Fused projector: Linear -> BN1d -> ReLU -> Linear -> BN1d, one kernel."""
    B, K = feat.shape
    K2, H = w1.shape
    H2, N = w2.shape
    assert K == K2 and H == H2 and K % tk == 0
    g1 = g1.reshape(1, H).astype(jnp.float32)
    b1 = b1.reshape(1, H).astype(jnp.float32)
    g2 = g2.reshape(1, N).astype(jnp.float32)
    b2 = b2.reshape(1, N).astype(jnp.float32)
    return pl.pallas_call(
        functools.partial(_projector_kernel, eps=eps),
        out_shape=jax.ShapeDtypeStruct((B, N), jnp.float32),
        grid_spec=pltpu.PrefetchScalarGridSpec(
            num_scalar_prefetch=0,
            grid=(K // tk,),
            in_specs=[pl.BlockSpec((B, tk), lambda k: (0, k)),
                      pl.BlockSpec((tk, H), lambda k: (k, 0)),
                      pl.BlockSpec((H, N), lambda k: (0, 0)),
                      pl.BlockSpec((1, H), lambda k: (0, 0)),
                      pl.BlockSpec((1, H), lambda k: (0, 0)),
                      pl.BlockSpec((1, N), lambda k: (0, 0)),
                      pl.BlockSpec((1, N), lambda k: (0, 0))],
            out_specs=pl.BlockSpec((B, N), lambda k: (0, 0)),
            scratch_shapes=[pltpu.VMEM((B, H), jnp.float32)],
        ),
        compiler_params=pltpu.CompilerParams(
            dimension_semantics=("arbitrary",),
            vmem_limit_bytes=_VMEM_LIMIT),
    )(feat, w1, w2, g1, b1, g2, b2)


# ------------------------------ JAX glue ops ----------------------------------
# im2col, the 2x2 maxpool and the BN batch-statistic reductions stay as fused
# XLA glue (see TODOs at the top).

def im2col(x, kh, kw, stride):
    # x: (N, Hp, Wp, C), already padded (bf16)
    n, hp, wp, c = x.shape
    oh = (hp - kh) // stride + 1
    ow = (wp - kw) // stride + 1
    cols = []
    for i in range(kh):
        for j in range(kw):
            cols.append(x[:, i:i + stride * oh:stride,
                          j:j + stride * ow:stride, :])
    p = jnp.stack(cols, axis=3)                       # (N, oh, ow, kh*kw, C)
    p = p.reshape(n, oh, ow, kh * kw * c)
    return p.reshape(n * oh * ow, kh * kw * c), oh, ow


def conv2d(x, w2d, kh, kw, *, stride, pad, pad_mode):
    # x: NHWC, w2d: (kh*kw*Cin, Cout) bf16.  Conv bias is intentionally not
    # applied: it is exactly cancelled by the following train-mode BatchNorm.
    n = x.shape[0]
    cout = w2d.shape[1]
    x_p = jnp.pad(x.astype(jnp.bfloat16),
                  ((0, 0), (pad, pad), (pad, pad), (0, 0)), mode=pad_mode)
    cols, oh, ow = im2col(x_p, kh, kw, stride)
    M = cols.shape[0]
    y = pallas_matmul_fullk(cols, w2d, tm=_pick_gemm_rows(M), tn=cout,
                            out_dtype=jnp.bfloat16)
    return y.reshape(n, oh, ow, cout)


def _bn_scale_shift(x, gamma, beta, reduce_axes, eps=_BN_EPS):
    # Training-mode BatchNorm (biased batch variance), two-pass, in f32.
    xf = x.astype(jnp.float32)
    mean = jnp.mean(xf, axis=reduce_axes)
    var = jnp.mean(jnp.square(xf - mean), axis=reduce_axes)
    scale = gamma * jax.lax.rsqrt(var + eps)
    shift = beta - mean * scale
    return scale, shift


def batchnorm_relu_conv(x, gamma, beta, relu=True):
    # x: (n, oh, ow, c) bf16.  Apply the affine on a lane-dense (n*oh, ow*c)
    # slab so the Pallas stores are full 128-lane vst's.
    n, oh, ow, c = x.shape
    scale, shift = _bn_scale_shift(x, gamma, beta, reduce_axes=(0, 1, 2))
    y = pallas_affine(x.reshape(n * oh, ow * c),
                      jnp.tile(scale, ow), jnp.tile(shift, ow), relu)
    return y.reshape(n, oh, ow, c)


def maxpool2x2(x):
    n, h, w, c = x.shape
    return x.reshape(n, h // 2, 2, w // 2, 2, c).max(axis=(2, 4))


# ------------------------------- Forward --------------------------------------

def forward(params, img1, img2):
    p = params
    # model(torch.cat((img1, img2)))
    x = jnp.concatenate([img1, img2], axis=0)          # (2B, 3, 96, 96) NCHW
    x = jnp.transpose(x, (0, 2, 3, 1))                 # -> NHWC

    # Conv2d(3,64,7,stride=2,pad=3,reflect) + BN2d(64) + ReLU + MaxPool(2)
    x = conv2d(x, p['conv1_w2d'], 7, 7, stride=2, pad=3, pad_mode='reflect')
    x = batchnorm_relu_conv(x, p['bn1_g'], p['bn1_b'], relu=True)
    x = maxpool2x2(x)                                  # (2B, 24, 24, 64)

    # Conv2d(64,128,3,stride=2,pad=1) + BN2d(128) + ReLU + MaxPool(2)
    x = conv2d(x, p['conv2_w2d'], 3, 3, stride=2, pad=1, pad_mode='constant')
    x = batchnorm_relu_conv(x, p['bn2_g'], p['bn2_b'], relu=True)
    x = maxpool2x2(x)                                  # (2B, 6, 6, 128)

    # split, concat along channel dim, flatten in NCHW order (torch semantics)
    B = img1.shape[0]
    x1, x2 = x[:B], x[B:]
    x_nchw = jnp.concatenate([jnp.transpose(x1, (0, 3, 1, 2)),
                              jnp.transpose(x2, (0, 3, 1, 2))], axis=1)
    feat = x_nchw.reshape(B, -1).astype(jnp.bfloat16)  # (B, 9216)

    # Fully fused projector:
    # Linear(9216,512,no bias)->BN1d->ReLU->Linear(512,512,no bias)->BN1d
    out = pallas_projector(feat, p['p_w1'], p['p_w2'],
                           p['p_bn1_g'], p['p_bn1_b'],
                           p['p_bn2_g'], p['p_bn2_b'])
    return out                                         # (B, 512)


# ----------------------------- Param init -------------------------------------

def init_params(key):
    ks = jax.random.split(key, 4)
    p = {}
    p['conv1_w'] = 0.02 * jax.random.normal(ks[0], (7, 7, 3, 64), jnp.float32)
    p['conv1_b'] = jnp.zeros((64,), jnp.float32)       # unused: cancelled by BN
    p['bn1_g'] = jnp.ones((64,), jnp.float32)
    p['bn1_b'] = jnp.zeros((64,), jnp.float32)
    p['conv2_w'] = 0.02 * jax.random.normal(ks[1], (3, 3, 64, 128), jnp.float32)
    p['conv2_b'] = jnp.zeros((128,), jnp.float32)      # unused: cancelled by BN
    p['bn2_g'] = jnp.ones((128,), jnp.float32)
    p['bn2_b'] = jnp.zeros((128,), jnp.float32)
    p['p_w1'] = 0.02 * jax.random.normal(ks[2], (9216, 512), jnp.float32)
    p['p_bn1_g'] = jnp.ones((512,), jnp.float32)
    p['p_bn1_b'] = jnp.zeros((512,), jnp.float32)
    p['p_w2'] = 0.02 * jax.random.normal(ks[3], (512, 512), jnp.float32)
    p['p_bn2_g'] = jnp.ones((512,), jnp.float32)
    p['p_bn2_b'] = jnp.zeros((512,), jnp.float32)
    return p


def prepare_params(params):
    """One-time (outside the per-call path): cast GEMM weights to bf16 and
    reshape conv weights to their 2D GEMM form so nothing is re-copied per
    call; BN params stay f32."""
    p = dict(params)
    p['conv1_w2d'] = params['conv1_w'].reshape(-1, 64).astype(jnp.bfloat16)
    p['conv2_w2d'] = params['conv2_w'].reshape(-1, 128).astype(jnp.bfloat16)
    p['p_w1'] = params['p_w1'].astype(jnp.bfloat16)
    p['p_w2'] = params['p_w2'].astype(jnp.bfloat16)
    return p


if __name__ == "__main__":
    key = jax.random.PRNGKey(0)
    kp, k1, k2 = jax.random.split(key, 3)
    params = prepare_params(init_params(kp))

    # Spatial size 96 is forced by the projector's in_features=9216 (=256*6*6).
    B = 2
    img1 = jax.random.normal(k1, (B, 3, 96, 96), jnp.float32)
    img2 = jax.random.normal(k2, (B, 3, 96, 96), jnp.float32)

    fwd = jax.jit(functools.partial(forward, params))
    out = jax.block_until_ready(fwd(img1, img2))
    assert out.shape == (B, 512)
    assert bool(jnp.all(jnp.isfinite(out)))
    print("KERNEL_OK")
</pallas_src>

<mosaic_0001>
module attributes {stable_mosaic.version = 11 : i64} {
  func.func @_matmul_fullk_kernel(%arg0: i32, %arg1: i32, %arg2: memref<2304x147xbf16, #tpu.memory_space<vmem>>, %arg3: memref<147x64xbf16, #tpu.memory_space<vmem>>, %arg4: memref<2304x64xbf16, #tpu.memory_space<vmem>>) attributes {dimension_semantics = [#tpu.dimension_semantics<parallel>, #tpu.dimension_semantics<parallel>], iteration_bounds = array<i64: 4, 1>, scalar_prefetch = 0 : i64, scratch_operands = 0 : i64, tpu.core_type = #tpu.core_type<tc>, window_params = [{transform_indices = @transform_0, window_bounds = array<i64: 2304, 147>}, {transform_indices = @transform_1, window_bounds = array<i64: 147, 64>}, {transform_indices = @transform_2, window_bounds = array<i64: 2304, 64>}]} {
    %c0 = arith.constant 0 : index
    %c0_0 = arith.constant 0 : index
    %0 = vector.load %arg2[%c0, %c0_0] : memref<2304x147xbf16, #tpu.memory_space<vmem>>, vector<2304x147xbf16>
    %c0_1 = arith.constant 0 : index
    %c0_2 = arith.constant 0 : index
    %1 = vector.load %arg3[%c0_1, %c0_2] : memref<147x64xbf16, #tpu.memory_space<vmem>>, vector<147x64xbf16>
    %cst = arith.constant dense<0.000000e+00> : vector<2304x64xf32>
    %2 = tpu.matmul %0, %1, %cst {dimension_numbers = #tpu.dot_dimension_numbers<[1], [0], [0], [1], [0, 0, 1, 1], [], []>} : vector<2304x147xbf16>, vector<147x64xbf16>, vector<2304x64xf32> -> vector<2304x64xf32>
    %3 = arith.truncf %2 : vector<2304x64xf32> to vector<2304x64xbf16>
    %c0_3 = arith.constant 0 : index
    %c0_4 = arith.constant 0 : index
    %4 = vector.load %arg4[%c0_3, %c0_4] : memref<2304x64xbf16, #tpu.memory_space<vmem>>, vector<2304x64xbf16>
    tpu.vector_store %arg4[%c0_3, %c0_4], %3 {strides = array<i32>} : memref<2304x64xbf16, #tpu.memory_space<vmem>>, vector<2304x64xbf16>,
    return
  }
  func.func @transform_0(%arg0: i32, %arg1: i32) -> (i32, i32) {
    %c0_i32 = arith.constant 0 : i32
    %c0_i32_0 = arith.constant 0 : i32
    return %arg0, %c0_i32 : i32, i32
  }
  func.func @transform_1(%arg0: i32, %arg1: i32) -> (i32, i32) {
    %c0_i32 = arith.constant 0 : i32
    %c0_i32_0 = arith.constant 0 : i32
    return %c0_i32, %arg1 : i32, i32
  }
  func.func @transform_2(%arg0: i32, %arg1: i32) -> (i32, i32) {
    %c0_i32 = arith.constant 0 : i32
    return %arg0, %arg1 : i32, i32
  }
}

module attributes {stable_mosaic.version = 11 : i64} {
  func.func @_affine_kernel(%arg0: i32, %arg1: memref<96x3072xbf16, #tpu.memory_space<vmem>>, %arg2: memref<1x3072xf32, #tpu.memory_space<vmem>>, %arg3: memref<1x3072xf32, #tpu.memory_space<vmem>>, %arg4: memref<96x3072xbf16, #tpu.memory_space<vmem>>) attributes {dimension_semantics = [#tpu.dimension_semantics<parallel>], iteration_bounds = array<i64: 2>, scalar_prefetch = 0 : i64, scratch_operands = 0 : i64, tpu.core_type = #tpu.core_type<tc>, window_params = [{transform_indices = @transform_0, window_bounds = array<i64: 96, 3072>}, {pipeline_mode = #tpu.pipeline_mode<synchronous>, transform_indices = @transform_1, window_bounds = array<i64: 1, 3072>}, {pipeline_mode = #tpu.pipeline_mode<synchronous>, transform_indices = @transform_2, window_bounds = array<i64: 1, 3072>}, {transform_indices = @transform_3, window_bounds = array<i64: 96, 3072>}]} {
    %c0 = arith.constant 0 : index
    %c0_0 = arith.constant 0 : index
    %0 = vector.load %arg1[%c0, %c0_0] : memref<96x3072xbf16, #tpu.memory_space<vmem>>, vector<96x3072xbf16>
    %1 = arith.extf %0 : vector<96x3072xbf16> to vector<96x3072xf32>
    %c0_1 = arith.constant 0 : index
    %c0_2 = arith.constant 0 : index
    %2 = vector.load %arg2[%c0_1, %c0_2] : memref<1x3072xf32, #tpu.memory_space<vmem>>, vector<1x3072xf32>
    %3 = vector.broadcast %2 : vector<1x3072xf32> to vector<96x3072xf32>
    %4 = arith.mulf %1, %3 : vector<96x3072xf32>
    %c0_3 = arith.constant 0 : index
    %c0_4 = arith.constant 0 : index
    %5 = vector.load %arg3[%c0_3, %c0_4] : memref<1x3072xf32, #tpu.memory_space<vmem>>, vector<1x3072xf32>
    %6 = vector.broadcast %5 : vector<1x3072xf32> to vector<96x3072xf32>
    %7 = arith.addf %4, %6 : vector<96x3072xf32>
    %cst = arith.constant 0.000000e+00 : f32
    %8 = vector.broadcast %cst : f32 to vector<96x3072xf32>
    %9 = arith.maximumf %7, %8 : vector<96x3072xf32>
    %10 = arith.truncf %9 : vector<96x3072xf32> to vector<96x3072xbf16>
    %c0_5 = arith.constant 0 : index
    %c0_6 = arith.constant 0 : index
    %11 = vector.load %arg4[%c0_5, %c0_6] : memref<96x3072xbf16, #tpu.memory_space<vmem>>, vector<96x3072xbf16>
    tpu.vector_store %arg4[%c0_5, %c0_6], %10 {strides = array<i32>} : memref<96x3072xbf16, #tpu.memory_space<vmem>>, vector<96x3072xbf16>,
    return
  }
  func.func @transform_0(%arg0: i32) -> (i32, i32) {
    %c0_i32 = arith.constant 0 : i32
    %c0_i32_0 = arith.constant 0 : i32
    return %arg0, %c0_i32 : i32, i32
  }
  func.func @transform_1(%arg0: i32) -> (i32, i32) {
    %c0_i32 = arith.constant 0 : i32
    %c0_i32_0 = arith.constant 0 : i32
    %c0_i32_1 = arith.constant 0 : i32
    return %c0_i32, %c0_i32_0 : i32, i32
  }
  func.func @transform_2(%arg0: i32) -> (i32, i32) {
    %c0_i32 = arith.constant 0 : i32
    %c0_i32_0 = arith.constant 0 : i32
    %c0_i32_1 = arith.constant 0 : i32
    return %c0_i32, %c0_i32_0 : i32, i32
  }
  func.func @transform_3(%arg0: i32) -> (i32, i32) {
    %c0_i32 = arith.constant 0 : i32
    %c0_i32_0 = arith.constant 0 : i32
    return %arg0, %c0_i32 : i32, i32
  }
}

module attributes {stable_mosaic.version = 11 : i64} {
  func.func @_matmul_fullk_kernel(%arg0: i32, %arg1: i32, %arg2: memref<288x576xbf16, #tpu.memory_space<vmem>>, %arg3: memref<576x128xbf16, #tpu.memory_space<vmem>>, %arg4: memref<288x128xbf16, #tpu.memory_space<vmem>>) attributes {dimension_semantics = [#tpu.dimension_semantics<parallel>, #tpu.dimension_semantics<parallel>], iteration_bounds = array<i64: 2, 1>, scalar_prefetch = 0 : i64, scratch_operands = 0 : i64, tpu.core_type = #tpu.core_type<tc>, window_params = [{transform_indices = @transform_0, window_bounds = array<i64: 288, 576>}, {transform_indices = @transform_1, window_bounds = array<i64: 576, 128>}, {transform_indices = @transform_2, window_bounds = array<i64: 288, 128>}]} {
    %c0 = arith.constant 0 : index
    %c0_0 = arith.constant 0 : index
    %0 = vector.load %arg2[%c0, %c0_0] : memref<288x576xbf16, #tpu.memory_space<vmem>>, vector<288x576xbf16>
    %c0_1 = arith.constant 0 : index
    %c0_2 = arith.constant 0 : index
    %1 = vector.load %arg3[%c0_1, %c0_2] : memref<576x128xbf16, #tpu.memory_space<vmem>>, vector<576x128xbf16>
    %cst = arith.constant dense<0.000000e+00> : vector<288x128xf32>
    %2 = tpu.matmul %0, %1, %cst {dimension_numbers = #tpu.dot_dimension_numbers<[1], [0], [0], [1], [0, 0, 1, 1], [], []>} : vector<288x576xbf16>, vector<576x128xbf16>, vector<288x128xf32> -> vector<288x128xf32>
    %3 = arith.truncf %2 : vector<288x128xf32> to vector<288x128xbf16>
    %c0_3 = arith.constant 0 : index
    %c0_4 = arith.constant 0 : index
    %4 = vector.load %arg4[%c0_3, %c0_4] : memref<288x128xbf16, #tpu.memory_space<vmem>>, vector<288x128xbf16>
    tpu.vector_store %arg4[%c0_3, %c0_4], %3 {strides = array<i32>} : memref<288x128xbf16, #tpu.memory_space<vmem>>, vector<288x128xbf16>,
    return
  }
  func.func @transform_0(%arg0: i32, %arg1: i32) -> (i32, i32) {
    %c0_i32 = arith.constant 0 : i32
    %c0_i32_0 = arith.constant 0 : i32
    return %arg0, %c0_i32 : i32, i32
  }
  func.func @transform_1(%arg0: i32, %arg1: i32) -> (i32, i32) {
    %c0_i32 = arith.constant 0 : i32
    %c0_i32_0 = arith.constant 0 : i32
    return %c0_i32, %arg1 : i32, i32
  }
  func.func @transform_2(%arg0: i32, %arg1: i32) -> (i32, i32) {
    %c0_i32 = arith.constant 0 : i32
    return %arg0, %arg1 : i32, i32
  }
}

module attributes {stable_mosaic.version = 11 : i64} {
  func.func @_affine_kernel(%arg0: i32, %arg1: memref<24x1536xbf16, #tpu.memory_space<vmem>>, %arg2: memref<1x1536xf32, #tpu.memory_space<vmem>>, %arg3: memref<1x1536xf32, #tpu.memory_space<vmem>>, %arg4: memref<24x1536xbf16, #tpu.memory_space<vmem>>) attributes {dimension_semantics = [#tpu.dimension_semantics<parallel>], iteration_bounds = array<i64: 2>, scalar_prefetch = 0 : i64, scratch_operands = 0 : i64, tpu.core_type = #tpu.core_type<tc>, window_params = [{transform_indices = @transform_0, window_bounds = array<i64: 24, 1536>}, {pipeline_mode = #tpu.pipeline_mode<synchronous>, transform_indices = @transform_1, window_bounds = array<i64: 1, 1536>}, {pipeline_mode = #tpu.pipeline_mode<synchronous>, transform_indices = @transform_2, window_bounds = array<i64: 1, 1536>}, {transform_indices = @transform_3, window_bounds = array<i64: 24, 1536>}]} {
    %c0 = arith.constant 0 : index
    %c0_0 = arith.constant 0 : index
    %0 = vector.load %arg1[%c0, %c0_0] : memref<24x1536xbf16, #tpu.memory_space<vmem>>, vector<24x1536xbf16>
    %1 = arith.extf %0 : vector<24x1536xbf16> to vector<24x1536xf32>
    %c0_1 = arith.constant 0 : index
    %c0_2 = arith.constant 0 : index
    %2 = vector.load %arg2[%c0_1, %c0_2] : memref<1x1536xf32, #tpu.memory_space<vmem>>, vector<1x1536xf32>
    %3 = vector.broadcast %2 : vector<1x1536xf32> to vector<24x1536xf32>
    %4 = arith.mulf %1, %3 : vector<24x1536xf32>
    %c0_3 = arith.constant 0 : index
    %c0_4 = arith.constant 0 : index
    %5 = vector.load %arg3[%c0_3, %c0_4] : memref<1x1536xf32, #tpu.memory_space<vmem>>, vector<1x1536xf32>
    %6 = vector.broadcast %5 : vector<1x1536xf32> to vector<24x1536xf32>
    %7 = arith.addf %4, %6 : vector<24x1536xf32>
    %cst = arith.constant 0.000000e+00 : f32
    %8 = vector.broadcast %cst : f32 to vector<24x1536xf32>
    %9 = arith.maximumf %7, %8 : vector<24x1536xf32>
    %10 = arith.truncf %9 : vector<24x1536xf32> to vector<24x1536xbf16>
    %c0_5 = arith.constant 0 : index
    %c0_6 = arith.constant 0 : index
    %11 = vector.load %arg4[%c0_5, %c0_6] : memref<24x1536xbf16, #tpu.memory_space<vmem>>, vector<24x1536xbf16>
    tpu.vector_store %arg4[%c0_5, %c0_6], %10 {strides = array<i32>} : memref<24x1536xbf16, #tpu.memory_space<vmem>>, vector<24x1536xbf16>,
    return
  }
  func.func @transform_0(%arg0: i32) -> (i32, i32) {
    %c0_i32 = arith.constant 0 : i32
    %c0_i32_0 = arith.constant 0 : i32
    return %arg0, %c0_i32 : i32, i32
  }
  func.func @transform_1(%arg0: i32) -> (i32, i32) {
    %c0_i32 = arith.constant 0 : i32
    %c0_i32_0 = arith.constant 0 : i32
    %c0_i32_1 = arith.constant 0 : i32
    return %c0_i32, %c0_i32_0 : i32, i32
  }
  func.func @transform_2(%arg0: i32) -> (i32, i32) {
    %c0_i32 = arith.constant 0 : i32
    %c0_i32_0 = arith.constant 0 : i32
    %c0_i32_1 = arith.constant 0 : i32
    return %c0_i32, %c0_i32_0 : i32, i32
  }
  func.func @transform_3(%arg0: i32) -> (i32, i32) {
    %c0_i32 = arith.constant 0 : i32
    %c0_i32_0 = arith.constant 0 : i32
    return %arg0, %c0_i32 : i32, i32
  }
}

module attributes {stable_mosaic.version = 11 : i64} {
  func.func @_projector_kernel(%arg0: i32, %arg1: memref<2x2304xbf16, #tpu.memory_space<vmem>>, %arg2: memref<2304x512xbf16, #tpu.memory_space<vmem>>, %arg3: memref<512x512xbf16, #tpu.memory_space<vmem>>, %arg4: memref<1x512xf32, #tpu.memory_space<vmem>>, %arg5: memref<1x512xf32, #tpu.memory_space<vmem>>, %arg6: memref<1x512xf32, #tpu.memory_space<vmem>>, %arg7: memref<1x512xf32, #tpu.memory_space<vmem>>, %arg8: memref<2x512xf32, #tpu.memory_space<vmem>>, %arg9: memref<2x512xf32, #tpu.memory_space<vmem>>) attributes {dimension_semantics = [#tpu.dimension_semantics<arbitrary>], iteration_bounds = array<i64: 4>, scalar_prefetch = 0 : i64, scratch_operands = 1 : i64, tpu.core_type = #tpu.core_type<tc>, window_params = [{transform_indices = @transform_0, window_bounds = array<i64: 2, 2304>}, {transform_indices = @transform_1, window_bounds = array<i64: 2304, 512>}, {pipeline_mode = #tpu.pipeline_mode<synchronous>, transform_indices = @transform_2, window_bounds = array<i64: 512, 512>}, {pipeline_mode = #tpu.pipeline_mode<synchronous>, transform_indices = @transform_3, window_bounds = array<i64: 1, 512>}, {pipeline_mode = #tpu.pipeline_mode<synchronous>, transform_indices = @transform_4, window_bounds = array<i64: 1, 512>}, {pipeline_mode = #tpu.pipeline_mode<synchronous>, transform_indices = @transform_5, window_bounds = array<i64: 1, 512>}, {pipeline_mode = #tpu.pipeline_mode<synchronous>, transform_indices = @transform_6, window_bounds = array<i64: 1, 512>}, {pipeline_mode = #tpu.pipeline_mode<synchronous>, transform_indices = @transform_7, window_bounds = array<i64: 2, 512>}]} {
    %c0_i32 = arith.constant 0 : i32
    %0 = arith.cmpi eq, %arg0, %c0_i32 : i32
    %1 = arith.extui %0 : i1 to i32
    %c0_i32_0 = arith.constant 0 : i32
    %2 = arith.cmpi ne, %1, %c0_i32_0 : i32
    scf.if %2 {
      %cst_9 = arith.constant 0.000000e+00 : f32
      %12 = vector.broadcast %cst_9 : f32 to vector<2x512xf32>
      %c0_10 = arith.constant 0 : index
      %c0_11 = arith.constant 0 : index
      %13 = vector.load %arg9[%c0_10, %c0_11] : memref<2x512xf32, #tpu.memory_space<vmem>>, vector<2x512xf32>
      tpu.vector_store %arg9[%c0_10, %c0_11], %12 {strides = array<i32>} : memref<2x512xf32, #tpu.memory_space<vmem>>, vector<2x512xf32>,
    } else {
    }
    %c0 = arith.constant 0 : index
    %c0_1 = arith.constant 0 : index
    %3 = vector.load %arg9[%c0, %c0_1] : memref<2x512xf32, #tpu.memory_space<vmem>>, vector<2x512xf32>
    %c0_2 = arith.constant 0 : index
    %c0_3 = arith.constant 0 : index
    %4 = vector.load %arg1[%c0_2, %c0_3] : memref<2x2304xbf16, #tpu.memory_space<vmem>>, vector<2x2304xbf16>
    %c0_4 = arith.constant 0 : index
    %c0_5 = arith.constant 0 : index
    %5 = vector.load %arg2[%c0_4, %c0_5] : memref<2304x512xbf16, #tpu.memory_space<vmem>>, vector<2304x512xbf16>
    %cst = arith.constant dense<0.000000e+00> : vector<2x512xf32>
    %6 = tpu.matmul %4, %5, %cst {dimension_numbers = #tpu.dot_dimension_numbers<[1], [0], [0], [1], [0, 0, 1, 1], [], []>} : vector<2x2304xbf16>, vector<2304x512xbf16>, vector<2x512xf32> -> vector<2x512xf32>
    %7 = arith.addf %3, %6 : vector<2x512xf32>
    %c0_6 = arith.constant 0 : index
    %c0_7 = arith.constant 0 : index
    %8 = vector.load %arg9[%c0_6, %c0_7] : memref<2x512xf32, #tpu.memory_space<vmem>>, vector<2x512xf32>
    tpu.vector_store %arg9[%c0_6, %c0_7], %7 {strides = array<i32>} : memref<2x512xf32, #tpu.memory_space<vmem>>, vector<2x512xf32>,
    %c3_i32 = arith.constant 3 : i32
    %9 = arith.cmpi eq, %arg0, %c3_i32 : i32
    %10 = arith.extui %9 : i1 to i32
    %c0_i32_8 = arith.constant 0 : i32
    %11 = arith.cmpi ne, %10, %c0_i32_8 : i32
    scf.if %11 {
      %c0_9 = arith.constant 0 : index
      %c0_10 = arith.constant 0 : index
      %12 = vector.load %arg9[%c0_9, %c0_10] : memref<2x512xf32, #tpu.memory_space<vmem>>, vector<2x512xf32>
      %cst_11 = arith.constant dense<0.000000e+00> : vector<512xf32>
      %13 = vector.multi_reduction <add>, %12, %cst_11 [0] : vector<2x512xf32> to vector<512xf32>
      %14 = vector.shape_cast %13 : vector<512xf32> to vector<1x512xf32>
      %cst_12 = arith.constant 2.000000e+00 : f32
      %15 = vector.broadcast %cst_12 : f32 to vector<1x512xf32>
      %16 = arith.divf %14, %15 : vector<1x512xf32>
      %17 = vector.broadcast %16 : vector<1x512xf32> to vector<2x512xf32>
      %18 = arith.subf %12, %17 : vector<2x512xf32>
      %19 = arith.mulf %18, %18 : vector<2x512xf32>
      %cst_13 = arith.constant dense<0.000000e+00> : vector<512xf32>
      %20 = vector.multi_reduction <add>, %19, %cst_13 [0] : vector<2x512xf32> to vector<512xf32>
      %21 = vector.shape_cast %20 : vector<512xf32> to vector<1x512xf32>
      %cst_14 = arith.constant 2.000000e+00 : f32
      %22 = vector.broadcast %cst_14 : f32 to vector<1x512xf32>
      %23 = arith.divf %21, %22 : vector<1x512xf32>
      %c0_15 = arith.constant 0 : index
      %c0_16 = arith.constant 0 : index
      %24 = vector.load %arg4[%c0_15, %c0_16] : memref<1x512xf32, #tpu.memory_space<vmem>>, vector<1x512xf32>
      %cst_17 = arith.constant 9.99999974E-6 : f32
      %25 = vector.broadcast %cst_17 : f32 to vector<1x512xf32>
      %26 = arith.addf %23, %25 : vector<1x512xf32>
      %27 = math.rsqrt %26 : vector<1x512xf32>
      %28 = arith.mulf %24, %27 : vector<1x512xf32>
      %29 = vector.broadcast %16 : vector<1x512xf32> to vector<2x512xf32>
      %30 = arith.subf %12, %29 : vector<2x512xf32>
      %31 = vector.broadcast %28 : vector<1x512xf32> to vector<2x512xf32>
      %32 = arith.mulf %30, %31 : vector<2x512xf32>
      %c0_18 = arith.constant 0 : index
      %c0_19 = arith.constant 0 : index
      %33 = vector.load %arg5[%c0_18, %c0_19] : memref<1x512xf32, #tpu.memory_space<vmem>>, vector<1x512xf32>
      %34 = vector.broadcast %33 : vector<1x512xf32> to vector<2x512xf32>
      %35 = arith.addf %32, %34 : vector<2x512xf32>
      %cst_20 = arith.constant 0.000000e+00 : f32
      %36 = vector.broadcast %cst_20 : f32 to vector<2x512xf32>
      %37 = arith.maximumf %35, %36 : vector<2x512xf32>
      %38 = arith.truncf %37 : vector<2x512xf32> to vector<2x512xbf16>
      %c0_21 = arith.constant 0 : index
      %c0_22 = arith.constant 0 : index
      %39 = vector.load %arg3[%c0_21, %c0_22] : memref<512x512xbf16, #tpu.memory_space<vmem>>, vector<512x512xbf16>
      %cst_23 = arith.constant dense<0.000000e+00> : vector<2x512xf32>
      %40 = tpu.matmul %38, %39, %cst_23 {dimension_numbers = #tpu.dot_dimension_numbers<[1], [0], [0], [1], [0, 0, 1, 1], [], []>} : vector<2x512xbf16>, vector<512x512xbf16>, vector<2x512xf32> -> vector<2x512xf32>
      %cst_24 = arith.constant dense<0.000000e+00> : vector<512xf32>
      %41 = vector.multi_reduction <add>, %40, %cst_24 [0] : vector<2x512xf32> to vector<512xf32>
      %42 = vector.shape_cast %41 : vector<512xf32> to vector<1x512xf32>
      %cst_25 = arith.constant 2.000000e+00 : f32
      %43 = vector.broadcast %cst_25 : f32 to vector<1x512xf32>
      %44 = arith.divf %42, %43 : vector<1x512xf32>
      %45 = vector.broadcast %44 : vector<1x512xf32> to vector<2x512xf32>
      %46 = arith.subf %40, %45 : vector<2x512xf32>
      %47 = arith.mulf %46, %46 : vector<2x512xf32>
      %cst_26 = arith.constant dense<0.000000e+00> : vector<512xf32>
      %48 = vector.multi_reduction <add>, %47, %cst_26 [0] : vector<2x512xf32> to vector<512xf32>
      %49 = vector.shape_cast %48 : vector<512xf32> to vector<1x512xf32>
      %cst_27 = arith.constant 2.000000e+00 : f32
      %50 = vector.broadcast %cst_27 : f32 to vector<1x512xf32>
      %51 = arith.divf %49, %50 : vector<1x512xf32>
      %c0_28 = arith.constant 0 : index
      %c0_29 = arith.constant 0 : index
      %52 = vector.load %arg6[%c0_28, %c0_29] : memref<1x512xf32, #tpu.memory_space<vmem>>, vector<1x512xf32>
      %cst_30 = arith.constant 9.99999974E-6 : f32
      %53 = vector.broadcast %cst_30 : f32 to vector<1x512xf32>
      %54 = arith.addf %51, %53 : vector<1x512xf32>
      %55 = math.rsqrt %54 : vector<1x512xf32>
      %56 = arith.mulf %52, %55 : vector<1x512xf32>
      %57 = vector.broadcast %44 : vector<1x512xf32> to vector<2x512xf32>
      %58 = arith.subf %40, %57 : vector<2x512xf32>
      %59 = vector.broadcast %56 : vector<1x512xf32> to vector<2x512xf32>
      %60 = arith.mulf %58, %59 : vector<2x512xf32>
      %c0_31 = arith.constant 0 : index
      %c0_32 = arith.constant 0 : index
      %61 = vector.load %arg7[%c0_31, %c0_32] : memref<1x512xf32, #tpu.memory_space<vmem>>, vector<1x512xf32>
      %62 = vector.broadcast %61 : vector<1x512xf32> to vector<2x512xf32>
      %63 = arith.addf %60, %62 : vector<2x512xf32>
      %c0_33 = arith.constant 0 : index
      %c0_34 = arith.constant 0 : index
      %64 = vector.load %arg8[%c0_33, %c0_34] : memref<2x512xf32, #tpu.memory_space<vmem>>, vector<2x512xf32>
      tpu.vector_store %arg8[%c0_33, %c0_34], %63 {strides = array<i32>} : memref<2x512xf32, #tpu.memory_space<vmem>>, vector<2x512xf32>,
    } else {
    }
    return
  }
  func.func @transform_0(%arg0: i32) -> (i32, i32) {
    %c0_i32 = arith.constant 0 : i32
    %c0_i32_0 = arith.constant 0 : i32
    return %c0_i32, %arg0 : i32, i32
  }
  func.func @transform_1(%arg0: i32) -> (i32, i32) {
    %c0_i32 = arith.constant 0 : i32
    %c0_i32_0 = arith.constant 0 : i32
    return %arg0, %c0_i32 : i32, i32
  }
  func.func @transform_2(%arg0: i32) -> (i32, i32) {
    %c0_i32 = arith.constant 0 : i32
    %c0_i32_0 = arith.constant 0 : i32
    %c0_i32_1 = arith.constant 0 : i32
    return %c0_i32, %c0_i32_0 : i32, i32
  }
  func.func @transform_3(%arg0: i32) -> (i32, i32) {
    %c0_i32 = arith.constant 0 : i32
    %c0_i32_0 = arith.constant 0 : i32
    %c0_i32_1 = arith.constant 0 : i32
    return %c0_i32, %c0_i32_0 : i32, i32
  }
  func.func @transform_4(%arg0: i32) -> (i32, i32) {
    %c0_i32 = arith.constant 0 : i32
    %c0_i32_0 = arith.constant 0 : i32
    %c0_i32_1 = arith.constant 0 : i32
    return %c0_i32, %c0_i32_0 : i32, i32
  }
  func.func @transform_5(%arg0: i32) -> (i32, i32) {
    %c0_i32 = arith.constant 0 : i32
    %c0_i32_0 = arith.constant 0 : i32
    %c0_i32_1 = arith.constant 0 : i32
    return %c0_i32, %c0_i32_0 : i32, i32
  }
  func.func @transform_6(%arg0: i32) -> (i32, i32) {
    %c0_i32 = arith.constant 0 : i32
    %c0_i32_0 = arith.constant 0 : i32
    %c0_i32_1 = arith.constant 0 : i32
    return %c0_i32, %c0_i32_0 : i32, i32
  }
  func.func @transform_7(%arg0: i32) -> (i32, i32) {
    %c0_i32 = arith.constant 0 : i32
    %c0_i32_0 = arith.constant 0 : i32
    %c0_i32_1 = arith.constant 0 : i32
    return %c0_i32, %c0_i32_0 : i32, i32
  }
}

</mosaic_0001>

<bundles_post_ra>
// kernel: forward.5
= control target key start
LH: loop header
LB: loop body
LE: loop exit
PB: predicated region body
PF: predicated region fallthrough
CT: control target
= control target key end

     0   :  { %s6467_s9 = smov 0   ;;  %s6469_s10 = smov 0   ;;  %s7645_s0 = inlined_call_operand.vmem [shape: bf16[9216,147], index: 0, kind: input, shape index: {}]   ;;  %s7646_s1 = inlined_call_operand.vmem [shape: bf16[147,64], index: 1, kind: input, shape index: {}]   ;;  %s7647_s2 = inlined_call_operand.vmem [shape: bf16[9216,64], index: 2, kind: output, shape index: {}]  }
   0x1   :  { %s6471_s11 = smov 0  }
   0x2 LB: > { %s24_s12 = sadd.s32 1, %s6444_s10  ;;  %p5009_p0 = scmp.ge.s32.totalorder %s6448_s11, 1  ;;  %s6448_s11 = sphi %s6471_s11, %s12_s11   ;;  %s6444_s10 = sphi %s6469_s10, %s7649_s10   ;;  %s6440_s9 = sphi %s6467_s9, %s7648_s9  }
   0x3   : > { %p26_p1 = scmp.ge.s32.totalorder %s24_s12, 4  ;;  %p137_p2 = scmp.lt.s32.totalorder %s6448_s11, 5 }
   0x5   : > { %s7651_s12 = smov (%p26_p1, %s24_s12), 0  ;;  %p138_p3 = pnand %p5009_p0, %p137_p2 }
   0x6   : > { %s167_s19 = smul.u32 (!%p138_p3), 288, %s6440_s9 }
   0x7   : > { %141 = sbr.rel (%p138_p3) target bundleno = 821 (0x335), region = 28 }
   0x8   : > { %p168_p4 = scmp.lt.s32.totalorder (!%p138_p3), %s167_s19, 1151 }
   0xc   : > { %v6080_v0 = vld [vmem:[%s7646_s1 + $0x38] sm:$0xff]   ;;  %v6450_v1 = vmov 0   ;;  %v6081_v2 = vld [vmem:[%s7646_s1 + $0x30] sm:$0xff]   ;;  %v6082_v3 = vld [vmem:[%s7646_s1 + $0x28] sm:$0xff]   ;;  %s7653_s19 = smov (!%p168_p4, %s167_s19), 1151  ;;  %vm1848_vm0 = vcmask 154624  }
   0xd   : > { %2288 = vmatprep.subr.bf16.mxu0 %v6450_v1  ;;  %6034 = vmatprep.subr.bf16.mxu1 %v6450_v1  ;;  %v6083_v4 = vld [vmem:[%s7646_s1 + $0x20] sm:$0xff]   ;;  %s5745_s22 = sshll.u32 %s7653_s19, 3  ;;  %v6084_v5 = vld [vmem:[%s7646_s1 + $0x18] sm:$0xff]   ;;  %v6085_v8 = vld [vmem:[%s7646_s1 + $0x10] sm:$0xff]   ;;  %vm2281_vm1 = vcmask 1040384   ;;  %vm2282_vm2 = vcmask 1041408  }
   0xe   : > { %2289 = vmatpush1.bf16.msra.mxu0 %v6080_v0  ;;  %6044 = vmatpush1.bf16.msra.mxu1 %v6080_v0  ;;  %s6509_s27 = scalar_lea.vmem %s7645_s0, %s5745_s22  ;;  %v6086_v9 = vld [vmem:[%s7646_s1 + $0x8] sm:$0xff]   ;;  %v6451_v10 = vmov 65535   ;;  %v6087_v12 = vld [vmem:[%s7646_s1] sm:$0xff]   ;;  %s5012_s13 = sshll.u32 %s7653_s19, 2  ;;  %vm4625_vm3 = vcmask 519168  }
   0xf   : > { %2290 = vmatprep.subr.bf16.mxu0 %v6450_v1  ;;  %6035 = vmatprep.subr.bf16.mxu1 %v6450_v1  ;;  %v6092_v6 = vld [vmem:[%s6509_s27 + $0x4] ss:$8 sps:$4 sm:$0xff]   ;;  %v2283_v11 = vsel %vm2281_vm1, 4294967295, %v6451_v10  ;;  %v6088_v13 = vld [vmem:[%s7646_s1 + $0x48] ss:$0 sps:$4 sm:$0x33]   ;;  %s6684_s16 = scalar_lea.vmem %s7647_s2, %s5012_s13 }
  0x10   : > { %v6095_v7 = vld [vmem:[%s6509_s27 + $0x484] ss:$8 sps:$4 sm:$0xff]   ;;  %5311 = vmatprep.mubr.msk.bf16.mxu0 %vm1848_vm0, %v6092_v6  ;;  %v2284_v14 = vsel %vm2282_vm2, %v2283_v11, 0  ;;  %v6090_v17 = vld [vmem:[%s6509_s27] ss:$8 sps:$4 sm:$0xff]  }
  0x11   : > { %5383 = vmatprep.mubr.msk.bf16.mxu1 %vm1848_vm0, %v6095_v7  ;;  %v2286_v15 = vand.u32 %v6088_v13, %v2284_v14  ;;  %v6089_v16 = vld [vmem:[%s7646_s1 + $0x40] sm:$0xff]   ;;  %v6096_v19 = vld [vmem:[%s6509_s27 + $0x14] ss:$8 sps:$4 sm:$0xff]   ;;  %v6100_v21 = vld [vmem:[%s6509_s27 + $0x10] ss:$8 sps:$4 sm:$0xff]  }
  0x12   : > { %2291 = vmatpush1.bf16.msra.mxu0 %v6081_v2  ;;  %6045 = vmatpush1.bf16.msra.mxu1 %v6081_v2  ;;  %v6093_v18 = vld [vmem:[%s6509_s27 + $0x480] ss:$8 sps:$4 sm:$0xff]   ;;  %v6098_v20 = vld [vmem:[%s6509_s27 + $0x494] ss:$8 sps:$4 sm:$0xff]   ;;  %v6101_v22 = vld [vmem:[%s6509_s27 + $0x490] ss:$8 sps:$4 sm:$0xff]  }
  0x13   : > { %2292 = vmatprep.subr.bf16.mxu0 %v6450_v1  ;;  %6036 = vmatprep.subr.bf16.mxu1 %v6450_v1  ;;  %v6102_v23 = vld [vmem:[%s6509_s27 + $0x24] ss:$8 sps:$4 sm:$0xff]   ;;  %v6106_v25 = vld [vmem:[%s6509_s27 + $0x20] ss:$8 sps:$4 sm:$0xff]   ;;  %v6108_v27 = vld [vmem:[%s6509_s27 + $0x34] ss:$8 sps:$4 sm:$0xff]  }
  0x14   : > { %v6104_v24 = vld [vmem:[%s6509_s27 + $0x4a4] ss:$8 sps:$4 sm:$0xff]   ;;  %v6107_v26 = vld [vmem:[%s6509_s27 + $0x4a0] ss:$8 sps:$4 sm:$0xff]   ;;  %v6110_v28 = vld [vmem:[%s6509_s27 + $0x4b4] ss:$8 sps:$4 sm:$0xff]  }
  0x15   : > { %v6112_v29 = vld [vmem:[%s6509_s27 + $0x30] ss:$8 sps:$4 sm:$0xff]   ;;  %v6114_v31 = vld [vmem:[%s6509_s27 + $0x44] ss:$8 sps:$4 sm:$0xff]   ;;  %v6118_v33 = vld [vmem:[%s6509_s27 + $0x40] ss:$8 sps:$4 sm:$0xff]  }
  0x16   : > { %2293 = vmatpush1.bf16.msra.mxu0 %v6082_v3  ;;  %6046 = vmatpush1.bf16.msra.mxu1 %v6082_v3  ;;  %v6113_v30 = vld [vmem:[%s6509_s27 + $0x4b0] ss:$8 sps:$4 sm:$0xff]   ;;  %v6116_v32 = vld [vmem:[%s6509_s27 + $0x4c4] ss:$8 sps:$4 sm:$0xff]   ;;  %v6119_v34 = vld [vmem:[%s6509_s27 + $0x4c0] ss:$8 sps:$4 sm:$0xff]  }
  0x17   : > { %2294 = vmatprep.subr.bf16.mxu0 %v6450_v1  ;;  %6037 = vmatprep.subr.bf16.mxu1 %v6450_v1  ;;  %v6120_v35 = vld [vmem:[%s6509_s27 + $0x54] ss:$8 sps:$4 sm:$0xff]   ;;  %v6124_v37 = vld [vmem:[%s6509_s27 + $0x50] ss:$8 sps:$4 sm:$0xff]   ;;  %v6126_v39 = vld [vmem:[%s6509_s27 + $0x64] ss:$8 sps:$4 sm:$0xff]  }
  0x18   : > { %v6122_v36 = vld [vmem:[%s6509_s27 + $0x4d4] ss:$8 sps:$4 sm:$0xff]   ;;  %v6125_v38 = vld [vmem:[%s6509_s27 + $0x4d0] ss:$8 sps:$4 sm:$0xff]   ;;  %v6128_v40 = vld [vmem:[%s6509_s27 + $0x4e4] ss:$8 sps:$4 sm:$0xff]  }
  0x19   : > { %v6130_v41 = vld [vmem:[%s6509_s27 + $0x60] ss:$8 sps:$4 sm:$0xff]   ;;  %v6132_v43 = vld [vmem:[%s6509_s27 + $0x74] ss:$8 sps:$4 sm:$0xff]   ;;  %v6136_v45 = vld [vmem:[%s6509_s27 + $0x70] ss:$8 sps:$4 sm:$0xff]  }
  0x1a   : > { %2295 = vmatpush1.bf16.msra.mxu0 %v6083_v4  ;;  %6047 = vmatpush1.bf16.msra.mxu1 %v6083_v4  ;;  %v6131_v42 = vld [vmem:[%s6509_s27 + $0x4e0] ss:$8 sps:$4 sm:$0xff]   ;;  %v6134_v44 = vld [vmem:[%s6509_s27 + $0x4f4] ss:$8 sps:$4 sm:$0xff]   ;;  %v6137_v46 = vld [vmem:[%s6509_s27 + $0x4f0] ss:$8 sps:$4 sm:$0xff]  }
  0x1b   : > { %2296 = vmatprep.subr.bf16.mxu0 %v6450_v1  ;;  %6038 = vmatprep.subr.bf16.mxu1 %v6450_v1  ;;  %v6138_v47 = vld [vmem:[%s6509_s27 + $0x84] ss:$8 sps:$4 sm:$0xff]   ;;  %v6142_v49 = vld [vmem:[%s6509_s27 + $0x80] ss:$8 sps:$4 sm:$0xff]   ;;  %v6144_v51 = vld [vmem:[%s6509_s27 + $0x94] ss:$8 sps:$4 sm:$0xff]  }
  0x1c   : > { %v6140_v48 = vld [vmem:[%s6509_s27 + $0x504] ss:$8 sps:$4 sm:$0xff]   ;;  %v6143_v50 = vld [vmem:[%s6509_s27 + $0x500] ss:$8 sps:$4 sm:$0xff]   ;;  %v6146_v52 = vld [vmem:[%s6509_s27 + $0x514] ss:$8 sps:$4 sm:$0xff]  }
  0x1d   : > { %v6148_v53 = vld [vmem:[%s6509_s27 + $0x90] ss:$8 sps:$4 sm:$0xff]   ;;  %v6150_v55 = vld [vmem:[%s6509_s27 + $0xa4] ss:$8 sps:$4 sm:$0xff]   ;;  %v6154_v57 = vld [vmem:[%s6509_s27 + $0xa0] ss:$8 sps:$4 sm:$0xff]  }
  0x1e   : > { %2297 = vmatpush1.bf16.msra.mxu0 %v6084_v5  ;;  %6048 = vmatpush1.bf16.msra.mxu1 %v6084_v5  ;;  %v6149_v54 = vld [vmem:[%s6509_s27 + $0x510] ss:$8 sps:$4 sm:$0xff]   ;;  %v6152_v56 = vld [vmem:[%s6509_s27 + $0x524] ss:$8 sps:$4 sm:$0xff]   ;;  %v6155_v58 = vld [vmem:[%s6509_s27 + $0x520] ss:$8 sps:$4 sm:$0xff]  }
  0x1f   : > { %2298 = vmatprep.subr.bf16.mxu0 %v6450_v1  ;;  %6039 = vmatprep.subr.bf16.mxu1 %v6450_v1  ;;  %v6156_v59 = vld [vmem:[%s6509_s27 + $0xb4] ss:$8 sps:$4 sm:$0xff]   ;;  %v6160_v61 = vld [vmem:[%s6509_s27 + $0xb0] ss:$8 sps:$4 sm:$0xff]   ;;  %v6162_v63 = vld [vmem:[%s6509_s27 + $0xc4] ss:$8 sps:$4 sm:$0xff]  }
  0x20   : > { %v6158_v60 = vld [vmem:[%s6509_s27 + $0x534] ss:$8 sps:$4 sm:$0xff]   ;;  %v6161_v62 = vld [vmem:[%s6509_s27 + $0x530] ss:$8 sps:$4 sm:$0xff]   ;;  %v6164_v0 = vld [vmem:[%s6509_s27 + $0x544] ss:$8 sps:$4 sm:$0xff]  }
  0x21   : > { %v6167_v2 = vld [vmem:[%s6509_s27 + $0x540] ss:$8 sps:$4 sm:$0xff]   ;;  %v6168_v3 = vld [vmem:[%s6509_s27 + $0xd4] ss:$8 sps:$4 sm:$0xff]   ;;  %v6172_v5 = vld [vmem:[%s6509_s27 + $0xd0] ss:$8 sps:$4 sm:$0xff]  }
  0x22   : > { %2299 = vmatpush1.bf16.msra.mxu0 %v6085_v8  ;;  %6049 = vmatpush1.bf16.msra.mxu1 %v6085_v8  ;;  %v6170_v4 = vld [vmem:[%s6509_s27 + $0x554] ss:$8 sps:$4 sm:$0xff]   ;;  %v6173_v6 = vld [vmem:[%s6509_s27 + $0x550] ss:$8 sps:$4 sm:$0xff]   ;;  %v6174_v7 = vld [vmem:[%s6509_s27 + $0xe4] ss:$8 sps:$4 sm:$0xff]  }
  0x23   : > { %2300 = vmatprep.subr.bf16.mxu0 %v6450_v1  ;;  %6040 = vmatprep.subr.bf16.mxu1 %v6450_v1  ;;  %v6176_v8 = vld [vmem:[%s6509_s27 + $0x564] ss:$8 sps:$4 sm:$0xff]   ;;  %v6179_v10 = vld [vmem:[%s6509_s27 + $0x560] ss:$8 sps:$4 sm:$0xff]   ;;  %v6180_v11 = vld [vmem:[%s6509_s27 + $0xf4] ss:$8 sps:$4 sm:$0xff]  }
  0x24   : > { %v6184_v13 = vld [vmem:[%s6509_s27 + $0xf0] ss:$8 sps:$4 sm:$0xff]  }
  0x25   : > { %v6185_v14 = vld [vmem:[%s6509_s27 + $0x570] ss:$8 sps:$4 sm:$0xff]  }
  0x26   : > { %2301 = vmatpush1.bf16.msra.mxu0 %v6086_v9  ;;  %6050 = vmatpush1.bf16.msra.mxu1 %v6086_v9  ;;  %v6178_v9 = vld [vmem:[%s6509_s27 + $0xe0] ss:$8 sps:$4 sm:$0xff]  }
  0x27   : > { %2302 = vmatprep.subr.bf16.mxu0 %v6450_v1  ;;  %6041 = vmatprep.subr.bf16.mxu1 %v6450_v1 }
  0x2a   : > { %2303 = vmatpush1.bf16.msra.mxu0 %v6087_v12  ;;  %6051 = vmatpush1.bf16.msra.mxu1 %v6087_v12  ;;  %v6182_v12 = vld [vmem:[%s6509_s27 + $0x574] ss:$8 sps:$4 sm:$0xff]  }
  0x2b   : > { %2316 = vmatprep.subr.bf16.mxu0 %v6450_v1  ;;  %6042 = vmatprep.subr.bf16.mxu1 %v6450_v1 }
  0x2e   : > { %2317 = vmatpush2.bf16.msra.mxu0 %v2286_v15  ;;  %6052 = vmatpush2.bf16.msra.mxu1 %v2286_v15  ;;  %v6186_v15 = vld [vmem:[%s6509_s27 + $0x104] ss:$8 sps:$4 sm:$0xff]  }
  0x2f   : > { %2318 = vmatprep.subr.bf16.mxu0 %v6450_v1  ;;  %6043 = vmatprep.subr.bf16.mxu1 %v6450_v1  ;;  %v6166_v1 = vld [vmem:[%s6509_s27 + $0xc0] ss:$8 sps:$4 sm:$0xff]  }
  0x32   : > { %2319 = vmatpush2.bf16.msra.mxu0 %v6089_v16  ;;  %6053 = vmatpush2.bf16.msra.mxu1 %v6089_v16  ;;  %v6188_v16 = vld [vmem:[%s6509_s27 + $0x584] ss:$8 sps:$4 sm:$0xff]  }
  0x35   : > { %2321 = vmatmul.mubr.bf16.vlgmr.msra.gmra.mxu0 %v6090_v17  ;;  %2897 = vmatmul.mubr.bf16.vlgmr.msra.gmra.mxu1 %v6093_v18  ;;  %v6190_v17 = vld [vmem:[%s6509_s27 + $0x100] ss:$8 sps:$4 sm:$0xff]  }
  0x36   : > { %5312 = vmatprep.mubr.msk.bf16.mxu0 %vm1848_vm0, %v6096_v19  ;;  %5384 = vmatprep.mubr.msk.bf16.mxu1 %vm1848_vm0, %v6098_v20  ;;  %v6191_v18 = vld [vmem:[%s6509_s27 + $0x580] ss:$8 sps:$4 sm:$0xff]   ;;  %v6192_v19 = vld [vmem:[%s6509_s27 + $0x114] ss:$8 sps:$4 sm:$0xff]  }
  0x37   : > { %v6194_v20 = vld [vmem:[%s6509_s27 + $0x594] ss:$8 sps:$4 sm:$0xff]  }
  0x3d   : > { %2329 = vmatmul.mubr.bf16.gmra.mxu0 %v6100_v21  ;;  %2905 = vmatmul.mubr.bf16.gmra.mxu1 %v6101_v22  ;;  %v6196_v21 = vld [vmem:[%s6509_s27 + $0x110] ss:$8 sps:$4 sm:$0xff]  }
  0x3e   : > { %5313 = vmatprep.mubr.msk.bf16.mxu0 %vm1848_vm0, %v6102_v23  ;;  %5385 = vmatprep.mubr.msk.bf16.mxu1 %vm1848_vm0, %v6104_v24  ;;  %v6197_v22 = vld [vmem:[%s6509_s27 + $0x590] ss:$8 sps:$4 sm:$0xff]   ;;  %v6198_v23 = vld [vmem:[%s6509_s27 + $0x124] ss:$8 sps:$4 sm:$0xff]  }
  0x3f   : > { %v6200_v24 = vld [vmem:[%s6509_s27 + $0x5a4] ss:$8 sps:$4 sm:$0xff]  }
  0x45   : > { %2337 = vmatmul.mubr.bf16.gmra.mxu0 %v6106_v25  ;;  %2913 = vmatmul.mubr.bf16.gmra.mxu1 %v6107_v26  ;;  %v6202_v25 = vld [vmem:[%s6509_s27 + $0x120] ss:$8 sps:$4 sm:$0xff]  }
  0x46   : > { %5314 = vmatprep.mubr.msk.bf16.mxu0 %vm1848_vm0, %v6108_v27  ;;  %5386 = vmatprep.mubr.msk.bf16.mxu1 %vm1848_vm0, %v6110_v28  ;;  %v6203_v26 = vld [vmem:[%s6509_s27 + $0x5a0] ss:$8 sps:$4 sm:$0xff]   ;;  %v6204_v27 = vld [vmem:[%s6509_s27 + $0x134] ss:$8 sps:$4 sm:$0xff]  }
  0x47   : > { %v6206_v28 = vld [vmem:[%s6509_s27 + $0x5b4] ss:$8 sps:$4 sm:$0xff]  }
  0x4d   : > { %2345 = vmatmul.mubr.bf16.gmra.mxu0 %v6112_v29  ;;  %2921 = vmatmul.mubr.bf16.gmra.mxu1 %v6113_v30  ;;  %v6208_v29 = vld [vmem:[%s6509_s27 + $0x130] ss:$8 sps:$4 sm:$0xff]  }
  0x4e   : > { %5315 = vmatprep.mubr.msk.bf16.mxu0 %vm1848_vm0, %v6114_v31  ;;  %5387 = vmatprep.mubr.msk.bf16.mxu1 %vm1848_vm0, %v6116_v32  ;;  %v6209_v30 = vld [vmem:[%s6509_s27 + $0x5b0] ss:$8 sps:$4 sm:$0xff]   ;;  %v6210_v31 = vld [vmem:[%s6509_s27 + $0x144] ss:$8 sps:$4 sm:$0xff]  }
  0x4f   : > { %v6212_v32 = vld [vmem:[%s6509_s27 + $0x5c4] ss:$8 sps:$4 sm:$0xff]  }
  0x55   : > { %2353 = vmatmul.mubr.bf16.gmra.mxu0 %v6118_v33  ;;  %2929 = vmatmul.mubr.bf16.gmra.mxu1 %v6119_v34  ;;  %v6214_v33 = vld [vmem:[%s6509_s27 + $0x140] ss:$8 sps:$4 sm:$0xff]  }
  0x56   : > { %5316 = vmatprep.mubr.msk.bf16.mxu0 %vm1848_vm0, %v6120_v35  ;;  %5388 = vmatprep.mubr.msk.bf16.mxu1 %vm1848_vm0, %v6122_v36  ;;  %v6215_v34 = vld [vmem:[%s6509_s27 + $0x5c0] ss:$8 sps:$4 sm:$0xff]   ;;  %v6216_v35 = vld [vmem:[%s6509_s27 + $0x154] ss:$8 sps:$4 sm:$0xff]  }
  0x57   : > { %v6218_v36 = vld [vmem:[%s6509_s27 + $0x5d4] ss:$8 sps:$4 sm:$0xff]  }
  0x5d   : > { %2361 = vmatmul.mubr.bf16.gmra.mxu0 %v6124_v37  ;;  %2937 = vmatmul.mubr.bf16.gmra.mxu1 %v6125_v38  ;;  %v6220_v37 = vld [vmem:[%s6509_s27 + $0x150] ss:$8 sps:$4 sm:$0xff]  }
  0x5e   : > { %5317 = vmatprep.mubr.msk.bf16.mxu0 %vm1848_vm0, %v6126_v39  ;;  %5389 = vmatprep.mubr.msk.bf16.mxu1 %vm1848_vm0, %v6128_v40  ;;  %v6221_v38 = vld [vmem:[%s6509_s27 + $0x5d0] ss:$8 sps:$4 sm:$0xff]   ;;  %v6222_v39 = vld [vmem:[%s6509_s27 + $0x164] ss:$8 sps:$4 sm:$0xff]  }
  0x5f   : > { %v6224_v40 = vld [vmem:[%s6509_s27 + $0x5e4] ss:$8 sps:$4 sm:$0xff]  }
  0x65   : > { %2369 = vmatmul.mubr.bf16.gmra.mxu0 %v6130_v41  ;;  %2945 = vmatmul.mubr.bf16.gmra.mxu1 %v6131_v42  ;;  %v6226_v41 = vld [vmem:[%s6509_s27 + $0x160] ss:$8 sps:$4 sm:$0xff]  }
  0x66   : > { %5318 = vmatprep.mubr.msk.bf16.mxu0 %vm1848_vm0, %v6132_v43  ;;  %5390 = vmatprep.mubr.msk.bf16.mxu1 %vm1848_vm0, %v6134_v44  ;;  %v6227_v42 = vld [vmem:[%s6509_s27 + $0x5e0] ss:$8 sps:$4 sm:$0xff]   ;;  %v6228_v43 = vld [vmem:[%s6509_s27 + $0x174] ss:$8 sps:$4 sm:$0xff]  }
  0x67   : > { %v6230_v44 = vld [vmem:[%s6509_s27 + $0x5f4] ss:$8 sps:$4 sm:$0xff]  }
  0x6d   : > { %2377 = vmatmul.mubr.bf16.gmra.mxu0 %v6136_v45  ;;  %2953 = vmatmul.mubr.bf16.gmra.mxu1 %v6137_v46  ;;  %v6232_v45 = vld [vmem:[%s6509_s27 + $0x170] ss:$8 sps:$4 sm:$0xff]  }
  0x6e   : > { %5319 = vmatprep.mubr.msk.bf16.mxu0 %vm1848_vm0, %v6138_v47  ;;  %5391 = vmatprep.mubr.msk.bf16.mxu1 %vm1848_vm0, %v6140_v48  ;;  %v6233_v46 = vld [vmem:[%s6509_s27 + $0x5f0] ss:$8 sps:$4 sm:$0xff]   ;;  %v6234_v47 = vld [vmem:[%s6509_s27 + $0x184] ss:$8 sps:$4 sm:$0xff]  }
  0x6f   : > { %v6236_v48 = vld [vmem:[%s6509_s27 + $0x604] ss:$8 sps:$4 sm:$0xff]  }
  0x75   : > { %2385 = vmatmul.mubr.bf16.gmra.mxu0 %v6142_v49  ;;  %2961 = vmatmul.mubr.bf16.gmra.mxu1 %v6143_v50  ;;  %v236_v49 = vld [vmem:[%s6509_s27 + $0x180] sm:$0xff]  ;;  %v237_v50 = vld [vmem:[%s6509_s27 + $0x188] sm:$0xff] }
  0x76   : > { %5320 = vmatprep.mubr.msk.bf16.mxu0 %vm1848_vm0, %v6144_v51  ;;  %5392 = vmatprep.mubr.msk.bf16.mxu1 %vm1848_vm0, %v6146_v52  ;;  %v380_v51 = vld [vmem:[%s6509_s27 + $0x600] sm:$0xff]  ;;  %v381_v52 = vld [vmem:[%s6509_s27 + $0x608] sm:$0xff] }
  0x7d   : > { %2393 = vmatmul.mubr.bf16.gmra.mxu0 %v6148_v53  ;;  %2969 = vmatmul.mubr.bf16.gmra.mxu1 %v6149_v54  ;;  %v5061_v53 = vcombine.low %v236_v49, %v237_v50  ;;  %v5205_v54 = vcombine.low %v380_v51, %v381_v52  ;;  %v6250_v49 = vld [vmem:[%s6509_s27 + $0x1c4] ss:$8 sps:$4 sm:$0xff]  }
  0x7e   : > { %5321 = vmatprep.mubr.msk.bf16.mxu0 %vm1848_vm0, %v6150_v55  ;;  %5393 = vmatprep.mubr.msk.bf16.mxu1 %vm1848_vm0, %v6152_v56  ;;  %v6238_v55 = vld [vmem:[%s6509_s27 + $0x194] ss:$8 sps:$4 sm:$0xff]   ;;  %v6252_v50 = vld [vmem:[%s6509_s27 + $0x644] ss:$8 sps:$4 sm:$0xff]  }
  0x7f   : > { %v6240_v56 = vld [vmem:[%s6509_s27 + $0x614] ss:$8 sps:$4 sm:$0xff]  }
  0x85   : > { %2401 = vmatmul.mubr.bf16.gmra.mxu0 %v6154_v57  ;;  %2977 = vmatmul.mubr.bf16.gmra.mxu1 %v6155_v58 }
  0x86   : > { %5322 = vmatprep.mubr.msk.bf16.mxu0 %vm1848_vm0, %v6156_v59  ;;  %5394 = vmatprep.mubr.msk.bf16.mxu1 %vm1848_vm0, %v6158_v60  ;;  %v238_v59 = vld [vmem:[%s6509_s27 + $0x190] sm:$0xff] }
  0x8d   : > { %2409 = vmatmul.mubr.bf16.gmra.mxu0 %v6160_v61  ;;  %2985 = vmatmul.mubr.bf16.gmra.mxu1 %v6161_v62  ;;  %v239_v62 = vld [vmem:[%s6509_s27 + $0x198] sm:$0xff] }
  0x8e   : > { %5323 = vmatprep.mubr.msk.bf16.mxu0 %vm1848_vm0, %v6162_v63  ;;  %5395 = vmatprep.mubr.msk.bf16.mxu1 %vm1848_vm0, %v6164_v0  ;;  %v382_v63 = vld [vmem:[%s6509_s27 + $0x610] sm:$0xff]  ;;  %v383_v0 = vld [vmem:[%s6509_s27 + $0x618] sm:$0xff] }
  0x95   : > { %2417 = vmatmul.mubr.bf16.gmra.mxu0 %v6166_v1  ;;  %2993 = vmatmul.mubr.bf16.gmra.mxu1 %v6167_v2 }
  0x96   : > { %5324 = vmatprep.mubr.msk.bf16.mxu0 %vm1848_vm0, %v6168_v3  ;;  %5396 = vmatprep.mubr.msk.bf16.mxu1 %vm1848_vm0, %v6170_v4 }
  0x9d   : > { %2425 = vmatmul.mubr.bf16.gmra.mxu0 %v6172_v5  ;;  %3001 = vmatmul.mubr.bf16.gmra.mxu1 %v6173_v6  ;;  %v5063_v5 = vcombine.low %v238_v59, %v239_v62  ;;  %v5207_v6 = vcombine.low %v382_v63, %v383_v0  ;;  %v388_v59 = vld [vmem:[%s6509_s27 + $0x640] sm:$0xff] }
  0x9e   : > { %5325 = vmatprep.mubr.msk.bf16.mxu0 %vm1848_vm0, %v6174_v7  ;;  %5397 = vmatprep.mubr.msk.bf16.mxu1 %vm1848_vm0, %v6176_v8 }
  0xa5   : > { %2433 = vmatmul.mubr.bf16.gmra.mxu0 %v6178_v9  ;;  %3009 = vmatmul.mubr.bf16.gmra.mxu1 %v6179_v10  ;;  %v6242_v9 = vld [vmem:[%s6509_s27 + $0x1a4] ss:$8 sps:$4 sm:$0xff]  }
  0xa6   : > { %5326 = vmatprep.mubr.msk.bf16.mxu0 %vm1848_vm0, %v6180_v11  ;;  %5398 = vmatprep.mubr.msk.bf16.mxu1 %vm1848_vm0, %v6182_v12  ;;  %v6244_v10 = vld [vmem:[%s6509_s27 + $0x624] ss:$8 sps:$4 sm:$0xff]  }
  0xad   : > { %2441 = vmatmul.mubr.bf16.gmra.mxu0 %v6184_v13  ;;  %3017 = vmatmul.mubr.bf16.gmra.mxu1 %v6185_v14 }
  0xae   : > { %5327 = vmatprep.mubr.msk.bf16.mxu0 %vm1848_vm0, %v6186_v15  ;;  %5399 = vmatprep.mubr.msk.bf16.mxu1 %vm1848_vm0, %v6188_v16  ;;  %v240_v15 = vld [vmem:[%s6509_s27 + $0x1a0] sm:$0xff] }
  0xb5   : > { %2449 = vmatmul.mubr.bf16.gmra.mxu0 %v6190_v17  ;;  %3025 = vmatmul.mubr.bf16.gmra.mxu1 %v6191_v18  ;;  %v241_v18 = vld [vmem:[%s6509_s27 + $0x1a8] sm:$0xff] }
  0xb6   : > { %5328 = vmatprep.mubr.msk.bf16.mxu0 %vm1848_vm0, %v6192_v19  ;;  %5400 = vmatprep.mubr.msk.bf16.mxu1 %vm1848_vm0, %v6194_v20  ;;  %v384_v19 = vld [vmem:[%s6509_s27 + $0x620] sm:$0xff]  ;;  %v385_v20 = vld [vmem:[%s6509_s27 + $0x628] sm:$0xff] }
  0xbd   : > { %2457 = vmatmul.mubr.bf16.gmra.mxu0 %v6196_v21  ;;  %3033 = vmatmul.mubr.bf16.gmra.mxu1 %v6197_v22 }
  0xbe   : > { %5329 = vmatprep.mubr.msk.bf16.mxu0 %vm1848_vm0, %v6198_v23  ;;  %5401 = vmatprep.mubr.msk.bf16.mxu1 %vm1848_vm0, %v6200_v24 }
  0xc5   : > { %2465 = vmatmul.mubr.bf16.gmra.mxu0 %v6202_v25  ;;  %3041 = vmatmul.mubr.bf16.gmra.mxu1 %v6203_v26  ;;  %v5065_v25 = vcombine.low %v240_v15, %v241_v18  ;;  %v5209_v26 = vcombine.low %v384_v19, %v385_v20  ;;  %v390_v15 = vld [vmem:[%s6509_s27 + $0x650] sm:$0xff] }
  0xc6   : > { %5330 = vmatprep.mubr.msk.bf16.mxu0 %vm1848_vm0, %v6204_v27  ;;  %5402 = vmatprep.mubr.msk.bf16.mxu1 %vm1848_vm0, %v6206_v28 }
  0xcd   : > { %2473 = vmatmul.mubr.bf16.gmra.mxu0 %v6208_v29  ;;  %3049 = vmatmul.mubr.bf16.gmra.mxu1 %v6209_v30  ;;  %v6246_v29 = vld [vmem:[%s6509_s27 + $0x1b4] ss:$8 sps:$4 sm:$0xff]  }
  0xce   : > { %5331 = vmatprep.mubr.msk.bf16.mxu0 %vm1848_vm0, %v6210_v31  ;;  %5403 = vmatprep.mubr.msk.bf16.mxu1 %vm1848_vm0, %v6212_v32  ;;  %v6248_v30 = vld [vmem:[%s6509_s27 + $0x634] ss:$8 sps:$4 sm:$0xff]  }
  0xd5   : > { %2481 = vmatmul.mubr.bf16.gmra.mxu0 %v6214_v33  ;;  %3057 = vmatmul.mubr.bf16.gmra.mxu1 %v6215_v34 }
  0xd6   : > { %5332 = vmatprep.mubr.msk.bf16.mxu0 %vm1848_vm0, %v6216_v35  ;;  %5404 = vmatprep.mubr.msk.bf16.mxu1 %vm1848_vm0, %v6218_v36  ;;  %v242_v35 = vld [vmem:[%s6509_s27 + $0x1b0] sm:$0xff] }
  0xdd   : > { %2489 = vmatmul.mubr.bf16.gmra.mxu0 %v6220_v37  ;;  %3065 = vmatmul.mubr.bf16.gmra.mxu1 %v6221_v38  ;;  %v243_v38 = vld [vmem:[%s6509_s27 + $0x1b8] sm:$0xff] }
  0xde   : > { %5333 = vmatprep.mubr.msk.bf16.mxu0 %vm1848_vm0, %v6222_v39  ;;  %5405 = vmatprep.mubr.msk.bf16.mxu1 %vm1848_vm0, %v6224_v40  ;;  %v386_v39 = vld [vmem:[%s6509_s27 + $0x630] sm:$0xff]  ;;  %v387_v40 = vld [vmem:[%s6509_s27 + $0x638] sm:$0xff] }
  0xe5   : > { %2497 = vmatmul.mubr.bf16.gmra.mxu0 %v6226_v41  ;;  %3073 = vmatmul.mubr.bf16.gmra.mxu1 %v6227_v42 }
  0xe6   : > { %5334 = vmatprep.mubr.msk.bf16.mxu0 %vm1848_vm0, %v6228_v43  ;;  %5406 = vmatprep.mubr.msk.bf16.mxu1 %vm1848_vm0, %v6230_v44 }
  0xed   : > { %2505 = vmatmul.mubr.bf16.gmra.mxu0 %v6232_v45  ;;  %3081 = vmatmul.mubr.bf16.gmra.mxu1 %v6233_v46  ;;  %v5067_v45 = vcombine.low %v242_v35, %v243_v38  ;;  %v5211_v46 = vcombine.low %v386_v39, %v387_v40  ;;  %v392_v35 = vld [vmem:[%s6509_s27 + $0x660] sm:$0xff] }
  0xee   : > { %5335 = vmatprep.mubr.msk.bf16.mxu0 %vm1848_vm0, %v6234_v47  ;;  %5407 = vmatprep.mubr.msk.bf16.mxu1 %vm1848_vm0, %v6236_v48 }
  0xf5   : > { %v2322_v57 = vpop.f32.mrf.mxu0  ;;  %2513 = vmatmul.mubr.bf16.gmra.mxu0 %v5061_v53  ;;  %v2898_v58 = vpop.f32.mrf.mxu1  ;;  %3089 = vmatmul.mubr.bf16.gmra.mxu1 %v5205_v54 }
  0xf6   : > { %v5746_v60 = vpack.c.bf16 %v2322_v57, %v2322_v57  ;;  %v5890_v61 = vpack.c.bf16 %v2898_v58, %v2898_v58  ;;  %5336 = vmatprep.mubr.msk.bf16.mxu0 %vm1848_vm0, %v6238_v55  ;;  %5408 = vmatprep.mubr.msk.bf16.mxu1 %vm1848_vm0, %v6240_v56  ;;  %v244_v55 = vld [vmem:[%s6509_s27 + $0x1c0] sm:$0xff]  ;;  %v245_v58 = vld [vmem:[%s6509_s27 + $0x1c8] sm:$0xff] }
  0xf7   : > { %v2324_v1 = vpop.f32.mrf.mxu0  ;;  %v2900_v2 = vpop.f32.mrf.mxu1 }
  0xf8   : > { %4626 = vst.msk [vmem:[%s6684_s16] sm:$0xf] %vm4625_vm3, %v5746_v60  ;;  %4770 = vst.msk [vmem:[%s6684_s16 + $0x240] sm:$0xf] %vm4625_vm3, %v5890_v61  ;;  %v389_v60 = vld [vmem:[%s6509_s27 + $0x648] sm:$0xff]  ;;  %v5069_v1 = vcombine.low %v244_v55, %v245_v58  ;;  %v394_v55 = vld [vmem:[%s6509_s27 + $0x670] sm:$0xff] }
  0xf9   : > { %v2325_v3 = vpop.f32.mrf.mxu0  ;;  %v2901_v4 = vpop.f32.mrf.mxu1  ;;  %v5213_v2 = vcombine.low %v388_v59, %v389_v60 }
  0xfa   : > { %v5747_v7 = vpack.c.bf16 %v2325_v3, %v2325_v3  ;;  %v5891_v8 = vpack.c.bf16 %v2901_v4, %v2901_v4 }
  0xfb   : > { %v2327_v11 = vpop.f32.mrf.mxu0  ;;  %v2903_v12 = vpop.f32.mrf.mxu1 }
  0xfc   : > { %4627 = vst.msk [vmem:[%s6684_s16 + $0x4] sm:$0xf] %vm4625_vm3, %v5747_v7  ;;  %4771 = vst.msk [vmem:[%s6684_s16 + $0x244] sm:$0xf] %vm4625_vm3, %v5891_v8  ;;  %v246_v11 = vld [vmem:[%s6509_s27 + $0x1d0] sm:$0xff] }
  0xfd   : > { %v2330_v13 = vpop.f32.mrf.mxu0  ;;  %2521 = vmatmul.mubr.bf16.gmra.mxu0 %v5063_v5  ;;  %v2906_v14 = vpop.f32.mrf.mxu1  ;;  %3097 = vmatmul.mubr.bf16.gmra.mxu1 %v5207_v6  ;;  %v6254_v5 = vld [vmem:[%s6509_s27 + $0x1d4] ss:$8 sps:$4 sm:$0xff]  }
  0xfe   : > { %v5748_v16 = vpack.c.bf16 %v2330_v13, %v2330_v13  ;;  %v5892_v17 = vpack.c.bf16 %v2906_v14, %v2906_v14  ;;  %5337 = vmatprep.mubr.msk.bf16.mxu0 %vm1848_vm0, %v6242_v9  ;;  %5409 = vmatprep.mubr.msk.bf16.mxu1 %vm1848_vm0, %v6244_v10  ;;  %v6256_v6 = vld [vmem:[%s6509_s27 + $0x654] ss:$8 sps:$4 sm:$0xff]  }
  0xff   : > { %v2332_v21 = vpop.f32.mrf.mxu0  ;;  %v2908_v22 = vpop.f32.mrf.mxu1  ;;  %v247_v14 = vld [vmem:[%s6509_s27 + $0x1d8] sm:$0xff] }
 0x100   : > { %4628 = vst.msk [vmem:[%s6684_s16 + $0x8] sm:$0xf] %vm4625_vm3, %v5748_v16  ;;  %4772 = vst.msk [vmem:[%s6684_s16 + $0x248] sm:$0xf] %vm4625_vm3, %v5892_v17  ;;  %v391_v16 = vld [vmem:[%s6509_s27 + $0x658] sm:$0xff]  ;;  %v5071_v21 = vcombine.low %v246_v11, %v247_v14  ;;  %v396_v11 = vld [vmem:[%s6509_s27 + $0x680] sm:$0xff] }
 0x101   : > { %v2333_v23 = vpop.f32.mrf.mxu0  ;;  %v2909_v24 = vpop.f32.mrf.mxu1  ;;  %v5215_v22 = vcombine.low %v390_v15, %v391_v16 }
 0x102   : > { %v5749_v27 = vpack.c.bf16 %v2333_v23, %v2333_v23  ;;  %v5893_v28 = vpack.c.bf16 %v2909_v24, %v2909_v24 }
 0x103   : > { %v2335_v31 = vpop.f32.mrf.mxu0  ;;  %v2911_v32 = vpop.f32.mrf.mxu1 }
 0x104   : > { %4629 = vst.msk [vmem:[%s6684_s16 + $0xc] sm:$0xf] %vm4625_vm3, %v5749_v27  ;;  %4773 = vst.msk [vmem:[%s6684_s16 + $0x24c] sm:$0xf] %vm4625_vm3, %v5893_v28  ;;  %v248_v31 = vld [vmem:[%s6509_s27 + $0x1e0] sm:$0xff] }
 0x105   : > { %v2338_v33 = vpop.f32.mrf.mxu0  ;;  %2529 = vmatmul.mubr.bf16.gmra.mxu0 %v5065_v25  ;;  %v2914_v34 = vpop.f32.mrf.mxu1  ;;  %3105 = vmatmul.mubr.bf16.gmra.mxu1 %v5209_v26  ;;  %v6258_v25 = vld [vmem:[%s6509_s27 + $0x1e4] ss:$8 sps:$4 sm:$0xff]  }
 0x106   : > { %v5750_v36 = vpack.c.bf16 %v2338_v33, %v2338_v33  ;;  %v5894_v37 = vpack.c.bf16 %v2914_v34, %v2914_v34  ;;  %5338 = vmatprep.mubr.msk.bf16.mxu0 %vm1848_vm0, %v6246_v29  ;;  %5410 = vmatprep.mubr.msk.bf16.mxu1 %vm1848_vm0, %v6248_v30  ;;  %v6260_v26 = vld [vmem:[%s6509_s27 + $0x664] ss:$8 sps:$4 sm:$0xff]  }
 0x107   : > { %v2340_v41 = vpop.f32.mrf.mxu0  ;;  %v2916_v42 = vpop.f32.mrf.mxu1  ;;  %v249_v34 = vld [vmem:[%s6509_s27 + $0x1e8] sm:$0xff] }
 0x108   : > { %4630 = vst.msk [vmem:[%s6684_s16 + $0x10] sm:$0xf] %vm4625_vm3, %v5750_v36  ;;  %4774 = vst.msk [vmem:[%s6684_s16 + $0x250] sm:$0xf] %vm4625_vm3, %v5894_v37  ;;  %v393_v36 = vld [vmem:[%s6509_s27 + $0x668] sm:$0xff]  ;;  %v5073_v41 = vcombine.low %v248_v31, %v249_v34  ;;  %v398_v31 = vld [vmem:[%s6509_s27 + $0x690] sm:$0xff] }
 0x109   : > { %v2341_v43 = vpop.f32.mrf.mxu0  ;;  %v2917_v44 = vpop.f32.mrf.mxu1  ;;  %v5217_v42 = vcombine.low %v392_v35, %v393_v36 }
 0x10a   : > { %v5751_v47 = vpack.c.bf16 %v2341_v43, %v2341_v43  ;;  %v5895_v48 = vpack.c.bf16 %v2917_v44, %v2917_v44 }
 0x10b   : > { %v2343_v51 = vpop.f32.mrf.mxu0  ;;  %v2919_v52 = vpop.f32.mrf.mxu1 }
 0x10c   : > { %4631 = vst.msk [vmem:[%s6684_s16 + $0x14] sm:$0xf] %vm4625_vm3, %v5751_v47  ;;  %4775 = vst.msk [vmem:[%s6684_s16 + $0x254] sm:$0xf] %vm4625_vm3, %v5895_v48  ;;  %v250_v51 = vld [vmem:[%s6509_s27 + $0x1f0] sm:$0xff] }
 0x10d   : > { %v2346_v53 = vpop.f32.mrf.mxu0  ;;  %2537 = vmatmul.mubr.bf16.gmra.mxu0 %v5067_v45  ;;  %v2922_v54 = vpop.f32.mrf.mxu1  ;;  %3113 = vmatmul.mubr.bf16.gmra.mxu1 %v5211_v46  ;;  %v6262_v45 = vld [vmem:[%s6509_s27 + $0x1f4] ss:$8 sps:$4 sm:$0xff]  }
 0x10e   : > { %v5752_v56 = vpack.c.bf16 %v2346_v53, %v2346_v53  ;;  %v5896_v57 = vpack.c.bf16 %v2922_v54, %v2922_v54  ;;  %5339 = vmatprep.mubr.msk.bf16.mxu0 %vm1848_vm0, %v6250_v49  ;;  %5411 = vmatprep.mubr.msk.bf16.mxu1 %vm1848_vm0, %v6252_v50  ;;  %v6264_v46 = vld [vmem:[%s6509_s27 + $0x674] ss:$8 sps:$4 sm:$0xff]  }
 0x10f   : > { %v2348_v61 = vpop.f32.mrf.mxu0  ;;  %v2924_v62 = vpop.f32.mrf.mxu1  ;;  %v251_v54 = vld [vmem:[%s6509_s27 + $0x1f8] sm:$0xff] }
 0x110   : > { %4632 = vst.msk [vmem:[%s6684_s16 + $0x18] sm:$0xf] %vm4625_vm3, %v5752_v56  ;;  %4776 = vst.msk [vmem:[%s6684_s16 + $0x258] sm:$0xf] %vm4625_vm3, %v5896_v57  ;;  %v395_v56 = vld [vmem:[%s6509_s27 + $0x678] sm:$0xff]  ;;  %v5075_v61 = vcombine.low %v250_v51, %v251_v54  ;;  %v400_v51 = vld [vmem:[%s6509_s27 + $0x6a0] sm:$0xff] }
 0x111   : > { %v2349_v63 = vpop.f32.mrf.mxu0  ;;  %v2925_v0 = vpop.f32.mrf.mxu1  ;;  %v5219_v62 = vcombine.low %v394_v55, %v395_v56 }
 0x112   : > { %v5753_v3 = vpack.c.bf16 %v2349_v63, %v2349_v63  ;;  %v5897_v4 = vpack.c.bf16 %v2925_v0, %v2925_v0 }
 0x113   : > { %v2351_v7 = vpop.f32.mrf.mxu0  ;;  %v2927_v8 = vpop.f32.mrf.mxu1 }
 0x114   : > { %4633 = vst.msk [vmem:[%s6684_s16 + $0x1c] sm:$0xf] %vm4625_vm3, %v5753_v3  ;;  %4777 = vst.msk [vmem:[%s6684_s16 + $0x25c] sm:$0xf] %vm4625_vm3, %v5897_v4  ;;  %v252_v7 = vld [vmem:[%s6509_s27 + $0x200] sm:$0xff] }
 0x115   : > { %v2354_v9 = vpop.f32.mrf.mxu0  ;;  %2545 = vmatmul.mubr.bf16.gmra.mxu0 %v5069_v1  ;;  %v2930_v10 = vpop.f32.mrf.mxu1  ;;  %3121 = vmatmul.mubr.bf16.gmra.mxu1 %v5213_v2  ;;  %v6266_v1 = vld [vmem:[%s6509_s27 + $0x204] ss:$8 sps:$4 sm:$0xff]  }
 0x116   : > { %v5754_v12 = vpack.c.bf16 %v2354_v9, %v2354_v9  ;;  %v5898_v13 = vpack.c.bf16 %v2930_v10, %v2930_v10  ;;  %5340 = vmatprep.mubr.msk.bf16.mxu0 %vm1848_vm0, %v6254_v5  ;;  %5412 = vmatprep.mubr.msk.bf16.mxu1 %vm1848_vm0, %v6256_v6  ;;  %v6268_v2 = vld [vmem:[%s6509_s27 + $0x684] ss:$8 sps:$4 sm:$0xff]  }
 0x117   : > { %v2356_v17 = vpop.f32.mrf.mxu0  ;;  %v2932_v18 = vpop.f32.mrf.mxu1  ;;  %v253_v10 = vld [vmem:[%s6509_s27 + $0x208] sm:$0xff] }
 0x118   : > { %4634 = vst.msk [vmem:[%s6684_s16 + $0x20] sm:$0xf] %vm4625_vm3, %v5754_v12  ;;  %4778 = vst.msk [vmem:[%s6684_s16 + $0x260] sm:$0xf] %vm4625_vm3, %v5898_v13  ;;  %v397_v12 = vld [vmem:[%s6509_s27 + $0x688] sm:$0xff]  ;;  %v5077_v17 = vcombine.low %v252_v7, %v253_v10  ;;  %v402_v7 = vld [vmem:[%s6509_s27 + $0x6b0] sm:$0xff] }
 0x119   : > { %v2357_v19 = vpop.f32.mrf.mxu0  ;;  %v2933_v20 = vpop.f32.mrf.mxu1  ;;  %v5221_v18 = vcombine.low %v396_v11, %v397_v12 }
 0x11a   : > { %v5755_v23 = vpack.c.bf16 %v2357_v19, %v2357_v19  ;;  %v5899_v24 = vpack.c.bf16 %v2933_v20, %v2933_v20 }
 0x11b   : > { %v2359_v27 = vpop.f32.mrf.mxu0  ;;  %v2935_v28 = vpop.f32.mrf.mxu1 }
 0x11c   : > { %4635 = vst.msk [vmem:[%s6684_s16 + $0x24] sm:$0xf] %vm4625_vm3, %v5755_v23  ;;  %4779 = vst.msk [vmem:[%s6684_s16 + $0x264] sm:$0xf] %vm4625_vm3, %v5899_v24  ;;  %v254_v27 = vld [vmem:[%s6509_s27 + $0x210] sm:$0xff] }
 0x11d   : > { %v2362_v29 = vpop.f32.mrf.mxu0  ;;  %2553 = vmatmul.mubr.bf16.gmra.mxu0 %v5071_v21  ;;  %v2938_v30 = vpop.f32.mrf.mxu1  ;;  %3129 = vmatmul.mubr.bf16.gmra.mxu1 %v5215_v22  ;;  %v6270_v21 = vld [vmem:[%s6509_s27 + $0x214] ss:$8 sps:$4 sm:$0xff]  }
 0x11e   : > { %v5756_v32 = vpack.c.bf16 %v2362_v29, %v2362_v29  ;;  %v5900_v33 = vpack.c.bf16 %v2938_v30, %v2938_v30  ;;  %5341 = vmatprep.mubr.msk.bf16.mxu0 %vm1848_vm0, %v6258_v25  ;;  %5413 = vmatprep.mubr.msk.bf16.mxu1 %vm1848_vm0, %v6260_v26  ;;  %v6272_v22 = vld [vmem:[%s6509_s27 + $0x694] ss:$8 sps:$4 sm:$0xff]  }
 0x11f   : > { %v2364_v37 = vpop.f32.mrf.mxu0  ;;  %v2940_v38 = vpop.f32.mrf.mxu1  ;;  %v255_v30 = vld [vmem:[%s6509_s27 + $0x218] sm:$0xff] }
 0x120   : > { %4636 = vst.msk [vmem:[%s6684_s16 + $0x28] sm:$0xf] %vm4625_vm3, %v5756_v32  ;;  %4780 = vst.msk [vmem:[%s6684_s16 + $0x268] sm:$0xf] %vm4625_vm3, %v5900_v33  ;;  %v399_v32 = vld [vmem:[%s6509_s27 + $0x698] sm:$0xff]  ;;  %v5079_v37 = vcombine.low %v254_v27, %v255_v30  ;;  %v404_v27 = vld [vmem:[%s6509_s27 + $0x6c0] sm:$0xff] }
 0x121   : > { %v2365_v39 = vpop.f32.mrf.mxu0  ;;  %v2941_v40 = vpop.f32.mrf.mxu1  ;;  %v5223_v38 = vcombine.low %v398_v31, %v399_v32 }
 0x122   : > { %v5757_v43 = vpack.c.bf16 %v2365_v39, %v2365_v39  ;;  %v5901_v44 = vpack.c.bf16 %v2941_v40, %v2941_v40 }
 0x123   : > { %v2367_v47 = vpop.f32.mrf.mxu0  ;;  %v2943_v48 = vpop.f32.mrf.mxu1 }
 0x124   : > { %4637 = vst.msk [vmem:[%s6684_s16 + $0x2c] sm:$0xf] %vm4625_vm3, %v5757_v43  ;;  %4781 = vst.msk [vmem:[%s6684_s16 + $0x26c] sm:$0xf] %vm4625_vm3, %v5901_v44  ;;  %v256_v47 = vld [vmem:[%s6509_s27 + $0x220] sm:$0xff] }
 0x125   : > { %v2370_v49 = vpop.f32.mrf.mxu0  ;;  %2561 = vmatmul.mubr.bf16.gmra.mxu0 %v5073_v41  ;;  %v2946_v50 = vpop.f32.mrf.mxu1  ;;  %3137 = vmatmul.mubr.bf16.gmra.mxu1 %v5217_v42  ;;  %v6274_v41 = vld [vmem:[%s6509_s27 + $0x224] ss:$8 sps:$4 sm:$0xff]  }
 0x126   : > { %v5758_v52 = vpack.c.bf16 %v2370_v49, %v2370_v49  ;;  %v5902_v53 = vpack.c.bf16 %v2946_v50, %v2946_v50  ;;  %5342 = vmatprep.mubr.msk.bf16.mxu0 %vm1848_vm0, %v6262_v45  ;;  %5414 = vmatprep.mubr.msk.bf16.mxu1 %vm1848_vm0, %v6264_v46  ;;  %v6276_v42 = vld [vmem:[%s6509_s27 + $0x6a4] ss:$8 sps:$4 sm:$0xff]  }
 0x127   : > { %v2372_v57 = vpop.f32.mrf.mxu0  ;;  %v2948_v58 = vpop.f32.mrf.mxu1  ;;  %v257_v50 = vld [vmem:[%s6509_s27 + $0x228] sm:$0xff] }
 0x128   : > { %4638 = vst.msk [vmem:[%s6684_s16 + $0x30] sm:$0xf] %vm4625_vm3, %v5758_v52  ;;  %4782 = vst.msk [vmem:[%s6684_s16 + $0x270] sm:$0xf] %vm4625_vm3, %v5902_v53  ;;  %v401_v52 = vld [vmem:[%s6509_s27 + $0x6a8] sm:$0xff]  ;;  %v5081_v57 = vcombine.low %v256_v47, %v257_v50  ;;  %v406_v47 = vld [vmem:[%s6509_s27 + $0x6d0] sm:$0xff] }
 0x129   : > { %v2373_v59 = vpop.f32.mrf.mxu0  ;;  %v2949_v60 = vpop.f32.mrf.mxu1  ;;  %v5225_v58 = vcombine.low %v400_v51, %v401_v52 }
 0x12a   : > { %v5759_v63 = vpack.c.bf16 %v2373_v59, %v2373_v59  ;;  %v5903_v0 = vpack.c.bf16 %v2949_v60, %v2949_v60 }
 0x12b   : > { %v2375_v3 = vpop.f32.mrf.mxu0  ;;  %v2951_v4 = vpop.f32.mrf.mxu1 }
 0x12c   : > { %4639 = vst.msk [vmem:[%s6684_s16 + $0x34] sm:$0xf] %vm4625_vm3, %v5759_v63  ;;  %4783 = vst.msk [vmem:[%s6684_s16 + $0x274] sm:$0xf] %vm4625_vm3, %v5903_v0  ;;  %v258_v3 = vld [vmem:[%s6509_s27 + $0x230] sm:$0xff] }
 0x12d   : > { %v2378_v5 = vpop.f32.mrf.mxu0  ;;  %2569 = vmatmul.mubr.bf16.gmra.mxu0 %v5075_v61  ;;  %v2954_v6 = vpop.f32.mrf.mxu1  ;;  %3145 = vmatmul.mubr.bf16.gmra.mxu1 %v5219_v62  ;;  %v6278_v61 = vld [vmem:[%s6509_s27 + $0x234] ss:$8 sps:$4 sm:$0xff]  }
 0x12e   : > { %v5760_v8 = vpack.c.bf16 %v2378_v5, %v2378_v5  ;;  %v5904_v9 = vpack.c.bf16 %v2954_v6, %v2954_v6  ;;  %5343 = vmatprep.mubr.msk.bf16.mxu0 %vm1848_vm0, %v6266_v1  ;;  %5415 = vmatprep.mubr.msk.bf16.mxu1 %vm1848_vm0, %v6268_v2  ;;  %v6280_v62 = vld [vmem:[%s6509_s27 + $0x6b4] ss:$8 sps:$4 sm:$0xff]  }
 0x12f   : > { %v2380_v13 = vpop.f32.mrf.mxu0  ;;  %v2956_v14 = vpop.f32.mrf.mxu1  ;;  %v259_v6 = vld [vmem:[%s6509_s27 + $0x238] sm:$0xff] }
 0x130   : > { %4640 = vst.msk [vmem:[%s6684_s16 + $0x38] sm:$0xf] %vm4625_vm3, %v5760_v8  ;;  %4784 = vst.msk [vmem:[%s6684_s16 + $0x278] sm:$0xf] %vm4625_vm3, %v5904_v9  ;;  %v403_v8 = vld [vmem:[%s6509_s27 + $0x6b8] sm:$0xff]  ;;  %v5083_v13 = vcombine.low %v258_v3, %v259_v6  ;;  %v408_v3 = vld [vmem:[%s6509_s27 + $0x6e0] sm:$0xff] }
 0x131   : > { %v2381_v15 = vpop.f32.mrf.mxu0  ;;  %v2957_v16 = vpop.f32.mrf.mxu1  ;;  %v5227_v14 = vcombine.low %v402_v7, %v403_v8 }
 0x132   : > { %v5761_v19 = vpack.c.bf16 %v2381_v15, %v2381_v15  ;;  %v5905_v20 = vpack.c.bf16 %v2957_v16, %v2957_v16 }
 0x133   : > { %v2383_v23 = vpop.f32.mrf.mxu0  ;;  %v2959_v24 = vpop.f32.mrf.mxu1 }
 0x134   : > { %4641 = vst.msk [vmem:[%s6684_s16 + $0x3c] sm:$0xf] %vm4625_vm3, %v5761_v19  ;;  %4785 = vst.msk [vmem:[%s6684_s16 + $0x27c] sm:$0xf] %vm4625_vm3, %v5905_v20  ;;  %v260_v23 = vld [vmem:[%s6509_s27 + $0x240] sm:$0xff] }
 0x135   : > { %v2386_v25 = vpop.f32.mrf.mxu0  ;;  %2577 = vmatmul.mubr.bf16.gmra.mxu0 %v5077_v17  ;;  %v2962_v26 = vpop.f32.mrf.mxu1  ;;  %3153 = vmatmul.mubr.bf16.gmra.mxu1 %v5221_v18  ;;  %v6282_v17 = vld [vmem:[%s6509_s27 + $0x244] ss:$8 sps:$4 sm:$0xff]  }
 0x136   : > { %v5762_v28 = vpack.c.bf16 %v2386_v25, %v2386_v25  ;;  %v5906_v29 = vpack.c.bf16 %v2962_v26, %v2962_v26  ;;  %5344 = vmatprep.mubr.msk.bf16.mxu0 %vm1848_vm0, %v6270_v21  ;;  %5416 = vmatprep.mubr.msk.bf16.mxu1 %vm1848_vm0, %v6272_v22  ;;  %v6284_v18 = vld [vmem:[%s6509_s27 + $0x6c4] ss:$8 sps:$4 sm:$0xff]  }
 0x137   : > { %v2388_v33 = vpop.f32.mrf.mxu0  ;;  %v2964_v34 = vpop.f32.mrf.mxu1  ;;  %v261_v26 = vld [vmem:[%s6509_s27 + $0x248] sm:$0xff] }
 0x138   : > { %4642 = vst.msk [vmem:[%s6684_s16 + $0x40] sm:$0xf] %vm4625_vm3, %v5762_v28  ;;  %4786 = vst.msk [vmem:[%s6684_s16 + $0x280] sm:$0xf] %vm4625_vm3, %v5906_v29  ;;  %v405_v28 = vld [vmem:[%s6509_s27 + $0x6c8] sm:$0xff]  ;;  %v5085_v33 = vcombine.low %v260_v23, %v261_v26  ;;  %v410_v23 = vld [vmem:[%s6509_s27 + $0x6f0] sm:$0xff] }
 0x139   : > { %v2389_v35 = vpop.f32.mrf.mxu0  ;;  %v2965_v36 = vpop.f32.mrf.mxu1  ;;  %v5229_v34 = vcombine.low %v404_v27, %v405_v28 }
 0x13a   : > { %v5763_v39 = vpack.c.bf16 %v2389_v35, %v2389_v35  ;;  %v5907_v40 = vpack.c.bf16 %v2965_v36, %v2965_v36 }
 0x13b   : > { %v2391_v43 = vpop.f32.mrf.mxu0  ;;  %v2967_v44 = vpop.f32.mrf.mxu1 }
 0x13c   : > { %4643 = vst.msk [vmem:[%s6684_s16 + $0x44] sm:$0xf] %vm4625_vm3, %v5763_v39  ;;  %4787 = vst.msk [vmem:[%s6684_s16 + $0x284] sm:$0xf] %vm4625_vm3, %v5907_v40  ;;  %v262_v43 = vld [vmem:[%s6509_s27 + $0x250] sm:$0xff] }
 0x13d   : > { %v2394_v45 = vpop.f32.mrf.mxu0  ;;  %2585 = vmatmul.mubr.bf16.gmra.mxu0 %v5079_v37  ;;  %v2970_v46 = vpop.f32.mrf.mxu1  ;;  %3161 = vmatmul.mubr.bf16.gmra.mxu1 %v5223_v38  ;;  %v6286_v37 = vld [vmem:[%s6509_s27 + $0x254] ss:$8 sps:$4 sm:$0xff]  }
 0x13e   : > { %v5764_v48 = vpack.c.bf16 %v2394_v45, %v2394_v45  ;;  %v5908_v49 = vpack.c.bf16 %v2970_v46, %v2970_v46  ;;  %5345 = vmatprep.mubr.msk.bf16.mxu0 %vm1848_vm0, %v6274_v41  ;;  %5417 = vmatprep.mubr.msk.bf16.mxu1 %vm1848_vm0, %v6276_v42  ;;  %v6288_v38 = vld [vmem:[%s6509_s27 + $0x6d4] ss:$8 sps:$4 sm:$0xff]  }
 0x13f   : > { %v2396_v53 = vpop.f32.mrf.mxu0  ;;  %v2972_v54 = vpop.f32.mrf.mxu1  ;;  %v263_v46 = vld [vmem:[%s6509_s27 + $0x258] sm:$0xff] }
 0x140   : > { %4644 = vst.msk [vmem:[%s6684_s16 + $0x48] sm:$0xf] %vm4625_vm3, %v5764_v48  ;;  %4788 = vst.msk [vmem:[%s6684_s16 + $0x288] sm:$0xf] %vm4625_vm3, %v5908_v49  ;;  %v407_v48 = vld [vmem:[%s6509_s27 + $0x6d8] sm:$0xff]  ;;  %v5087_v53 = vcombine.low %v262_v43, %v263_v46  ;;  %v412_v43 = vld [vmem:[%s6509_s27 + $0x700] sm:$0xff] }
 0x141   : > { %v2397_v55 = vpop.f32.mrf.mxu0  ;;  %v2973_v56 = vpop.f32.mrf.mxu1  ;;  %v5231_v54 = vcombine.low %v406_v47, %v407_v48 }
 0x142   : > { %v5765_v59 = vpack.c.bf16 %v2397_v55, %v2397_v55  ;;  %v5909_v60 = vpack.c.bf16 %v2973_v56, %v2973_v56 }
 0x143   : > { %v2399_v63 = vpop.f32.mrf.mxu0  ;;  %v2975_v0 = vpop.f32.mrf.mxu1 }
 0x144   : > { %4645 = vst.msk [vmem:[%s6684_s16 + $0x4c] sm:$0xf] %vm4625_vm3, %v5765_v59  ;;  %4789 = vst.msk [vmem:[%s6684_s16 + $0x28c] sm:$0xf] %vm4625_vm3, %v5909_v60  ;;  %v264_v63 = vld [vmem:[%s6509_s27 + $0x260] sm:$0xff] }
 0x145   : > { %v2402_v1 = vpop.f32.mrf.mxu0  ;;  %2593 = vmatmul.mubr.bf16.gmra.mxu0 %v5081_v57  ;;  %v2978_v2 = vpop.f32.mrf.mxu1  ;;  %3169 = vmatmul.mubr.bf16.gmra.mxu1 %v5225_v58  ;;  %v6290_v57 = vld [vmem:[%s6509_s27 + $0x264] ss:$8 sps:$4 sm:$0xff]  }
 0x146   : > { %v5766_v4 = vpack.c.bf16 %v2402_v1, %v2402_v1  ;;  %v5910_v5 = vpack.c.bf16 %v2978_v2, %v2978_v2  ;;  %5346 = vmatprep.mubr.msk.bf16.mxu0 %vm1848_vm0, %v6278_v61  ;;  %5418 = vmatprep.mubr.msk.bf16.mxu1 %vm1848_vm0, %v6280_v62  ;;  %v6292_v58 = vld [vmem:[%s6509_s27 + $0x6e4] ss:$8 sps:$4 sm:$0xff]  }
 0x147   : > { %v2404_v9 = vpop.f32.mrf.mxu0  ;;  %v2980_v10 = vpop.f32.mrf.mxu1  ;;  %v265_v2 = vld [vmem:[%s6509_s27 + $0x268] sm:$0xff] }
 0x148   : > { %4646 = vst.msk [vmem:[%s6684_s16 + $0x50] sm:$0xf] %vm4625_vm3, %v5766_v4  ;;  %4790 = vst.msk [vmem:[%s6684_s16 + $0x290] sm:$0xf] %vm4625_vm3, %v5910_v5  ;;  %v409_v4 = vld [vmem:[%s6509_s27 + $0x6e8] sm:$0xff]  ;;  %v5089_v9 = vcombine.low %v264_v63, %v265_v2  ;;  %v414_v63 = vld [vmem:[%s6509_s27 + $0x710] sm:$0xff] }
 0x149   : > { %v2405_v11 = vpop.f32.mrf.mxu0  ;;  %v2981_v12 = vpop.f32.mrf.mxu1  ;;  %v5233_v10 = vcombine.low %v408_v3, %v409_v4 }
 0x14a   : > { %v5767_v15 = vpack.c.bf16 %v2405_v11, %v2405_v11  ;;  %v5911_v16 = vpack.c.bf16 %v2981_v12, %v2981_v12 }
 0x14b   : > { %v2407_v19 = vpop.f32.mrf.mxu0  ;;  %v2983_v20 = vpop.f32.mrf.mxu1 }
 0x14c   : > { %4647 = vst.msk [vmem:[%s6684_s16 + $0x54] sm:$0xf] %vm4625_vm3, %v5767_v15  ;;  %4791 = vst.msk [vmem:[%s6684_s16 + $0x294] sm:$0xf] %vm4625_vm3, %v5911_v16  ;;  %v266_v19 = vld [vmem:[%s6509_s27 + $0x270] sm:$0xff] }
 0x14d   : > { %v2410_v21 = vpop.f32.mrf.mxu0  ;;  %2601 = vmatmul.mubr.bf16.gmra.mxu0 %v5083_v13  ;;  %v2986_v22 = vpop.f32.mrf.mxu1  ;;  %3177 = vmatmul.mubr.bf16.gmra.mxu1 %v5227_v14  ;;  %v6294_v13 = vld [vmem:[%s6509_s27 + $0x274] ss:$8 sps:$4 sm:$0xff]  }
 0x14e   : > { %v5768_v24 = vpack.c.bf16 %v2410_v21, %v2410_v21  ;;  %v5912_v25 = vpack.c.bf16 %v2986_v22, %v2986_v22  ;;  %5347 = vmatprep.mubr.msk.bf16.mxu0 %vm1848_vm0, %v6282_v17  ;;  %5419 = vmatprep.mubr.msk.bf16.mxu1 %vm1848_vm0, %v6284_v18  ;;  %v6296_v14 = vld [vmem:[%s6509_s27 + $0x6f4] ss:$8 sps:$4 sm:$0xff]  }
 0x14f   : > { %v2412_v29 = vpop.f32.mrf.mxu0  ;;  %v2988_v30 = vpop.f32.mrf.mxu1  ;;  %v267_v22 = vld [vmem:[%s6509_s27 + $0x278] sm:$0xff] }
 0x150   : > { %4648 = vst.msk [vmem:[%s6684_s16 + $0x58] sm:$0xf] %vm4625_vm3, %v5768_v24  ;;  %4792 = vst.msk [vmem:[%s6684_s16 + $0x298] sm:$0xf] %vm4625_vm3, %v5912_v25  ;;  %v411_v24 = vld [vmem:[%s6509_s27 + $0x6f8] sm:$0xff]  ;;  %v5091_v29 = vcombine.low %v266_v19, %v267_v22  ;;  %v416_v19 = vld [vmem:[%s6509_s27 + $0x720] sm:$0xff] }
 0x151   : > { %v2413_v31 = vpop.f32.mrf.mxu0  ;;  %v2989_v32 = vpop.f32.mrf.mxu1  ;;  %v5235_v30 = vcombine.low %v410_v23, %v411_v24 }
 0x152   : > { %v5769_v35 = vpack.c.bf16 %v2413_v31, %v2413_v31  ;;  %v5913_v36 = vpack.c.bf16 %v2989_v32, %v2989_v32 }
 0x153   : > { %v2415_v39 = vpop.f32.mrf.mxu0  ;;  %v2991_v40 = vpop.f32.mrf.mxu1 }
 0x154   : > { %4649 = vst.msk [vmem:[%s6684_s16 + $0x5c] sm:$0xf] %vm4625_vm3, %v5769_v35  ;;  %4793 = vst.msk [vmem:[%s6684_s16 + $0x29c] sm:$0xf] %vm4625_vm3, %v5913_v36  ;;  %v268_v39 = vld [vmem:[%s6509_s27 + $0x280] sm:$0xff] }
 0x155   : > { %v2418_v41 = vpop.f32.mrf.mxu0  ;;  %2609 = vmatmul.mubr.bf16.gmra.mxu0 %v5085_v33  ;;  %v2994_v42 = vpop.f32.mrf.mxu1  ;;  %3185 = vmatmul.mubr.bf16.gmra.mxu1 %v5229_v34  ;;  %v6298_v33 = vld [vmem:[%s6509_s27 + $0x284] ss:$8 sps:$4 sm:$0xff]  }
 0x156   : > { %v5770_v44 = vpack.c.bf16 %v2418_v41, %v2418_v41  ;;  %v5914_v45 = vpack.c.bf16 %v2994_v42, %v2994_v42  ;;  %5348 = vmatprep.mubr.msk.bf16.mxu0 %vm1848_vm0, %v6286_v37  ;;  %5420 = vmatprep.mubr.msk.bf16.mxu1 %vm1848_vm0, %v6288_v38  ;;  %v6300_v34 = vld [vmem:[%s6509_s27 + $0x704] ss:$8 sps:$4 sm:$0xff]  }
 0x157   : > { %v2420_v49 = vpop.f32.mrf.mxu0  ;;  %v2996_v50 = vpop.f32.mrf.mxu1  ;;  %v269_v42 = vld [vmem:[%s6509_s27 + $0x288] sm:$0xff] }
 0x158   : > { %4650 = vst.msk [vmem:[%s6684_s16 + $0x60] sm:$0xf] %vm4625_vm3, %v5770_v44  ;;  %4794 = vst.msk [vmem:[%s6684_s16 + $0x2a0] sm:$0xf] %vm4625_vm3, %v5914_v45  ;;  %v413_v44 = vld [vmem:[%s6509_s27 + $0x708] sm:$0xff]  ;;  %v5093_v49 = vcombine.low %v268_v39, %v269_v42  ;;  %v418_v39 = vld [vmem:[%s6509_s27 + $0x730] sm:$0xff] }
 0x159   : > { %v2421_v51 = vpop.f32.mrf.mxu0  ;;  %v2997_v52 = vpop.f32.mrf.mxu1  ;;  %v5237_v50 = vcombine.low %v412_v43, %v413_v44 }
 0x15a   : > { %v5771_v55 = vpack.c.bf16 %v2421_v51, %v2421_v51  ;;  %v5915_v56 = vpack.c.bf16 %v2997_v52, %v2997_v52 }
 0x15b   : > { %v2423_v59 = vpop.f32.mrf.mxu0  ;;  %v2999_v60 = vpop.f32.mrf.mxu1 }
 0x15c   : > { %4651 = vst.msk [vmem:[%s6684_s16 + $0x64] sm:$0xf] %vm4625_vm3, %v5771_v55  ;;  %4795 = vst.msk [vmem:[%s6684_s16 + $0x2a4] sm:$0xf] %vm4625_vm3, %v5915_v56  ;;  %v270_v59 = vld [vmem:[%s6509_s27 + $0x290] sm:$0xff] }
 0x15d   : > { %v2426_v61 = vpop.f32.mrf.mxu0  ;;  %2617 = vmatmul.mubr.bf16.gmra.mxu0 %v5087_v53  ;;  %v3002_v62 = vpop.f32.mrf.mxu1  ;;  %3193 = vmatmul.mubr.bf16.gmra.mxu1 %v5231_v54  ;;  %v6302_v53 = vld [vmem:[%s6509_s27 + $0x294] ss:$8 sps:$4 sm:$0xff]  }
 0x15e   : > { %v5772_v0 = vpack.c.bf16 %v2426_v61, %v2426_v61  ;;  %v5916_v1 = vpack.c.bf16 %v3002_v62, %v3002_v62  ;;  %5349 = vmatprep.mubr.msk.bf16.mxu0 %vm1848_vm0, %v6290_v57  ;;  %5421 = vmatprep.mubr.msk.bf16.mxu1 %vm1848_vm0, %v6292_v58  ;;  %v6304_v54 = vld [vmem:[%s6509_s27 + $0x714] ss:$8 sps:$4 sm:$0xff]  }
 0x15f   : > { %v2428_v5 = vpop.f32.mrf.mxu0  ;;  %v3004_v6 = vpop.f32.mrf.mxu1  ;;  %v271_v62 = vld [vmem:[%s6509_s27 + $0x298] sm:$0xff] }
 0x160   : > { %4652 = vst.msk [vmem:[%s6684_s16 + $0x68] sm:$0xf] %vm4625_vm3, %v5772_v0  ;;  %4796 = vst.msk [vmem:[%s6684_s16 + $0x2a8] sm:$0xf] %vm4625_vm3, %v5916_v1  ;;  %v415_v0 = vld [vmem:[%s6509_s27 + $0x718] sm:$0xff]  ;;  %v5095_v5 = vcombine.low %v270_v59, %v271_v62  ;;  %v420_v59 = vld [vmem:[%s6509_s27 + $0x740] sm:$0xff] }
 0x161   : > { %v2429_v7 = vpop.f32.mrf.mxu0  ;;  %v3005_v8 = vpop.f32.mrf.mxu1  ;;  %v5239_v6 = vcombine.low %v414_v63, %v415_v0 }
 0x162   : > { %v5773_v11 = vpack.c.bf16 %v2429_v7, %v2429_v7  ;;  %v5917_v12 = vpack.c.bf16 %v3005_v8, %v3005_v8 }
 0x163   : > { %v2431_v15 = vpop.f32.mrf.mxu0  ;;  %v3007_v16 = vpop.f32.mrf.mxu1 }
 0x164   : > { %4653 = vst.msk [vmem:[%s6684_s16 + $0x6c] sm:$0xf] %vm4625_vm3, %v5773_v11  ;;  %4797 = vst.msk [vmem:[%s6684_s16 + $0x2ac] sm:$0xf] %vm4625_vm3, %v5917_v12  ;;  %v272_v15 = vld [vmem:[%s6509_s27 + $0x2a0] sm:$0xff] }
 0x165   : > { %v2434_v17 = vpop.f32.mrf.mxu0  ;;  %2625 = vmatmul.mubr.bf16.gmra.mxu0 %v5089_v9  ;;  %v3010_v18 = vpop.f32.mrf.mxu1  ;;  %3201 = vmatmul.mubr.bf16.gmra.mxu1 %v5233_v10  ;;  %v6306_v9 = vld [vmem:[%s6509_s27 + $0x2a4] ss:$8 sps:$4 sm:$0xff]  }
 0x166   : > { %v5774_v20 = vpack.c.bf16 %v2434_v17, %v2434_v17  ;;  %v5918_v21 = vpack.c.bf16 %v3010_v18, %v3010_v18  ;;  %5350 = vmatprep.mubr.msk.bf16.mxu0 %vm1848_vm0, %v6294_v13  ;;  %5422 = vmatprep.mubr.msk.bf16.mxu1 %vm1848_vm0, %v6296_v14  ;;  %v6308_v10 = vld [vmem:[%s6509_s27 + $0x724] ss:$8 sps:$4 sm:$0xff]  }
 0x167   : > { %v2436_v25 = vpop.f32.mrf.mxu0  ;;  %v3012_v26 = vpop.f32.mrf.mxu1  ;;  %v273_v18 = vld [vmem:[%s6509_s27 + $0x2a8] sm:$0xff] }
 0x168   : > { %4654 = vst.msk [vmem:[%s6684_s16 + $0x70] sm:$0xf] %vm4625_vm3, %v5774_v20  ;;  %4798 = vst.msk [vmem:[%s6684_s16 + $0x2b0] sm:$0xf] %vm4625_vm3, %v5918_v21  ;;  %v417_v20 = vld [vmem:[%s6509_s27 + $0x728] sm:$0xff]  ;;  %v5097_v25 = vcombine.low %v272_v15, %v273_v18  ;;  %v422_v15 = vld [vmem:[%s6509_s27 + $0x750] sm:$0xff] }
 0x169   : > { %v2437_v27 = vpop.f32.mrf.mxu0  ;;  %v3013_v28 = vpop.f32.mrf.mxu1  ;;  %v5241_v26 = vcombine.low %v416_v19, %v417_v20 }
 0x16a   : > { %v5775_v31 = vpack.c.bf16 %v2437_v27, %v2437_v27  ;;  %v5919_v32 = vpack.c.bf16 %v3013_v28, %v3013_v28 }
 0x16b   : > { %v2439_v35 = vpop.f32.mrf.mxu0  ;;  %v3015_v36 = vpop.f32.mrf.mxu1 }
 0x16c   : > { %4655 = vst.msk [vmem:[%s6684_s16 + $0x74] sm:$0xf] %vm4625_vm3, %v5775_v31  ;;  %4799 = vst.msk [vmem:[%s6684_s16 + $0x2b4] sm:$0xf] %vm4625_vm3, %v5919_v32  ;;  %v274_v35 = vld [vmem:[%s6509_s27 + $0x2b0] sm:$0xff] }
 0x16d   : > { %v2442_v37 = vpop.f32.mrf.mxu0  ;;  %2633 = vmatmul.mubr.bf16.gmra.mxu0 %v5091_v29  ;;  %v3018_v38 = vpop.f32.mrf.mxu1  ;;  %3209 = vmatmul.mubr.bf16.gmra.mxu1 %v5235_v30  ;;  %v6310_v29 = vld [vmem:[%s6509_s27 + $0x2b4] ss:$8 sps:$4 sm:$0xff]  }
 0x16e   : > { %v5776_v40 = vpack.c.bf16 %v2442_v37, %v2442_v37  ;;  %v5920_v41 = vpack.c.bf16 %v3018_v38, %v3018_v38  ;;  %5351 = vmatprep.mubr.msk.bf16.mxu0 %vm1848_vm0, %v6298_v33  ;;  %5423 = vmatprep.mubr.msk.bf16.mxu1 %vm1848_vm0, %v6300_v34  ;;  %v6312_v30 = vld [vmem:[%s6509_s27 + $0x734] ss:$8 sps:$4 sm:$0xff]  }
 0x16f   : > { %v2444_v45 = vpop.f32.mrf.mxu0  ;;  %v3020_v46 = vpop.f32.mrf.mxu1  ;;  %v275_v38 = vld [vmem:[%s6509_s27 + $0x2b8] sm:$0xff] }
 0x170   : > { %4656 = vst.msk [vmem:[%s6684_s16 + $0x78] sm:$0xf] %vm4625_vm3, %v5776_v40  ;;  %4800 = vst.msk [vmem:[%s6684_s16 + $0x2b8] sm:$0xf] %vm4625_vm3, %v5920_v41  ;;  %v419_v40 = vld [vmem:[%s6509_s27 + $0x738] sm:$0xff]  ;;  %v5099_v45 = vcombine.low %v274_v35, %v275_v38  ;;  %v424_v35 = vld [vmem:[%s6509_s27 + $0x760] sm:$0xff] }
 0x171   : > { %v2445_v47 = vpop.f32.mrf.mxu0  ;;  %v3021_v48 = vpop.f32.mrf.mxu1  ;;  %v5243_v46 = vcombine.low %v418_v39, %v419_v40 }
 0x172   : > { %v5777_v51 = vpack.c.bf16 %v2445_v47, %v2445_v47  ;;  %v5921_v52 = vpack.c.bf16 %v3021_v48, %v3021_v48 }
 0x173   : > { %v2447_v55 = vpop.f32.mrf.mxu0  ;;  %v3023_v56 = vpop.f32.mrf.mxu1 }
 0x174   : > { %4657 = vst.msk [vmem:[%s6684_s16 + $0x7c] sm:$0xf] %vm4625_vm3, %v5777_v51  ;;  %4801 = vst.msk [vmem:[%s6684_s16 + $0x2bc] sm:$0xf] %vm4625_vm3, %v5921_v52  ;;  %v276_v55 = vld [vmem:[%s6509_s27 + $0x2c0] sm:$0xff] }
 0x175   : > { %v2450_v57 = vpop.f32.mrf.mxu0  ;;  %2641 = vmatmul.mubr.bf16.gmra.mxu0 %v5093_v49  ;;  %v3026_v58 = vpop.f32.mrf.mxu1  ;;  %3217 = vmatmul.mubr.bf16.gmra.mxu1 %v5237_v50  ;;  %v6314_v49 = vld [vmem:[%s6509_s27 + $0x2c4] ss:$8 sps:$4 sm:$0xff]  }
 0x176   : > { %v5778_v60 = vpack.c.bf16 %v2450_v57, %v2450_v57  ;;  %v5922_v61 = vpack.c.bf16 %v3026_v58, %v3026_v58  ;;  %5352 = vmatprep.mubr.msk.bf16.mxu0 %vm1848_vm0, %v6302_v53  ;;  %5424 = vmatprep.mubr.msk.bf16.mxu1 %vm1848_vm0, %v6304_v54  ;;  %v6316_v50 = vld [vmem:[%s6509_s27 + $0x744] ss:$8 sps:$4 sm:$0xff]  }
 0x177   : > { %v2452_v1 = vpop.f32.mrf.mxu0  ;;  %v3028_v2 = vpop.f32.mrf.mxu1  ;;  %v277_v58 = vld [vmem:[%s6509_s27 + $0x2c8] sm:$0xff] }
 0x178   : > { %4658 = vst.msk [vmem:[%s6684_s16 + $0x80] sm:$0xf] %vm4625_vm3, %v5778_v60  ;;  %4802 = vst.msk [vmem:[%s6684_s16 + $0x2c0] sm:$0xf] %vm4625_vm3, %v5922_v61  ;;  %v421_v60 = vld [vmem:[%s6509_s27 + $0x748] sm:$0xff]  ;;  %v5101_v1 = vcombine.low %v276_v55, %v277_v58  ;;  %v426_v55 = vld [vmem:[%s6509_s27 + $0x770] sm:$0xff] }
 0x179   : > { %v2453_v3 = vpop.f32.mrf.mxu0  ;;  %v3029_v4 = vpop.f32.mrf.mxu1  ;;  %v5245_v2 = vcombine.low %v420_v59, %v421_v60 }
 0x17a   : > { %v5779_v7 = vpack.c.bf16 %v2453_v3, %v2453_v3  ;;  %v5923_v8 = vpack.c.bf16 %v3029_v4, %v3029_v4 }
 0x17b   : > { %v2455_v11 = vpop.f32.mrf.mxu0  ;;  %v3031_v12 = vpop.f32.mrf.mxu1 }
 0x17c   : > { %4659 = vst.msk [vmem:[%s6684_s16 + $0x84] sm:$0xf] %vm4625_vm3, %v5779_v7  ;;  %4803 = vst.msk [vmem:[%s6684_s16 + $0x2c4] sm:$0xf] %vm4625_vm3, %v5923_v8  ;;  %v278_v11 = vld [vmem:[%s6509_s27 + $0x2d0] sm:$0xff] }
 0x17d   : > { %v2458_v13 = vpop.f32.mrf.mxu0  ;;  %2649 = vmatmul.mubr.bf16.gmra.mxu0 %v5095_v5  ;;  %v3034_v14 = vpop.f32.mrf.mxu1  ;;  %3225 = vmatmul.mubr.bf16.gmra.mxu1 %v5239_v6  ;;  %v6318_v5 = vld [vmem:[%s6509_s27 + $0x2d4] ss:$8 sps:$4 sm:$0xff]  }
 0x17e   : > { %v5780_v16 = vpack.c.bf16 %v2458_v13, %v2458_v13  ;;  %v5924_v17 = vpack.c.bf16 %v3034_v14, %v3034_v14  ;;  %5353 = vmatprep.mubr.msk.bf16.mxu0 %vm1848_vm0, %v6306_v9  ;;  %5425 = vmatprep.mubr.msk.bf16.mxu1 %vm1848_vm0, %v6308_v10  ;;  %v6320_v6 = vld [vmem:[%s6509_s27 + $0x754] ss:$8 sps:$4 sm:$0xff]  }
 0x17f   : > { %v2460_v21 = vpop.f32.mrf.mxu0  ;;  %v3036_v22 = vpop.f32.mrf.mxu1  ;;  %v279_v14 = vld [vmem:[%s6509_s27 + $0x2d8] sm:$0xff] }
 0x180   : > { %4660 = vst.msk [vmem:[%s6684_s16 + $0x88] sm:$0xf] %vm4625_vm3, %v5780_v16  ;;  %4804 = vst.msk [vmem:[%s6684_s16 + $0x2c8] sm:$0xf] %vm4625_vm3, %v5924_v17  ;;  %v423_v16 = vld [vmem:[%s6509_s27 + $0x758] sm:$0xff]  ;;  %v5103_v21 = vcombine.low %v278_v11, %v279_v14  ;;  %v428_v11 = vld [vmem:[%s6509_s27 + $0x780] sm:$0xff] }
 0x181   : > { %v2461_v23 = vpop.f32.mrf.mxu0  ;;  %v3037_v24 = vpop.f32.mrf.mxu1  ;;  %v5247_v22 = vcombine.low %v422_v15, %v423_v16 }
 0x182   : > { %v5781_v27 = vpack.c.bf16 %v2461_v23, %v2461_v23  ;;  %v5925_v28 = vpack.c.bf16 %v3037_v24, %v3037_v24 }
 0x183   : > { %v2463_v31 = vpop.f32.mrf.mxu0  ;;  %v3039_v32 = vpop.f32.mrf.mxu1 }
 0x184   : > { %4661 = vst.msk [vmem:[%s6684_s16 + $0x8c] sm:$0xf] %vm4625_vm3, %v5781_v27  ;;  %4805 = vst.msk [vmem:[%s6684_s16 + $0x2cc] sm:$0xf] %vm4625_vm3, %v5925_v28  ;;  %v280_v31 = vld [vmem:[%s6509_s27 + $0x2e0] sm:$0xff] }
 0x185   : > { %v2466_v33 = vpop.f32.mrf.mxu0  ;;  %2657 = vmatmul.mubr.bf16.gmra.mxu0 %v5097_v25  ;;  %v3042_v34 = vpop.f32.mrf.mxu1  ;;  %3233 = vmatmul.mubr.bf16.gmra.mxu1 %v5241_v26  ;;  %v6322_v25 = vld [vmem:[%s6509_s27 + $0x2e4] ss:$8 sps:$4 sm:$0xff]  }
 0x186   : > { %v5782_v36 = vpack.c.bf16 %v2466_v33, %v2466_v33  ;;  %v5926_v37 = vpack.c.bf16 %v3042_v34, %v3042_v34  ;;  %5354 = vmatprep.mubr.msk.bf16.mxu0 %vm1848_vm0, %v6310_v29  ;;  %5426 = vmatprep.mubr.msk.bf16.mxu1 %vm1848_vm0, %v6312_v30  ;;  %v6324_v26 = vld [vmem:[%s6509_s27 + $0x764] ss:$8 sps:$4 sm:$0xff]  }
 0x187   : > { %v2468_v41 = vpop.f32.mrf.mxu0  ;;  %v3044_v42 = vpop.f32.mrf.mxu1  ;;  %v281_v34 = vld [vmem:[%s6509_s27 + $0x2e8] sm:$0xff] }
 0x188   : > { %4662 = vst.msk [vmem:[%s6684_s16 + $0x90] sm:$0xf] %vm4625_vm3, %v5782_v36  ;;  %4806 = vst.msk [vmem:[%s6684_s16 + $0x2d0] sm:$0xf] %vm4625_vm3, %v5926_v37  ;;  %v425_v36 = vld [vmem:[%s6509_s27 + $0x768] sm:$0xff]  ;;  %v5105_v41 = vcombine.low %v280_v31, %v281_v34  ;;  %v430_v31 = vld [vmem:[%s6509_s27 + $0x790] sm:$0xff] }
 0x189   : > { %v2469_v43 = vpop.f32.mrf.mxu0  ;;  %v3045_v44 = vpop.f32.mrf.mxu1  ;;  %v5249_v42 = vcombine.low %v424_v35, %v425_v36 }
 0x18a   : > { %v5783_v47 = vpack.c.bf16 %v2469_v43, %v2469_v43  ;;  %v5927_v48 = vpack.c.bf16 %v3045_v44, %v3045_v44 }
 0x18b   : > { %v2471_v51 = vpop.f32.mrf.mxu0  ;;  %v3047_v52 = vpop.f32.mrf.mxu1 }
 0x18c   : > { %4663 = vst.msk [vmem:[%s6684_s16 + $0x94] sm:$0xf] %vm4625_vm3, %v5783_v47  ;;  %4807 = vst.msk [vmem:[%s6684_s16 + $0x2d4] sm:$0xf] %vm4625_vm3, %v5927_v48  ;;  %v282_v51 = vld [vmem:[%s6509_s27 + $0x2f0] sm:$0xff] }
 0x18d   : > { %v2474_v53 = vpop.f32.mrf.mxu0  ;;  %2665 = vmatmul.mubr.bf16.gmra.mxu0 %v5099_v45  ;;  %v3050_v54 = vpop.f32.mrf.mxu1  ;;  %3241 = vmatmul.mubr.bf16.gmra.mxu1 %v5243_v46  ;;  %v6326_v45 = vld [vmem:[%s6509_s27 + $0x2f4] ss:$8 sps:$4 sm:$0xff]  }
 0x18e   : > { %v5784_v56 = vpack.c.bf16 %v2474_v53, %v2474_v53  ;;  %v5928_v57 = vpack.c.bf16 %v3050_v54, %v3050_v54  ;;  %5355 = vmatprep.mubr.msk.bf16.mxu0 %vm1848_vm0, %v6314_v49  ;;  %5427 = vmatprep.mubr.msk.bf16.mxu1 %vm1848_vm0, %v6316_v50  ;;  %v6328_v46 = vld [vmem:[%s6509_s27 + $0x774] ss:$8 sps:$4 sm:$0xff]  }
 0x18f   : > { %v2476_v61 = vpop.f32.mrf.mxu0  ;;  %v3052_v62 = vpop.f32.mrf.mxu1  ;;  %v283_v54 = vld [vmem:[%s6509_s27 + $0x2f8] sm:$0xff] }
 0x190   : > { %4664 = vst.msk [vmem:[%s6684_s16 + $0x98] sm:$0xf] %vm4625_vm3, %v5784_v56  ;;  %4808 = vst.msk [vmem:[%s6684_s16 + $0x2d8] sm:$0xf] %vm4625_vm3, %v5928_v57  ;;  %v427_v56 = vld [vmem:[%s6509_s27 + $0x778] sm:$0xff]  ;;  %v5107_v61 = vcombine.low %v282_v51, %v283_v54  ;;  %v432_v51 = vld [vmem:[%s6509_s27 + $0x7a0] sm:$0xff] }
 0x191   : > { %v2477_v63 = vpop.f32.mrf.mxu0  ;;  %v3053_v0 = vpop.f32.mrf.mxu1  ;;  %v5251_v62 = vcombine.low %v426_v55, %v427_v56 }
 0x192   : > { %v5785_v3 = vpack.c.bf16 %v2477_v63, %v2477_v63  ;;  %v5929_v4 = vpack.c.bf16 %v3053_v0, %v3053_v0 }
 0x193   : > { %v2479_v7 = vpop.f32.mrf.mxu0  ;;  %v3055_v8 = vpop.f32.mrf.mxu1 }
 0x194   : > { %4665 = vst.msk [vmem:[%s6684_s16 + $0x9c] sm:$0xf] %vm4625_vm3, %v5785_v3  ;;  %4809 = vst.msk [vmem:[%s6684_s16 + $0x2dc] sm:$0xf] %vm4625_vm3, %v5929_v4  ;;  %v284_v7 = vld [vmem:[%s6509_s27 + $0x300] sm:$0xff] }
 0x195   : > { %v2482_v9 = vpop.f32.mrf.mxu0  ;;  %2673 = vmatmul.mubr.bf16.gmra.mxu0 %v5101_v1  ;;  %v3058_v10 = vpop.f32.mrf.mxu1  ;;  %3249 = vmatmul.mubr.bf16.gmra.mxu1 %v5245_v2  ;;  %v6330_v1 = vld [vmem:[%s6509_s27 + $0x304] ss:$8 sps:$4 sm:$0xff]  }
 0x196   : > { %v5786_v12 = vpack.c.bf16 %v2482_v9, %v2482_v9  ;;  %v5930_v13 = vpack.c.bf16 %v3058_v10, %v3058_v10  ;;  %5356 = vmatprep.mubr.msk.bf16.mxu0 %vm1848_vm0, %v6318_v5  ;;  %5428 = vmatprep.mubr.msk.bf16.mxu1 %vm1848_vm0, %v6320_v6  ;;  %v6332_v2 = vld [vmem:[%s6509_s27 + $0x784] ss:$8 sps:$4 sm:$0xff]  }
 0x197   : > { %v2484_v17 = vpop.f32.mrf.mxu0  ;;  %v3060_v18 = vpop.f32.mrf.mxu1  ;;  %v285_v10 = vld [vmem:[%s6509_s27 + $0x308] sm:$0xff] }
 0x198   : > { %4666 = vst.msk [vmem:[%s6684_s16 + $0xa0] sm:$0xf] %vm4625_vm3, %v5786_v12  ;;  %4810 = vst.msk [vmem:[%s6684_s16 + $0x2e0] sm:$0xf] %vm4625_vm3, %v5930_v13  ;;  %v429_v12 = vld [vmem:[%s6509_s27 + $0x788] sm:$0xff]  ;;  %v5109_v17 = vcombine.low %v284_v7, %v285_v10  ;;  %v434_v7 = vld [vmem:[%s6509_s27 + $0x7b0] sm:$0xff] }
 0x199   : > { %v2485_v19 = vpop.f32.mrf.mxu0  ;;  %v3061_v20 = vpop.f32.mrf.mxu1  ;;  %v5253_v18 = vcombine.low %v428_v11, %v429_v12 }
 0x19a   : > { %v5787_v23 = vpack.c.bf16 %v2485_v19, %v2485_v19  ;;  %v5931_v24 = vpack.c.bf16 %v3061_v20, %v3061_v20 }
 0x19b   : > { %v2487_v27 = vpop.f32.mrf.mxu0  ;;  %v3063_v28 = vpop.f32.mrf.mxu1 }
 0x19c   : > { %4667 = vst.msk [vmem:[%s6684_s16 + $0xa4] sm:$0xf] %vm4625_vm3, %v5787_v23  ;;  %4811 = vst.msk [vmem:[%s6684_s16 + $0x2e4] sm:$0xf] %vm4625_vm3, %v5931_v24  ;;  %v286_v27 = vld [vmem:[%s6509_s27 + $0x310] sm:$0xff] }
 0x19d   : > { %v2490_v29 = vpop.f32.mrf.mxu0  ;;  %2681 = vmatmul.mubr.bf16.gmra.mxu0 %v5103_v21  ;;  %v3066_v30 = vpop.f32.mrf.mxu1  ;;  %3257 = vmatmul.mubr.bf16.gmra.mxu1 %v5247_v22  ;;  %v6334_v21 = vld [vmem:[%s6509_s27 + $0x314] ss:$8 sps:$4 sm:$0xff]  }
 0x19e   : > { %v5788_v32 = vpack.c.bf16 %v2490_v29, %v2490_v29  ;;  %v5932_v33 = vpack.c.bf16 %v3066_v30, %v3066_v30  ;;  %5357 = vmatprep.mubr.msk.bf16.mxu0 %vm1848_vm0, %v6322_v25  ;;  %5429 = vmatprep.mubr.msk.bf16.mxu1 %vm1848_vm0, %v6324_v26  ;;  %v6336_v22 = vld [vmem:[%s6509_s27 + $0x794] ss:$8 sps:$4 sm:$0xff]  }
 0x19f   : > { %v2492_v37 = vpop.f32.mrf.mxu0  ;;  %v3068_v38 = vpop.f32.mrf.mxu1  ;;  %v287_v30 = vld [vmem:[%s6509_s27 + $0x318] sm:$0xff] }
 0x1a0   : > { %4668 = vst.msk [vmem:[%s6684_s16 + $0xa8] sm:$0xf] %vm4625_vm3, %v5788_v32  ;;  %4812 = vst.msk [vmem:[%s6684_s16 + $0x2e8] sm:$0xf] %vm4625_vm3, %v5932_v33  ;;  %v431_v32 = vld [vmem:[%s6509_s27 + $0x798] sm:$0xff]  ;;  %v5111_v37 = vcombine.low %v286_v27, %v287_v30  ;;  %v436_v27 = vld [vmem:[%s6509_s27 + $0x7c0] sm:$0xff] }
 0x1a1   : > { %v2493_v39 = vpop.f32.mrf.mxu0  ;;  %v3069_v40 = vpop.f32.mrf.mxu1  ;;  %v5255_v38 = vcombine.low %v430_v31, %v431_v32 }
 0x1a2   : > { %v5789_v43 = vpack.c.bf16 %v2493_v39, %v2493_v39  ;;  %v5933_v44 = vpack.c.bf16 %v3069_v40, %v3069_v40 }
 0x1a3   : > { %v2495_v47 = vpop.f32.mrf.mxu0  ;;  %v3071_v48 = vpop.f32.mrf.mxu1 }
 0x1a4   : > { %4669 = vst.msk [vmem:[%s6684_s16 + $0xac] sm:$0xf] %vm4625_vm3, %v5789_v43  ;;  %4813 = vst.msk [vmem:[%s6684_s16 + $0x2ec] sm:$0xf] %vm4625_vm3, %v5933_v44  ;;  %v288_v47 = vld [vmem:[%s6509_s27 + $0x320] sm:$0xff] }
 0x1a5   : > { %v2498_v49 = vpop.f32.mrf.mxu0  ;;  %2689 = vmatmul.mubr.bf16.gmra.mxu0 %v5105_v41  ;;  %v3074_v50 = vpop.f32.mrf.mxu1  ;;  %3265 = vmatmul.mubr.bf16.gmra.mxu1 %v5249_v42  ;;  %v6338_v41 = vld [vmem:[%s6509_s27 + $0x324] ss:$8 sps:$4 sm:$0xff]  }
 0x1a6   : > { %v5790_v52 = vpack.c.bf16 %v2498_v49, %v2498_v49  ;;  %v5934_v53 = vpack.c.bf16 %v3074_v50, %v3074_v50  ;;  %5358 = vmatprep.mubr.msk.bf16.mxu0 %vm1848_vm0, %v6326_v45  ;;  %5430 = vmatprep.mubr.msk.bf16.mxu1 %vm1848_vm0, %v6328_v46  ;;  %v6340_v42 = vld [vmem:[%s6509_s27 + $0x7a4] ss:$8 sps:$4 sm:$0xff]  }
 0x1a7   : > { %v2500_v57 = vpop.f32.mrf.mxu0  ;;  %v3076_v58 = vpop.f32.mrf.mxu1  ;;  %v289_v50 = vld [vmem:[%s6509_s27 + $0x328] sm:$0xff] }
 0x1a8   : > { %4670 = vst.msk [vmem:[%s6684_s16 + $0xb0] sm:$0xf] %vm4625_vm3, %v5790_v52  ;;  %4814 = vst.msk [vmem:[%s6684_s16 + $0x2f0] sm:$0xf] %vm4625_vm3, %v5934_v53  ;;  %v433_v52 = vld [vmem:[%s6509_s27 + $0x7a8] sm:$0xff]  ;;  %v5113_v57 = vcombine.low %v288_v47, %v289_v50  ;;  %v438_v47 = vld [vmem:[%s6509_s27 + $0x7d0] sm:$0xff] }
 0x1a9   : > { %v2501_v59 = vpop.f32.mrf.mxu0  ;;  %v3077_v60 = vpop.f32.mrf.mxu1  ;;  %v5257_v58 = vcombine.low %v432_v51, %v433_v52 }
 0x1aa   : > { %v5791_v63 = vpack.c.bf16 %v2501_v59, %v2501_v59  ;;  %v5935_v0 = vpack.c.bf16 %v3077_v60, %v3077_v60 }
 0x1ab   : > { %v2503_v3 = vpop.f32.mrf.mxu0  ;;  %v3079_v4 = vpop.f32.mrf.mxu1 }
 0x1ac   : > { %4671 = vst.msk [vmem:[%s6684_s16 + $0xb4] sm:$0xf] %vm4625_vm3, %v5791_v63  ;;  %4815 = vst.msk [vmem:[%s6684_s16 + $0x2f4] sm:$0xf] %vm4625_vm3, %v5935_v0  ;;  %v290_v3 = vld [vmem:[%s6509_s27 + $0x330] sm:$0xff] }
 0x1ad   : > { %v2506_v5 = vpop.f32.mrf.mxu0  ;;  %2697 = vmatmul.mubr.bf16.gmra.mxu0 %v5107_v61  ;;  %v3082_v6 = vpop.f32.mrf.mxu1  ;;  %3273 = vmatmul.mubr.bf16.gmra.mxu1 %v5251_v62  ;;  %v6342_v61 = vld [vmem:[%s6509_s27 + $0x334] ss:$8 sps:$4 sm:$0xff]  }
 0x1ae   : > { %v5792_v8 = vpack.c.bf16 %v2506_v5, %v2506_v5  ;;  %v5936_v9 = vpack.c.bf16 %v3082_v6, %v3082_v6  ;;  %5359 = vmatprep.mubr.msk.bf16.mxu0 %vm1848_vm0, %v6330_v1  ;;  %5431 = vmatprep.mubr.msk.bf16.mxu1 %vm1848_vm0, %v6332_v2  ;;  %v6344_v62 = vld [vmem:[%s6509_s27 + $0x7b4] ss:$8 sps:$4 sm:$0xff]  }
 0x1af   : > { %v2508_v13 = vpop.f32.mrf.mxu0  ;;  %v3084_v14 = vpop.f32.mrf.mxu1  ;;  %v291_v6 = vld [vmem:[%s6509_s27 + $0x338] sm:$0xff] }
 0x1b0   : > { %4672 = vst.msk [vmem:[%s6684_s16 + $0xb8] sm:$0xf] %vm4625_vm3, %v5792_v8  ;;  %4816 = vst.msk [vmem:[%s6684_s16 + $0x2f8] sm:$0xf] %vm4625_vm3, %v5936_v9  ;;  %v435_v8 = vld [vmem:[%s6509_s27 + $0x7b8] sm:$0xff]  ;;  %v5115_v13 = vcombine.low %v290_v3, %v291_v6  ;;  %v440_v3 = vld [vmem:[%s6509_s27 + $0x7e0] sm:$0xff] }
 0x1b1   : > { %v2509_v15 = vpop.f32.mrf.mxu0  ;;  %v3085_v16 = vpop.f32.mrf.mxu1  ;;  %v5259_v14 = vcombine.low %v434_v7, %v435_v8 }
 0x1b2   : > { %v5793_v19 = vpack.c.bf16 %v2509_v15, %v2509_v15  ;;  %v5937_v20 = vpack.c.bf16 %v3085_v16, %v3085_v16 }
 0x1b3   : > { %v2511_v23 = vpop.f32.mrf.mxu0  ;;  %v3087_v24 = vpop.f32.mrf.mxu1 }
 0x1b4   : > { %4673 = vst.msk [vmem:[%s6684_s16 + $0xbc] sm:$0xf] %vm4625_vm3, %v5793_v19  ;;  %4817 = vst.msk [vmem:[%s6684_s16 + $0x2fc] sm:$0xf] %vm4625_vm3, %v5937_v20  ;;  %v292_v23 = vld [vmem:[%s6509_s27 + $0x340] sm:$0xff] }
 0x1b5   : > { %v2514_v25 = vpop.f32.mrf.mxu0  ;;  %2705 = vmatmul.mubr.bf16.gmra.mxu0 %v5109_v17  ;;  %v3090_v26 = vpop.f32.mrf.mxu1  ;;  %3281 = vmatmul.mubr.bf16.gmra.mxu1 %v5253_v18  ;;  %v6346_v17 = vld [vmem:[%s6509_s27 + $0x344] ss:$8 sps:$4 sm:$0xff]  }
 0x1b6   : > { %v5794_v28 = vpack.c.bf16 %v2514_v25, %v2514_v25  ;;  %v5938_v29 = vpack.c.bf16 %v3090_v26, %v3090_v26  ;;  %5360 = vmatprep.mubr.msk.bf16.mxu0 %vm1848_vm0, %v6334_v21  ;;  %5432 = vmatprep.mubr.msk.bf16.mxu1 %vm1848_vm0, %v6336_v22  ;;  %v6348_v18 = vld [vmem:[%s6509_s27 + $0x7c4] ss:$8 sps:$4 sm:$0xff]  }
 0x1b7   : > { %v2516_v33 = vpop.f32.mrf.mxu0  ;;  %v3092_v34 = vpop.f32.mrf.mxu1  ;;  %v293_v26 = vld [vmem:[%s6509_s27 + $0x348] sm:$0xff] }
 0x1b8   : > { %4674 = vst.msk [vmem:[%s6684_s16 + $0xc0] sm:$0xf] %vm4625_vm3, %v5794_v28  ;;  %4818 = vst.msk [vmem:[%s6684_s16 + $0x300] sm:$0xf] %vm4625_vm3, %v5938_v29  ;;  %v437_v28 = vld [vmem:[%s6509_s27 + $0x7c8] sm:$0xff]  ;;  %v5117_v33 = vcombine.low %v292_v23, %v293_v26  ;;  %v442_v23 = vld [vmem:[%s6509_s27 + $0x7f0] sm:$0xff] }
 0x1b9   : > { %v2517_v35 = vpop.f32.mrf.mxu0  ;;  %v3093_v36 = vpop.f32.mrf.mxu1  ;;  %v5261_v34 = vcombine.low %v436_v27, %v437_v28 }
 0x1ba   : > { %v5795_v39 = vpack.c.bf16 %v2517_v35, %v2517_v35  ;;  %v5939_v40 = vpack.c.bf16 %v3093_v36, %v3093_v36 }
 0x1bb   : > { %v2519_v43 = vpop.f32.mrf.mxu0  ;;  %v3095_v44 = vpop.f32.mrf.mxu1 }
 0x1bc   : > { %4675 = vst.msk [vmem:[%s6684_s16 + $0xc4] sm:$0xf] %vm4625_vm3, %v5795_v39  ;;  %4819 = vst.msk [vmem:[%s6684_s16 + $0x304] sm:$0xf] %vm4625_vm3, %v5939_v40  ;;  %v294_v43 = vld [vmem:[%s6509_s27 + $0x350] sm:$0xff] }
 0x1bd   : > { %v2522_v45 = vpop.f32.mrf.mxu0  ;;  %2713 = vmatmul.mubr.bf16.gmra.mxu0 %v5111_v37  ;;  %v3098_v46 = vpop.f32.mrf.mxu1  ;;  %3289 = vmatmul.mubr.bf16.gmra.mxu1 %v5255_v38  ;;  %v6350_v37 = vld [vmem:[%s6509_s27 + $0x354] ss:$8 sps:$4 sm:$0xff]  }
 0x1be   : > { %v5796_v48 = vpack.c.bf16 %v2522_v45, %v2522_v45  ;;  %v5940_v49 = vpack.c.bf16 %v3098_v46, %v3098_v46  ;;  %5361 = vmatprep.mubr.msk.bf16.mxu0 %vm1848_vm0, %v6338_v41  ;;  %5433 = vmatprep.mubr.msk.bf16.mxu1 %vm1848_vm0, %v6340_v42  ;;  %v6352_v38 = vld [vmem:[%s6509_s27 + $0x7d4] ss:$8 sps:$4 sm:$0xff]  }
 0x1bf   : > { %v2524_v53 = vpop.f32.mrf.mxu0  ;;  %v3100_v54 = vpop.f32.mrf.mxu1  ;;  %v295_v46 = vld [vmem:[%s6509_s27 + $0x358] sm:$0xff] }
 0x1c0   : > { %4676 = vst.msk [vmem:[%s6684_s16 + $0xc8] sm:$0xf] %vm4625_vm3, %v5796_v48  ;;  %4820 = vst.msk [vmem:[%s6684_s16 + $0x308] sm:$0xf] %vm4625_vm3, %v5940_v49  ;;  %v439_v48 = vld [vmem:[%s6509_s27 + $0x7d8] sm:$0xff]  ;;  %v5119_v53 = vcombine.low %v294_v43, %v295_v46  ;;  %v444_v43 = vld [vmem:[%s6509_s27 + $0x800] sm:$0xff] }
 0x1c1   : > { %v2525_v55 = vpop.f32.mrf.mxu0  ;;  %v3101_v56 = vpop.f32.mrf.mxu1  ;;  %v5263_v54 = vcombine.low %v438_v47, %v439_v48 }
 0x1c2   : > { %v5797_v59 = vpack.c.bf16 %v2525_v55, %v2525_v55  ;;  %v5941_v60 = vpack.c.bf16 %v3101_v56, %v3101_v56 }
 0x1c3   : > { %v2527_v63 = vpop.f32.mrf.mxu0  ;;  %v3103_v0 = vpop.f32.mrf.mxu1 }
 0x1c4   : > { %4677 = vst.msk [vmem:[%s6684_s16 + $0xcc] sm:$0xf] %vm4625_vm3, %v5797_v59  ;;  %4821 = vst.msk [vmem:[%s6684_s16 + $0x30c] sm:$0xf] %vm4625_vm3, %v5941_v60  ;;  %v296_v63 = vld [vmem:[%s6509_s27 + $0x360] sm:$0xff] }
 0x1c5   : > { %v2530_v1 = vpop.f32.mrf.mxu0  ;;  %2721 = vmatmul.mubr.bf16.gmra.mxu0 %v5113_v57  ;;  %v3106_v2 = vpop.f32.mrf.mxu1  ;;  %3297 = vmatmul.mubr.bf16.gmra.mxu1 %v5257_v58  ;;  %v6354_v57 = vld [vmem:[%s6509_s27 + $0x364] ss:$8 sps:$4 sm:$0xff]  }
 0x1c6   : > { %v5798_v4 = vpack.c.bf16 %v2530_v1, %v2530_v1  ;;  %v5942_v5 = vpack.c.bf16 %v3106_v2, %v3106_v2  ;;  %5362 = vmatprep.mubr.msk.bf16.mxu0 %vm1848_vm0, %v6342_v61  ;;  %5434 = vmatprep.mubr.msk.bf16.mxu1 %vm1848_vm0, %v6344_v62  ;;  %v6356_v58 = vld [vmem:[%s6509_s27 + $0x7e4] ss:$8 sps:$4 sm:$0xff]  }
 0x1c7   : > { %v2532_v9 = vpop.f32.mrf.mxu0  ;;  %v3108_v10 = vpop.f32.mrf.mxu1  ;;  %v297_v2 = vld [vmem:[%s6509_s27 + $0x368] sm:$0xff] }
 0x1c8   : > { %4678 = vst.msk [vmem:[%s6684_s16 + $0xd0] sm:$0xf] %vm4625_vm3, %v5798_v4  ;;  %4822 = vst.msk [vmem:[%s6684_s16 + $0x310] sm:$0xf] %vm4625_vm3, %v5942_v5  ;;  %v441_v4 = vld [vmem:[%s6509_s27 + $0x7e8] sm:$0xff]  ;;  %v5121_v9 = vcombine.low %v296_v63, %v297_v2  ;;  %v446_v63 = vld [vmem:[%s6509_s27 + $0x810] sm:$0xff] }
 0x1c9   : > { %v2533_v11 = vpop.f32.mrf.mxu0  ;;  %v3109_v12 = vpop.f32.mrf.mxu1  ;;  %v5265_v10 = vcombine.low %v440_v3, %v441_v4 }
 0x1ca   : > { %v5799_v15 = vpack.c.bf16 %v2533_v11, %v2533_v11  ;;  %v5943_v16 = vpack.c.bf16 %v3109_v12, %v3109_v12 }
 0x1cb   : > { %v2535_v19 = vpop.f32.mrf.mxu0  ;;  %v3111_v20 = vpop.f32.mrf.mxu1 }
 0x1cc   : > { %4679 = vst.msk [vmem:[%s6684_s16 + $0xd4] sm:$0xf] %vm4625_vm3, %v5799_v15  ;;  %4823 = vst.msk [vmem:[%s6684_s16 + $0x314] sm:$0xf] %vm4625_vm3, %v5943_v16  ;;  %v298_v19 = vld [vmem:[%s6509_s27 + $0x370] sm:$0xff] }
 0x1cd   : > { %v2538_v21 = vpop.f32.mrf.mxu0  ;;  %2729 = vmatmul.mubr.bf16.gmra.mxu0 %v5115_v13  ;;  %v3114_v22 = vpop.f32.mrf.mxu1  ;;  %3305 = vmatmul.mubr.bf16.gmra.mxu1 %v5259_v14  ;;  %v6358_v13 = vld [vmem:[%s6509_s27 + $0x374] ss:$8 sps:$4 sm:$0xff]  }
 0x1ce   : > { %v5800_v24 = vpack.c.bf16 %v2538_v21, %v2538_v21  ;;  %v5944_v25 = vpack.c.bf16 %v3114_v22, %v3114_v22  ;;  %5363 = vmatprep.mubr.msk.bf16.mxu0 %vm1848_vm0, %v6346_v17  ;;  %5435 = vmatprep.mubr.msk.bf16.mxu1 %vm1848_vm0, %v6348_v18  ;;  %v6360_v14 = vld [vmem:[%s6509_s27 + $0x7f4] ss:$8 sps:$4 sm:$0xff]  }
 0x1cf   : > { %v2540_v29 = vpop.f32.mrf.mxu0  ;;  %v3116_v30 = vpop.f32.mrf.mxu1  ;;  %v299_v22 = vld [vmem:[%s6509_s27 + $0x378] sm:$0xff] }
 0x1d0   : > { %4680 = vst.msk [vmem:[%s6684_s16 + $0xd8] sm:$0xf] %vm4625_vm3, %v5800_v24  ;;  %4824 = vst.msk [vmem:[%s6684_s16 + $0x318] sm:$0xf] %vm4625_vm3, %v5944_v25  ;;  %v443_v24 = vld [vmem:[%s6509_s27 + $0x7f8] sm:$0xff]  ;;  %v5123_v29 = vcombine.low %v298_v19, %v299_v22  ;;  %v448_v19 = vld [vmem:[%s6509_s27 + $0x820] sm:$0xff] }
 0x1d1   : > { %v2541_v31 = vpop.f32.mrf.mxu0  ;;  %v3117_v32 = vpop.f32.mrf.mxu1  ;;  %v5267_v30 = vcombine.low %v442_v23, %v443_v24 }
 0x1d2   : > { %v5801_v35 = vpack.c.bf16 %v2541_v31, %v2541_v31  ;;  %v5945_v36 = vpack.c.bf16 %v3117_v32, %v3117_v32 }
 0x1d3   : > { %v2543_v39 = vpop.f32.mrf.mxu0  ;;  %v3119_v40 = vpop.f32.mrf.mxu1 }
 0x1d4   : > { %4681 = vst.msk [vmem:[%s6684_s16 + $0xdc] sm:$0xf] %vm4625_vm3, %v5801_v35  ;;  %4825 = vst.msk [vmem:[%s6684_s16 + $0x31c] sm:$0xf] %vm4625_vm3, %v5945_v36  ;;  %v300_v39 = vld [vmem:[%s6509_s27 + $0x380] sm:$0xff] }
 0x1d5   : > { %v2546_v41 = vpop.f32.mrf.mxu0  ;;  %2737 = vmatmul.mubr.bf16.gmra.mxu0 %v5117_v33  ;;  %v3122_v42 = vpop.f32.mrf.mxu1  ;;  %3313 = vmatmul.mubr.bf16.gmra.mxu1 %v5261_v34  ;;  %v6362_v33 = vld [vmem:[%s6509_s27 + $0x384] ss:$8 sps:$4 sm:$0xff]  }
 0x1d6   : > { %v5802_v44 = vpack.c.bf16 %v2546_v41, %v2546_v41  ;;  %v5946_v45 = vpack.c.bf16 %v3122_v42, %v3122_v42  ;;  %5364 = vmatprep.mubr.msk.bf16.mxu0 %vm1848_vm0, %v6350_v37  ;;  %5436 = vmatprep.mubr.msk.bf16.mxu1 %vm1848_vm0, %v6352_v38  ;;  %v6364_v34 = vld [vmem:[%s6509_s27 + $0x804] ss:$8 sps:$4 sm:$0xff]  }
 0x1d7   : > { %v2548_v49 = vpop.f32.mrf.mxu0  ;;  %v3124_v50 = vpop.f32.mrf.mxu1  ;;  %v301_v42 = vld [vmem:[%s6509_s27 + $0x388] sm:$0xff] }
 0x1d8   : > { %4682 = vst.msk [vmem:[%s6684_s16 + $0xe0] sm:$0xf] %vm4625_vm3, %v5802_v44  ;;  %4826 = vst.msk [vmem:[%s6684_s16 + $0x320] sm:$0xf] %vm4625_vm3, %v5946_v45  ;;  %v445_v44 = vld [vmem:[%s6509_s27 + $0x808] sm:$0xff]  ;;  %v5125_v49 = vcombine.low %v300_v39, %v301_v42  ;;  %v450_v39 = vld [vmem:[%s6509_s27 + $0x830] sm:$0xff] }
 0x1d9   : > { %v2549_v51 = vpop.f32.mrf.mxu0  ;;  %v3125_v52 = vpop.f32.mrf.mxu1  ;;  %v5269_v50 = vcombine.low %v444_v43, %v445_v44 }
 0x1da   : > { %v5803_v55 = vpack.c.bf16 %v2549_v51, %v2549_v51  ;;  %v5947_v56 = vpack.c.bf16 %v3125_v52, %v3125_v52 }
 0x1db   : > { %v2551_v59 = vpop.f32.mrf.mxu0  ;;  %v3127_v60 = vpop.f32.mrf.mxu1 }
 0x1dc   : > { %4683 = vst.msk [vmem:[%s6684_s16 + $0xe4] sm:$0xf] %vm4625_vm3, %v5803_v55  ;;  %4827 = vst.msk [vmem:[%s6684_s16 + $0x324] sm:$0xf] %vm4625_vm3, %v5947_v56  ;;  %v302_v59 = vld [vmem:[%s6509_s27 + $0x390] sm:$0xff] }
 0x1dd   : > { %v2554_v61 = vpop.f32.mrf.mxu0  ;;  %2745 = vmatmul.mubr.bf16.gmra.mxu0 %v5119_v53  ;;  %v3130_v62 = vpop.f32.mrf.mxu1  ;;  %3321 = vmatmul.mubr.bf16.gmra.mxu1 %v5263_v54  ;;  %v6366_v53 = vld [vmem:[%s6509_s27 + $0x394] ss:$8 sps:$4 sm:$0xff]  }
 0x1de   : > { %v5804_v0 = vpack.c.bf16 %v2554_v61, %v2554_v61  ;;  %v5948_v1 = vpack.c.bf16 %v3130_v62, %v3130_v62  ;;  %5365 = vmatprep.mubr.msk.bf16.mxu0 %vm1848_vm0, %v6354_v57  ;;  %5437 = vmatprep.mubr.msk.bf16.mxu1 %vm1848_vm0, %v6356_v58  ;;  %v6368_v54 = vld [vmem:[%s6509_s27 + $0x814] ss:$8 sps:$4 sm:$0xff]  }
 0x1df   : > { %v2556_v5 = vpop.f32.mrf.mxu0  ;;  %v3132_v6 = vpop.f32.mrf.mxu1  ;;  %v303_v62 = vld [vmem:[%s6509_s27 + $0x398] sm:$0xff] }
 0x1e0   : > { %4684 = vst.msk [vmem:[%s6684_s16 + $0xe8] sm:$0xf] %vm4625_vm3, %v5804_v0  ;;  %4828 = vst.msk [vmem:[%s6684_s16 + $0x328] sm:$0xf] %vm4625_vm3, %v5948_v1  ;;  %v447_v0 = vld [vmem:[%s6509_s27 + $0x818] sm:$0xff]  ;;  %v5127_v5 = vcombine.low %v302_v59, %v303_v62  ;;  %v452_v59 = vld [vmem:[%s6509_s27 + $0x840] sm:$0xff] }
 0x1e1   : > { %v2557_v7 = vpop.f32.mrf.mxu0  ;;  %v3133_v8 = vpop.f32.mrf.mxu1  ;;  %v5271_v6 = vcombine.low %v446_v63, %v447_v0 }
 0x1e2   : > { %v5805_v11 = vpack.c.bf16 %v2557_v7, %v2557_v7  ;;  %v5949_v12 = vpack.c.bf16 %v3133_v8, %v3133_v8 }
 0x1e3   : > { %v2559_v15 = vpop.f32.mrf.mxu0  ;;  %v3135_v16 = vpop.f32.mrf.mxu1 }
 0x1e4   : > { %4685 = vst.msk [vmem:[%s6684_s16 + $0xec] sm:$0xf] %vm4625_vm3, %v5805_v11  ;;  %4829 = vst.msk [vmem:[%s6684_s16 + $0x32c] sm:$0xf] %vm4625_vm3, %v5949_v12  ;;  %v304_v15 = vld [vmem:[%s6509_s27 + $0x3a0] sm:$0xff] }
 0x1e5   : > { %v2562_v17 = vpop.f32.mrf.mxu0  ;;  %2753 = vmatmul.mubr.bf16.gmra.mxu0 %v5121_v9  ;;  %v3138_v18 = vpop.f32.mrf.mxu1  ;;  %3329 = vmatmul.mubr.bf16.gmra.mxu1 %v5265_v10  ;;  %v6370_v9 = vld [vmem:[%s6509_s27 + $0x3a4] ss:$8 sps:$4 sm:$0xff]  }
 0x1e6   : > { %v5806_v20 = vpack.c.bf16 %v2562_v17, %v2562_v17  ;;  %v5950_v21 = vpack.c.bf16 %v3138_v18, %v3138_v18  ;;  %5366 = vmatprep.mubr.msk.bf16.mxu0 %vm1848_vm0, %v6358_v13  ;;  %5438 = vmatprep.mubr.msk.bf16.mxu1 %vm1848_vm0, %v6360_v14  ;;  %v6372_v10 = vld [vmem:[%s6509_s27 + $0x824] ss:$8 sps:$4 sm:$0xff]  }
 0x1e7   : > { %v2564_v25 = vpop.f32.mrf.mxu0  ;;  %v3140_v26 = vpop.f32.mrf.mxu1  ;;  %v305_v18 = vld [vmem:[%s6509_s27 + $0x3a8] sm:$0xff] }
 0x1e8   : > { %4686 = vst.msk [vmem:[%s6684_s16 + $0xf0] sm:$0xf] %vm4625_vm3, %v5806_v20  ;;  %4830 = vst.msk [vmem:[%s6684_s16 + $0x330] sm:$0xf] %vm4625_vm3, %v5950_v21  ;;  %v449_v20 = vld [vmem:[%s6509_s27 + $0x828] sm:$0xff]  ;;  %v5129_v25 = vcombine.low %v304_v15, %v305_v18  ;;  %v454_v15 = vld [vmem:[%s6509_s27 + $0x850] sm:$0xff] }
 0x1e9   : > { %v2565_v27 = vpop.f32.mrf.mxu0  ;;  %v3141_v28 = vpop.f32.mrf.mxu1  ;;  %v5273_v26 = vcombine.low %v448_v19, %v449_v20 }
 0x1ea   : > { %v5807_v31 = vpack.c.bf16 %v2565_v27, %v2565_v27  ;;  %v5951_v32 = vpack.c.bf16 %v3141_v28, %v3141_v28 }
 0x1eb   : > { %v2567_v35 = vpop.f32.mrf.mxu0  ;;  %v3143_v36 = vpop.f32.mrf.mxu1 }
 0x1ec   : > { %4687 = vst.msk [vmem:[%s6684_s16 + $0xf4] sm:$0xf] %vm4625_vm3, %v5807_v31  ;;  %4831 = vst.msk [vmem:[%s6684_s16 + $0x334] sm:$0xf] %vm4625_vm3, %v5951_v32  ;;  %v306_v35 = vld [vmem:[%s6509_s27 + $0x3b0] sm:$0xff] }
 0x1ed   : > { %v2570_v37 = vpop.f32.mrf.mxu0  ;;  %2761 = vmatmul.mubr.bf16.gmra.mxu0 %v5123_v29  ;;  %v3146_v38 = vpop.f32.mrf.mxu1  ;;  %3337 = vmatmul.mubr.bf16.gmra.mxu1 %v5267_v30  ;;  %v6374_v29 = vld [vmem:[%s6509_s27 + $0x3b4] ss:$8 sps:$4 sm:$0xff]  }
 0x1ee   : > { %v5808_v40 = vpack.c.bf16 %v2570_v37, %v2570_v37  ;;  %v5952_v41 = vpack.c.bf16 %v3146_v38, %v3146_v38  ;;  %5367 = vmatprep.mubr.msk.bf16.mxu0 %vm1848_vm0, %v6362_v33  ;;  %5439 = vmatprep.mubr.msk.bf16.mxu1 %vm1848_vm0, %v6364_v34  ;;  %v6376_v30 = vld [vmem:[%s6509_s27 + $0x834] ss:$8 sps:$4 sm:$0xff]  }
 0x1ef   : > { %v2572_v45 = vpop.f32.mrf.mxu0  ;;  %v3148_v46 = vpop.f32.mrf.mxu1  ;;  %v307_v38 = vld [vmem:[%s6509_s27 + $0x3b8] sm:$0xff] }
 0x1f0   : > { %4688 = vst.msk [vmem:[%s6684_s16 + $0xf8] sm:$0xf] %vm4625_vm3, %v5808_v40  ;;  %4832 = vst.msk [vmem:[%s6684_s16 + $0x338] sm:$0xf] %vm4625_vm3, %v5952_v41  ;;  %v451_v40 = vld [vmem:[%s6509_s27 + $0x838] sm:$0xff]  ;;  %v5131_v45 = vcombine.low %v306_v35, %v307_v38  ;;  %v456_v35 = vld [vmem:[%s6509_s27 + $0x860] sm:$0xff] }
 0x1f1   : > { %v2573_v47 = vpop.f32.mrf.mxu0  ;;  %v3149_v48 = vpop.f32.mrf.mxu1  ;;  %v5275_v46 = vcombine.low %v450_v39, %v451_v40 }
 0x1f2   : > { %v5809_v51 = vpack.c.bf16 %v2573_v47, %v2573_v47  ;;  %v5953_v52 = vpack.c.bf16 %v3149_v48, %v3149_v48 }
 0x1f3   : > { %v2575_v55 = vpop.f32.mrf.mxu0  ;;  %v3151_v56 = vpop.f32.mrf.mxu1 }
 0x1f4   : > { %4689 = vst.msk [vmem:[%s6684_s16 + $0xfc] sm:$0xf] %vm4625_vm3, %v5809_v51  ;;  %4833 = vst.msk [vmem:[%s6684_s16 + $0x33c] sm:$0xf] %vm4625_vm3, %v5953_v52  ;;  %v308_v55 = vld [vmem:[%s6509_s27 + $0x3c0] sm:$0xff] }
 0x1f5   : > { %v2578_v57 = vpop.f32.mrf.mxu0  ;;  %2769 = vmatmul.mubr.bf16.gmra.mxu0 %v5125_v49  ;;  %v3154_v58 = vpop.f32.mrf.mxu1  ;;  %3345 = vmatmul.mubr.bf16.gmra.mxu1 %v5269_v50  ;;  %v6378_v49 = vld [vmem:[%s6509_s27 + $0x3c4] ss:$8 sps:$4 sm:$0xff]  }
 0x1f6   : > { %v5810_v60 = vpack.c.bf16 %v2578_v57, %v2578_v57  ;;  %v5954_v61 = vpack.c.bf16 %v3154_v58, %v3154_v58  ;;  %5368 = vmatprep.mubr.msk.bf16.mxu0 %vm1848_vm0, %v6366_v53  ;;  %5440 = vmatprep.mubr.msk.bf16.mxu1 %vm1848_vm0, %v6368_v54  ;;  %v6380_v50 = vld [vmem:[%s6509_s27 + $0x844] ss:$8 sps:$4 sm:$0xff]  }
 0x1f7   : > { %v2580_v1 = vpop.f32.mrf.mxu0  ;;  %v3156_v2 = vpop.f32.mrf.mxu1  ;;  %v309_v58 = vld [vmem:[%s6509_s27 + $0x3c8] sm:$0xff] }
 0x1f8   : > { %4690 = vst.msk [vmem:[%s6684_s16 + $0x100] sm:$0xf] %vm4625_vm3, %v5810_v60  ;;  %4834 = vst.msk [vmem:[%s6684_s16 + $0x340] sm:$0xf] %vm4625_vm3, %v5954_v61  ;;  %v453_v60 = vld [vmem:[%s6509_s27 + $0x848] sm:$0xff]  ;;  %v5133_v1 = vcombine.low %v308_v55, %v309_v58  ;;  %v458_v55 = vld [vmem:[%s6509_s27 + $0x870] sm:$0xff] }
 0x1f9   : > { %v2581_v3 = vpop.f32.mrf.mxu0  ;;  %v3157_v4 = vpop.f32.mrf.mxu1  ;;  %v5277_v2 = vcombine.low %v452_v59, %v453_v60 }
 0x1fa   : > { %v5811_v7 = vpack.c.bf16 %v2581_v3, %v2581_v3  ;;  %v5955_v8 = vpack.c.bf16 %v3157_v4, %v3157_v4 }
 0x1fb   : > { %v2583_v11 = vpop.f32.mrf.mxu0  ;;  %v3159_v12 = vpop.f32.mrf.mxu1 }
 0x1fc   : > { %4691 = vst.msk [vmem:[%s6684_s16 + $0x104] sm:$0xf] %vm4625_vm3, %v5811_v7  ;;  %4835 = vst.msk [vmem:[%s6684_s16 + $0x344] sm:$0xf] %vm4625_vm3, %v5955_v8  ;;  %v310_v11 = vld [vmem:[%s6509_s27 + $0x3d0] sm:$0xff] }
 0x1fd   : > { %v2586_v13 = vpop.f32.mrf.mxu0  ;;  %2777 = vmatmul.mubr.bf16.gmra.mxu0 %v5127_v5  ;;  %v3162_v14 = vpop.f32.mrf.mxu1  ;;  %3353 = vmatmul.mubr.bf16.gmra.mxu1 %v5271_v6  ;;  %v6382_v5 = vld [vmem:[%s6509_s27 + $0x3d4] ss:$8 sps:$4 sm:$0xff]  }
 0x1fe   : > { %v5812_v16 = vpack.c.bf16 %v2586_v13, %v2586_v13  ;;  %v5956_v17 = vpack.c.bf16 %v3162_v14, %v3162_v14  ;;  %5369 = vmatprep.mubr.msk.bf16.mxu0 %vm1848_vm0, %v6370_v9  ;;  %5441 = vmatprep.mubr.msk.bf16.mxu1 %vm1848_vm0, %v6372_v10  ;;  %v6384_v6 = vld [vmem:[%s6509_s27 + $0x854] ss:$8 sps:$4 sm:$0xff]  }
 0x1ff   : > { %v2588_v21 = vpop.f32.mrf.mxu0  ;;  %v3164_v22 = vpop.f32.mrf.mxu1  ;;  %v311_v14 = vld [vmem:[%s6509_s27 + $0x3d8] sm:$0xff] }
 0x200   : > { %4692 = vst.msk [vmem:[%s6684_s16 + $0x108] sm:$0xf] %vm4625_vm3, %v5812_v16  ;;  %4836 = vst.msk [vmem:[%s6684_s16 + $0x348] sm:$0xf] %vm4625_vm3, %v5956_v17  ;;  %v455_v16 = vld [vmem:[%s6509_s27 + $0x858] sm:$0xff]  ;;  %v5135_v21 = vcombine.low %v310_v11, %v311_v14  ;;  %v460_v11 = vld [vmem:[%s6509_s27 + $0x880] sm:$0xff] }
 0x201   : > { %v2589_v23 = vpop.f32.mrf.mxu0  ;;  %v3165_v24 = vpop.f32.mrf.mxu1  ;;  %v5279_v22 = vcombine.low %v454_v15, %v455_v16 }
 0x202   : > { %v5813_v27 = vpack.c.bf16 %v2589_v23, %v2589_v23  ;;  %v5957_v28 = vpack.c.bf16 %v3165_v24, %v3165_v24 }
 0x203   : > { %v2591_v31 = vpop.f32.mrf.mxu0  ;;  %v3167_v32 = vpop.f32.mrf.mxu1 }
 0x204   : > { %4693 = vst.msk [vmem:[%s6684_s16 + $0x10c] sm:$0xf] %vm4625_vm3, %v5813_v27  ;;  %4837 = vst.msk [vmem:[%s6684_s16 + $0x34c] sm:$0xf] %vm4625_vm3, %v5957_v28  ;;  %v312_v31 = vld [vmem:[%s6509_s27 + $0x3e0] sm:$0xff] }
 0x205   : > { %v2594_v33 = vpop.f32.mrf.mxu0  ;;  %2785 = vmatmul.mubr.bf16.gmra.mxu0 %v5129_v25  ;;  %v3170_v34 = vpop.f32.mrf.mxu1  ;;  %3361 = vmatmul.mubr.bf16.gmra.mxu1 %v5273_v26  ;;  %v6386_v25 = vld [vmem:[%s6509_s27 + $0x3e4] ss:$8 sps:$4 sm:$0xff]  }
 0x206   : > { %v5814_v36 = vpack.c.bf16 %v2594_v33, %v2594_v33  ;;  %v5958_v37 = vpack.c.bf16 %v3170_v34, %v3170_v34  ;;  %5370 = vmatprep.mubr.msk.bf16.mxu0 %vm1848_vm0, %v6374_v29  ;;  %5442 = vmatprep.mubr.msk.bf16.mxu1 %vm1848_vm0, %v6376_v30  ;;  %v6388_v26 = vld [vmem:[%s6509_s27 + $0x864] ss:$8 sps:$4 sm:$0xff]  }
 0x207   : > { %v2596_v41 = vpop.f32.mrf.mxu0  ;;  %v3172_v42 = vpop.f32.mrf.mxu1  ;;  %v313_v34 = vld [vmem:[%s6509_s27 + $0x3e8] sm:$0xff] }
 0x208   : > { %4694 = vst.msk [vmem:[%s6684_s16 + $0x110] sm:$0xf] %vm4625_vm3, %v5814_v36  ;;  %4838 = vst.msk [vmem:[%s6684_s16 + $0x350] sm:$0xf] %vm4625_vm3, %v5958_v37  ;;  %v457_v36 = vld [vmem:[%s6509_s27 + $0x868] sm:$0xff]  ;;  %v5137_v41 = vcombine.low %v312_v31, %v313_v34  ;;  %v462_v31 = vld [vmem:[%s6509_s27 + $0x890] sm:$0xff] }
 0x209   : > { %v2597_v43 = vpop.f32.mrf.mxu0  ;;  %v3173_v44 = vpop.f32.mrf.mxu1  ;;  %v5281_v42 = vcombine.low %v456_v35, %v457_v36 }
 0x20a   : > { %v5815_v47 = vpack.c.bf16 %v2597_v43, %v2597_v43  ;;  %v5959_v48 = vpack.c.bf16 %v3173_v44, %v3173_v44 }
 0x20b   : > { %v2599_v51 = vpop.f32.mrf.mxu0  ;;  %v3175_v52 = vpop.f32.mrf.mxu1 }
 0x20c   : > { %4695 = vst.msk [vmem:[%s6684_s16 + $0x114] sm:$0xf] %vm4625_vm3, %v5815_v47  ;;  %4839 = vst.msk [vmem:[%s6684_s16 + $0x354] sm:$0xf] %vm4625_vm3, %v5959_v48  ;;  %v314_v51 = vld [vmem:[%s6509_s27 + $0x3f0] sm:$0xff] }
 0x20d   : > { %v2602_v53 = vpop.f32.mrf.mxu0  ;;  %2793 = vmatmul.mubr.bf16.gmra.mxu0 %v5131_v45  ;;  %v3178_v54 = vpop.f32.mrf.mxu1  ;;  %3369 = vmatmul.mubr.bf16.gmra.mxu1 %v5275_v46  ;;  %v6390_v45 = vld [vmem:[%s6509_s27 + $0x3f4] ss:$8 sps:$4 sm:$0xff]  }
 0x20e   : > { %v5816_v56 = vpack.c.bf16 %v2602_v53, %v2602_v53  ;;  %v5960_v57 = vpack.c.bf16 %v3178_v54, %v3178_v54  ;;  %5371 = vmatprep.mubr.msk.bf16.mxu0 %vm1848_vm0, %v6378_v49  ;;  %5443 = vmatprep.mubr.msk.bf16.mxu1 %vm1848_vm0, %v6380_v50  ;;  %v6392_v46 = vld [vmem:[%s6509_s27 + $0x874] ss:$8 sps:$4 sm:$0xff]  }
 0x20f   : > { %v2604_v61 = vpop.f32.mrf.mxu0  ;;  %v3180_v62 = vpop.f32.mrf.mxu1  ;;  %v315_v54 = vld [vmem:[%s6509_s27 + $0x3f8] sm:$0xff] }
 0x210   : > { %4696 = vst.msk [vmem:[%s6684_s16 + $0x118] sm:$0xf] %vm4625_vm3, %v5816_v56  ;;  %4840 = vst.msk [vmem:[%s6684_s16 + $0x358] sm:$0xf] %vm4625_vm3, %v5960_v57  ;;  %v459_v56 = vld [vmem:[%s6509_s27 + $0x878] sm:$0xff]  ;;  %v5139_v61 = vcombine.low %v314_v51, %v315_v54  ;;  %v464_v51 = vld [vmem:[%s6509_s27 + $0x8a0] sm:$0xff] }
 0x211   : > { %v2605_v63 = vpop.f32.mrf.mxu0  ;;  %v3181_v0 = vpop.f32.mrf.mxu1  ;;  %v5283_v62 = vcombine.low %v458_v55, %v459_v56 }
 0x212   : > { %v5817_v3 = vpack.c.bf16 %v2605_v63, %v2605_v63  ;;  %v5961_v4 = vpack.c.bf16 %v3181_v0, %v3181_v0 }
 0x213   : > { %v2607_v7 = vpop.f32.mrf.mxu0  ;;  %v3183_v8 = vpop.f32.mrf.mxu1 }
 0x214   : > { %4697 = vst.msk [vmem:[%s6684_s16 + $0x11c] sm:$0xf] %vm4625_vm3, %v5817_v3  ;;  %4841 = vst.msk [vmem:[%s6684_s16 + $0x35c] sm:$0xf] %vm4625_vm3, %v5961_v4  ;;  %v316_v7 = vld [vmem:[%s6509_s27 + $0x400] sm:$0xff] }
 0x215   : > { %v2610_v9 = vpop.f32.mrf.mxu0  ;;  %2801 = vmatmul.mubr.bf16.gmra.mxu0 %v5133_v1  ;;  %v3186_v10 = vpop.f32.mrf.mxu1  ;;  %3377 = vmatmul.mubr.bf16.gmra.mxu1 %v5277_v2  ;;  %v6394_v1 = vld [vmem:[%s6509_s27 + $0x404] ss:$8 sps:$4 sm:$0xff]  }
 0x216   : > { %v5818_v12 = vpack.c.bf16 %v2610_v9, %v2610_v9  ;;  %v5962_v13 = vpack.c.bf16 %v3186_v10, %v3186_v10  ;;  %5372 = vmatprep.mubr.msk.bf16.mxu0 %vm1848_vm0, %v6382_v5  ;;  %5444 = vmatprep.mubr.msk.bf16.mxu1 %vm1848_vm0, %v6384_v6  ;;  %v6396_v2 = vld [vmem:[%s6509_s27 + $0x884] ss:$8 sps:$4 sm:$0xff]  }
 0x217   : > { %v2612_v17 = vpop.f32.mrf.mxu0  ;;  %v3188_v18 = vpop.f32.mrf.mxu1  ;;  %v317_v10 = vld [vmem:[%s6509_s27 + $0x408] sm:$0xff] }
 0x218   : > { %4698 = vst.msk [vmem:[%s6684_s16 + $0x120] sm:$0xf] %vm4625_vm3, %v5818_v12  ;;  %4842 = vst.msk [vmem:[%s6684_s16 + $0x360] sm:$0xf] %vm4625_vm3, %v5962_v13  ;;  %v461_v12 = vld [vmem:[%s6509_s27 + $0x888] sm:$0xff]  ;;  %v5141_v17 = vcombine.low %v316_v7, %v317_v10  ;;  %v466_v7 = vld [vmem:[%s6509_s27 + $0x8b0] sm:$0xff] }
 0x219   : > { %v2613_v19 = vpop.f32.mrf.mxu0  ;;  %v3189_v20 = vpop.f32.mrf.mxu1  ;;  %v5285_v18 = vcombine.low %v460_v11, %v461_v12 }
 0x21a   : > { %v5819_v23 = vpack.c.bf16 %v2613_v19, %v2613_v19  ;;  %v5963_v24 = vpack.c.bf16 %v3189_v20, %v3189_v20 }
 0x21b   : > { %v2615_v27 = vpop.f32.mrf.mxu0  ;;  %v3191_v28 = vpop.f32.mrf.mxu1 }
 0x21c   : > { %4699 = vst.msk [vmem:[%s6684_s16 + $0x124] sm:$0xf] %vm4625_vm3, %v5819_v23  ;;  %4843 = vst.msk [vmem:[%s6684_s16 + $0x364] sm:$0xf] %vm4625_vm3, %v5963_v24  ;;  %v318_v27 = vld [vmem:[%s6509_s27 + $0x410] sm:$0xff] }
 0x21d   : > { %v2618_v29 = vpop.f32.mrf.mxu0  ;;  %2809 = vmatmul.mubr.bf16.gmra.mxu0 %v5135_v21  ;;  %v3194_v30 = vpop.f32.mrf.mxu1  ;;  %3385 = vmatmul.mubr.bf16.gmra.mxu1 %v5279_v22  ;;  %v6398_v21 = vld [vmem:[%s6509_s27 + $0x414] ss:$8 sps:$4 sm:$0xff]  }
 0x21e   : > { %v5820_v32 = vpack.c.bf16 %v2618_v29, %v2618_v29  ;;  %v5964_v33 = vpack.c.bf16 %v3194_v30, %v3194_v30  ;;  %5373 = vmatprep.mubr.msk.bf16.mxu0 %vm1848_vm0, %v6386_v25  ;;  %5445 = vmatprep.mubr.msk.bf16.mxu1 %vm1848_vm0, %v6388_v26  ;;  %v6400_v22 = vld [vmem:[%s6509_s27 + $0x894] ss:$8 sps:$4 sm:$0xff]  }
 0x21f   : > { %v2620_v37 = vpop.f32.mrf.mxu0  ;;  %v3196_v38 = vpop.f32.mrf.mxu1  ;;  %v319_v30 = vld [vmem:[%s6509_s27 + $0x418] sm:$0xff] }
 0x220   : > { %4700 = vst.msk [vmem:[%s6684_s16 + $0x128] sm:$0xf] %vm4625_vm3, %v5820_v32  ;;  %4844 = vst.msk [vmem:[%s6684_s16 + $0x368] sm:$0xf] %vm4625_vm3, %v5964_v33  ;;  %v463_v32 = vld [vmem:[%s6509_s27 + $0x898] sm:$0xff]  ;;  %v5143_v37 = vcombine.low %v318_v27, %v319_v30  ;;  %v468_v27 = vld [vmem:[%s6509_s27 + $0x8c0] sm:$0xff] }
 0x221   : > { %v2621_v39 = vpop.f32.mrf.mxu0  ;;  %v3197_v40 = vpop.f32.mrf.mxu1  ;;  %v5287_v38 = vcombine.low %v462_v31, %v463_v32 }
 0x222   : > { %v5821_v43 = vpack.c.bf16 %v2621_v39, %v2621_v39  ;;  %v5965_v44 = vpack.c.bf16 %v3197_v40, %v3197_v40 }
 0x223   : > { %v2623_v47 = vpop.f32.mrf.mxu0  ;;  %v3199_v48 = vpop.f32.mrf.mxu1 }
 0x224   : > { %4701 = vst.msk [vmem:[%s6684_s16 + $0x12c] sm:$0xf] %vm4625_vm3, %v5821_v43  ;;  %4845 = vst.msk [vmem:[%s6684_s16 + $0x36c] sm:$0xf] %vm4625_vm3, %v5965_v44  ;;  %v320_v47 = vld [vmem:[%s6509_s27 + $0x420] sm:$0xff] }
 0x225   : > { %v2626_v49 = vpop.f32.mrf.mxu0  ;;  %2817 = vmatmul.mubr.bf16.gmra.mxu0 %v5137_v41  ;;  %v3202_v50 = vpop.f32.mrf.mxu1  ;;  %3393 = vmatmul.mubr.bf16.gmra.mxu1 %v5281_v42  ;;  %v6402_v41 = vld [vmem:[%s6509_s27 + $0x424] ss:$8 sps:$4 sm:$0xff]  }
 0x226   : > { %v5822_v52 = vpack.c.bf16 %v2626_v49, %v2626_v49  ;;  %v5966_v53 = vpack.c.bf16 %v3202_v50, %v3202_v50  ;;  %5374 = vmatprep.mubr.msk.bf16.mxu0 %vm1848_vm0, %v6390_v45  ;;  %5446 = vmatprep.mubr.msk.bf16.mxu1 %vm1848_vm0, %v6392_v46  ;;  %v6404_v42 = vld [vmem:[%s6509_s27 + $0x8a4] ss:$8 sps:$4 sm:$0xff]  }
 0x227   : > { %v2628_v57 = vpop.f32.mrf.mxu0  ;;  %v3204_v58 = vpop.f32.mrf.mxu1  ;;  %v321_v50 = vld [vmem:[%s6509_s27 + $0x428] sm:$0xff] }
 0x228   : > { %4702 = vst.msk [vmem:[%s6684_s16 + $0x130] sm:$0xf] %vm4625_vm3, %v5822_v52  ;;  %4846 = vst.msk [vmem:[%s6684_s16 + $0x370] sm:$0xf] %vm4625_vm3, %v5966_v53  ;;  %v465_v52 = vld [vmem:[%s6509_s27 + $0x8a8] sm:$0xff]  ;;  %v5145_v57 = vcombine.low %v320_v47, %v321_v50  ;;  %v470_v47 = vld [vmem:[%s6509_s27 + $0x8d0] sm:$0xff] }
 0x229   : > { %v2629_v59 = vpop.f32.mrf.mxu0  ;;  %v3205_v60 = vpop.f32.mrf.mxu1  ;;  %v5289_v58 = vcombine.low %v464_v51, %v465_v52 }
 0x22a   : > { %v5823_v63 = vpack.c.bf16 %v2629_v59, %v2629_v59  ;;  %v5967_v0 = vpack.c.bf16 %v3205_v60, %v3205_v60 }
 0x22b   : > { %v2631_v3 = vpop.f32.mrf.mxu0  ;;  %v3207_v4 = vpop.f32.mrf.mxu1 }
 0x22c   : > { %4703 = vst.msk [vmem:[%s6684_s16 + $0x134] sm:$0xf] %vm4625_vm3, %v5823_v63  ;;  %4847 = vst.msk [vmem:[%s6684_s16 + $0x374] sm:$0xf] %vm4625_vm3, %v5967_v0  ;;  %v322_v3 = vld [vmem:[%s6509_s27 + $0x430] sm:$0xff] }
 0x22d   : > { %v2634_v5 = vpop.f32.mrf.mxu0  ;;  %2825 = vmatmul.mubr.bf16.gmra.mxu0 %v5139_v61  ;;  %v3210_v6 = vpop.f32.mrf.mxu1  ;;  %3401 = vmatmul.mubr.bf16.gmra.mxu1 %v5283_v62  ;;  %v6406_v61 = vld [vmem:[%s6509_s27 + $0x434] ss:$8 sps:$4 sm:$0xff]  }
 0x22e   : > { %v5824_v8 = vpack.c.bf16 %v2634_v5, %v2634_v5  ;;  %v5968_v9 = vpack.c.bf16 %v3210_v6, %v3210_v6  ;;  %5375 = vmatprep.mubr.msk.bf16.mxu0 %vm1848_vm0, %v6394_v1  ;;  %5447 = vmatprep.mubr.msk.bf16.mxu1 %vm1848_vm0, %v6396_v2  ;;  %v6408_v62 = vld [vmem:[%s6509_s27 + $0x8b4] ss:$8 sps:$4 sm:$0xff]  }
 0x22f   : > { %v2636_v13 = vpop.f32.mrf.mxu0  ;;  %v3212_v14 = vpop.f32.mrf.mxu1  ;;  %v323_v6 = vld [vmem:[%s6509_s27 + $0x438] sm:$0xff] }
 0x230   : > { %4704 = vst.msk [vmem:[%s6684_s16 + $0x138] sm:$0xf] %vm4625_vm3, %v5824_v8  ;;  %4848 = vst.msk [vmem:[%s6684_s16 + $0x378] sm:$0xf] %vm4625_vm3, %v5968_v9  ;;  %v467_v8 = vld [vmem:[%s6509_s27 + $0x8b8] sm:$0xff]  ;;  %v5147_v13 = vcombine.low %v322_v3, %v323_v6  ;;  %v472_v3 = vld [vmem:[%s6509_s27 + $0x8e0] sm:$0xff] }
 0x231   : > { %v2637_v15 = vpop.f32.mrf.mxu0  ;;  %v3213_v16 = vpop.f32.mrf.mxu1  ;;  %v5291_v14 = vcombine.low %v466_v7, %v467_v8 }
 0x232   : > { %v5825_v19 = vpack.c.bf16 %v2637_v15, %v2637_v15  ;;  %v5969_v20 = vpack.c.bf16 %v3213_v16, %v3213_v16 }
 0x233   : > { %v2639_v23 = vpop.f32.mrf.mxu0  ;;  %v3215_v24 = vpop.f32.mrf.mxu1 }
 0x234   : > { %4705 = vst.msk [vmem:[%s6684_s16 + $0x13c] sm:$0xf] %vm4625_vm3, %v5825_v19  ;;  %4849 = vst.msk [vmem:[%s6684_s16 + $0x37c] sm:$0xf] %vm4625_vm3, %v5969_v20  ;;  %v324_v23 = vld [vmem:[%s6509_s27 + $0x440] sm:$0xff] }
 0x235   : > { %v2642_v25 = vpop.f32.mrf.mxu0  ;;  %2833 = vmatmul.mubr.bf16.gmra.mxu0 %v5141_v17  ;;  %v3218_v26 = vpop.f32.mrf.mxu1  ;;  %3409 = vmatmul.mubr.bf16.gmra.mxu1 %v5285_v18  ;;  %v6410_v17 = vld [vmem:[%s6509_s27 + $0x444] ss:$8 sps:$4 sm:$0xff]  }
 0x236   : > { %v5826_v28 = vpack.c.bf16 %v2642_v25, %v2642_v25  ;;  %v5970_v29 = vpack.c.bf16 %v3218_v26, %v3218_v26  ;;  %5376 = vmatprep.mubr.msk.bf16.mxu0 %vm1848_vm0, %v6398_v21  ;;  %5448 = vmatprep.mubr.msk.bf16.mxu1 %vm1848_vm0, %v6400_v22  ;;  %v6412_v18 = vld [vmem:[%s6509_s27 + $0x8c4] ss:$8 sps:$4 sm:$0xff]  }
 0x237   : > { %v2644_v33 = vpop.f32.mrf.mxu0  ;;  %v3220_v34 = vpop.f32.mrf.mxu1  ;;  %v325_v26 = vld [vmem:[%s6509_s27 + $0x448] sm:$0xff] }
 0x238   : > { %4706 = vst.msk [vmem:[%s6684_s16 + $0x140] sm:$0xf] %vm4625_vm3, %v5826_v28  ;;  %4850 = vst.msk [vmem:[%s6684_s16 + $0x380] sm:$0xf] %vm4625_vm3, %v5970_v29  ;;  %v469_v28 = vld [vmem:[%s6509_s27 + $0x8c8] sm:$0xff]  ;;  %v5149_v33 = vcombine.low %v324_v23, %v325_v26  ;;  %v474_v23 = vld [vmem:[%s6509_s27 + $0x8f0] sm:$0xff] }
 0x239   : > { %v2645_v35 = vpop.f32.mrf.mxu0  ;;  %v3221_v36 = vpop.f32.mrf.mxu1  ;;  %v5293_v34 = vcombine.low %v468_v27, %v469_v28 }
 0x23a   : > { %v5827_v39 = vpack.c.bf16 %v2645_v35, %v2645_v35  ;;  %v5971_v40 = vpack.c.bf16 %v3221_v36, %v3221_v36 }
 0x23b   : > { %v2647_v43 = vpop.f32.mrf.mxu0  ;;  %v3223_v44 = vpop.f32.mrf.mxu1 }
 0x23c   : > { %4707 = vst.msk [vmem:[%s6684_s16 + $0x144] sm:$0xf] %vm4625_vm3, %v5827_v39  ;;  %4851 = vst.msk [vmem:[%s6684_s16 + $0x384] sm:$0xf] %vm4625_vm3, %v5971_v40  ;;  %v326_v43 = vld [vmem:[%s6509_s27 + $0x450] sm:$0xff] }
 0x23d   : > { %v2650_v45 = vpop.f32.mrf.mxu0  ;;  %2841 = vmatmul.mubr.bf16.gmra.mxu0 %v5143_v37  ;;  %v3226_v46 = vpop.f32.mrf.mxu1  ;;  %3417 = vmatmul.mubr.bf16.gmra.mxu1 %v5287_v38  ;;  %v6414_v37 = vld [vmem:[%s6509_s27 + $0x454] ss:$8 sps:$4 sm:$0xff]  }
 0x23e   : > { %v5828_v48 = vpack.c.bf16 %v2650_v45, %v2650_v45  ;;  %v5972_v49 = vpack.c.bf16 %v3226_v46, %v3226_v46  ;;  %5377 = vmatprep.mubr.msk.bf16.mxu0 %vm1848_vm0, %v6402_v41  ;;  %5449 = vmatprep.mubr.msk.bf16.mxu1 %vm1848_vm0, %v6404_v42  ;;  %v6416_v38 = vld [vmem:[%s6509_s27 + $0x8d4] ss:$8 sps:$4 sm:$0xff]  }
 0x23f   : > { %v2652_v53 = vpop.f32.mrf.mxu0  ;;  %v3228_v54 = vpop.f32.mrf.mxu1  ;;  %v327_v46 = vld [vmem:[%s6509_s27 + $0x458] sm:$0xff] }
 0x240   : > { %4708 = vst.msk [vmem:[%s6684_s16 + $0x148] sm:$0xf] %vm4625_vm3, %v5828_v48  ;;  %4852 = vst.msk [vmem:[%s6684_s16 + $0x388] sm:$0xf] %vm4625_vm3, %v5972_v49  ;;  %v471_v48 = vld [vmem:[%s6509_s27 + $0x8d8] sm:$0xff]  ;;  %v5151_v53 = vcombine.low %v326_v43, %v327_v46 }
 0x241   : > { %v2653_v55 = vpop.f32.mrf.mxu0  ;;  %v3229_v56 = vpop.f32.mrf.mxu1  ;;  %v5295_v54 = vcombine.low %v470_v47, %v471_v48 }
 0x242   : > { %v5829_v59 = vpack.c.bf16 %v2653_v55, %v2653_v55  ;;  %v5973_v60 = vpack.c.bf16 %v3229_v56, %v3229_v56 }
 0x243   : > { %v2655_v63 = vpop.f32.mrf.mxu0  ;;  %v3231_v0 = vpop.f32.mrf.mxu1 }
 0x244   : > { %4709 = vst.msk [vmem:[%s6684_s16 + $0x14c] sm:$0xf] %vm4625_vm3, %v5829_v59  ;;  %4853 = vst.msk [vmem:[%s6684_s16 + $0x38c] sm:$0xf] %vm4625_vm3, %v5973_v60  ;;  %v328_v63 = vld [vmem:[%s6509_s27 + $0x460] sm:$0xff] }
 0x245   : > { %v2658_v1 = vpop.f32.mrf.mxu0  ;;  %2849 = vmatmul.mubr.bf16.gmra.mxu0 %v5145_v57  ;;  %v3234_v2 = vpop.f32.mrf.mxu1  ;;  %3425 = vmatmul.mubr.bf16.gmra.mxu1 %v5289_v58  ;;  %v6418_v57 = vld [vmem:[%s6509_s27 + $0x464] ss:$8 sps:$4 sm:$0xff]  }
 0x246   : > { %v5830_v4 = vpack.c.bf16 %v2658_v1, %v2658_v1  ;;  %v5974_v5 = vpack.c.bf16 %v3234_v2, %v3234_v2  ;;  %5378 = vmatprep.mubr.msk.bf16.mxu0 %vm1848_vm0, %v6406_v61  ;;  %5450 = vmatprep.mubr.msk.bf16.mxu1 %vm1848_vm0, %v6408_v62  ;;  %v6420_v58 = vld [vmem:[%s6509_s27 + $0x8e4] ss:$8 sps:$4 sm:$0xff]  }
 0x247   : > { %v2660_v9 = vpop.f32.mrf.mxu0  ;;  %v3236_v10 = vpop.f32.mrf.mxu1  ;;  %v329_v2 = vld [vmem:[%s6509_s27 + $0x468] sm:$0xff] }
 0x248   : > { %4710 = vst.msk [vmem:[%s6684_s16 + $0x150] sm:$0xf] %vm4625_vm3, %v5830_v4  ;;  %4854 = vst.msk [vmem:[%s6684_s16 + $0x390] sm:$0xf] %vm4625_vm3, %v5974_v5  ;;  %v473_v4 = vld [vmem:[%s6509_s27 + $0x8e8] sm:$0xff]  ;;  %v5153_v9 = vcombine.low %v328_v63, %v329_v2 }
 0x249   : > { %v2661_v11 = vpop.f32.mrf.mxu0  ;;  %v3237_v12 = vpop.f32.mrf.mxu1  ;;  %v5297_v10 = vcombine.low %v472_v3, %v473_v4 }
 0x24a   : > { %v5831_v15 = vpack.c.bf16 %v2661_v11, %v2661_v11  ;;  %v5975_v16 = vpack.c.bf16 %v3237_v12, %v3237_v12 }
 0x24b   : > { %v2663_v19 = vpop.f32.mrf.mxu0  ;;  %v3239_v20 = vpop.f32.mrf.mxu1 }
 0x24c   : > { %4711 = vst.msk [vmem:[%s6684_s16 + $0x154] sm:$0xf] %vm4625_vm3, %v5831_v15  ;;  %4855 = vst.msk [vmem:[%s6684_s16 + $0x394] sm:$0xf] %vm4625_vm3, %v5975_v16  ;;  %v330_v19 = vld [vmem:[%s6509_s27 + $0x470] sm:$0xff] }
 0x24d   : > { %v2666_v21 = vpop.f32.mrf.mxu0  ;;  %2857 = vmatmul.mubr.bf16.gmra.mxu0 %v5147_v13  ;;  %v3242_v22 = vpop.f32.mrf.mxu1  ;;  %3433 = vmatmul.mubr.bf16.gmra.mxu1 %v5291_v14  ;;  %v6422_v13 = vld [vmem:[%s6509_s27 + $0x474] ss:$8 sps:$4 sm:$0xff]  }
 0x24e   : > { %v5832_v24 = vpack.c.bf16 %v2666_v21, %v2666_v21  ;;  %v5976_v25 = vpack.c.bf16 %v3242_v22, %v3242_v22  ;;  %5379 = vmatprep.mubr.msk.bf16.mxu0 %vm1848_vm0, %v6410_v17  ;;  %5451 = vmatprep.mubr.msk.bf16.mxu1 %vm1848_vm0, %v6412_v18  ;;  %v6424_v14 = vld [vmem:[%s6509_s27 + $0x8f4] ss:$8 sps:$4 sm:$0xff]  }
 0x24f   : > { %v2668_v29 = vpop.f32.mrf.mxu0  ;;  %v3244_v30 = vpop.f32.mrf.mxu1  ;;  %v331_v22 = vld [vmem:[%s6509_s27 + $0x478] sm:$0xff] }
 0x250   : > { %4712 = vst.msk [vmem:[%s6684_s16 + $0x158] sm:$0xf] %vm4625_vm3, %v5832_v24  ;;  %4856 = vst.msk [vmem:[%s6684_s16 + $0x398] sm:$0xf] %vm4625_vm3, %v5976_v25  ;;  %v475_v24 = vld [vmem:[%s6509_s27 + $0x8f8] sm:$0xff]  ;;  %v5155_v29 = vcombine.low %v330_v19, %v331_v22 }
 0x251   : > { %v2669_v31 = vpop.f32.mrf.mxu0  ;;  %v3245_v32 = vpop.f32.mrf.mxu1  ;;  %v5299_v30 = vcombine.low %v474_v23, %v475_v24 }
 0x252   : > { %v5833_v35 = vpack.c.bf16 %v2669_v31, %v2669_v31  ;;  %v5977_v36 = vpack.c.bf16 %v3245_v32, %v3245_v32 }
 0x253   : > { %v2671_v39 = vpop.f32.mrf.mxu0  ;;  %v3247_v40 = vpop.f32.mrf.mxu1 }
 0x254   : > { %4713 = vst.msk [vmem:[%s6684_s16 + $0x15c] sm:$0xf] %vm4625_vm3, %v5833_v35  ;;  %4857 = vst.msk [vmem:[%s6684_s16 + $0x39c] sm:$0xf] %vm4625_vm3, %v5977_v36 }
 0x255   : > { %v2674_v41 = vpop.f32.mrf.mxu0  ;;  %2865 = vmatmul.mubr.bf16.gmra.mxu0 %v5149_v33  ;;  %v3250_v42 = vpop.f32.mrf.mxu1  ;;  %3441 = vmatmul.mubr.bf16.gmra.mxu1 %v5293_v34 }
 0x256   : > { %v5834_v44 = vpack.c.bf16 %v2674_v41, %v2674_v41  ;;  %v5978_v45 = vpack.c.bf16 %v3250_v42, %v3250_v42  ;;  %5380 = vmatprep.mubr.msk.bf16.mxu0 %vm1848_vm0, %v6414_v37  ;;  %5452 = vmatprep.mubr.msk.bf16.mxu1 %vm1848_vm0, %v6416_v38 }
 0x257   : > { %v2676_v49 = vpop.f32.mrf.mxu0  ;;  %v3252_v50 = vpop.f32.mrf.mxu1 }
 0x258   : > { %4714 = vst.msk [vmem:[%s6684_s16 + $0x160] sm:$0xf] %vm4625_vm3, %v5834_v44  ;;  %4858 = vst.msk [vmem:[%s6684_s16 + $0x3a0] sm:$0xf] %vm4625_vm3, %v5978_v45 }
 0x259   : > { %v2677_v51 = vpop.f32.mrf.mxu0  ;;  %v3253_v52 = vpop.f32.mrf.mxu1 }
 0x25a   : > { %v5835_v55 = vpack.c.bf16 %v2677_v51, %v2677_v51  ;;  %v5979_v56 = vpack.c.bf16 %v3253_v52, %v3253_v52 }
 0x25b   : > { %v2679_v59 = vpop.f32.mrf.mxu0  ;;  %v3255_v60 = vpop.f32.mrf.mxu1 }
 0x25c   : > { %4715 = vst.msk [vmem:[%s6684_s16 + $0x164] sm:$0xf] %vm4625_vm3, %v5835_v55  ;;  %4859 = vst.msk [vmem:[%s6684_s16 + $0x3a4] sm:$0xf] %vm4625_vm3, %v5979_v56 }
 0x25d   : > { %v2682_v61 = vpop.f32.mrf.mxu0  ;;  %2873 = vmatmul.mubr.bf16.gmra.mxu0 %v5151_v53  ;;  %v3258_v62 = vpop.f32.mrf.mxu1  ;;  %3449 = vmatmul.mubr.bf16.gmra.mxu1 %v5295_v54 }
 0x25e   : > { %v5836_v0 = vpack.c.bf16 %v2682_v61, %v2682_v61  ;;  %v5980_v1 = vpack.c.bf16 %v3258_v62, %v3258_v62  ;;  %5381 = vmatprep.mubr.msk.bf16.mxu0 %vm1848_vm0, %v6418_v57  ;;  %5453 = vmatprep.mubr.msk.bf16.mxu1 %vm1848_vm0, %v6420_v58 }
 0x25f   : > { %v2684_v5 = vpop.f32.mrf.mxu0  ;;  %v3260_v6 = vpop.f32.mrf.mxu1 }
 0x260   : > { %4716 = vst.msk [vmem:[%s6684_s16 + $0x168] sm:$0xf] %vm4625_vm3, %v5836_v0  ;;  %4860 = vst.msk [vmem:[%s6684_s16 + $0x3a8] sm:$0xf] %vm4625_vm3, %v5980_v1 }
 0x261   : > { %v2685_v7 = vpop.f32.mrf.mxu0  ;;  %v3261_v8 = vpop.f32.mrf.mxu1 }
 0x262   : > { %v5837_v11 = vpack.c.bf16 %v2685_v7, %v2685_v7  ;;  %v5981_v12 = vpack.c.bf16 %v3261_v8, %v3261_v8 }
 0x263   : > { %v2687_v15 = vpop.f32.mrf.mxu0  ;;  %v3263_v16 = vpop.f32.mrf.mxu1 }
 0x264   : > { %4717 = vst.msk [vmem:[%s6684_s16 + $0x16c] sm:$0xf] %vm4625_vm3, %v5837_v11  ;;  %4861 = vst.msk [vmem:[%s6684_s16 + $0x3ac] sm:$0xf] %vm4625_vm3, %v5981_v12 }
 0x265   : > { %v2690_v17 = vpop.f32.mrf.mxu0  ;;  %2881 = vmatmul.mubr.bf16.gmra.mxu0 %v5153_v9  ;;  %v3266_v18 = vpop.f32.mrf.mxu1  ;;  %3457 = vmatmul.mubr.bf16.gmra.mxu1 %v5297_v10 }
 0x266   : > { %v5838_v20 = vpack.c.bf16 %v2690_v17, %v2690_v17  ;;  %v5982_v21 = vpack.c.bf16 %v3266_v18, %v3266_v18  ;;  %5382 = vmatprep.mubr.msk.bf16.mxu0 %vm1848_vm0, %v6422_v13  ;;  %5454 = vmatprep.mubr.msk.bf16.mxu1 %vm1848_vm0, %v6424_v14 }
 0x267   : > { %v2692_v25 = vpop.f32.mrf.mxu0  ;;  %v3268_v26 = vpop.f32.mrf.mxu1 }
 0x268   : > { %4718 = vst.msk [vmem:[%s6684_s16 + $0x170] sm:$0xf] %vm4625_vm3, %v5838_v20  ;;  %4862 = vst.msk [vmem:[%s6684_s16 + $0x3b0] sm:$0xf] %vm4625_vm3, %v5982_v21 }
 0x269   : > { %v2693_v27 = vpop.f32.mrf.mxu0  ;;  %v3269_v28 = vpop.f32.mrf.mxu1 }
 0x26a   : > { %v5839_v31 = vpack.c.bf16 %v2693_v27, %v2693_v27  ;;  %v5983_v32 = vpack.c.bf16 %v3269_v28, %v3269_v28 }
 0x26b   : > { %v2695_v33 = vpop.f32.mrf.mxu0  ;;  %v3271_v34 = vpop.f32.mrf.mxu1 }
 0x26c   : > { %4719 = vst.msk [vmem:[%s6684_s16 + $0x174] sm:$0xf] %vm4625_vm3, %v5839_v31  ;;  %4863 = vst.msk [vmem:[%s6684_s16 + $0x3b4] sm:$0xf] %vm4625_vm3, %v5983_v32 }
 0x26d   : > { %v2698_v35 = vpop.f32.mrf.mxu0  ;;  %2889 = vmatmul.mubr.bf16.gmra.mxu0 %v5155_v29  ;;  %v3274_v36 = vpop.f32.mrf.mxu1  ;;  %3465 = vmatmul.mubr.bf16.gmra.mxu1 %v5299_v30 }
 0x26e   : > { %v5840_v37 = vpack.c.bf16 %v2698_v35, %v2698_v35  ;;  %v5984_v38 = vpack.c.bf16 %v3274_v36, %v3274_v36 }
 0x26f   : > { %v2700_v39 = vpop.f32.mrf.mxu0  ;;  %v3276_v40 = vpop.f32.mrf.mxu1 }
 0x270   : > { %4720 = vst.msk [vmem:[%s6684_s16 + $0x178] sm:$0xf] %vm4625_vm3, %v5840_v37  ;;  %4864 = vst.msk [vmem:[%s6684_s16 + $0x3b8] sm:$0xf] %vm4625_vm3, %v5984_v38 }
 0x271   : > { %v2701_v41 = vpop.f32.mrf.mxu0  ;;  %v3277_v42 = vpop.f32.mrf.mxu1 }
 0x272   : > { %v5841_v43 = vpack.c.bf16 %v2701_v41, %v2701_v41  ;;  %v5985_v44 = vpack.c.bf16 %v3277_v42, %v3277_v42 }
 0x273   : > { %v2703_v45 = vpop.f32.mrf.mxu0  ;;  %v3279_v46 = vpop.f32.mrf.mxu1 }
 0x274   : > { %4721 = vst.msk [vmem:[%s6684_s16 + $0x17c] sm:$0xf] %vm4625_vm3, %v5841_v43  ;;  %4865 = vst.msk [vmem:[%s6684_s16 + $0x3bc] sm:$0xf] %vm4625_vm3, %v5985_v44 }
 0x275   : > { %v2706_v47 = vpop.f32.mrf.mxu0  ;;  %v3282_v48 = vpop.f32.mrf.mxu1 }
 0x276   : > { %v5842_v49 = vpack.c.bf16 %v2706_v47, %v2706_v47  ;;  %v5986_v50 = vpack.c.bf16 %v3282_v48, %v3282_v48 }
 0x277   : > { %v2708_v51 = vpop.f32.mrf.mxu0  ;;  %v3284_v52 = vpop.f32.mrf.mxu1 }
 0x278   : > { %4722 = vst.msk [vmem:[%s6684_s16 + $0x180] sm:$0xf] %vm4625_vm3, %v5842_v49  ;;  %4866 = vst.msk [vmem:[%s6684_s16 + $0x3c0] sm:$0xf] %vm4625_vm3, %v5986_v50 }
 0x279   : > { %v2709_v53 = vpop.f32.mrf.mxu0  ;;  %v3285_v54 = vpop.f32.mrf.mxu1 }
 0x27a   : > { %v5843_v55 = vpack.c.bf16 %v2709_v53, %v2709_v53  ;;  %v5987_v56 = vpack.c.bf16 %v3285_v54, %v3285_v54 }
 0x27b   : > { %v2711_v57 = vpop.f32.mrf.mxu0  ;;  %v3287_v58 = vpop.f32.mrf.mxu1 }
 0x27c   : > { %4723 = vst.msk [vmem:[%s6684_s16 + $0x184] sm:$0xf] %vm4625_vm3, %v5843_v55  ;;  %4867 = vst.msk [vmem:[%s6684_s16 + $0x3c4] sm:$0xf] %vm4625_vm3, %v5987_v56 }
 0x27d   : > { %v2714_v59 = vpop.f32.mrf.mxu0  ;;  %v3290_v60 = vpop.f32.mrf.mxu1 }
 0x27e   : > { %v5844_v61 = vpack.c.bf16 %v2714_v59, %v2714_v59  ;;  %v5988_v62 = vpack.c.bf16 %v3290_v60, %v3290_v60 }
 0x27f   : > { %v2716_v63 = vpop.f32.mrf.mxu0  ;;  %v3292_v0 = vpop.f32.mrf.mxu1 }
 0x280   : > { %4724 = vst.msk [vmem:[%s6684_s16 + $0x188] sm:$0xf] %vm4625_vm3, %v5844_v61  ;;  %4868 = vst.msk [vmem:[%s6684_s16 + $0x3c8] sm:$0xf] %vm4625_vm3, %v5988_v62 }
 0x281   : > { %v2717_v1 = vpop.f32.mrf.mxu0  ;;  %v3293_v2 = vpop.f32.mrf.mxu1 }
 0x282   : > { %v5845_v3 = vpack.c.bf16 %v2717_v1, %v2717_v1  ;;  %v5989_v4 = vpack.c.bf16 %v3293_v2, %v3293_v2 }
 0x283   : > { %v2719_v5 = vpop.f32.mrf.mxu0  ;;  %v3295_v6 = vpop.f32.mrf.mxu1 }
 0x284   : > { %4725 = vst.msk [vmem:[%s6684_s16 + $0x18c] sm:$0xf] %vm4625_vm3, %v5845_v3  ;;  %4869 = vst.msk [vmem:[%s6684_s16 + $0x3cc] sm:$0xf] %vm4625_vm3, %v5989_v4 }
 0x285   : > { %v2722_v7 = vpop.f32.mrf.mxu0  ;;  %v3298_v8 = vpop.f32.mrf.mxu1 }
 0x286   : > { %v5846_v9 = vpack.c.bf16 %v2722_v7, %v2722_v7  ;;  %v5990_v10 = vpack.c.bf16 %v3298_v8, %v3298_v8 }
 0x287   : > { %v2724_v11 = vpop.f32.mrf.mxu0  ;;  %v3300_v12 = vpop.f32.mrf.mxu1 }
 0x288   : > { %4726 = vst.msk [vmem:[%s6684_s16 + $0x190] sm:$0xf] %vm4625_vm3, %v5846_v9  ;;  %4870 = vst.msk [vmem:[%s6684_s16 + $0x3d0] sm:$0xf] %vm4625_vm3, %v5990_v10 }
 0x289   : > { %v2725_v13 = vpop.f32.mrf.mxu0  ;;  %v3301_v14 = vpop.f32.mrf.mxu1 }
 0x28a   : > { %v5847_v15 = vpack.c.bf16 %v2725_v13, %v2725_v13  ;;  %v5991_v16 = vpack.c.bf16 %v3301_v14, %v3301_v14 }
 0x28b   : > { %v2727_v17 = vpop.f32.mrf.mxu0  ;;  %v3303_v18 = vpop.f32.mrf.mxu1 }
 0x28c   : > { %4727 = vst.msk [vmem:[%s6684_s16 + $0x194] sm:$0xf] %vm4625_vm3, %v5847_v15  ;;  %4871 = vst.msk [vmem:[%s6684_s16 + $0x3d4] sm:$0xf] %vm4625_vm3, %v5991_v16 }
 0x28d   : > { %v2730_v19 = vpop.f32.mrf.mxu0  ;;  %v3306_v20 = vpop.f32.mrf.mxu1 }
 0x28e   : > { %v5848_v21 = vpack.c.bf16 %v2730_v19, %v2730_v19  ;;  %v5992_v22 = vpack.c.bf16 %v3306_v20, %v3306_v20 }
 0x28f   : > { %v2732_v23 = vpop.f32.mrf.mxu0  ;;  %v3308_v24 = vpop.f32.mrf.mxu1 }
 0x290   : > { %4728 = vst.msk [vmem:[%s6684_s16 + $0x198] sm:$0xf] %vm4625_vm3, %v5848_v21  ;;  %4872 = vst.msk [vmem:[%s6684_s16 + $0x3d8] sm:$0xf] %vm4625_vm3, %v5992_v22 }
 0x291   : > { %v2733_v25 = vpop.f32.mrf.mxu0  ;;  %v3309_v26 = vpop.f32.mrf.mxu1 }
 0x292   : > { %v5849_v27 = vpack.c.bf16 %v2733_v25, %v2733_v25  ;;  %v5993_v28 = vpack.c.bf16 %v3309_v26, %v3309_v26 }
 0x293   : > { %v2735_v29 = vpop.f32.mrf.mxu0  ;;  %v3311_v30 = vpop.f32.mrf.mxu1 }
 0x294   : > { %4729 = vst.msk [vmem:[%s6684_s16 + $0x19c] sm:$0xf] %vm4625_vm3, %v5849_v27  ;;  %4873 = vst.msk [vmem:[%s6684_s16 + $0x3dc] sm:$0xf] %vm4625_vm3, %v5993_v28 }
 0x295   : > { %v2738_v31 = vpop.f32.mrf.mxu0  ;;  %v3314_v32 = vpop.f32.mrf.mxu1 }
 0x296   : > { %v5850_v33 = vpack.c.bf16 %v2738_v31, %v2738_v31  ;;  %v5994_v34 = vpack.c.bf16 %v3314_v32, %v3314_v32 }
 0x297   : > { %v2740_v35 = vpop.f32.mrf.mxu0  ;;  %v3316_v36 = vpop.f32.mrf.mxu1 }
 0x298   : > { %4730 = vst.msk [vmem:[%s6684_s16 + $0x1a0] sm:$0xf] %vm4625_vm3, %v5850_v33  ;;  %4874 = vst.msk [vmem:[%s6684_s16 + $0x3e0] sm:$0xf] %vm4625_vm3, %v5994_v34 }
 0x299   : > { %v2741_v37 = vpop.f32.mrf.mxu0  ;;  %v3317_v38 = vpop.f32.mrf.mxu1 }
 0x29a   : > { %v5851_v39 = vpack.c.bf16 %v2741_v37, %v2741_v37  ;;  %v5995_v40 = vpack.c.bf16 %v3317_v38, %v3317_v38 }
 0x29b   : > { %v2743_v41 = vpop.f32.mrf.mxu0  ;;  %v3319_v42 = vpop.f32.mrf.mxu1 }
 0x29c   : > { %4731 = vst.msk [vmem:[%s6684_s16 + $0x1a4] sm:$0xf] %vm4625_vm3, %v5851_v39  ;;  %4875 = vst.msk [vmem:[%s6684_s16 + $0x3e4] sm:$0xf] %vm4625_vm3, %v5995_v40 }
 0x29d   : > { %v2746_v43 = vpop.f32.mrf.mxu0  ;;  %v3322_v44 = vpop.f32.mrf.mxu1 }
 0x29e   : > { %v5852_v45 = vpack.c.bf16 %v2746_v43, %v2746_v43  ;;  %v5996_v46 = vpack.c.bf16 %v3322_v44, %v3322_v44 }
 0x29f   : > { %v2748_v47 = vpop.f32.mrf.mxu0  ;;  %v3324_v48 = vpop.f32.mrf.mxu1 }
 0x2a0   : > { %4732 = vst.msk [vmem:[%s6684_s16 + $0x1a8] sm:$0xf] %vm4625_vm3, %v5852_v45  ;;  %4876 = vst.msk [vmem:[%s6684_s16 + $0x3e8] sm:$0xf] %vm4625_vm3, %v5996_v46 }
 0x2a1   : > { %v2749_v49 = vpop.f32.mrf.mxu0  ;;  %v3325_v50 = vpop.f32.mrf.mxu1 }
 0x2a2   : > { %v5853_v51 = vpack.c.bf16 %v2749_v49, %v2749_v49  ;;  %v5997_v52 = vpack.c.bf16 %v3325_v50, %v3325_v50 }
 0x2a3   : > { %v2751_v53 = vpop.f32.mrf.mxu0  ;;  %v3327_v54 = vpop.f32.mrf.mxu1 }
 0x2a4   : > { %4733 = vst.msk [vmem:[%s6684_s16 + $0x1ac] sm:$0xf] %vm4625_vm3, %v5853_v51  ;;  %4877 = vst.msk [vmem:[%s6684_s16 + $0x3ec] sm:$0xf] %vm4625_vm3, %v5997_v52 }
 0x2a5   : > { %v2754_v55 = vpop.f32.mrf.mxu0  ;;  %v3330_v56 = vpop.f32.mrf.mxu1 }
 0x2a6   : > { %v5854_v57 = vpack.c.bf16 %v2754_v55, %v2754_v55  ;;  %v5998_v58 = vpack.c.bf16 %v3330_v56, %v3330_v56 }
 0x2a7   : > { %v2756_v59 = vpop.f32.mrf.mxu0  ;;  %v3332_v60 = vpop.f32.mrf.mxu1 }
 0x2a8   : > { %4734 = vst.msk [vmem:[%s6684_s16 + $0x1b0] sm:$0xf] %vm4625_vm3, %v5854_v57  ;;  %4878 = vst.msk [vmem:[%s6684_s16 + $0x3f0] sm:$0xf] %vm4625_vm3, %v5998_v58 }
 0x2a9   : > { %v2757_v61 = vpop.f32.mrf.mxu0  ;;  %v3333_v62 = vpop.f32.mrf.mxu1 }
 0x2aa   : > { %v5855_v63 = vpack.c.bf16 %v2757_v61, %v2757_v61  ;;  %v5999_v0 = vpack.c.bf16 %v3333_v62, %v3333_v62 }
 0x2ab   : > { %v2759_v1 = vpop.f32.mrf.mxu0  ;;  %v3335_v2 = vpop.f32.mrf.mxu1 }
 0x2ac   : > { %4735 = vst.msk [vmem:[%s6684_s16 + $0x1b4] sm:$0xf] %vm4625_vm3, %v5855_v63  ;;  %4879 = vst.msk [vmem:[%s6684_s16 + $0x3f4] sm:$0xf] %vm4625_vm3, %v5999_v0 }
 0x2ad   : > { %v2762_v3 = vpop.f32.mrf.mxu0  ;;  %v3338_v4 = vpop.f32.mrf.mxu1 }
 0x2ae   : > { %v5856_v5 = vpack.c.bf16 %v2762_v3, %v2762_v3  ;;  %v6000_v6 = vpack.c.bf16 %v3338_v4, %v3338_v4 }
 0x2af   : > { %v2764_v7 = vpop.f32.mrf.mxu0  ;;  %v3340_v8 = vpop.f32.mrf.mxu1 }
 0x2b0   : > { %4736 = vst.msk [vmem:[%s6684_s16 + $0x1b8] sm:$0xf] %vm4625_vm3, %v5856_v5  ;;  %4880 = vst.msk [vmem:[%s6684_s16 + $0x3f8] sm:$0xf] %vm4625_vm3, %v6000_v6 }
 0x2b1   : > { %v2765_v9 = vpop.f32.mrf.mxu0  ;;  %v3341_v10 = vpop.f32.mrf.mxu1 }
 0x2b2   : > { %v5857_v11 = vpack.c.bf16 %v2765_v9, %v2765_v9  ;;  %v6001_v12 = vpack.c.bf16 %v3341_v10, %v3341_v10 }
 0x2b3   : > { %v2767_v13 = vpop.f32.mrf.mxu0  ;;  %v3343_v14 = vpop.f32.mrf.mxu1 }
 0x2b4   : > { %4737 = vst.msk [vmem:[%s6684_s16 + $0x1bc] sm:$0xf] %vm4625_vm3, %v5857_v11  ;;  %4881 = vst.msk [vmem:[%s6684_s16 + $0x3fc] sm:$0xf] %vm4625_vm3, %v6001_v12 }
 0x2b5   : > { %v2770_v15 = vpop.f32.mrf.mxu0  ;;  %v3346_v16 = vpop.f32.mrf.mxu1 }
 0x2b6   : > { %v5858_v17 = vpack.c.bf16 %v2770_v15, %v2770_v15  ;;  %v6002_v18 = vpack.c.bf16 %v3346_v16, %v3346_v16 }
 0x2b7   : > { %v2772_v19 = vpop.f32.mrf.mxu0  ;;  %v3348_v20 = vpop.f32.mrf.mxu1 }
 0x2b8   : > { %4738 = vst.msk [vmem:[%s6684_s16 + $0x1c0] sm:$0xf] %vm4625_vm3, %v5858_v17  ;;  %4882 = vst.msk [vmem:[%s6684_s16 + $0x400] sm:$0xf] %vm4625_vm3, %v6002_v18 }
 0x2b9   : > { %v2773_v21 = vpop.f32.mrf.mxu0  ;;  %v3349_v22 = vpop.f32.mrf.mxu1 }
 0x2ba   : > { %v5859_v23 = vpack.c.bf16 %v2773_v21, %v2773_v21  ;;  %v6003_v24 = vpack.c.bf16 %v3349_v22, %v3349_v22 }
 0x2bb   : > { %v2775_v25 = vpop.f32.mrf.mxu0  ;;  %v3351_v26 = vpop.f32.mrf.mxu1 }
 0x2bc   : > { %4739 = vst.msk [vmem:[%s6684_s16 + $0x1c4] sm:$0xf] %vm4625_vm3, %v5859_v23  ;;  %4883 = vst.msk [vmem:[%s6684_s16 + $0x404] sm:$0xf] %vm4625_vm3, %v6003_v24 }
 0x2bd   : > { %v2778_v27 = vpop.f32.mrf.mxu0  ;;  %v3354_v28 = vpop.f32.mrf.mxu1 }
 0x2be   : > { %v5860_v29 = vpack.c.bf16 %v2778_v27, %v2778_v27  ;;  %v6004_v30 = vpack.c.bf16 %v3354_v28, %v3354_v28 }
 0x2bf   : > { %v2780_v31 = vpop.f32.mrf.mxu0  ;;  %v3356_v32 = vpop.f32.mrf.mxu1 }
 0x2c0   : > { %4740 = vst.msk [vmem:[%s6684_s16 + $0x1c8] sm:$0xf] %vm4625_vm3, %v5860_v29  ;;  %4884 = vst.msk [vmem:[%s6684_s16 + $0x408] sm:$0xf] %vm4625_vm3, %v6004_v30 }
 0x2c1   : > { %v2781_v33 = vpop.f32.mrf.mxu0  ;;  %v3357_v34 = vpop.f32.mrf.mxu1 }
 0x2c2   : > { %v5861_v35 = vpack.c.bf16 %v2781_v33, %v2781_v33  ;;  %v6005_v36 = vpack.c.bf16 %v3357_v34, %v3357_v34 }
 0x2c3   : > { %v2783_v37 = vpop.f32.mrf.mxu0  ;;  %v3359_v38 = vpop.f32.mrf.mxu1 }
 0x2c4   : > { %4741 = vst.msk [vmem:[%s6684_s16 + $0x1cc] sm:$0xf] %vm4625_vm3, %v5861_v35  ;;  %4885 = vst.msk [vmem:[%s6684_s16 + $0x40c] sm:$0xf] %vm4625_vm3, %v6005_v36 }
 0x2c5   : > { %v2786_v39 = vpop.f32.mrf.mxu0  ;;  %v3362_v40 = vpop.f32.mrf.mxu1 }
 0x2c6   : > { %v5862_v41 = vpack.c.bf16 %v2786_v39, %v2786_v39  ;;  %v6006_v42 = vpack.c.bf16 %v3362_v40, %v3362_v40 }
 0x2c7   : > { %v2788_v43 = vpop.f32.mrf.mxu0  ;;  %v3364_v44 = vpop.f32.mrf.mxu1 }
 0x2c8   : > { %4742 = vst.msk [vmem:[%s6684_s16 + $0x1d0] sm:$0xf] %vm4625_vm3, %v5862_v41  ;;  %4886 = vst.msk [vmem:[%s6684_s16 + $0x410] sm:$0xf] %vm4625_vm3, %v6006_v42 }
 0x2c9   : > { %v2789_v45 = vpop.f32.mrf.mxu0  ;;  %v3365_v46 = vpop.f32.mrf.mxu1 }
 0x2ca   : > { %v5863_v47 = vpack.c.bf16 %v2789_v45, %v2789_v45  ;;  %v6007_v48 = vpack.c.bf16 %v3365_v46, %v3365_v46 }
 0x2cb   : > { %v2791_v49 = vpop.f32.mrf.mxu0  ;;  %v3367_v50 = vpop.f32.mrf.mxu1 }
 0x2cc   : > { %4743 = vst.msk [vmem:[%s6684_s16 + $0x1d4] sm:$0xf] %vm4625_vm3, %v5863_v47  ;;  %4887 = vst.msk [vmem:[%s6684_s16 + $0x414] sm:$0xf] %vm4625_vm3, %v6007_v48 }
 0x2cd   : > { %v2794_v51 = vpop.f32.mrf.mxu0  ;;  %v3370_v52 = vpop.f32.mrf.mxu1 }
 0x2ce   : > { %v5864_v53 = vpack.c.bf16 %v2794_v51, %v2794_v51  ;;  %v6008_v54 = vpack.c.bf16 %v3370_v52, %v3370_v52 }
 0x2cf   : > { %v2796_v55 = vpop.f32.mrf.mxu0  ;;  %v3372_v56 = vpop.f32.mrf.mxu1 }
 0x2d0   : > { %4744 = vst.msk [vmem:[%s6684_s16 + $0x1d8] sm:$0xf] %vm4625_vm3, %v5864_v53  ;;  %4888 = vst.msk [vmem:[%s6684_s16 + $0x418] sm:$0xf] %vm4625_vm3, %v6008_v54 }
 0x2d1   : > { %v2797_v57 = vpop.f32.mrf.mxu0  ;;  %v3373_v58 = vpop.f32.mrf.mxu1 }
 0x2d2   : > { %v5865_v59 = vpack.c.bf16 %v2797_v57, %v2797_v57  ;;  %v6009_v60 = vpack.c.bf16 %v3373_v58, %v3373_v58 }
 0x2d3   : > { %v2799_v61 = vpop.f32.mrf.mxu0  ;;  %v3375_v62 = vpop.f32.mrf.mxu1 }
 0x2d4   : > { %4745 = vst.msk [vmem:[%s6684_s16 + $0x1dc] sm:$0xf] %vm4625_vm3, %v5865_v59  ;;  %4889 = vst.msk [vmem:[%s6684_s16 + $0x41c] sm:$0xf] %vm4625_vm3, %v6009_v60 }
 0x2d5   : > { %v2802_v63 = vpop.f32.mrf.mxu0  ;;  %v3378_v0 = vpop.f32.mrf.mxu1 }
 0x2d6   : > { %v5866_v1 = vpack.c.bf16 %v2802_v63, %v2802_v63  ;;  %v6010_v2 = vpack.c.bf16 %v3378_v0, %v3378_v0 }
 0x2d7   : > { %v2804_v3 = vpop.f32.mrf.mxu0  ;;  %v3380_v4 = vpop.f32.mrf.mxu1 }
 0x2d8   : > { %4746 = vst.msk [vmem:[%s6684_s16 + $0x1e0] sm:$0xf] %vm4625_vm3, %v5866_v1  ;;  %4890 = vst.msk [vmem:[%s6684_s16 + $0x420] sm:$0xf] %vm4625_vm3, %v6010_v2 }
 0x2d9   : > { %v2805_v5 = vpop.f32.mrf.mxu0  ;;  %v3381_v6 = vpop.f32.mrf.mxu1 }
 0x2da   : > { %v5867_v7 = vpack.c.bf16 %v2805_v5, %v2805_v5  ;;  %v6011_v8 = vpack.c.bf16 %v3381_v6, %v3381_v6 }
 0x2db   : > { %v2807_v9 = vpop.f32.mrf.mxu0  ;;  %v3383_v10 = vpop.f32.mrf.mxu1 }
 0x2dc   : > { %4747 = vst.msk [vmem:[%s6684_s16 + $0x1e4] sm:$0xf] %vm4625_vm3, %v5867_v7  ;;  %4891 = vst.msk [vmem:[%s6684_s16 + $0x424] sm:$0xf] %vm4625_vm3, %v6011_v8 }
 0x2dd   : > { %v2810_v11 = vpop.f32.mrf.mxu0  ;;  %v3386_v12 = vpop.f32.mrf.mxu1 }
 0x2de   : > { %v5868_v13 = vpack.c.bf16 %v2810_v11, %v2810_v11  ;;  %v6012_v14 = vpack.c.bf16 %v3386_v12, %v3386_v12 }
 0x2df   : > { %v2812_v15 = vpop.f32.mrf.mxu0  ;;  %v3388_v16 = vpop.f32.mrf.mxu1 }
 0x2e0   : > { %4748 = vst.msk [vmem:[%s6684_s16 + $0x1e8] sm:$0xf] %vm4625_vm3, %v5868_v13  ;;  %4892 = vst.msk [vmem:[%s6684_s16 + $0x428] sm:$0xf] %vm4625_vm3, %v6012_v14 }
 0x2e1   : > { %v2813_v17 = vpop.f32.mrf.mxu0  ;;  %v3389_v18 = vpop.f32.mrf.mxu1 }
 0x2e2   : > { %v5869_v19 = vpack.c.bf16 %v2813_v17, %v2813_v17  ;;  %v6013_v20 = vpack.c.bf16 %v3389_v18, %v3389_v18 }
 0x2e3   : > { %v2815_v21 = vpop.f32.mrf.mxu0  ;;  %v3391_v22 = vpop.f32.mrf.mxu1 }
 0x2e4   : > { %4749 = vst.msk [vmem:[%s6684_s16 + $0x1ec] sm:$0xf] %vm4625_vm3, %v5869_v19  ;;  %4893 = vst.msk [vmem:[%s6684_s16 + $0x42c] sm:$0xf] %vm4625_vm3, %v6013_v20 }
 0x2e5   : > { %v2818_v23 = vpop.f32.mrf.mxu0  ;;  %v3394_v24 = vpop.f32.mrf.mxu1 }
 0x2e6   : > { %v5870_v25 = vpack.c.bf16 %v2818_v23, %v2818_v23  ;;  %v6014_v26 = vpack.c.bf16 %v3394_v24, %v3394_v24 }
 0x2e7   : > { %v2820_v27 = vpop.f32.mrf.mxu0  ;;  %v3396_v28 = vpop.f32.mrf.mxu1 }
 0x2e8   : > { %4750 = vst.msk [vmem:[%s6684_s16 + $0x1f0] sm:$0xf] %vm4625_vm3, %v5870_v25  ;;  %4894 = vst.msk [vmem:[%s6684_s16 + $0x430] sm:$0xf] %vm4625_vm3, %v6014_v26 }
 0x2e9   : > { %v2821_v29 = vpop.f32.mrf.mxu0  ;;  %v3397_v30 = vpop.f32.mrf.mxu1 }
 0x2ea   : > { %v5871_v31 = vpack.c.bf16 %v2821_v29, %v2821_v29  ;;  %v6015_v32 = vpack.c.bf16 %v3397_v30, %v3397_v30 }
 0x2eb   : > { %v2823_v33 = vpop.f32.mrf.mxu0  ;;  %v3399_v34 = vpop.f32.mrf.mxu1 }
 0x2ec   : > { %4751 = vst.msk [vmem:[%s6684_s16 + $0x1f4] sm:$0xf] %vm4625_vm3, %v5871_v31  ;;  %4895 = vst.msk [vmem:[%s6684_s16 + $0x434] sm:$0xf] %vm4625_vm3, %v6015_v32 }
 0x2ed   : > { %v2826_v35 = vpop.f32.mrf.mxu0  ;;  %v3402_v36 = vpop.f32.mrf.mxu1 }
 0x2ee   : > { %v5872_v37 = vpack.c.bf16 %v2826_v35, %v2826_v35  ;;  %v6016_v38 = vpack.c.bf16 %v3402_v36, %v3402_v36 }
 0x2ef   : > { %v2828_v39 = vpop.f32.mrf.mxu0  ;;  %v3404_v40 = vpop.f32.mrf.mxu1 }
 0x2f0   : > { %4752 = vst.msk [vmem:[%s6684_s16 + $0x1f8] sm:$0xf] %vm4625_vm3, %v5872_v37  ;;  %4896 = vst.msk [vmem:[%s6684_s16 + $0x438] sm:$0xf] %vm4625_vm3, %v6016_v38 }
 0x2f1   : > { %v2829_v41 = vpop.f32.mrf.mxu0  ;;  %v3405_v42 = vpop.f32.mrf.mxu1 }
 0x2f2   : > { %v5873_v43 = vpack.c.bf16 %v2829_v41, %v2829_v41  ;;  %v6017_v44 = vpack.c.bf16 %v3405_v42, %v3405_v42 }
 0x2f3   : > { %v2831_v45 = vpop.f32.mrf.mxu0  ;;  %v3407_v46 = vpop.f32.mrf.mxu1 }
 0x2f4   : > { %4753 = vst.msk [vmem:[%s6684_s16 + $0x1fc] sm:$0xf] %vm4625_vm3, %v5873_v43  ;;  %4897 = vst.msk [vmem:[%s6684_s16 + $0x43c] sm:$0xf] %vm4625_vm3, %v6017_v44 }
 0x2f5   : > { %v2834_v47 = vpop.f32.mrf.mxu0  ;;  %v3410_v48 = vpop.f32.mrf.mxu1 }
 0x2f6   : > { %v5874_v49 = vpack.c.bf16 %v2834_v47, %v2834_v47  ;;  %v6018_v50 = vpack.c.bf16 %v3410_v48, %v3410_v48 }
 0x2f7   : > { %v2836_v51 = vpop.f32.mrf.mxu0  ;;  %v3412_v52 = vpop.f32.mrf.mxu1 }
 0x2f8   : > { %4754 = vst.msk [vmem:[%s6684_s16 + $0x200] sm:$0xf] %vm4625_vm3, %v5874_v49  ;;  %4898 = vst.msk [vmem:[%s6684_s16 + $0x440] sm:$0xf] %vm4625_vm3, %v6018_v50 }
 0x2f9   : > { %v2837_v53 = vpop.f32.mrf.mxu0  ;;  %v3413_v54 = vpop.f32.mrf.mxu1 }
 0x2fa   : > { %v5875_v55 = vpack.c.bf16 %v2837_v53, %v2837_v53  ;;  %v6019_v56 = vpack.c.bf16 %v3413_v54, %v3413_v54 }
 0x2fb   : > { %v2839_v57 = vpop.f32.mrf.mxu0  ;;  %v3415_v58 = vpop.f32.mrf.mxu1 }
 0x2fc   : > { %4755 = vst.msk [vmem:[%s6684_s16 + $0x204] sm:$0xf] %vm4625_vm3, %v5875_v55  ;;  %4899 = vst.msk [vmem:[%s6684_s16 + $0x444] sm:$0xf] %vm4625_vm3, %v6019_v56 }
 0x2fd   : > { %v2842_v59 = vpop.f32.mrf.mxu0  ;;  %v3418_v60 = vpop.f32.mrf.mxu1 }
 0x2fe   : > { %v5876_v61 = vpack.c.bf16 %v2842_v59, %v2842_v59  ;;  %v6020_v62 = vpack.c.bf16 %v3418_v60, %v3418_v60 }
 0x2ff   : > { %v2844_v63 = vpop.f32.mrf.mxu0  ;;  %v3420_v0 = vpop.f32.mrf.mxu1 }
 0x300   : > { %4756 = vst.msk [vmem:[%s6684_s16 + $0x208] sm:$0xf] %vm4625_vm3, %v5876_v61  ;;  %4900 = vst.msk [vmem:[%s6684_s16 + $0x448] sm:$0xf] %vm4625_vm3, %v6020_v62 }
 0x301   : > { %v2845_v1 = vpop.f32.mrf.mxu0  ;;  %v3421_v2 = vpop.f32.mrf.mxu1 }
 0x302   : > { %v5877_v3 = vpack.c.bf16 %v2845_v1, %v2845_v1  ;;  %v6021_v4 = vpack.c.bf16 %v3421_v2, %v3421_v2 }
 0x303   : > { %v2847_v5 = vpop.f32.mrf.mxu0  ;;  %v3423_v6 = vpop.f32.mrf.mxu1 }
 0x304   : > { %4757 = vst.msk [vmem:[%s6684_s16 + $0x20c] sm:$0xf] %vm4625_vm3, %v5877_v3  ;;  %4901 = vst.msk [vmem:[%s6684_s16 + $0x44c] sm:$0xf] %vm4625_vm3, %v6021_v4 }
 0x305   : > { %v2850_v7 = vpop.f32.mrf.mxu0  ;;  %v3426_v8 = vpop.f32.mrf.mxu1 }
 0x306   : > { %v5878_v9 = vpack.c.bf16 %v2850_v7, %v2850_v7  ;;  %v6022_v10 = vpack.c.bf16 %v3426_v8, %v3426_v8 }
 0x307   : > { %v2852_v11 = vpop.f32.mrf.mxu0  ;;  %v3428_v12 = vpop.f32.mrf.mxu1 }
 0x308   : > { %4758 = vst.msk [vmem:[%s6684_s16 + $0x210] sm:$0xf] %vm4625_vm3, %v5878_v9  ;;  %4902 = vst.msk [vmem:[%s6684_s16 + $0x450] sm:$0xf] %vm4625_vm3, %v6022_v10 }
 0x309   : > { %v2853_v13 = vpop.f32.mrf.mxu0  ;;  %v3429_v14 = vpop.f32.mrf.mxu1 }
 0x30a   : > { %v5879_v15 = vpack.c.bf16 %v2853_v13, %v2853_v13  ;;  %v6023_v16 = vpack.c.bf16 %v3429_v14, %v3429_v14 }
 0x30b   : > { %v2855_v17 = vpop.f32.mrf.mxu0  ;;  %v3431_v18 = vpop.f32.mrf.mxu1 }
 0x30c   : > { %4759 = vst.msk [vmem:[%s6684_s16 + $0x214] sm:$0xf] %vm4625_vm3, %v5879_v15  ;;  %4903 = vst.msk [vmem:[%s6684_s16 + $0x454] sm:$0xf] %vm4625_vm3, %v6023_v16 }
 0x30d   : > { %v2858_v19 = vpop.f32.mrf.mxu0  ;;  %v3434_v20 = vpop.f32.mrf.mxu1 }
 0x30e   : > { %v5880_v21 = vpack.c.bf16 %v2858_v19, %v2858_v19  ;;  %v6024_v22 = vpack.c.bf16 %v3434_v20, %v3434_v20 }
 0x30f   : > { %v2860_v23 = vpop.f32.mrf.mxu0  ;;  %v3436_v24 = vpop.f32.mrf.mxu1 }
 0x310   : > { %4760 = vst.msk [vmem:[%s6684_s16 + $0x218] sm:$0xf] %vm4625_vm3, %v5880_v21  ;;  %4904 = vst.msk [vmem:[%s6684_s16 + $0x458] sm:$0xf] %vm4625_vm3, %v6024_v22 }
 0x311   : > { %v2861_v25 = vpop.f32.mrf.mxu0  ;;  %v3437_v26 = vpop.f32.mrf.mxu1 }
 0x312   : > { %v5881_v27 = vpack.c.bf16 %v2861_v25, %v2861_v25  ;;  %v6025_v28 = vpack.c.bf16 %v3437_v26, %v3437_v26 }
 0x313   : > { %v2863_v29 = vpop.f32.mrf.mxu0  ;;  %v3439_v30 = vpop.f32.mrf.mxu1 }
 0x314   : > { %4761 = vst.msk [vmem:[%s6684_s16 + $0x21c] sm:$0xf] %vm4625_vm3, %v5881_v27  ;;  %4905 = vst.msk [vmem:[%s6684_s16 + $0x45c] sm:$0xf] %vm4625_vm3, %v6025_v28 }
 0x315   : > { %v2866_v31 = vpop.f32.mrf.mxu0  ;;  %v3442_v32 = vpop.f32.mrf.mxu1 }
 0x316   : > { %v5882_v33 = vpack.c.bf16 %v2866_v31, %v2866_v31  ;;  %v6026_v34 = vpack.c.bf16 %v3442_v32, %v3442_v32 }
 0x317   : > { %v2868_v35 = vpop.f32.mrf.mxu0  ;;  %v3444_v36 = vpop.f32.mrf.mxu1 }
 0x318   : > { %4762 = vst.msk [vmem:[%s6684_s16 + $0x220] sm:$0xf] %vm4625_vm3, %v5882_v33  ;;  %4906 = vst.msk [vmem:[%s6684_s16 + $0x460] sm:$0xf] %vm4625_vm3, %v6026_v34 }
 0x319   : > { %v2869_v37 = vpop.f32.mrf.mxu0  ;;  %v3445_v38 = vpop.f32.mrf.mxu1 }
 0x31a   : > { %v5883_v39 = vpack.c.bf16 %v2869_v37, %v2869_v37  ;;  %v6027_v40 = vpack.c.bf16 %v3445_v38, %v3445_v38 }
 0x31b   : > { %v2871_v41 = vpop.f32.mrf.mxu0  ;;  %v3447_v42 = vpop.f32.mrf.mxu1 }
 0x31c   : > { %4763 = vst.msk [vmem:[%s6684_s16 + $0x224] sm:$0xf] %vm4625_vm3, %v5883_v39  ;;  %4907 = vst.msk [vmem:[%s6684_s16 + $0x464] sm:$0xf] %vm4625_vm3, %v6027_v40 }
 0x31d   : > { %v2874_v43 = vpop.f32.mrf.mxu0  ;;  %v3450_v44 = vpop.f32.mrf.mxu1 }
 0x31e   : > { %v5884_v45 = vpack.c.bf16 %v2874_v43, %v2874_v43  ;;  %v6028_v46 = vpack.c.bf16 %v3450_v44, %v3450_v44 }
 0x31f   : > { %v2876_v47 = vpop.f32.mrf.mxu0  ;;  %v3452_v48 = vpop.f32.mrf.mxu1 }
 0x320   : > { %4764 = vst.msk [vmem:[%s6684_s16 + $0x228] sm:$0xf] %vm4625_vm3, %v5884_v45  ;;  %4908 = vst.msk [vmem:[%s6684_s16 + $0x468] sm:$0xf] %vm4625_vm3, %v6028_v46 }
 0x321   : > { %v2877_v49 = vpop.f32.mrf.mxu0  ;;  %v3453_v50 = vpop.f32.mrf.mxu1 }
 0x322   : > { %v5885_v51 = vpack.c.bf16 %v2877_v49, %v2877_v49  ;;  %v6029_v52 = vpack.c.bf16 %v3453_v50, %v3453_v50 }
 0x323   : > { %v2879_v53 = vpop.f32.mrf.mxu0  ;;  %v3455_v54 = vpop.f32.mrf.mxu1 }
 0x324   : > { %4765 = vst.msk [vmem:[%s6684_s16 + $0x22c] sm:$0xf] %vm4625_vm3, %v5885_v51  ;;  %4909 = vst.msk [vmem:[%s6684_s16 + $0x46c] sm:$0xf] %vm4625_vm3, %v6029_v52 }
 0x325   : > { %v2882_v55 = vpop.f32.mrf.mxu0  ;;  %v3458_v56 = vpop.f32.mrf.mxu1 }
 0x326   : > { %v5886_v57 = vpack.c.bf16 %v2882_v55, %v2882_v55  ;;  %v6030_v58 = vpack.c.bf16 %v3458_v56, %v3458_v56 }
 0x327   : > { %v2884_v59 = vpop.f32.mrf.mxu0  ;;  %v3460_v60 = vpop.f32.mrf.mxu1 }
 0x328   : > { %4766 = vst.msk [vmem:[%s6684_s16 + $0x230] sm:$0xf] %vm4625_vm3, %v5886_v57  ;;  %4910 = vst.msk [vmem:[%s6684_s16 + $0x470] sm:$0xf] %vm4625_vm3, %v6030_v58 }
 0x329   : > { %v2885_v61 = vpop.f32.mrf.mxu0  ;;  %v3461_v62 = vpop.f32.mrf.mxu1 }
 0x32a   : > { %v5887_v63 = vpack.c.bf16 %v2885_v61, %v2885_v61  ;;  %v6031_v0 = vpack.c.bf16 %v3461_v62, %v3461_v62 }
 0x32b   : > { %v2887_v1 = vpop.f32.mrf.mxu0  ;;  %v3463_v2 = vpop.f32.mrf.mxu1 }
 0x32c   : > { %4767 = vst.msk [vmem:[%s6684_s16 + $0x234] sm:$0xf] %vm4625_vm3, %v5887_v63  ;;  %4911 = vst.msk [vmem:[%s6684_s16 + $0x474] sm:$0xf] %vm4625_vm3, %v6031_v0 }
 0x32d   : > { %v2890_v3 = vpop.f32.mrf.mxu0  ;;  %v3466_v4 = vpop.f32.mrf.mxu1 }
 0x32e   : > { %v5888_v5 = vpack.c.bf16 %v2890_v3, %v2890_v3  ;;  %v6032_v6 = vpack.c.bf16 %v3466_v4, %v3466_v4 }
 0x32f   : > { %v2892_v7 = vpop.f32.mrf.mxu0  ;;  %v3468_v8 = vpop.f32.mrf.mxu1 }
 0x330   : > { %4768 = vst.msk [vmem:[%s6684_s16 + $0x238] sm:$0xf] %vm4625_vm3, %v5888_v5  ;;  %4912 = vst.msk [vmem:[%s6684_s16 + $0x478] sm:$0xf] %vm4625_vm3, %v6032_v6 }
 0x331   : > { %v2893_v9 = vpop.f32.mrf.mxu0  ;;  %v3469_v10 = vpop.f32.mrf.mxu1 }
 0x332   : > { %v5889_v11 = vpack.c.bf16 %v2893_v9, %v2893_v9  ;;  %v6033_v12 = vpack.c.bf16 %v3469_v10, %v3469_v10 }
 0x333   : > { %v2895_v13 = vpop.f32.mrf.mxu0  ;;  %v3471_v14 = vpop.f32.mrf.mxu1 }
 0x334   : > { %4769 = vst.msk [vmem:[%s6684_s16 + $0x23c] sm:$0xf] %vm4625_vm3, %v5889_v11  ;;  %4913 = vst.msk [vmem:[%s6684_s16 + $0x47c] sm:$0xf] %vm4625_vm3, %v6033_v12 }
 0x335 PF: > { %s12_s11 = sadd.s32 1, %s6448_s11   ;;  %s7648_s9 = smov %s6444_s10 }
 0x336   : > { %p9_p5 = scmp.ge.s32.totalorder %s12_s11, 6   ;;  %s7649_s10 = smov %s7651_s12 }
 0x338   :  { %11 = sbr.rel (!%p9_p5) target bundleno = 2 (0x2), region = 61 }

// kernel: tile.23
= control target key start
LH: loop header
LB: loop body
LE: loop exit
PB: predicated region body
PF: predicated region fallthrough
CT: control target
= control target key end

     0   :  { %s52_s0 = inlined_call_operand.vmem [shape: f32[64], index: 0, kind: input, shape index: {}]   ;;  %s53_s1 = inlined_call_operand.vmem [shape: f32[48,64], index: 1, kind: output, shape index: {}]  }
   0x1   :  { %v4_v0 = vld [vmem:[%s52_s0] ss:$0 sm:$0xff] }
   0x2   :  { %5 = vst [vmem:[%s53_s1] sm:$0xff] %v4_v0  ;;  %16 = vst [vmem:[%s53_s1 + $0x8] sm:$0xff] %v4_v0 }
   0x3   :  { %17 = vst [vmem:[%s53_s1 + $0x10] sm:$0xff] %v4_v0  ;;  %18 = vst [vmem:[%s53_s1 + $0x18] sm:$0xff] %v4_v0 }
   0x4   :  { %19 = vst [vmem:[%s53_s1 + $0x20] sm:$0xff] %v4_v0  ;;  %20 = vst [vmem:[%s53_s1 + $0x28] sm:$0xff] %v4_v0 }

// kernel: tile.28
= control target key start
LH: loop header
LB: loop body
LE: loop exit
PB: predicated region body
PF: predicated region fallthrough
CT: control target
= control target key end

     0   :  { %s264_s10 = smov 64   ;;  %vm3_vm0 = vcmask 523264   ;;  %vm24_vm1 = vcmask 1048064   ;;  %s365_s0 = inlined_call_operand.vmem [shape: f32[48,64], index: 0, kind: input, shape index: {}]   ;;  %s366_s1 = inlined_call_operand.vmem [shape: f32[1,3072], index: 1, kind: output, shape index: {}]  }
   0x1   :  { %v237_v0 = vld [vmem:[%s365_s0 + $0x1] ss:$2 sm:$0xff]   ;;  %v2_v2 = vld [vmem:[%s365_s0] ss:$2 sm:$0xff]   ;;  %v238_v3 = vld [vmem:[%s365_s0 + $0x11] ss:$2 sm:$0xff]  }
   0x2   :  { %v239_v1 = vld [vmem:[%s365_s0 + $0x21] ss:$2 sm:$0xff]   ;;  %22 = vrot.lane.b32.xlu0 %v237_v0, %s264_s10  ;;  %4 = vst.msk [vmem:[#allocation0] ss:$8 sm:$0xf] %vm3_vm0, %v2_v2  }
   0x3   :  { %38 = vrot.lane.b32.xlu1 %v239_v1, %s264_s10  ;;  %5 = vst.msk [vmem:[#allocation0] ss:$8 sm:$0xf0] %vm3_vm0, %v2_v2   ;;  %v236_v4 = vld [vmem:[%s365_s0 + $0x20] ss:$2 sm:$0xff]  }
   0x4   :  { %v235_v5 = vld [vmem:[%s365_s0 + $0x10] ss:$2 sm:$0xff]   ;;  %17 = vst.msk [vmem:[#allocation0 + $0x80] ss:$8 sm:$0xf] %vm3_vm0, %v236_v4  }
   0x5   :  { %19 = vst.msk [vmem:[#allocation0 + $0x80] ss:$8 sm:$0xf0] %vm3_vm0, %v236_v4   ;;  %10 = vst.msk [vmem:[#allocation0 + $0x40] ss:$8 sm:$0xf] %vm3_vm0, %v235_v5  }
   0x6   :  { %12 = vst.msk [vmem:[#allocation0 + $0x40] ss:$8 sm:$0xf0] %vm3_vm0, %v235_v5   ;;  %29 = vrot.lane.b32.xlu0 %v238_v3, %s264_s10 }
  0x74   :  { %v23_v6 = vpop.permute.xlu0 %22  }
  0x75   :  { %v39_v7 = vpop.permute.xlu1 %38   ;;  %25 = vst.msk [vmem:[#allocation0] ss:$8 sm:$0xf] %vm24_vm1, %v23_v6   ;;  %26 = vst.msk [vmem:[#allocation0] ss:$8 sm:$0xf0] %vm24_vm1, %v23_v6  }
  0x76   :  { %42 = vst.msk [vmem:[#allocation0 + $0x80] ss:$8 sm:$0xf] %vm24_vm1, %v39_v7   ;;  %44 = vst.msk [vmem:[#allocation0 + $0x80] ss:$8 sm:$0xf0] %vm24_vm1, %v39_v7  }
  0x78   :  { %v30_v8 = vpop.permute.xlu0 %29  }
  0x79   :  { %33 = vst.msk [vmem:[#allocation0 + $0x40] ss:$8 sm:$0xf] %vm24_vm1, %v30_v8   ;;  %35 = vst.msk [vmem:[#allocation0 + $0x40] ss:$8 sm:$0xf0] %vm24_vm1, %v30_v8  }
  0x7c   :  { %v49_v9 = vld [vmem:[#allocation0] sm:$0x1]  ;;  %v54_v10 = vld [vmem:[#allocation0 + $0x8] sm:$0x1]  ;;  %v60_v11 = vld [vmem:[#allocation0 + $0x10] sm:$0x1] }
  0x7d   :  { %52 = vst [vmem:[%s366_s1] sm:$0x1] %v49_v9  ;;  %240 = vst [vmem:[%s366_s1 + $0x1] sm:$0x1] %v54_v10  ;;  %v67_v12 = vld [vmem:[#allocation0 + $0x18] sm:$0x1] }
  0x7e   :  { %241 = vst [vmem:[%s366_s1 + $0x2] sm:$0x1] %v60_v11  ;;  %v74_v13 = vld [vmem:[#allocation0 + $0x20] sm:$0x1]  ;;  %v81_v14 = vld [vmem:[#allocation0 + $0x28] sm:$0x1] }
  0x7f   :  { %242 = vst [vmem:[%s366_s1 + $0x3] sm:$0x1] %v67_v12  ;;  %243 = vst [vmem:[%s366_s1 + $0x4] sm:$0x1] %v74_v13  ;;  %v88_v15 = vld [vmem:[#allocation0 + $0x30] sm:$0x1] }
  0x80   :  { %244 = vst [vmem:[%s366_s1 + $0x5] sm:$0x1] %v81_v14  ;;  %v95_v16 = vld [vmem:[#allocation0 + $0x38] sm:$0x1]  ;;  %v158_v17 = vld [vmem:[#allocation0 + $0x80] sm:$0x1] }
  0x81   :  { %245 = vst [vmem:[%s366_s1 + $0x6] sm:$0x1] %v88_v15  ;;  %246 = vst [vmem:[%s366_s1 + $0x7] sm:$0x1] %v95_v16  ;;  %v165_v18 = vld [vmem:[#allocation0 + $0x88] sm:$0x1] }
  0x82   :  { %255 = vst [vmem:[%s366_s1 + $0x10] sm:$0x1] %v158_v17  ;;  %v172_v19 = vld [vmem:[#allocation0 + $0x90] sm:$0x1]  ;;  %v179_v20 = vld [vmem:[#allocation0 + $0x98] sm:$0x1] }
  0x83   :  { %256 = vst [vmem:[%s366_s1 + $0x11] sm:$0x1] %v165_v18  ;;  %257 = vst [vmem:[%s366_s1 + $0x12] sm:$0x1] %v172_v19  ;;  %v186_v21 = vld [vmem:[#allocation0 + $0xa0] sm:$0x1] }
  0x84   :  { %258 = vst [vmem:[%s366_s1 + $0x13] sm:$0x1] %v179_v20  ;;  %v193_v22 = vld [vmem:[#allocation0 + $0xa8] sm:$0x1]  ;;  %v200_v23 = vld [vmem:[#allocation0 + $0xb0] sm:$0x1] }
  0x85   :  { %259 = vst [vmem:[%s366_s1 + $0x14] sm:$0x1] %v186_v21  ;;  %260 = vst [vmem:[%s366_s1 + $0x15] sm:$0x1] %v193_v22  ;;  %v207_v24 = vld [vmem:[#allocation0 + $0xb8] sm:$0x1] }
  0x86   :  { %261 = vst [vmem:[%s366_s1 + $0x16] sm:$0x1] %v200_v23  ;;  %v102_v25 = vld [vmem:[#allocation0 + $0x40] sm:$0x1]  ;;  %v109_v26 = vld [vmem:[#allocation0 + $0x48] sm:$0x1] }
  0x87   :  { %262 = vst [vmem:[%s366_s1 + $0x17] sm:$0x1] %v207_v24  ;;  %247 = vst [vmem:[%s366_s1 + $0x8] sm:$0x1] %v102_v25  ;;  %v116_v27 = vld [vmem:[#allocation0 + $0x50] sm:$0x1] }
  0x88   :  { %248 = vst [vmem:[%s366_s1 + $0x9] sm:$0x1] %v109_v26  ;;  %v123_v28 = vld [vmem:[#allocation0 + $0x58] sm:$0x1]  ;;  %v130_v29 = vld [vmem:[#allocation0 + $0x60] sm:$0x1] }
  0x89   :  { %249 = vst [vmem:[%s366_s1 + $0xa] sm:$0x1] %v116_v27  ;;  %250 = vst [vmem:[%s366_s1 + $0xb] sm:$0x1] %v123_v28  ;;  %v137_v30 = vld [vmem:[#allocation0 + $0x68] sm:$0x1] }
  0x8a   :  { %251 = vst [vmem:[%s366_s1 + $0xc] sm:$0x1] %v130_v29  ;;  %v144_v31 = vld [vmem:[#allocation0 + $0x70] sm:$0x1]  ;;  %v151_v32 = vld [vmem:[#allocation0 + $0x78] sm:$0x1] }
  0x8b   :  { %252 = vst [vmem:[%s366_s1 + $0xd] sm:$0x1] %v137_v30  ;;  %253 = vst [vmem:[%s366_s1 + $0xe] sm:$0x1] %v144_v31 }
  0x8c   :  { %254 = vst [vmem:[%s366_s1 + $0xf] sm:$0x1] %v151_v32 }

// kernel: forward.6
= control target key start
LH: loop header
LB: loop body
LE: loop exit
PB: predicated region body
PF: predicated region fallthrough
CT: control target
= control target key end

     0   :  { %s3127_s12 = smov 0   ;;  %s4207_s0 = inlined_call_operand.vmem [shape: bf16[192,3072], index: 0, kind: input, shape index: {}]   ;;  %s4208_s1 = inlined_call_operand.vmem [shape: f32[1,3072], index: 1, kind: input, shape index: {}]   ;;  %s4209_s2 = inlined_call_operand.vmem [shape: f32[1,3072], index: 2, kind: input, shape index: {}]   ;;  %s4210_s3 = inlined_call_operand.vmem [shape: bf16[192,3072], index: 3, kind: output, shape index: {}]  }
   0x1 LB: > { %s2793_s13 = sadd.s32 4294967295, %s3105_s12   ;;  %p2797_p0 = scmp.ge.s32.totalorder %s3105_s12, 1  ;;  %s3105_s12 = sphi %s3127_s12, %s13_s12  }
   0x2   : > { %p139_p1 = scmp.lt.s32.totalorder %s3105_s12, 3 }
   0x4   : > { %p140_p2 = pnand %p2797_p0, %p139_p1 }
   0x6   : > { %143 = sbr.rel (%p140_p2) target bundleno = 360 (0x168), region = 32 }
   0xb   : > { %s165_s14 = smul.u32 12, %s2793_s13  ;;  %v617_v0 = vlaneseq  ;;  %v611_v2 = vld [vmem:[%s4208_s1] sm:$0xff]  ;;  %v612_v61 = vld [vmem:[%s4208_s1 + $0x8] sm:$0xff] }
   0xc   : > { %v1025_v3 = vld [vmem:[%s4209_s2] sm:$0xff] }
   0xd   : > { %p166_p3 = scmp.lt.s32.totalorder %s165_s14, 23  ;;  %v618_v1 = vshrl.u32 %v617_v0, 7 }
   0xf   : > { %s4343_s14 = smov (!%p166_p3, %s165_s14), 23  ;;  %v3143_v4 = vsub.s32 0, %v618_v1  ;;  %v3145_v5 = vsub.s32 1, %v618_v1  ;;  %v3147_v6 = vsub.s32 2, %v618_v1  ;;  %v3149_v7 = vsub.s32 3, %v618_v1 }
  0x10   : > { %v3151_v8 = vsub.s32 4, %v618_v1  ;;  %v3153_v9 = vsub.s32 5, %v618_v1  ;;  %v3155_v10 = vsub.s32 6, %v618_v1  ;;  %v3157_v11 = vsub.s32 7, %v618_v1  ;;  %s3090_s19 = smul.u32 96, %s4343_s14 }
  0x11   : > { %v3161_v12 = vrot.slane %v611_v2, %v3143_v4  ;;  %v3164_v13 = vrot.slane %v611_v2, %v3145_v5  ;;  %v3167_v14 = vrot.slane %v1025_v3, %v3143_v4  ;;  %v3170_v15 = vrot.slane %v1025_v3, %v3145_v5 }
  0x12   : > { %v3173_v16 = vrot.slane %v611_v2, %v3147_v6  ;;  %v3176_v17 = vrot.slane %v611_v2, %v3149_v7  ;;  %v3179_v18 = vrot.slane %v1025_v3, %v3147_v6  ;;  %v3182_v19 = vrot.slane %v1025_v3, %v3149_v7  ;;  %s3189_s22 = scalar_lea.vmem %s4207_s0, %s3090_s19  ;;  %s3244_s27 = scalar_lea.vmem %s4210_s3, %s3090_s19 }
  0x13   : > { %v3192_v20 = vrot.slane %v611_v2, %v3151_v8  ;;  %v3195_v21 = vrot.slane %v611_v2, %v3153_v9  ;;  %v3198_v22 = vrot.slane %v1025_v3, %v3151_v8  ;;  %v3201_v23 = vrot.slane %v1025_v3, %v3153_v9  ;;  %v179_v24 = vld [vmem:[%s3189_s22] sm:$0xff]  ;;  %v180_v25 = vld [vmem:[%s3189_s22 + $0x8] sm:$0xff]  ;;  %v181_v26 = vld [vmem:[%s3189_s22 + $0x10] sm:$0xff] }
  0x14   : > { %4242 = vst [vmem:[#allocation2_spill] sm:$0xff] %v3173_v16  ;;  %4243 = vst [vmem:[#allocation3_spill] sm:$0xff] %v3179_v18  ;;  %v3207_v27 = vrot.slane %v611_v2, %v3155_v10  ;;  %v3210_v28 = vrot.slane %v611_v2, %v3157_v11  ;;  %v3213_v29 = vrot.slane %v1025_v3, %v3155_v10  ;;  %v323_v31 = vunpack.c.l.bf16 %v179_v24  ;;  %v182_v35 = vld [vmem:[%s3189_s22 + $0x18] sm:$0xff]  ;;  %v183_v56 = vld [vmem:[%s3189_s22 + $0x20] sm:$0xff] }
  0x15   : > { %4244 = vst [vmem:[#allocation4_spill] sm:$0xff] %v3182_v19  ;;  %v3216_v30 = vrot.slane %v1025_v3, %v3157_v11  ;;  %v324_v32 = vunpack.c.h.bf16 %v179_v24  ;;  %v325_v33 = vunpack.c.l.bf16 %v180_v25  ;;  %v326_v34 = vunpack.c.h.bf16 %v180_v25  ;;  %v1026_v2 = vld [vmem:[%s4209_s2 + $0x8] sm:$0xff] }
  0x16   : > { %v327_v36 = vunpack.c.l.bf16 %v181_v26  ;;  %v328_v37 = vunpack.c.h.bf16 %v181_v26  ;;  %v329_v38 = vunpack.c.l.bf16 %v182_v35  ;;  %v330_v39 = vunpack.c.h.bf16 %v182_v35  ;;  %v184_v3 = vld [vmem:[%s3189_s22 + $0x28] sm:$0xff] }
  0x17   : > { %v737_v40 = vmul.f32 %v3161_v12, %v323_v31  ;;  %v738_v41 = vmul.f32 %v3164_v13, %v324_v32  ;;  %v739_v42 = vmul.f32 %v3173_v16, %v325_v33  ;;  %v740_v43 = vmul.f32 %v3176_v17, %v326_v34 }
  0x18   : > { %v741_v44 = vmul.f32 %v3192_v20, %v327_v36  ;;  %v742_v45 = vmul.f32 %v3195_v21, %v328_v37  ;;  %v743_v46 = vmul.f32 %v3207_v27, %v329_v38  ;;  %v744_v47 = vmul.f32 %v3210_v28, %v330_v39  ;;  %v185_v36 = vld [vmem:[%s3189_s22 + $0x30] sm:$0xff] }
  0x19   : > { %v1151_v48 = vadd.f32 %v3167_v14, %v737_v40  ;;  %v1152_v49 = vadd.f32 %v3170_v15, %v738_v41  ;;  %v1153_v50 = vadd.f32 %v3179_v18, %v739_v42  ;;  %v1154_v51 = vadd.f32 %v3182_v19, %v740_v43 }
  0x1a   : > { %v1155_v52 = vadd.f32 %v3198_v22, %v741_v44  ;;  %v1156_v53 = vadd.f32 %v3201_v23, %v742_v45  ;;  %v1157_v54 = vadd.f32 %v3213_v29, %v743_v46  ;;  %v1158_v55 = vadd.f32 %v3216_v30, %v744_v47 }
  0x1b   : > { %v1439_v57 = vmax.f32 %v1151_v48, 0.0  ;;  %v1440_v58 = vmax.f32 %v1152_v49, 0.0  ;;  %v1441_v59 = vmax.f32 %v1153_v50, 0.0  ;;  %v1442_v60 = vmax.f32 %v1154_v51, 0.0 }
  0x1c   : > { %v1443_v62 = vmax.f32 %v1155_v52, 0.0  ;;  %v1444_v63 = vmax.f32 %v1156_v53, 0.0  ;;  %v1445_v0 = vmax.f32 %v1157_v54, 0.0  ;;  %v1446_v1 = vmax.f32 %v1158_v55, 0.0  ;;  %v186_v53 = vld [vmem:[%s3189_s22 + $0x38] sm:$0xff] }
  0x1d   : > { %v2946_v24 = vpack.c.bf16 %v1440_v58, %v1439_v57  ;;  %v2947_v25 = vpack.c.bf16 %v1442_v60, %v1441_v59  ;;  %v331_v26 = vunpack.c.l.bf16 %v183_v56  ;;  %v332_v31 = vunpack.c.h.bf16 %v183_v56 }
  0x1e   : > { %v2948_v32 = vpack.c.bf16 %v1444_v63, %v1443_v62  ;;  %v2949_v33 = vpack.c.bf16 %v1446_v1, %v1445_v0  ;;  %v3251_v34 = vrot.slane %v612_v61, %v3143_v4  ;;  %v3254_v35 = vrot.slane %v612_v61, %v3145_v5 }
  0x1f   : > { %2591 = vst [vmem:[%s3244_s27] sm:$0xff] %v2946_v24  ;;  %2592 = vst [vmem:[%s3244_s27 + $0x8] sm:$0xff] %v2947_v25  ;;  %v3260_v37 = vrot.slane %v1026_v2, %v3143_v4  ;;  %v3263_v38 = vrot.slane %v1026_v2, %v3145_v5  ;;  %v333_v39 = vunpack.c.l.bf16 %v184_v3  ;;  %v334_v40 = vunpack.c.h.bf16 %v184_v3  ;;  %v187_v24 = vld [vmem:[%s3189_s22 + $0x40] sm:$0xff] }
  0x20   : > { %2593 = vst [vmem:[%s3244_s27 + $0x10] sm:$0xff] %v2948_v32  ;;  %2594 = vst [vmem:[%s3244_s27 + $0x18] sm:$0xff] %v2949_v33  ;;  %v745_v41 = vmul.f32 %v3251_v34, %v331_v26  ;;  %v746_v42 = vmul.f32 %v3254_v35, %v332_v31  ;;  %v3270_v43 = vrot.slane %v612_v61, %v3147_v6  ;;  %v335_v47 = vunpack.c.l.bf16 %v185_v36 }
  0x21   : > { %v3273_v44 = vrot.slane %v612_v61, %v3149_v7  ;;  %v3276_v45 = vrot.slane %v1026_v2, %v3147_v6  ;;  %v3279_v46 = vrot.slane %v1026_v2, %v3149_v7  ;;  %v336_v48 = vunpack.c.h.bf16 %v185_v36 }
  0x22   : > { %v1159_v49 = vadd.f32 %v3260_v37, %v745_v41  ;;  %v1160_v50 = vadd.f32 %v3263_v38, %v746_v42  ;;  %v747_v51 = vmul.f32 %v3270_v43, %v333_v39  ;;  %v3287_v54 = vrot.slane %v612_v61, %v3151_v8  ;;  %v613_v41 = vld [vmem:[%s4208_s1 + $0x10] sm:$0xff] }
  0x23   : > { %v748_v52 = vmul.f32 %v3273_v44, %v334_v40  ;;  %v3290_v55 = vrot.slane %v612_v61, %v3153_v9  ;;  %v3293_v56 = vrot.slane %v1026_v2, %v3151_v8  ;;  %v3296_v57 = vrot.slane %v1026_v2, %v3153_v9  ;;  %v3320_v42 = vld [vmem:[%s4209_s2 + $0x10] sm:$0xff] }
  0x24   : > { %v1447_v58 = vmax.f32 %v1159_v49, 0.0  ;;  %v1448_v59 = vmax.f32 %v1160_v50, 0.0  ;;  %v1161_v60 = vadd.f32 %v3276_v45, %v747_v51  ;;  %v749_v63 = vmul.f32 %v3287_v54, %v335_v47  ;;  %v188_v50 = vld [vmem:[%s3189_s22 + $0x48] sm:$0xff] }
  0x25   : > { %v1162_v62 = vadd.f32 %v3279_v46, %v748_v52  ;;  %v750_v0 = vmul.f32 %v3290_v55, %v336_v48  ;;  %v337_v1 = vunpack.c.l.bf16 %v186_v53  ;;  %v338_v3 = vunpack.c.h.bf16 %v186_v53 }
  0x26   : > { %v2950_v25 = vpack.c.bf16 %v1448_v59, %v1447_v58  ;;  %v1449_v26 = vmax.f32 %v1161_v60, 0.0  ;;  %v3304_v32 = vrot.slane %v612_v61, %v3155_v10  ;;  %v1163_v33 = vadd.f32 %v3293_v56, %v749_v63 }
  0x27   : > { %v1450_v31 = vmax.f32 %v1162_v62, 0.0  ;;  %v1164_v36 = vadd.f32 %v3296_v57, %v750_v0  ;;  %v3309_v39 = vrot.slane %v612_v61, %v3157_v11  ;;  %v3312_v40 = vrot.slane %v1026_v2, %v3155_v10 }
  0x28   : > { %2595 = vst [vmem:[%s3244_s27 + $0x20] sm:$0xff] %v2950_v25  ;;  %v751_v48 = vmul.f32 %v3304_v32, %v337_v1  ;;  %v3325_v49 = vrot.slane %v1026_v2, %v3157_v11  ;;  %v339_v61 = vunpack.c.l.bf16 %v187_v24  ;;  %v1451_v51 = vmax.f32 %v1163_v33, 0.0 }
  0x29   : > { %v2951_v47 = vpack.c.bf16 %v1450_v31, %v1449_v26  ;;  %v1452_v52 = vmax.f32 %v1164_v36, 0.0  ;;  %v752_v53 = vmul.f32 %v3309_v39, %v338_v3  ;;  %v340_v58 = vunpack.c.h.bf16 %v187_v24  ;;  %v189_v24 = vld [vmem:[%s3189_s22 + $0x50] sm:$0xff] }
  0x2a   : > { %4245 = vst [vmem:[#allocation5_spill] sm:$0xff] %v3325_v49  ;;  %v1165_v59 = vadd.f32 %v3312_v40, %v751_v48  ;;  %v3332_v60 = vrot.slane %v613_v41, %v3143_v4  ;;  %v3335_v62 = vrot.slane %v613_v41, %v3145_v5  ;;  %v3339_v2 = vrot.slane %v3320_v42, %v3143_v4 }
  0x2b   : > { %2596 = vst [vmem:[%s3244_s27 + $0x28] sm:$0xff] %v2951_v47  ;;  %v2952_v63 = vpack.c.bf16 %v1452_v52, %v1451_v51  ;;  %v1166_v0 = vadd.f32 %v3325_v49, %v752_v53  ;;  %v3344_v1 = vrot.slane %v3320_v42, %v3145_v5  ;;  %v341_v3 = vunpack.c.l.bf16 %v188_v50 }
  0x2c   : > { %4246 = vst [vmem:[#allocation6_spill] sm:$0xff] %v3332_v60  ;;  %4247 = vst [vmem:[#allocation7_spill] sm:$0xff] %v3335_v62  ;;  %v1453_v25 = vmax.f32 %v1165_v59, 0.0  ;;  %v753_v26 = vmul.f32 %v3332_v60, %v339_v61  ;;  %v754_v31 = vmul.f32 %v3335_v62, %v340_v58  ;;  %v342_v33 = vunpack.c.h.bf16 %v188_v50 }
  0x2d   : > { %4248 = vst [vmem:[#allocation8_spill] sm:$0xff] %v3344_v1  ;;  %2597 = vst [vmem:[%s3244_s27 + $0x30] sm:$0xff] %v2952_v63  ;;  %v1454_v36 = vmax.f32 %v1166_v0, 0.0  ;;  %v3351_v4 = vrot.slane %v613_v41, %v3147_v6  ;;  %v3354_v47 = vrot.slane %v613_v41, %v3149_v7  ;;  %v3358_v5 = vrot.slane %v3320_v42, %v3147_v6  ;;  %v190_v63 = vld [vmem:[%s3189_s22 + $0x58] sm:$0xff] }
  0x2e   : > { %v1167_v48 = vadd.f32 %v3339_v2, %v753_v26  ;;  %v1168_v61 = vadd.f32 %v3344_v1, %v754_v31  ;;  %v3364_v50 = vrot.slane %v3320_v42, %v3149_v7  ;;  %v343_v51 = vunpack.c.l.bf16 %v189_v24 }
  0x2f   : > { %4249 = vst [vmem:[#allocation9_spill] sm:$0xff] %v3351_v4  ;;  %4250 = vst [vmem:[#allocation10_spill] sm:$0xff] %v3354_v47  ;;  %v2953_v52 = vpack.c.bf16 %v1454_v36, %v1453_v25  ;;  %v755_v53 = vmul.f32 %v3351_v4, %v341_v3  ;;  %v756_v58 = vmul.f32 %v3354_v47, %v342_v33  ;;  %v344_v59 = vunpack.c.h.bf16 %v189_v24 }
  0x30   : > { %4251 = vst [vmem:[#allocation11_spill] sm:$0xff] %v3358_v5  ;;  %4252 = vst [vmem:[#allocation12_spill] sm:$0xff] %v3364_v50  ;;  %v1455_v0 = vmax.f32 %v1167_v48, 0.0  ;;  %v1456_v6 = vmax.f32 %v1168_v61, 0.0  ;;  %v3370_v62 = vrot.slane %v613_v41, %v3151_v8  ;;  %v3373_v26 = vrot.slane %v613_v41, %v3153_v9  ;;  %v191_v61 = vld [vmem:[%s3189_s22 + $0x60] sm:$0xff] }
  0x31   : > { %2598 = vst [vmem:[%s3244_s27 + $0x38] sm:$0xff] %v2953_v52  ;;  %v1169_v7 = vadd.f32 %v3358_v5, %v755_v53  ;;  %v1170_v25 = vadd.f32 %v3364_v50, %v756_v58  ;;  %v3380_v3 = vrot.slane %v3320_v42, %v3151_v8  ;;  %v3384_v24 = vrot.slane %v3320_v42, %v3153_v9 }
  0x32   : > { %4253 = vst [vmem:[#allocation13_spill] sm:$0xff] %v3370_v62  ;;  %v2954_v31 = vpack.c.bf16 %v1456_v6, %v1455_v0  ;;  %v757_v33 = vmul.f32 %v3370_v62, %v343_v51  ;;  %v758_v36 = vmul.f32 %v3373_v26, %v344_v59  ;;  %v345_v48 = vunpack.c.l.bf16 %v190_v63  ;;  %v192_v59 = vld [vmem:[%s3189_s22 + $0x68] sm:$0xff] }
  0x33   : > { %4254 = vst [vmem:[#allocation14_spill] sm:$0xff] %v3380_v3  ;;  %4255 = vst [vmem:[#allocation15_spill] sm:$0xff] %v3384_v24  ;;  %v1457_v52 = vmax.f32 %v1169_v7, 0.0  ;;  %v1458_v53 = vmax.f32 %v1170_v25, 0.0  ;;  %v346_v58 = vunpack.c.h.bf16 %v190_v63  ;;  %v3390_v50 = vrot.slane %v613_v41, %v3155_v10 }
  0x34   : > { %2599 = vst [vmem:[%s3244_s27 + $0x40] sm:$0xff] %v2954_v31  ;;  %v1171_v8 = vadd.f32 %v3380_v3, %v757_v33  ;;  %v1172_v9 = vadd.f32 %v3384_v24, %v758_v36  ;;  %v3396_v0 = vrot.slane %v613_v41, %v3157_v11  ;;  %v3400_v51 = vrot.slane %v3320_v42, %v3155_v10  ;;  %v193_v31 = vld [vmem:[%s3189_s22 + $0x70] sm:$0xff] }
  0x35   : > { %4256 = vst [vmem:[#allocation16_spill] sm:$0xff] %v3390_v50  ;;  %v2955_v6 = vpack.c.bf16 %v1458_v53, %v1457_v52  ;;  %v759_v63 = vmul.f32 %v3390_v50, %v345_v48  ;;  %v3406_v7 = vrot.slane %v3320_v42, %v3157_v11  ;;  %v347_v25 = vunpack.c.l.bf16 %v191_v61 }
  0x36   : > { %v1459_v33 = vmax.f32 %v1171_v8, 0.0  ;;  %v1460_v36 = vmax.f32 %v1172_v9, 0.0  ;;  %v760_v41 = vmul.f32 %v3396_v0, %v346_v58  ;;  %v348_v24 = vunpack.c.h.bf16 %v191_v61  ;;  %v194_v8 = vld [vmem:[%s3189_s22 + $0x78] sm:$0xff] }
  0x37   : > { %2600 = vst [vmem:[%s3244_s27 + $0x48] sm:$0xff] %v2955_v6  ;;  %v1173_v10 = vadd.f32 %v3400_v51, %v759_v63  ;;  %v761_v52 = vmul.f32 %v3161_v12, %v347_v25  ;;  %v349_v53 = vunpack.c.l.bf16 %v192_v59  ;;  %v350_v48 = vunpack.c.h.bf16 %v192_v59 }
  0x38   : > { %v2956_v50 = vpack.c.bf16 %v1460_v36, %v1459_v33  ;;  %v1174_v11 = vadd.f32 %v3406_v7, %v760_v41  ;;  %v762_v42 = vmul.f32 %v3164_v13, %v348_v24  ;;  %v351_v3 = vunpack.c.l.bf16 %v193_v31 }
  0x39   : > { %v1461_v9 = vmax.f32 %v1173_v10, 0.0  ;;  %v1175_v58 = vadd.f32 %v3167_v14, %v761_v52  ;;  %v763_v61 = vmul.f32 %v3173_v16, %v349_v53  ;;  %v764_v6 = vmul.f32 %v3176_v17, %v350_v48  ;;  %v195_v52 = vld [vmem:[%s3189_s22 + $0x80] sm:$0xff] }
  0x3a   : > { %2601 = vst [vmem:[%s3244_s27 + $0x50] sm:$0xff] %v2956_v50  ;;  %v1462_v63 = vmax.f32 %v1174_v11, 0.0  ;;  %v1176_v25 = vadd.f32 %v3170_v15, %v762_v42  ;;  %v352_v59 = vunpack.c.h.bf16 %v193_v31  ;;  %v765_v33 = vmul.f32 %v3192_v20, %v351_v3 }
  0x3b   : > { %v1463_v24 = vmax.f32 %v1175_v58, 0.0  ;;  %v1177_v36 = vadd.f32 %v3179_v18, %v763_v61  ;;  %v1178_v41 = vadd.f32 %v3182_v19, %v764_v6  ;;  %v353_v10 = vunpack.c.l.bf16 %v194_v8  ;;  %v196_v58 = vld [vmem:[%s3189_s22 + $0x88] sm:$0xff] }
  0x3c   : > { %v2957_v53 = vpack.c.bf16 %v1462_v63, %v1461_v9  ;;  %v1464_v16 = vmax.f32 %v1176_v25, 0.0  ;;  %v766_v50 = vmul.f32 %v3195_v21, %v352_v59  ;;  %v1179_v48 = vadd.f32 %v3198_v22, %v765_v33  ;;  %v197_v9 = vld [vmem:[%s3189_s22 + $0x90] sm:$0xff] }
  0x3d   : > { %v1465_v11 = vmax.f32 %v1177_v36, 0.0  ;;  %v1466_v31 = vmax.f32 %v1178_v41, 0.0  ;;  %v354_v42 = vunpack.c.h.bf16 %v194_v8  ;;  %v767_v3 = vmul.f32 %v3207_v27, %v353_v10 }
  0x3e   : > { %2602 = vst [vmem:[%s3244_s27 + $0x58] sm:$0xff] %v2957_v53  ;;  %v2958_v61 = vpack.c.bf16 %v1464_v16, %v1463_v24  ;;  %v1180_v6 = vadd.f32 %v3201_v23, %v766_v50  ;;  %v1467_v19 = vmax.f32 %v1179_v48, 0.0  ;;  %v355_v18 = vunpack.c.l.bf16 %v195_v52  ;;  %v198_v48 = vld [vmem:[%s3189_s22 + $0x98] sm:$0xff] }
  0x3f   : > { %v2959_v63 = vpack.c.bf16 %v1466_v31, %v1465_v11  ;;  %v768_v25 = vmul.f32 %v3210_v28, %v354_v42  ;;  %v1181_v59 = vadd.f32 %v3213_v29, %v767_v3  ;;  %v356_v33 = vunpack.c.h.bf16 %v195_v52 }
  0x40   : > { %2603 = vst [vmem:[%s3244_s27 + $0x60] sm:$0xff] %v2958_v61  ;;  %v1468_v8 = vmax.f32 %v1180_v6, 0.0  ;;  %v769_v36 = vmul.f32 %v3251_v34, %v355_v18  ;;  %v357_v41 = vunpack.c.l.bf16 %v196_v58  ;;  %v358_v10 = vunpack.c.h.bf16 %v196_v58 }
  0x41   : > { %2604 = vst [vmem:[%s3244_s27 + $0x68] sm:$0xff] %v2959_v63  ;;  %v1182_v16 = vadd.f32 %v3216_v30, %v768_v25  ;;  %v1469_v24 = vmax.f32 %v1181_v59, 0.0  ;;  %v770_v53 = vmul.f32 %v3254_v35, %v356_v33  ;;  %v359_v50 = vunpack.c.l.bf16 %v197_v9  ;;  %v199_v59 = vld [vmem:[%s3189_s22 + $0xa0] sm:$0xff] }
  0x42   : > { %v2960_v11 = vpack.c.bf16 %v1468_v8, %v1467_v19  ;;  %v1183_v31 = vadd.f32 %v3260_v37, %v769_v36  ;;  %v771_v52 = vmul.f32 %v3270_v43, %v357_v41  ;;  %v772_v42 = vmul.f32 %v3273_v44, %v358_v10 }
  0x43   : > { %v1470_v18 = vmax.f32 %v1182_v16, 0.0  ;;  %v1184_v3 = vadd.f32 %v3263_v38, %v770_v53  ;;  %v360_v58 = vunpack.c.h.bf16 %v197_v9  ;;  %v773_v61 = vmul.f32 %v3287_v54, %v359_v50  ;;  %v200_v50 = vld [vmem:[%s3189_s22 + $0xa8] sm:$0xff] }
  0x44   : > { %2605 = vst [vmem:[%s3244_s27 + $0x70] sm:$0xff] %v2960_v11  ;;  %v1471_v6 = vmax.f32 %v1183_v31, 0.0  ;;  %v1185_v63 = vadd.f32 %v3276_v45, %v771_v52  ;;  %v1186_v19 = vadd.f32 %v3279_v46, %v772_v42  ;;  %v361_v25 = vunpack.c.l.bf16 %v198_v48 }
  0x45   : > { %v2961_v33 = vpack.c.bf16 %v1470_v18, %v1469_v24  ;;  %v1472_v8 = vmax.f32 %v1184_v3, 0.0  ;;  %v774_v36 = vmul.f32 %v3290_v55, %v360_v58  ;;  %v1187_v41 = vadd.f32 %v3293_v56, %v773_v61  ;;  %v201_v24 = vld [vmem:[%s3189_s22 + $0xb0] sm:$0xff] }
  0x46   : > { %v1473_v9 = vmax.f32 %v1185_v63, 0.0  ;;  %v1474_v10 = vmax.f32 %v1186_v19, 0.0  ;;  %v362_v16 = vunpack.c.h.bf16 %v198_v48  ;;  %v775_v53 = vmul.f32 %v3304_v32, %v361_v25 }
  0x47   : > { %2606 = vst [vmem:[%s3244_s27 + $0x78] sm:$0xff] %v2961_v33  ;;  %v2962_v11 = vpack.c.bf16 %v1472_v8, %v1471_v6  ;;  %v1188_v31 = vadd.f32 %v3296_v57, %v774_v36  ;;  %v1475_v52 = vmax.f32 %v1187_v41, 0.0  ;;  %v363_v42 = vunpack.c.l.bf16 %v199_v59  ;;  %v4257_v8 = vld [vmem:[#allocation7_spill] sm:$0xff] }
  0x48   : > { %v2963_v18 = vpack.c.bf16 %v1474_v10, %v1473_v9  ;;  %v776_v3 = vmul.f32 %v3309_v39, %v362_v16  ;;  %v1189_v58 = vadd.f32 %v3312_v40, %v775_v53  ;;  %v364_v61 = vunpack.c.h.bf16 %v199_v59  ;;  %v202_v9 = vld [vmem:[%s3189_s22 + $0xb8] sm:$0xff] }
  0x49   : > { %2607 = vst [vmem:[%s3244_s27 + $0x80] sm:$0xff] %v2962_v11  ;;  %v1476_v48 = vmax.f32 %v1188_v31, 0.0  ;;  %v777_v63 = vmul.f32 %v3332_v60, %v363_v42  ;;  %v365_v19 = vunpack.c.l.bf16 %v200_v50  ;;  %v366_v25 = vunpack.c.h.bf16 %v200_v50 }
  0x4a   : > { %2608 = vst [vmem:[%s3244_s27 + $0x88] sm:$0xff] %v2963_v18  ;;  %v1190_v6 = vadd.f32 %v3325_v49, %v776_v3  ;;  %v1477_v33 = vmax.f32 %v1189_v58, 0.0  ;;  %v778_v36 = vmul.f32 %v4257_v8, %v364_v61  ;;  %v367_v41 = vunpack.c.l.bf16 %v201_v24  ;;  %v4258_v58 = vld [vmem:[#allocation12_spill] sm:$0xff] }
  0x4b   : > { %v2964_v10 = vpack.c.bf16 %v1476_v48, %v1475_v52  ;;  %v1191_v16 = vadd.f32 %v3339_v2, %v777_v63  ;;  %v779_v59 = vmul.f32 %v3351_v4, %v365_v19  ;;  %v780_v53 = vmul.f32 %v3354_v47, %v366_v25  ;;  %v203_v48 = vld [vmem:[%s3189_s22 + $0xc0] sm:$0xff] }
  0x4c   : > { %v1478_v11 = vmax.f32 %v1190_v6, 0.0  ;;  %v1192_v31 = vadd.f32 %v3344_v1, %v778_v36  ;;  %v368_v50 = vunpack.c.h.bf16 %v201_v24  ;;  %v781_v42 = vmul.f32 %v3370_v62, %v367_v41  ;;  %v4259_v6 = vld [vmem:[#allocation14_spill] sm:$0xff]  ;;  %v4260_v62 = vld [vmem:[#allocation16_spill] sm:$0xff] }
  0x4d   : > { %2609 = vst [vmem:[%s3244_s27 + $0x90] sm:$0xff] %v2964_v10  ;;  %v1479_v18 = vmax.f32 %v1191_v16, 0.0  ;;  %v1193_v3 = vadd.f32 %v3358_v5, %v779_v59  ;;  %v1194_v52 = vadd.f32 %v4258_v58, %v780_v53  ;;  %v369_v61 = vunpack.c.l.bf16 %v202_v9  ;;  %v204_v16 = vld [vmem:[%s3189_s22 + $0xc8] sm:$0xff] }
  0x4e   : > { %v2965_v63 = vpack.c.bf16 %v1478_v11, %v1477_v33  ;;  %v1480_v19 = vmax.f32 %v1192_v31, 0.0  ;;  %v782_v25 = vmul.f32 %v3373_v26, %v368_v50  ;;  %v1195_v36 = vadd.f32 %v4259_v6, %v781_v42  ;;  %v4261_v53 = vld [vmem:[#allocation15_spill] sm:$0xff]  ;;  %v205_v33 = vld [vmem:[%s3189_s22 + $0xd0] sm:$0xff] }
  0x4f   : > { %v1481_v24 = vmax.f32 %v1193_v3, 0.0  ;;  %v1482_v1 = vmax.f32 %v1194_v52, 0.0  ;;  %v370_v41 = vunpack.c.h.bf16 %v202_v9  ;;  %v783_v10 = vmul.f32 %v4260_v62, %v369_v61 }
  0x50   : > { %2610 = vst [vmem:[%s3244_s27 + $0x98] sm:$0xff] %v2965_v63  ;;  %v2966_v59 = vpack.c.bf16 %v1480_v19, %v1479_v18  ;;  %v1196_v58 = vadd.f32 %v4261_v53, %v782_v25  ;;  %v1483_v5 = vmax.f32 %v1195_v36, 0.0  ;;  %v371_v47 = vunpack.c.l.bf16 %v203_v48  ;;  %v206_v25 = vld [vmem:[%s3189_s22 + $0xd8] sm:$0xff] }
  0x51   : > { %v2967_v11 = vpack.c.bf16 %v1482_v1, %v1481_v24  ;;  %v784_v31 = vmul.f32 %v3396_v0, %v370_v41  ;;  %v1197_v50 = vadd.f32 %v3400_v51, %v783_v10  ;;  %v372_v42 = vunpack.c.h.bf16 %v203_v48  ;;  %v4262_v48 = vld [vmem:[#allocation2_spill] sm:$0xff] }
  0x52   : > { %2611 = vst [vmem:[%s3244_s27 + $0xa0] sm:$0xff] %v2966_v59  ;;  %v1484_v9 = vmax.f32 %v1196_v58, 0.0  ;;  %v785_v3 = vmul.f32 %v3161_v12, %v371_v47  ;;  %v373_v52 = vunpack.c.l.bf16 %v204_v16  ;;  %v374_v61 = vunpack.c.h.bf16 %v204_v16 }
  0x53   : > { %2612 = vst [vmem:[%s3244_s27 + $0xa8] sm:$0xff] %v2967_v11  ;;  %v1198_v18 = vadd.f32 %v3406_v7, %v784_v31  ;;  %v1485_v63 = vmax.f32 %v1197_v50, 0.0  ;;  %v786_v19 = vmul.f32 %v3164_v13, %v372_v42  ;;  %v375_v1 = vunpack.c.l.bf16 %v205_v33  ;;  %v4263_v31 = vld [vmem:[#allocation3_spill] sm:$0xff]  ;;  %v4264_v42 = vld [vmem:[#allocation4_spill] sm:$0xff] }
  0x54   : > { %v2968_v36 = vpack.c.bf16 %v1484_v9, %v1483_v5  ;;  %v1199_v24 = vadd.f32 %v3167_v14, %v785_v3  ;;  %v787_v41 = vmul.f32 %v4262_v48, %v373_v52  ;;  %v788_v58 = vmul.f32 %v3176_v17, %v374_v61  ;;  %v207_v3 = vld [vmem:[%s3189_s22 + $0xe0] sm:$0xff] }
  0x55   : > { %v1486_v47 = vmax.f32 %v1198_v18, 0.0  ;;  %v1200_v10 = vadd.f32 %v3170_v15, %v786_v19  ;;  %v376_v16 = vunpack.c.h.bf16 %v205_v33  ;;  %v789_v59 = vmul.f32 %v3192_v20, %v375_v1 }
  0x56   : > { %2613 = vst [vmem:[%s3244_s27 + $0xb0] sm:$0xff] %v2968_v36  ;;  %v1487_v11 = vmax.f32 %v1199_v24, 0.0  ;;  %v1201_v50 = vadd.f32 %v4263_v31, %v787_v41  ;;  %v1202_v5 = vadd.f32 %v4264_v42, %v788_v58  ;;  %v377_v9 = vunpack.c.l.bf16 %v206_v25  ;;  %v208_v24 = vld [vmem:[%s3189_s22 + $0xe8] sm:$0xff] }
  0x57   : > { %v2969_v52 = vpack.c.bf16 %v1486_v47, %v1485_v63  ;;  %v1488_v48 = vmax.f32 %v1200_v10, 0.0  ;;  %v790_v61 = vmul.f32 %v3195_v21, %v376_v16  ;;  %v1203_v18 = vadd.f32 %v3198_v22, %v789_v59  ;;  %v209_v63 = vld [vmem:[%s3189_s22 + $0xf0] sm:$0xff] }
  0x58   : > { %v1489_v33 = vmax.f32 %v1201_v50, 0.0  ;;  %v1490_v19 = vmax.f32 %v1202_v5, 0.0  ;;  %v378_v1 = vunpack.c.h.bf16 %v206_v25  ;;  %v791_v36 = vmul.f32 %v3207_v27, %v377_v9 }
  0x59   : > { %2614 = vst [vmem:[%s3244_s27 + $0xb8] sm:$0xff] %v2969_v52  ;;  %v2970_v41 = vpack.c.bf16 %v1488_v48, %v1487_v11  ;;  %v1204_v58 = vadd.f32 %v3201_v23, %v790_v61  ;;  %v1491_v42 = vmax.f32 %v1203_v18, 0.0  ;;  %v379_v31 = vunpack.c.l.bf16 %v207_v3  ;;  %v210_v18 = vld [vmem:[%s3189_s22 + $0xf8] sm:$0xff] }
  0x5a   : > { %v2971_v47 = vpack.c.bf16 %v1490_v19, %v1489_v33  ;;  %v792_v10 = vmul.f32 %v3210_v28, %v378_v1  ;;  %v1205_v16 = vadd.f32 %v3213_v29, %v791_v36  ;;  %v380_v59 = vunpack.c.h.bf16 %v207_v3 }
  0x5b   : > { %2615 = vst [vmem:[%s3244_s27 + $0xc0] sm:$0xff] %v2970_v41  ;;  %v1492_v25 = vmax.f32 %v1204_v58, 0.0  ;;  %v793_v50 = vmul.f32 %v3251_v34, %v379_v31  ;;  %v381_v5 = vunpack.c.l.bf16 %v208_v24  ;;  %v382_v9 = vunpack.c.h.bf16 %v208_v24 }
  0x5c   : > { %2616 = vst [vmem:[%s3244_s27 + $0xc8] sm:$0xff] %v2971_v47  ;;  %v1206_v48 = vadd.f32 %v3216_v30, %v792_v10  ;;  %v1493_v11 = vmax.f32 %v1205_v16, 0.0  ;;  %v794_v52 = vmul.f32 %v3254_v35, %v380_v59  ;;  %v383_v61 = vunpack.c.l.bf16 %v209_v63  ;;  %v211_v16 = vld [vmem:[%s3189_s22 + $0x100] sm:$0xff] }
  0x5d   : > { %v2972_v33 = vpack.c.bf16 %v1492_v25, %v1491_v42  ;;  %v1207_v19 = vadd.f32 %v3260_v37, %v793_v50  ;;  %v795_v3 = vmul.f32 %v3270_v43, %v381_v5  ;;  %v796_v1 = vmul.f32 %v3273_v44, %v382_v9 }
  0x5e   : > { %v1494_v31 = vmax.f32 %v1206_v48, 0.0  ;;  %v1208_v36 = vadd.f32 %v3263_v38, %v794_v52  ;;  %v384_v24 = vunpack.c.h.bf16 %v209_v63  ;;  %v797_v41 = vmul.f32 %v3287_v54, %v383_v61  ;;  %v212_v61 = vld [vmem:[%s3189_s22 + $0x108] sm:$0xff] }
  0x5f   : > { %2617 = vst [vmem:[%s3244_s27 + $0xd0] sm:$0xff] %v2972_v33  ;;  %v1495_v58 = vmax.f32 %v1207_v19, 0.0  ;;  %v1209_v47 = vadd.f32 %v3276_v45, %v795_v3  ;;  %v1210_v42 = vadd.f32 %v3279_v46, %v796_v1  ;;  %v385_v10 = vunpack.c.l.bf16 %v210_v18 }
  0x60   : > { %v2973_v59 = vpack.c.bf16 %v1494_v31, %v1493_v11  ;;  %v1496_v25 = vmax.f32 %v1208_v36, 0.0  ;;  %v798_v50 = vmul.f32 %v3290_v55, %v384_v24  ;;  %v1211_v5 = vadd.f32 %v3293_v56, %v797_v41  ;;  %v213_v11 = vld [vmem:[%s3189_s22 + $0x110] sm:$0xff] }
  0x61   : > { %v1497_v63 = vmax.f32 %v1209_v47, 0.0  ;;  %v1498_v9 = vmax.f32 %v1210_v42, 0.0  ;;  %v386_v48 = vunpack.c.h.bf16 %v210_v18  ;;  %v799_v52 = vmul.f32 %v3304_v32, %v385_v10 }
  0x62   : > { %2618 = vst [vmem:[%s3244_s27 + $0xd8] sm:$0xff] %v2973_v59  ;;  %v2974_v33 = vpack.c.bf16 %v1496_v25, %v1495_v58  ;;  %v1212_v19 = vadd.f32 %v3296_v57, %v798_v50  ;;  %v1499_v3 = vmax.f32 %v1211_v5, 0.0  ;;  %v387_v1 = vunpack.c.l.bf16 %v211_v16  ;;  %v214_v5 = vld [vmem:[%s3189_s22 + $0x118] sm:$0xff] }
  0x63   : > { %v2975_v31 = vpack.c.bf16 %v1498_v9, %v1497_v63  ;;  %v800_v36 = vmul.f32 %v3309_v39, %v386_v48  ;;  %v1213_v24 = vadd.f32 %v3312_v40, %v799_v52  ;;  %v388_v41 = vunpack.c.h.bf16 %v211_v16  ;;  %v4265_v48 = vld [vmem:[#allocation10_spill] sm:$0xff] }
  0x64   : > { %2619 = vst [vmem:[%s3244_s27 + $0xe0] sm:$0xff] %v2974_v33  ;;  %v1500_v18 = vmax.f32 %v1212_v19, 0.0  ;;  %v801_v47 = vmul.f32 %v3332_v60, %v387_v1  ;;  %v389_v42 = vunpack.c.l.bf16 %v212_v61  ;;  %v390_v10 = vunpack.c.h.bf16 %v212_v61  ;;  %v4266_v19 = vld [vmem:[#allocation8_spill] sm:$0xff] }
  0x65   : > { %2620 = vst [vmem:[%s3244_s27 + $0xe8] sm:$0xff] %v2975_v31  ;;  %v1214_v58 = vadd.f32 %v3325_v49, %v800_v36  ;;  %v1501_v59 = vmax.f32 %v1213_v24, 0.0  ;;  %v802_v25 = vmul.f32 %v4257_v8, %v388_v41  ;;  %v391_v50 = vunpack.c.l.bf16 %v213_v11  ;;  %v4267_v31 = vld [vmem:[#allocation13_spill] sm:$0xff]  ;;  %v4268_v41 = vld [vmem:[#allocation11_spill] sm:$0xff]  ;;  %v4269_v49 = vld [vmem:[#allocation12_spill] sm:$0xff] }
  0x66   : > { %v2976_v63 = vpack.c.bf16 %v1500_v18, %v1499_v3  ;;  %v1215_v9 = vadd.f32 %v3339_v2, %v801_v47  ;;  %v803_v16 = vmul.f32 %v3351_v4, %v389_v42  ;;  %v804_v52 = vmul.f32 %v4265_v48, %v390_v10  ;;  %v215_v47 = vld [vmem:[%s3189_s22 + $0x120] sm:$0xff] }
  0x67   : > { %v1502_v33 = vmax.f32 %v1214_v58, 0.0  ;;  %v1216_v1 = vadd.f32 %v4266_v19, %v802_v25  ;;  %v392_v61 = vunpack.c.h.bf16 %v213_v11  ;;  %v805_v36 = vmul.f32 %v4267_v31, %v391_v50 }
  0x68   : > { %2621 = vst [vmem:[%s3244_s27 + $0xf0] sm:$0xff] %v2976_v63  ;;  %v1503_v24 = vmax.f32 %v1215_v9, 0.0  ;;  %v1217_v8 = vadd.f32 %v4268_v41, %v803_v16  ;;  %v1218_v3 = vadd.f32 %v4269_v49, %v804_v52  ;;  %v393_v18 = vunpack.c.l.bf16 %v214_v5  ;;  %v216_v9 = vld [vmem:[%s3189_s22 + $0x128] sm:$0xff] }
  0x69   : > { %v2977_v42 = vpack.c.bf16 %v1502_v33, %v1501_v59  ;;  %v1504_v4 = vmax.f32 %v1216_v1, 0.0  ;;  %v806_v10 = vmul.f32 %v3373_v26, %v392_v61  ;;  %v1219_v58 = vadd.f32 %v4259_v6, %v805_v36  ;;  %v217_v59 = vld [vmem:[%s3189_s22 + $0x130] sm:$0xff] }
  0x6a   : > { %v1505_v11 = vmax.f32 %v1217_v8, 0.0  ;;  %v1506_v25 = vmax.f32 %v1218_v3, 0.0  ;;  %v394_v50 = vunpack.c.h.bf16 %v214_v5  ;;  %v807_v63 = vmul.f32 %v4260_v62, %v393_v18 }
  0x6b   : > { %2622 = vst [vmem:[%s3244_s27 + $0xf8] sm:$0xff] %v2977_v42  ;;  %v2978_v16 = vpack.c.bf16 %v1504_v4, %v1503_v24  ;;  %v1220_v52 = vadd.f32 %v4261_v53, %v806_v10  ;;  %v1507_v49 = vmax.f32 %v1219_v58, 0.0  ;;  %v395_v41 = vunpack.c.l.bf16 %v215_v47  ;;  %v218_v58 = vld [vmem:[%s3189_s22 + $0x138] sm:$0xff] }
  0x6c   : > { %v2979_v33 = vpack.c.bf16 %v1506_v25, %v1505_v11  ;;  %v808_v1 = vmul.f32 %v3396_v0, %v394_v50  ;;  %v1221_v61 = vadd.f32 %v3400_v51, %v807_v63  ;;  %v396_v8 = vunpack.c.h.bf16 %v215_v47  ;;  %v4270_v47 = vld [vmem:[#allocation2_spill] sm:$0xff] }
  0x6d   : > { %2623 = vst [vmem:[%s3244_s27 + $0x100] sm:$0xff] %v2978_v16  ;;  %v1508_v5 = vmax.f32 %v1220_v52, 0.0  ;;  %v809_v36 = vmul.f32 %v3161_v12, %v395_v41  ;;  %v397_v3 = vunpack.c.l.bf16 %v216_v9  ;;  %v398_v18 = vunpack.c.h.bf16 %v216_v9 }
  0x6e   : > { %2624 = vst [vmem:[%s3244_s27 + $0x108] sm:$0xff] %v2979_v33  ;;  %v1222_v4 = vadd.f32 %v3406_v7, %v808_v1  ;;  %v1509_v24 = vmax.f32 %v1221_v61, 0.0  ;;  %v810_v42 = vmul.f32 %v3164_v13, %v396_v8  ;;  %v399_v10 = vunpack.c.l.bf16 %v217_v59  ;;  %v4271_v1 = vld [vmem:[#allocation3_spill] sm:$0xff]  ;;  %v4272_v8 = vld [vmem:[#allocation4_spill] sm:$0xff] }
  0x6f   : > { %v2980_v11 = vpack.c.bf16 %v1508_v5, %v1507_v49  ;;  %v1223_v25 = vadd.f32 %v3167_v14, %v809_v36  ;;  %v811_v50 = vmul.f32 %v4270_v47, %v397_v3  ;;  %v812_v63 = vmul.f32 %v3176_v17, %v398_v18  ;;  %v219_v36 = vld [vmem:[%s3189_s22 + $0x140] sm:$0xff] }
  0x70   : > { %v1510_v41 = vmax.f32 %v1222_v4, 0.0  ;;  %v1224_v16 = vadd.f32 %v3170_v15, %v810_v42  ;;  %v400_v9 = vunpack.c.h.bf16 %v217_v59  ;;  %v813_v52 = vmul.f32 %v3192_v20, %v399_v10 }
  0x71   : > { %2625 = vst [vmem:[%s3244_s27 + $0x110] sm:$0xff] %v2980_v11  ;;  %v1511_v33 = vmax.f32 %v1223_v25, 0.0  ;;  %v1225_v61 = vadd.f32 %v4271_v1, %v811_v50  ;;  %v1226_v49 = vadd.f32 %v4272_v8, %v812_v63  ;;  %v401_v5 = vunpack.c.l.bf16 %v218_v58  ;;  %v220_v25 = vld [vmem:[%s3189_s22 + $0x148] sm:$0xff] }
  0x72   : > { %v2981_v3 = vpack.c.bf16 %v1510_v41, %v1509_v24  ;;  %v1512_v47 = vmax.f32 %v1224_v16, 0.0  ;;  %v814_v18 = vmul.f32 %v3195_v21, %v400_v9  ;;  %v1227_v4 = vadd.f32 %v3198_v22, %v813_v52  ;;  %v221_v24 = vld [vmem:[%s3189_s22 + $0x150] sm:$0xff] }
  0x73   : > { %v1513_v59 = vmax.f32 %v1225_v61, 0.0  ;;  %v1514_v42 = vmax.f32 %v1226_v49, 0.0  ;;  %v402_v10 = vunpack.c.h.bf16 %v218_v58  ;;  %v815_v11 = vmul.f32 %v3207_v27, %v401_v5 }
  0x74   : > { %2626 = vst [vmem:[%s3244_s27 + $0x118] sm:$0xff] %v2981_v3  ;;  %v2982_v50 = vpack.c.bf16 %v1512_v47, %v1511_v33  ;;  %v1228_v63 = vadd.f32 %v3201_v23, %v814_v18  ;;  %v1515_v8 = vmax.f32 %v1227_v4, 0.0  ;;  %v403_v1 = vunpack.c.l.bf16 %v219_v36  ;;  %v222_v4 = vld [vmem:[%s3189_s22 + $0x158] sm:$0xff] }
  0x75   : > { %v2983_v41 = vpack.c.bf16 %v1514_v42, %v1513_v59  ;;  %v816_v16 = vmul.f32 %v3210_v28, %v402_v10  ;;  %v1229_v9 = vadd.f32 %v3213_v29, %v815_v11  ;;  %v404_v52 = vunpack.c.h.bf16 %v219_v36 }
  0x76   : > { %2627 = vst [vmem:[%s3244_s27 + $0x120] sm:$0xff] %v2982_v50  ;;  %v1516_v58 = vmax.f32 %v1228_v63, 0.0  ;;  %v817_v61 = vmul.f32 %v3251_v34, %v403_v1  ;;  %v405_v49 = vunpack.c.l.bf16 %v220_v25  ;;  %v406_v5 = vunpack.c.h.bf16 %v220_v25 }
  0x77   : > { %2628 = vst [vmem:[%s3244_s27 + $0x128] sm:$0xff] %v2983_v41  ;;  %v1230_v47 = vadd.f32 %v3216_v30, %v816_v16  ;;  %v1517_v33 = vmax.f32 %v1229_v9, 0.0  ;;  %v818_v3 = vmul.f32 %v3254_v35, %v404_v52  ;;  %v407_v18 = vunpack.c.l.bf16 %v221_v24  ;;  %v223_v9 = vld [vmem:[%s3189_s22 + $0x160] sm:$0xff] }
  0x78   : > { %v2984_v59 = vpack.c.bf16 %v1516_v58, %v1515_v8  ;;  %v1231_v42 = vadd.f32 %v3260_v37, %v817_v61  ;;  %v819_v36 = vmul.f32 %v3270_v43, %v405_v49  ;;  %v820_v10 = vmul.f32 %v3273_v44, %v406_v5 }
  0x79   : > { %v1518_v1 = vmax.f32 %v1230_v47, 0.0  ;;  %v1232_v11 = vadd.f32 %v3263_v38, %v818_v3  ;;  %v408_v25 = vunpack.c.h.bf16 %v221_v24  ;;  %v821_v50 = vmul.f32 %v3287_v54, %v407_v18  ;;  %v224_v18 = vld [vmem:[%s3189_s22 + $0x168] sm:$0xff] }
  0x7a   : > { %2629 = vst [vmem:[%s3244_s27 + $0x130] sm:$0xff] %v2984_v59  ;;  %v1519_v63 = vmax.f32 %v1231_v42, 0.0  ;;  %v1233_v41 = vadd.f32 %v3276_v45, %v819_v36  ;;  %v1234_v8 = vadd.f32 %v3279_v46, %v820_v10  ;;  %v409_v16 = vunpack.c.l.bf16 %v222_v4 }
  0x7b   : > { %v2985_v52 = vpack.c.bf16 %v1518_v1, %v1517_v33  ;;  %v1520_v58 = vmax.f32 %v1232_v11, 0.0  ;;  %v822_v61 = vmul.f32 %v3290_v55, %v408_v25  ;;  %v1235_v49 = vadd.f32 %v3293_v56, %v821_v50  ;;  %v225_v33 = vld [vmem:[%s3189_s22 + $0x170] sm:$0xff] }
  0x7c   : > { %v1521_v24 = vmax.f32 %v1233_v41, 0.0  ;;  %v1522_v5 = vmax.f32 %v1234_v8, 0.0  ;;  %v410_v47 = vunpack.c.h.bf16 %v222_v4  ;;  %v823_v3 = vmul.f32 %v3304_v32, %v409_v16 }
  0x7d   : > { %2630 = vst [vmem:[%s3244_s27 + $0x138] sm:$0xff] %v2985_v52  ;;  %v2986_v59 = vpack.c.bf16 %v1520_v58, %v1519_v63  ;;  %v1236_v42 = vadd.f32 %v3296_v57, %v822_v61  ;;  %v1523_v36 = vmax.f32 %v1235_v49, 0.0  ;;  %v411_v10 = vunpack.c.l.bf16 %v223_v9  ;;  %v4273_v63 = vld [vmem:[#allocation5_spill] sm:$0xff]  ;;  %v4274_v61 = vld [vmem:[#allocation7_spill] sm:$0xff] }
  0x7e   : > { %v2987_v1 = vpack.c.bf16 %v1522_v5, %v1521_v24  ;;  %v824_v11 = vmul.f32 %v3309_v39, %v410_v47  ;;  %v1237_v25 = vadd.f32 %v3312_v40, %v823_v3  ;;  %v412_v50 = vunpack.c.h.bf16 %v223_v9  ;;  %v226_v5 = vld [vmem:[%s3189_s22 + $0x178] sm:$0xff] }
  0x7f   : > { %2631 = vst [vmem:[%s3244_s27 + $0x140] sm:$0xff] %v2986_v59  ;;  %v1524_v4 = vmax.f32 %v1236_v42, 0.0  ;;  %v825_v41 = vmul.f32 %v3332_v60, %v411_v10  ;;  %v413_v8 = vunpack.c.l.bf16 %v224_v18  ;;  %v414_v16 = vunpack.c.h.bf16 %v224_v18  ;;  %v4275_v9 = vld [vmem:[#allocation9_spill] sm:$0xff] }
  0x80   : > { %2632 = vst [vmem:[%s3244_s27 + $0x148] sm:$0xff] %v2987_v1  ;;  %v1238_v52 = vadd.f32 %v4273_v63, %v824_v11  ;;  %v1525_v58 = vmax.f32 %v1237_v25, 0.0  ;;  %v826_v49 = vmul.f32 %v4274_v61, %v412_v50  ;;  %v415_v24 = vunpack.c.l.bf16 %v225_v33  ;;  %v4276_v25 = vld [vmem:[#allocation11_spill] sm:$0xff]  ;;  %v4277_v61 = vld [vmem:[#allocation12_spill] sm:$0xff] }
  0x81   : > { %v2988_v47 = vpack.c.bf16 %v1524_v4, %v1523_v36  ;;  %v1239_v3 = vadd.f32 %v3339_v2, %v825_v41  ;;  %v827_v59 = vmul.f32 %v4275_v9, %v413_v8  ;;  %v828_v42 = vmul.f32 %v4265_v48, %v414_v16  ;;  %v227_v41 = vld [vmem:[%s3189_s22 + $0x180] sm:$0xff] }
  0x82   : > { %v1526_v10 = vmax.f32 %v1238_v52, 0.0  ;;  %v1240_v60 = vadd.f32 %v4266_v19, %v826_v49  ;;  %v416_v18 = vunpack.c.h.bf16 %v225_v33  ;;  %v829_v1 = vmul.f32 %v4267_v31, %v415_v24 }
  0x83   : > { %2633 = vst [vmem:[%s3244_s27 + $0x150] sm:$0xff] %v2988_v47  ;;  %v1527_v11 = vmax.f32 %v1239_v3, 0.0  ;;  %v1241_v50 = vadd.f32 %v4276_v25, %v827_v59  ;;  %v1242_v36 = vadd.f32 %v4277_v61, %v828_v42  ;;  %v417_v4 = vunpack.c.l.bf16 %v226_v5  ;;  %v228_v3 = vld [vmem:[%s3189_s22 + $0x188] sm:$0xff] }
  0x84   : > { %v2989_v8 = vpack.c.bf16 %v1526_v10, %v1525_v58  ;;  %v1528_v9 = vmax.f32 %v1240_v60, 0.0  ;;  %v830_v16 = vmul.f32 %v3373_v26, %v416_v18  ;;  %v1243_v52 = vadd.f32 %v4259_v6, %v829_v1  ;;  %v229_v60 = vld [vmem:[%s3189_s22 + $0x190] sm:$0xff] }
  0x85   : > { %v1529_v33 = vmax.f32 %v1241_v50, 0.0  ;;  %v1530_v49 = vmax.f32 %v1242_v36, 0.0  ;;  %v418_v24 = vunpack.c.h.bf16 %v226_v5  ;;  %v831_v47 = vmul.f32 %v4260_v62, %v417_v4 }
  0x86   : > { %2634 = vst [vmem:[%s3244_s27 + $0x158] sm:$0xff] %v2989_v8  ;;  %v2990_v59 = vpack.c.bf16 %v1528_v9, %v1527_v11  ;;  %v1244_v42 = vadd.f32 %v4261_v53, %v830_v16  ;;  %v1531_v61 = vmax.f32 %v1243_v52, 0.0  ;;  %v419_v25 = vunpack.c.l.bf16 %v227_v41  ;;  %v230_v52 = vld [vmem:[%s3189_s22 + $0x198] sm:$0xff] }
  0x87   : > { %v2991_v58 = vpack.c.bf16 %v1530_v49, %v1529_v33  ;;  %v832_v10 = vmul.f32 %v3396_v0, %v418_v24  ;;  %v1245_v18 = vadd.f32 %v3400_v51, %v831_v47  ;;  %v420_v1 = vunpack.c.h.bf16 %v227_v41  ;;  %v4278_v41 = vld [vmem:[#allocation2_spill] sm:$0xff] }
  0x88   : > { %2635 = vst [vmem:[%s3244_s27 + $0x160] sm:$0xff] %v2990_v59  ;;  %v1532_v5 = vmax.f32 %v1244_v42, 0.0  ;;  %v833_v50 = vmul.f32 %v3161_v12, %v419_v25  ;;  %v421_v36 = vunpack.c.l.bf16 %v228_v3  ;;  %v422_v4 = vunpack.c.h.bf16 %v228_v3 }
  0x89   : > { %2636 = vst [vmem:[%s3244_s27 + $0x168] sm:$0xff] %v2991_v58  ;;  %v1246_v9 = vadd.f32 %v3406_v7, %v832_v10  ;;  %v1533_v11 = vmax.f32 %v1245_v18, 0.0  ;;  %v834_v8 = vmul.f32 %v3164_v13, %v420_v1  ;;  %v423_v16 = vunpack.c.l.bf16 %v229_v60  ;;  %v4279_v10 = vld [vmem:[#allocation3_spill] sm:$0xff]  ;;  %v4280_v1 = vld [vmem:[#allocation4_spill] sm:$0xff] }
  0x8a   : > { %v2992_v33 = vpack.c.bf16 %v1532_v5, %v1531_v61  ;;  %v1247_v49 = vadd.f32 %v3167_v14, %v833_v50  ;;  %v835_v24 = vmul.f32 %v4278_v41, %v421_v36  ;;  %v836_v47 = vmul.f32 %v3176_v17, %v422_v4  ;;  %v231_v50 = vld [vmem:[%s3189_s22 + $0x1a0] sm:$0xff] }
  0x8b   : > { %v1534_v25 = vmax.f32 %v1246_v9, 0.0  ;;  %v1248_v59 = vadd.f32 %v3170_v15, %v834_v8  ;;  %v424_v3 = vunpack.c.h.bf16 %v229_v60  ;;  %v837_v42 = vmul.f32 %v3192_v20, %v423_v16 }
  0x8c   : > { %2637 = vst [vmem:[%s3244_s27 + $0x170] sm:$0xff] %v2992_v33  ;;  %v1535_v58 = vmax.f32 %v1247_v49, 0.0  ;;  %v1249_v18 = vadd.f32 %v4279_v10, %v835_v24  ;;  %v1250_v61 = vadd.f32 %v4280_v1, %v836_v47  ;;  %v425_v5 = vunpack.c.l.bf16 %v230_v52  ;;  %v232_v49 = vld [vmem:[%s3189_s22 + $0x1a8] sm:$0xff] }
  0x8d   : > { %v2993_v36 = vpack.c.bf16 %v1534_v25, %v1533_v11  ;;  %v1536_v41 = vmax.f32 %v1248_v59, 0.0  ;;  %v838_v4 = vmul.f32 %v3195_v21, %v424_v3  ;;  %v1251_v9 = vadd.f32 %v3198_v22, %v837_v42  ;;  %v233_v11 = vld [vmem:[%s3189_s22 + $0x1b0] sm:$0xff] }
  0x8e   : > { %v1537_v60 = vmax.f32 %v1249_v18, 0.0  ;;  %v1538_v8 = vmax.f32 %v1250_v61, 0.0  ;;  %v426_v16 = vunpack.c.h.bf16 %v230_v52  ;;  %v839_v33 = vmul.f32 %v3207_v27, %v425_v5 }
  0x8f   : > { %2638 = vst [vmem:[%s3244_s27 + $0x178] sm:$0xff] %v2993_v36  ;;  %v2994_v24 = vpack.c.bf16 %v1536_v41, %v1535_v58  ;;  %v1252_v47 = vadd.f32 %v3201_v23, %v838_v4  ;;  %v1539_v1 = vmax.f32 %v1251_v9, 0.0  ;;  %v427_v10 = vunpack.c.l.bf16 %v231_v50  ;;  %v234_v9 = vld [vmem:[%s3189_s22 + $0x1b8] sm:$0xff] }
  0x90   : > { %v2995_v25 = vpack.c.bf16 %v1538_v8, %v1537_v60  ;;  %v840_v59 = vmul.f32 %v3210_v28, %v426_v16  ;;  %v1253_v3 = vadd.f32 %v3213_v29, %v839_v33  ;;  %v428_v42 = vunpack.c.h.bf16 %v231_v50 }
  0x91   : > { %2639 = vst [vmem:[%s3244_s27 + $0x180] sm:$0xff] %v2994_v24  ;;  %v1540_v52 = vmax.f32 %v1252_v47, 0.0  ;;  %v841_v18 = vmul.f32 %v3251_v34, %v427_v10  ;;  %v429_v61 = vunpack.c.l.bf16 %v232_v49  ;;  %v430_v5 = vunpack.c.h.bf16 %v232_v49 }
  0x92   : > { %2640 = vst [vmem:[%s3244_s27 + $0x188] sm:$0xff] %v2995_v25  ;;  %v1254_v41 = vadd.f32 %v3216_v30, %v840_v59  ;;  %v1541_v58 = vmax.f32 %v1253_v3, 0.0  ;;  %v842_v36 = vmul.f32 %v3254_v35, %v428_v42  ;;  %v431_v4 = vunpack.c.l.bf16 %v233_v11  ;;  %v235_v3 = vld [vmem:[%s3189_s22 + $0x1c0] sm:$0xff] }
  0x93   : > { %v2996_v60 = vpack.c.bf16 %v1540_v52, %v1539_v1  ;;  %v1255_v8 = vadd.f32 %v3260_v37, %v841_v18  ;;  %v843_v50 = vmul.f32 %v3270_v43, %v429_v61  ;;  %v844_v16 = vmul.f32 %v3273_v44, %v430_v5 }
  0x94   : > { %v1542_v10 = vmax.f32 %v1254_v41, 0.0  ;;  %v1256_v33 = vadd.f32 %v3263_v38, %v842_v36  ;;  %v432_v49 = vunpack.c.h.bf16 %v233_v11  ;;  %v845_v24 = vmul.f32 %v3287_v54, %v431_v4  ;;  %v236_v4 = vld [vmem:[%s3189_s22 + $0x1c8] sm:$0xff] }
  0x95   : > { %2641 = vst [vmem:[%s3244_s27 + $0x190] sm:$0xff] %v2996_v60  ;;  %v1543_v47 = vmax.f32 %v1255_v8, 0.0  ;;  %v1257_v25 = vadd.f32 %v3276_v45, %v843_v50  ;;  %v1258_v1 = vadd.f32 %v3279_v46, %v844_v16  ;;  %v433_v59 = vunpack.c.l.bf16 %v234_v9 }
  0x96   : > { %v2997_v42 = vpack.c.bf16 %v1542_v10, %v1541_v58  ;;  %v1544_v52 = vmax.f32 %v1256_v33, 0.0  ;;  %v846_v18 = vmul.f32 %v3290_v55, %v432_v49  ;;  %v1259_v61 = vadd.f32 %v3293_v56, %v845_v24  ;;  %v237_v58 = vld [vmem:[%s3189_s22 + $0x1d0] sm:$0xff] }
  0x97   : > { %v1545_v11 = vmax.f32 %v1257_v25, 0.0  ;;  %v1546_v5 = vmax.f32 %v1258_v1, 0.0  ;;  %v434_v41 = vunpack.c.h.bf16 %v234_v9  ;;  %v847_v36 = vmul.f32 %v3304_v32, %v433_v59  ;;  %v4281_v25 = vld [vmem:[#allocation6_spill] sm:$0xff] }
  0x98   : > { %2642 = vst [vmem:[%s3244_s27 + $0x198] sm:$0xff] %v2997_v42  ;;  %v2998_v60 = vpack.c.bf16 %v1544_v52, %v1543_v47  ;;  %v1260_v8 = vadd.f32 %v3296_v57, %v846_v18  ;;  %v1547_v50 = vmax.f32 %v1259_v61, 0.0  ;;  %v435_v16 = vunpack.c.l.bf16 %v235_v3  ;;  %v4282_v18 = vld [vmem:[#allocation7_spill] sm:$0xff] }
  0x99   : > { %v2999_v10 = vpack.c.bf16 %v1546_v5, %v1545_v11  ;;  %v848_v33 = vmul.f32 %v3309_v39, %v434_v41  ;;  %v1261_v49 = vadd.f32 %v3312_v40, %v847_v36  ;;  %v436_v24 = vunpack.c.h.bf16 %v235_v3  ;;  %v238_v5 = vld [vmem:[%s3189_s22 + $0x1d8] sm:$0xff] }
  0x9a   : > { %2643 = vst [vmem:[%s3244_s27 + $0x1a0] sm:$0xff] %v2998_v60  ;;  %v1548_v9 = vmax.f32 %v1260_v8, 0.0  ;;  %v849_v1 = vmul.f32 %v4281_v25, %v435_v16  ;;  %v437_v59 = vunpack.c.l.bf16 %v236_v4  ;;  %v438_v42 = vunpack.c.h.bf16 %v236_v4  ;;  %v4283_v3 = vld [vmem:[#allocation9_spill] sm:$0xff] }
  0x9b   : > { %2644 = vst [vmem:[%s3244_s27 + $0x1a8] sm:$0xff] %v2999_v10  ;;  %v1262_v47 = vadd.f32 %v4273_v63, %v848_v33  ;;  %v1549_v52 = vmax.f32 %v1261_v49, 0.0  ;;  %v850_v61 = vmul.f32 %v4282_v18, %v436_v24  ;;  %v439_v11 = vunpack.c.l.bf16 %v237_v58  ;;  %v4284_v49 = vld [vmem:[#allocation11_spill] sm:$0xff]  ;;  %v4285_v18 = vld [vmem:[#allocation12_spill] sm:$0xff] }
  0x9c   : > { %v3000_v41 = vpack.c.bf16 %v1548_v9, %v1547_v50  ;;  %v1263_v36 = vadd.f32 %v3339_v2, %v849_v1  ;;  %v851_v60 = vmul.f32 %v4283_v3, %v437_v59  ;;  %v852_v8 = vmul.f32 %v4265_v48, %v438_v42  ;;  %v239_v1 = vld [vmem:[%s3189_s22 + $0x1e0] sm:$0xff] }
  0x9d   : > { %v1550_v16 = vmax.f32 %v1262_v47, 0.0  ;;  %v1264_v25 = vadd.f32 %v4266_v19, %v850_v61  ;;  %v440_v4 = vunpack.c.h.bf16 %v237_v58  ;;  %v853_v10 = vmul.f32 %v4267_v31, %v439_v11 }
  0x9e   : > { %2645 = vst [vmem:[%s3244_s27 + $0x1b0] sm:$0xff] %v3000_v41  ;;  %v1551_v33 = vmax.f32 %v1263_v36, 0.0  ;;  %v1265_v24 = vadd.f32 %v4284_v49, %v851_v60  ;;  %v1266_v50 = vadd.f32 %v4285_v18, %v852_v8  ;;  %v441_v9 = vunpack.c.l.bf16 %v238_v5  ;;  %v240_v36 = vld [vmem:[%s3189_s22 + $0x1e8] sm:$0xff] }
  0x9f   : > { %v3001_v59 = vpack.c.bf16 %v1550_v16, %v1549_v52  ;;  %v1552_v3 = vmax.f32 %v1264_v25, 0.0  ;;  %v854_v42 = vmul.f32 %v3373_v26, %v440_v4  ;;  %v1267_v47 = vadd.f32 %v4259_v6, %v853_v10  ;;  %v241_v25 = vld [vmem:[%s3189_s22 + $0x1f0] sm:$0xff] }
  0xa0   : > { %v1553_v58 = vmax.f32 %v1265_v24, 0.0  ;;  %v1554_v61 = vmax.f32 %v1266_v50, 0.0  ;;  %v442_v11 = vunpack.c.h.bf16 %v238_v5  ;;  %v855_v41 = vmul.f32 %v4260_v62, %v441_v9 }
  0xa1   : > { %2646 = vst [vmem:[%s3244_s27 + $0x1b8] sm:$0xff] %v3001_v59  ;;  %v3002_v60 = vpack.c.bf16 %v1552_v3, %v1551_v33  ;;  %v1268_v8 = vadd.f32 %v4261_v53, %v854_v42  ;;  %v1555_v18 = vmax.f32 %v1267_v47, 0.0  ;;  %v443_v49 = vunpack.c.l.bf16 %v239_v1  ;;  %v242_v47 = vld [vmem:[%s3189_s22 + $0x1f8] sm:$0xff] }
  0xa2   : > { %v3003_v52 = vpack.c.bf16 %v1554_v61, %v1553_v58  ;;  %v856_v16 = vmul.f32 %v3396_v0, %v442_v11  ;;  %v1269_v4 = vadd.f32 %v3400_v51, %v855_v41  ;;  %v444_v10 = vunpack.c.h.bf16 %v239_v1  ;;  %v4286_v1 = vld [vmem:[#allocation2_spill] sm:$0xff] }
  0xa3   : > { %2647 = vst [vmem:[%s3244_s27 + $0x1c0] sm:$0xff] %v3002_v60  ;;  %v1556_v5 = vmax.f32 %v1268_v8, 0.0  ;;  %v857_v24 = vmul.f32 %v3161_v12, %v443_v49  ;;  %v445_v50 = vunpack.c.l.bf16 %v240_v36  ;;  %v446_v9 = vunpack.c.h.bf16 %v240_v36 }
  0xa4   : > { %2648 = vst [vmem:[%s3244_s27 + $0x1c8] sm:$0xff] %v3003_v52  ;;  %v1270_v3 = vadd.f32 %v3406_v7, %v856_v16  ;;  %v1557_v33 = vmax.f32 %v1269_v4, 0.0  ;;  %v858_v59 = vmul.f32 %v3164_v13, %v444_v10  ;;  %v447_v42 = vunpack.c.l.bf16 %v241_v25  ;;  %v4287_v16 = vld [vmem:[#allocation3_spill] sm:$0xff]  ;;  %v4288_v10 = vld [vmem:[#allocation4_spill] sm:$0xff] }
  0xa5   : > { %v3004_v58 = vpack.c.bf16 %v1556_v5, %v1555_v18  ;;  %v1271_v61 = vadd.f32 %v3167_v14, %v857_v24  ;;  %v859_v11 = vmul.f32 %v4286_v1, %v445_v50  ;;  %v860_v41 = vmul.f32 %v3176_v17, %v446_v9  ;;  %v243_v24 = vld [vmem:[%s3189_s22 + $0x200] sm:$0xff] }
  0xa6   : > { %v1558_v49 = vmax.f32 %v1270_v3, 0.0  ;;  %v1272_v60 = vadd.f32 %v3170_v15, %v858_v59  ;;  %v448_v36 = vunpack.c.h.bf16 %v241_v25  ;;  %v861_v8 = vmul.f32 %v3192_v20, %v447_v42 }
  0xa7   : > { %2649 = vst [vmem:[%s3244_s27 + $0x1d0] sm:$0xff] %v3004_v58  ;;  %v1559_v52 = vmax.f32 %v1271_v61, 0.0  ;;  %v1273_v4 = vadd.f32 %v4287_v16, %v859_v11  ;;  %v1274_v18 = vadd.f32 %v4288_v10, %v860_v41  ;;  %v449_v5 = vunpack.c.l.bf16 %v242_v47  ;;  %v244_v61 = vld [vmem:[%s3189_s22 + $0x208] sm:$0xff] }
  0xa8   : > { %v3005_v50 = vpack.c.bf16 %v1558_v49, %v1557_v33  ;;  %v1560_v1 = vmax.f32 %v1272_v60, 0.0  ;;  %v862_v9 = vmul.f32 %v3195_v21, %v448_v36  ;;  %v1275_v3 = vadd.f32 %v3198_v22, %v861_v8  ;;  %v245_v33 = vld [vmem:[%s3189_s22 + $0x210] sm:$0xff] }
  0xa9   : > { %v1561_v25 = vmax.f32 %v1273_v4, 0.0  ;;  %v1562_v59 = vmax.f32 %v1274_v18, 0.0  ;;  %v450_v42 = vunpack.c.h.bf16 %v242_v47  ;;  %v863_v58 = vmul.f32 %v3207_v27, %v449_v5 }
  0xaa   : > { %2650 = vst [vmem:[%s3244_s27 + $0x1d8] sm:$0xff] %v3005_v50  ;;  %v3006_v11 = vpack.c.bf16 %v1560_v1, %v1559_v52  ;;  %v1276_v41 = vadd.f32 %v3201_v23, %v862_v9  ;;  %v1563_v10 = vmax.f32 %v1275_v3, 0.0  ;;  %v451_v16 = vunpack.c.l.bf16 %v243_v24  ;;  %v246_v3 = vld [vmem:[%s3189_s22 + $0x218] sm:$0xff] }
  0xab   : > { %v3007_v49 = vpack.c.bf16 %v1562_v59, %v1561_v25  ;;  %v864_v60 = vmul.f32 %v3210_v28, %v450_v42  ;;  %v1277_v36 = vadd.f32 %v3213_v29, %v863_v58  ;;  %v452_v8 = vunpack.c.h.bf16 %v243_v24 }
  0xac   : > { %2651 = vst [vmem:[%s3244_s27 + $0x1e0] sm:$0xff] %v3006_v11  ;;  %v1564_v47 = vmax.f32 %v1276_v41, 0.0  ;;  %v865_v4 = vmul.f32 %v3251_v34, %v451_v16  ;;  %v453_v18 = vunpack.c.l.bf16 %v244_v61  ;;  %v454_v5 = vunpack.c.h.bf16 %v244_v61 }
  0xad   : > { %2652 = vst [vmem:[%s3244_s27 + $0x1e8] sm:$0xff] %v3007_v49  ;;  %v1278_v1 = vadd.f32 %v3216_v30, %v864_v60  ;;  %v1565_v52 = vmax.f32 %v1277_v36, 0.0  ;;  %v866_v50 = vmul.f32 %v3254_v35, %v452_v8  ;;  %v455_v9 = vunpack.c.l.bf16 %v245_v33  ;;  %v247_v36 = vld [vmem:[%s3189_s22 + $0x220] sm:$0xff] }
  0xae   : > { %v3008_v25 = vpack.c.bf16 %v1564_v47, %v1563_v10  ;;  %v1279_v59 = vadd.f32 %v3260_v37, %v865_v4  ;;  %v867_v24 = vmul.f32 %v3270_v43, %v453_v18  ;;  %v868_v42 = vmul.f32 %v3273_v44, %v454_v5 }
  0xaf   : > { %v1566_v16 = vmax.f32 %v1278_v1, 0.0  ;;  %v1280_v58 = vadd.f32 %v3263_v38, %v866_v50  ;;  %v456_v61 = vunpack.c.h.bf16 %v245_v33  ;;  %v869_v11 = vmul.f32 %v3287_v54, %v455_v9  ;;  %v248_v9 = vld [vmem:[%s3189_s22 + $0x228] sm:$0xff] }
  0xb0   : > { %2653 = vst [vmem:[%s3244_s27 + $0x1f0] sm:$0xff] %v3008_v25  ;;  %v1567_v41 = vmax.f32 %v1279_v59, 0.0  ;;  %v1281_v49 = vadd.f32 %v3276_v45, %v867_v24  ;;  %v1282_v10 = vadd.f32 %v3279_v46, %v868_v42  ;;  %v457_v60 = vunpack.c.l.bf16 %v246_v3 }
  0xb1   : > { %v3009_v8 = vpack.c.bf16 %v1566_v16, %v1565_v52  ;;  %v1568_v47 = vmax.f32 %v1280_v58, 0.0  ;;  %v870_v4 = vmul.f32 %v3290_v55, %v456_v61  ;;  %v1283_v18 = vadd.f32 %v3293_v56, %v869_v11  ;;  %v249_v52 = vld [vmem:[%s3189_s22 + $0x230] sm:$0xff] }
  0xb2   : > { %v1569_v33 = vmax.f32 %v1281_v49, 0.0  ;;  %v1570_v5 = vmax.f32 %v1282_v10, 0.0  ;;  %v458_v1 = vunpack.c.h.bf16 %v246_v3  ;;  %v871_v50 = vmul.f32 %v3304_v32, %v457_v60  ;;  %v4289_v49 = vld [vmem:[#allocation6_spill] sm:$0xff] }
  0xb3   : > { %2654 = vst [vmem:[%s3244_s27 + $0x1f8] sm:$0xff] %v3009_v8  ;;  %v3010_v25 = vpack.c.bf16 %v1568_v47, %v1567_v41  ;;  %v1284_v59 = vadd.f32 %v3296_v57, %v870_v4  ;;  %v1571_v24 = vmax.f32 %v1283_v18, 0.0  ;;  %v459_v42 = vunpack.c.l.bf16 %v247_v36  ;;  %v4290_v4 = vld [vmem:[#allocation7_spill] sm:$0xff] }
  0xb4   : > { %v3011_v16 = vpack.c.bf16 %v1570_v5, %v1569_v33  ;;  %v872_v58 = vmul.f32 %v3309_v39, %v458_v1  ;;  %v1285_v61 = vadd.f32 %v3312_v40, %v871_v50  ;;  %v460_v11 = vunpack.c.h.bf16 %v247_v36  ;;  %v250_v5 = vld [vmem:[%s3189_s22 + $0x238] sm:$0xff] }
  0xb5   : > { %2655 = vst [vmem:[%s3244_s27 + $0x200] sm:$0xff] %v3010_v25  ;;  %v1572_v3 = vmax.f32 %v1284_v59, 0.0  ;;  %v873_v10 = vmul.f32 %v4289_v49, %v459_v42  ;;  %v461_v60 = vunpack.c.l.bf16 %v248_v9  ;;  %v462_v8 = vunpack.c.h.bf16 %v248_v9  ;;  %v4291_v36 = vld [vmem:[#allocation9_spill] sm:$0xff] }
  0xb6   : > { %2656 = vst [vmem:[%s3244_s27 + $0x208] sm:$0xff] %v3011_v16  ;;  %v1286_v41 = vadd.f32 %v4273_v63, %v872_v58  ;;  %v1573_v47 = vmax.f32 %v1285_v61, 0.0  ;;  %v874_v18 = vmul.f32 %v4290_v4, %v460_v11  ;;  %v463_v33 = vunpack.c.l.bf16 %v249_v52  ;;  %v4292_v61 = vld [vmem:[#allocation11_spill] sm:$0xff]  ;;  %v4293_v4 = vld [vmem:[#allocation12_spill] sm:$0xff] }
  0xb7   : > { %v3012_v1 = vpack.c.bf16 %v1572_v3, %v1571_v24  ;;  %v1287_v50 = vadd.f32 %v3339_v2, %v873_v10  ;;  %v875_v25 = vmul.f32 %v4291_v36, %v461_v60  ;;  %v876_v59 = vmul.f32 %v4265_v48, %v462_v8  ;;  %v251_v10 = vld [vmem:[%s3189_s22 + $0x240] sm:$0xff] }
  0xb8   : > { %v1574_v42 = vmax.f32 %v1286_v41, 0.0  ;;  %v1288_v49 = vadd.f32 %v4266_v19, %v874_v18  ;;  %v464_v9 = vunpack.c.h.bf16 %v249_v52  ;;  %v877_v16 = vmul.f32 %v4267_v31, %v463_v33 }
  0xb9   : > { %2657 = vst [vmem:[%s3244_s27 + $0x210] sm:$0xff] %v3012_v1  ;;  %v1575_v58 = vmax.f32 %v1287_v50, 0.0  ;;  %v1289_v11 = vadd.f32 %v4292_v61, %v875_v25  ;;  %v1290_v24 = vadd.f32 %v4293_v4, %v876_v59  ;;  %v465_v3 = vunpack.c.l.bf16 %v250_v5  ;;  %v252_v50 = vld [vmem:[%s3189_s22 + $0x248] sm:$0xff] }
  0xba   : > { %v3013_v60 = vpack.c.bf16 %v1574_v42, %v1573_v47  ;;  %v1576_v36 = vmax.f32 %v1288_v49, 0.0  ;;  %v878_v8 = vmul.f32 %v3373_v26, %v464_v9  ;;  %v1291_v41 = vadd.f32 %v4259_v6, %v877_v16  ;;  %v253_v49 = vld [vmem:[%s3189_s22 + $0x250] sm:$0xff] }
  0xbb   : > { %v1577_v52 = vmax.f32 %v1289_v11, 0.0  ;;  %v1578_v18 = vmax.f32 %v1290_v24, 0.0  ;;  %v466_v33 = vunpack.c.h.bf16 %v250_v5  ;;  %v879_v1 = vmul.f32 %v4260_v62, %v465_v3 }
  0xbc   : > { %2658 = vst [vmem:[%s3244_s27 + $0x218] sm:$0xff] %v3013_v60  ;;  %v3014_v25 = vpack.c.bf16 %v1576_v36, %v1575_v58  ;;  %v1292_v59 = vadd.f32 %v4261_v53, %v878_v8  ;;  %v1579_v4 = vmax.f32 %v1291_v41, 0.0  ;;  %v467_v61 = vunpack.c.l.bf16 %v251_v10  ;;  %v254_v41 = vld [vmem:[%s3189_s22 + $0x258] sm:$0xff] }
  0xbd   : > { %v3015_v47 = vpack.c.bf16 %v1578_v18, %v1577_v52  ;;  %v880_v42 = vmul.f32 %v3396_v0, %v466_v33  ;;  %v1293_v9 = vadd.f32 %v3400_v51, %v879_v1  ;;  %v468_v16 = vunpack.c.h.bf16 %v251_v10  ;;  %v4294_v10 = vld [vmem:[#allocation2_spill] sm:$0xff] }
  0xbe   : > { %2659 = vst [vmem:[%s3244_s27 + $0x220] sm:$0xff] %v3014_v25  ;;  %v1580_v5 = vmax.f32 %v1292_v59, 0.0  ;;  %v881_v11 = vmul.f32 %v3161_v12, %v467_v61  ;;  %v469_v24 = vunpack.c.l.bf16 %v252_v50  ;;  %v470_v3 = vunpack.c.h.bf16 %v252_v50 }
  0xbf   : > { %2660 = vst [vmem:[%s3244_s27 + $0x228] sm:$0xff] %v3015_v47  ;;  %v1294_v36 = vadd.f32 %v3406_v7, %v880_v42  ;;  %v1581_v58 = vmax.f32 %v1293_v9, 0.0  ;;  %v882_v60 = vmul.f32 %v3164_v13, %v468_v16  ;;  %v471_v8 = vunpack.c.l.bf16 %v253_v49  ;;  %v4295_v42 = vld [vmem:[#allocation3_spill] sm:$0xff]  ;;  %v4296_v16 = vld [vmem:[#allocation4_spill] sm:$0xff] }
  0xc0   : > { %v3016_v52 = vpack.c.bf16 %v1580_v5, %v1579_v4  ;;  %v1295_v18 = vadd.f32 %v3167_v14, %v881_v11  ;;  %v883_v33 = vmul.f32 %v4294_v10, %v469_v24  ;;  %v884_v1 = vmul.f32 %v3176_v17, %v470_v3  ;;  %v255_v11 = vld [vmem:[%s3189_s22 + $0x260] sm:$0xff] }
  0xc1   : > { %v1582_v61 = vmax.f32 %v1294_v36, 0.0  ;;  %v1296_v25 = vadd.f32 %v3170_v15, %v882_v60  ;;  %v472_v50 = vunpack.c.h.bf16 %v253_v49  ;;  %v885_v59 = vmul.f32 %v3192_v20, %v471_v8 }
  0xc2   : > { %2661 = vst [vmem:[%s3244_s27 + $0x230] sm:$0xff] %v3016_v52  ;;  %v1583_v47 = vmax.f32 %v1295_v18, 0.0  ;;  %v1297_v9 = vadd.f32 %v4295_v42, %v883_v33  ;;  %v1298_v4 = vadd.f32 %v4296_v16, %v884_v1  ;;  %v473_v5 = vunpack.c.l.bf16 %v254_v41  ;;  %v256_v18 = vld [vmem:[%s3189_s22 + $0x268] sm:$0xff] }
  0xc3   : > { %v3017_v24 = vpack.c.bf16 %v1582_v61, %v1581_v58  ;;  %v1584_v10 = vmax.f32 %v1296_v25, 0.0  ;;  %v886_v3 = vmul.f32 %v3195_v21, %v472_v50  ;;  %v1299_v36 = vadd.f32 %v3198_v22, %v885_v59  ;;  %v257_v58 = vld [vmem:[%s3189_s22 + $0x270] sm:$0xff] }
  0xc4   : > { %v1585_v49 = vmax.f32 %v1297_v9, 0.0  ;;  %v1586_v60 = vmax.f32 %v1298_v4, 0.0  ;;  %v474_v8 = vunpack.c.h.bf16 %v254_v41  ;;  %v887_v52 = vmul.f32 %v3207_v27, %v473_v5 }
  0xc5   : > { %2662 = vst [vmem:[%s3244_s27 + $0x238] sm:$0xff] %v3017_v24  ;;  %v3018_v33 = vpack.c.bf16 %v1584_v10, %v1583_v47  ;;  %v1300_v1 = vadd.f32 %v3201_v23, %v886_v3  ;;  %v1587_v16 = vmax.f32 %v1299_v36, 0.0  ;;  %v475_v42 = vunpack.c.l.bf16 %v255_v11  ;;  %v258_v36 = vld [vmem:[%s3189_s22 + $0x278] sm:$0xff] }
  0xc6   : > { %v3019_v61 = vpack.c.bf16 %v1586_v60, %v1585_v49  ;;  %v888_v25 = vmul.f32 %v3210_v28, %v474_v8  ;;  %v1301_v50 = vadd.f32 %v3213_v29, %v887_v52  ;;  %v476_v59 = vunpack.c.h.bf16 %v255_v11 }
  0xc7   : > { %2663 = vst [vmem:[%s3244_s27 + $0x240] sm:$0xff] %v3018_v33  ;;  %v1588_v41 = vmax.f32 %v1300_v1, 0.0  ;;  %v889_v9 = vmul.f32 %v3251_v34, %v475_v42  ;;  %v477_v4 = vunpack.c.l.bf16 %v256_v18  ;;  %v478_v5 = vunpack.c.h.bf16 %v256_v18 }
  0xc8   : > { %2664 = vst [vmem:[%s3244_s27 + $0x248] sm:$0xff] %v3019_v61  ;;  %v1302_v10 = vadd.f32 %v3216_v30, %v888_v25  ;;  %v1589_v47 = vmax.f32 %v1301_v50, 0.0  ;;  %v890_v24 = vmul.f32 %v3254_v35, %v476_v59  ;;  %v479_v3 = vunpack.c.l.bf16 %v257_v58  ;;  %v259_v50 = vld [vmem:[%s3189_s22 + $0x280] sm:$0xff] }
  0xc9   : > { %v3020_v49 = vpack.c.bf16 %v1588_v41, %v1587_v16  ;;  %v1303_v60 = vadd.f32 %v3260_v37, %v889_v9  ;;  %v891_v11 = vmul.f32 %v3270_v43, %v477_v4  ;;  %v892_v8 = vmul.f32 %v3273_v44, %v478_v5 }
  0xca   : > { %v1590_v42 = vmax.f32 %v1302_v10, 0.0  ;;  %v1304_v52 = vadd.f32 %v3263_v38, %v890_v24  ;;  %v480_v18 = vunpack.c.h.bf16 %v257_v58  ;;  %v893_v33 = vmul.f32 %v3287_v54, %v479_v3  ;;  %v260_v3 = vld [vmem:[%s3189_s22 + $0x288] sm:$0xff] }
  0xcb   : > { %2665 = vst [vmem:[%s3244_s27 + $0x250] sm:$0xff] %v3020_v49  ;;  %v1591_v1 = vmax.f32 %v1303_v60, 0.0  ;;  %v1305_v61 = vadd.f32 %v3276_v45, %v891_v11  ;;  %v1306_v16 = vadd.f32 %v3279_v46, %v892_v8  ;;  %v481_v25 = vunpack.c.l.bf16 %v258_v36 }
  0xcc   : > { %v3021_v59 = vpack.c.bf16 %v1590_v42, %v1589_v47  ;;  %v1592_v41 = vmax.f32 %v1304_v52, 0.0  ;;  %v894_v9 = vmul.f32 %v3290_v55, %v480_v18  ;;  %v1307_v4 = vadd.f32 %v3293_v56, %v893_v33  ;;  %v261_v47 = vld [vmem:[%s3189_s22 + $0x290] sm:$0xff] }
  0xcd   : > { %v1593_v58 = vmax.f32 %v1305_v61, 0.0  ;;  %v1594_v5 = vmax.f32 %v1306_v16, 0.0  ;;  %v482_v10 = vunpack.c.h.bf16 %v258_v36  ;;  %v895_v24 = vmul.f32 %v3304_v32, %v481_v25  ;;  %v4297_v61 = vld [vmem:[#allocation6_spill] sm:$0xff] }
  0xce   : > { %2666 = vst [vmem:[%s3244_s27 + $0x258] sm:$0xff] %v3021_v59  ;;  %v3022_v49 = vpack.c.bf16 %v1592_v41, %v1591_v1  ;;  %v1308_v60 = vadd.f32 %v3296_v57, %v894_v9  ;;  %v1595_v11 = vmax.f32 %v1307_v4, 0.0  ;;  %v483_v8 = vunpack.c.l.bf16 %v259_v50  ;;  %v4298_v9 = vld [vmem:[#allocation7_spill] sm:$0xff] }
  0xcf   : > { %v3023_v42 = vpack.c.bf16 %v1594_v5, %v1593_v58  ;;  %v896_v52 = vmul.f32 %v3309_v39, %v482_v10  ;;  %v1309_v18 = vadd.f32 %v3312_v40, %v895_v24  ;;  %v484_v33 = vunpack.c.h.bf16 %v259_v50  ;;  %v262_v5 = vld [vmem:[%s3189_s22 + $0x298] sm:$0xff] }
  0xd0   : > { %2667 = vst [vmem:[%s3244_s27 + $0x260] sm:$0xff] %v3022_v49  ;;  %v1596_v36 = vmax.f32 %v1308_v60, 0.0  ;;  %v897_v16 = vmul.f32 %v4297_v61, %v483_v8  ;;  %v485_v25 = vunpack.c.l.bf16 %v260_v3  ;;  %v486_v59 = vunpack.c.h.bf16 %v260_v3  ;;  %v4299_v50 = vld [vmem:[#allocation9_spill] sm:$0xff] }
  0xd1   : > { %2668 = vst [vmem:[%s3244_s27 + $0x268] sm:$0xff] %v3023_v42  ;;  %v1310_v1 = vadd.f32 %v4273_v63, %v896_v52  ;;  %v1597_v41 = vmax.f32 %v1309_v18, 0.0  ;;  %v898_v4 = vmul.f32 %v4298_v9, %v484_v33  ;;  %v487_v58 = vunpack.c.l.bf16 %v261_v47  ;;  %v4300_v18 = vld [vmem:[#allocation11_spill] sm:$0xff]  ;;  %v4301_v9 = vld [vmem:[#allocation12_spill] sm:$0xff] }
  0xd2   : > { %v3024_v10 = vpack.c.bf16 %v1596_v36, %v1595_v11  ;;  %v1311_v24 = vadd.f32 %v3339_v2, %v897_v16  ;;  %v899_v49 = vmul.f32 %v4299_v50, %v485_v25  ;;  %v900_v60 = vmul.f32 %v4265_v48, %v486_v59  ;;  %v263_v16 = vld [vmem:[%s3189_s22 + $0x2a0] sm:$0xff] }
  0xd3   : > { %v1598_v8 = vmax.f32 %v1310_v1, 0.0  ;;  %v1312_v61 = vadd.f32 %v4266_v19, %v898_v4  ;;  %v488_v3 = vunpack.c.h.bf16 %v261_v47  ;;  %v901_v42 = vmul.f32 %v4267_v31, %v487_v58 }
  0xd4   : > { %2669 = vst [vmem:[%s3244_s27 + $0x270] sm:$0xff] %v3024_v10  ;;  %v1599_v52 = vmax.f32 %v1311_v24, 0.0  ;;  %v1313_v33 = vadd.f32 %v4300_v18, %v899_v49  ;;  %v1314_v11 = vadd.f32 %v4301_v9, %v900_v60  ;;  %v489_v36 = vunpack.c.l.bf16 %v262_v5  ;;  %v264_v24 = vld [vmem:[%s3189_s22 + $0x2a8] sm:$0xff] }
  0xd5   : > { %v3025_v25 = vpack.c.bf16 %v1598_v8, %v1597_v41  ;;  %v1600_v50 = vmax.f32 %v1312_v61, 0.0  ;;  %v902_v59 = vmul.f32 %v3373_v26, %v488_v3  ;;  %v1315_v1 = vadd.f32 %v4259_v6, %v901_v42  ;;  %v265_v61 = vld [vmem:[%s3189_s22 + $0x2b0] sm:$0xff] }
  0xd6   : > { %v1601_v47 = vmax.f32 %v1313_v33, 0.0  ;;  %v1602_v4 = vmax.f32 %v1314_v11, 0.0  ;;  %v490_v58 = vunpack.c.h.bf16 %v262_v5  ;;  %v903_v10 = vmul.f32 %v4260_v62, %v489_v36 }
  0xd7   : > { %2670 = vst [vmem:[%s3244_s27 + $0x278] sm:$0xff] %v3025_v25  ;;  %v3026_v49 = vpack.c.bf16 %v1600_v50, %v1599_v52  ;;  %v1316_v60 = vadd.f32 %v4261_v53, %v902_v59  ;;  %v1603_v9 = vmax.f32 %v1315_v1, 0.0  ;;  %v491_v18 = vunpack.c.l.bf16 %v263_v16  ;;  %v266_v1 = vld [vmem:[%s3189_s22 + $0x2b8] sm:$0xff] }
  0xd8   : > { %v3027_v41 = vpack.c.bf16 %v1602_v4, %v1601_v47  ;;  %v904_v8 = vmul.f32 %v3396_v0, %v490_v58  ;;  %v1317_v3 = vadd.f32 %v3400_v51, %v903_v10  ;;  %v492_v42 = vunpack.c.h.bf16 %v263_v16  ;;  %v4302_v16 = vld [vmem:[#allocation2_spill] sm:$0xff] }
  0xd9   : > { %2671 = vst [vmem:[%s3244_s27 + $0x280] sm:$0xff] %v3026_v49  ;;  %v1604_v5 = vmax.f32 %v1316_v60, 0.0  ;;  %v905_v33 = vmul.f32 %v3161_v12, %v491_v18  ;;  %v493_v11 = vunpack.c.l.bf16 %v264_v24  ;;  %v494_v36 = vunpack.c.h.bf16 %v264_v24 }
  0xda   : > { %2672 = vst [vmem:[%s3244_s27 + $0x288] sm:$0xff] %v3027_v41  ;;  %v1318_v50 = vadd.f32 %v3406_v7, %v904_v8  ;;  %v1605_v52 = vmax.f32 %v1317_v3, 0.0  ;;  %v906_v25 = vmul.f32 %v3164_v13, %v492_v42  ;;  %v495_v59 = vunpack.c.l.bf16 %v265_v61  ;;  %v4303_v8 = vld [vmem:[#allocation3_spill] sm:$0xff]  ;;  %v4304_v42 = vld [vmem:[#allocation4_spill] sm:$0xff] }
  0xdb   : > { %v3028_v47 = vpack.c.bf16 %v1604_v5, %v1603_v9  ;;  %v1319_v4 = vadd.f32 %v3167_v14, %v905_v33  ;;  %v907_v58 = vmul.f32 %v4302_v16, %v493_v11  ;;  %v908_v10 = vmul.f32 %v3176_v17, %v494_v36  ;;  %v267_v33 = vld [vmem:[%s3189_s22 + $0x2c0] sm:$0xff] }
  0xdc   : > { %v1606_v18 = vmax.f32 %v1318_v50, 0.0  ;;  %v1320_v49 = vadd.f32 %v3170_v15, %v906_v25  ;;  %v496_v24 = vunpack.c.h.bf16 %v265_v61  ;;  %v909_v60 = vmul.f32 %v3192_v20, %v495_v59 }
  0xdd   : > { %2673 = vst [vmem:[%s3244_s27 + $0x290] sm:$0xff] %v3028_v47  ;;  %v1607_v41 = vmax.f32 %v1319_v4, 0.0  ;;  %v1321_v3 = vadd.f32 %v4303_v8, %v907_v58  ;;  %v1322_v9 = vadd.f32 %v4304_v42, %v908_v10  ;;  %v497_v5 = vunpack.c.l.bf16 %v266_v1  ;;  %v268_v4 = vld [vmem:[%s3189_s22 + $0x2c8] sm:$0xff] }
  0xde   : > { %v3029_v11 = vpack.c.bf16 %v1606_v18, %v1605_v52  ;;  %v1608_v16 = vmax.f32 %v1320_v49, 0.0  ;;  %v910_v36 = vmul.f32 %v3195_v21, %v496_v24  ;;  %v1323_v50 = vadd.f32 %v3198_v22, %v909_v60  ;;  %v269_v52 = vld [vmem:[%s3189_s22 + $0x2d0] sm:$0xff] }
  0xdf   : > { %v1609_v61 = vmax.f32 %v1321_v3, 0.0  ;;  %v1610_v25 = vmax.f32 %v1322_v9, 0.0  ;;  %v498_v59 = vunpack.c.h.bf16 %v266_v1  ;;  %v911_v47 = vmul.f32 %v3207_v27, %v497_v5 }
  0xe0   : > { %2674 = vst [vmem:[%s3244_s27 + $0x298] sm:$0xff] %v3029_v11  ;;  %v3030_v58 = vpack.c.bf16 %v1608_v16, %v1607_v41  ;;  %v1324_v10 = vadd.f32 %v3201_v23, %v910_v36  ;;  %v1611_v42 = vmax.f32 %v1323_v50, 0.0  ;;  %v499_v8 = vunpack.c.l.bf16 %v267_v33  ;;  %v270_v50 = vld [vmem:[%s3189_s22 + $0x2d8] sm:$0xff] }
  0xe1   : > { %v3031_v18 = vpack.c.bf16 %v1610_v25, %v1609_v61  ;;  %v912_v49 = vmul.f32 %v3210_v28, %v498_v59  ;;  %v1325_v24 = vadd.f32 %v3213_v29, %v911_v47  ;;  %v500_v60 = vunpack.c.h.bf16 %v267_v33 }
  0xe2   : > { %2675 = vst [vmem:[%s3244_s27 + $0x2a0] sm:$0xff] %v3030_v58  ;;  %v1612_v1 = vmax.f32 %v1324_v10, 0.0  ;;  %v913_v3 = vmul.f32 %v3251_v34, %v499_v8  ;;  %v501_v9 = vunpack.c.l.bf16 %v268_v4  ;;  %v502_v5 = vunpack.c.h.bf16 %v268_v4 }
  0xe3   : > { %2676 = vst [vmem:[%s3244_s27 + $0x2a8] sm:$0xff] %v3031_v18  ;;  %v1326_v16 = vadd.f32 %v3216_v30, %v912_v49  ;;  %v1613_v41 = vmax.f32 %v1325_v24, 0.0  ;;  %v914_v11 = vmul.f32 %v3254_v35, %v500_v60  ;;  %v503_v36 = vunpack.c.l.bf16 %v269_v52  ;;  %v271_v24 = vld [vmem:[%s3189_s22 + $0x2e0] sm:$0xff] }
  0xe4   : > { %v3032_v61 = vpack.c.bf16 %v1612_v1, %v1611_v42  ;;  %v1327_v25 = vadd.f32 %v3260_v37, %v913_v3  ;;  %v915_v33 = vmul.f32 %v3270_v43, %v501_v9  ;;  %v916_v59 = vmul.f32 %v3273_v44, %v502_v5 }
  0xe5   : > { %v1614_v8 = vmax.f32 %v1326_v16, 0.0  ;;  %v1328_v47 = vadd.f32 %v3263_v38, %v914_v11  ;;  %v504_v4 = vunpack.c.h.bf16 %v269_v52  ;;  %v917_v58 = vmul.f32 %v3287_v54, %v503_v36  ;;  %v272_v36 = vld [vmem:[%s3189_s22 + $0x2e8] sm:$0xff] }
  0xe6   : > { %2677 = vst [vmem:[%s3244_s27 + $0x2b0] sm:$0xff] %v3032_v61  ;;  %v1615_v10 = vmax.f32 %v1327_v25, 0.0  ;;  %v1329_v18 = vadd.f32 %v3276_v45, %v915_v33  ;;  %v1330_v42 = vadd.f32 %v3279_v46, %v916_v59  ;;  %v505_v49 = vunpack.c.l.bf16 %v270_v50 }
  0xe7   : > { %v3033_v60 = vpack.c.bf16 %v1614_v8, %v1613_v41  ;;  %v1616_v1 = vmax.f32 %v1328_v47, 0.0  ;;  %v918_v3 = vmul.f32 %v3290_v55, %v504_v4  ;;  %v1331_v9 = vadd.f32 %v3293_v56, %v917_v58  ;;  %v273_v41 = vld [vmem:[%s3189_s22 + $0x2f0] sm:$0xff] }
  0xe8   : > { %v1617_v52 = vmax.f32 %v1329_v18, 0.0  ;;  %v1618_v5 = vmax.f32 %v1330_v42, 0.0  ;;  %v506_v16 = vunpack.c.h.bf16 %v270_v50  ;;  %v919_v11 = vmul.f32 %v3304_v32, %v505_v49  ;;  %v4305_v18 = vld [vmem:[#allocation6_spill] sm:$0xff] }
  0xe9   : > { %2678 = vst [vmem:[%s3244_s27 + $0x2b8] sm:$0xff] %v3033_v60  ;;  %v3034_v61 = vpack.c.bf16 %v1616_v1, %v1615_v10  ;;  %v1332_v25 = vadd.f32 %v3296_v57, %v918_v3  ;;  %v1619_v33 = vmax.f32 %v1331_v9, 0.0  ;;  %v507_v59 = vunpack.c.l.bf16 %v271_v24  ;;  %v4306_v3 = vld [vmem:[#allocation7_spill] sm:$0xff] }
  0xea   : > { %v3035_v8 = vpack.c.bf16 %v1618_v5, %v1617_v52  ;;  %v920_v47 = vmul.f32 %v3309_v39, %v506_v16  ;;  %v1333_v4 = vadd.f32 %v3312_v40, %v919_v11  ;;  %v508_v58 = vunpack.c.h.bf16 %v271_v24  ;;  %v274_v5 = vld [vmem:[%s3189_s22 + $0x2f8] sm:$0xff] }
  0xeb   : > { %2679 = vst [vmem:[%s3244_s27 + $0x2c0] sm:$0xff] %v3034_v61  ;;  %v1620_v50 = vmax.f32 %v1332_v25, 0.0  ;;  %v921_v42 = vmul.f32 %v4305_v18, %v507_v59  ;;  %v509_v49 = vunpack.c.l.bf16 %v272_v36  ;;  %v510_v60 = vunpack.c.h.bf16 %v272_v36  ;;  %v4307_v24 = vld [vmem:[#allocation9_spill] sm:$0xff] }
  0xec   : > { %2680 = vst [vmem:[%s3244_s27 + $0x2c8] sm:$0xff] %v3035_v8  ;;  %v1334_v10 = vadd.f32 %v4273_v63, %v920_v47  ;;  %v1621_v1 = vmax.f32 %v1333_v4, 0.0  ;;  %v922_v9 = vmul.f32 %v4306_v3, %v508_v58  ;;  %v511_v52 = vunpack.c.l.bf16 %v273_v41  ;;  %v4308_v4 = vld [vmem:[#allocation11_spill] sm:$0xff]  ;;  %v4309_v3 = vld [vmem:[#allocation12_spill] sm:$0xff] }
  0xed   : > { %v3036_v16 = vpack.c.bf16 %v1620_v50, %v1619_v33  ;;  %v1335_v11 = vadd.f32 %v3339_v2, %v921_v42  ;;  %v923_v61 = vmul.f32 %v4307_v24, %v509_v49  ;;  %v924_v25 = vmul.f32 %v4265_v48, %v510_v60  ;;  %v275_v42 = vld [vmem:[%s3189_s22 + $0x300] sm:$0xff] }
  0xee   : > { %v1622_v59 = vmax.f32 %v1334_v10, 0.0  ;;  %v1336_v18 = vadd.f32 %v4266_v19, %v922_v9  ;;  %v512_v36 = vunpack.c.h.bf16 %v273_v41  ;;  %v925_v8 = vmul.f32 %v4267_v31, %v511_v52 }
  0xef   : > { %2681 = vst [vmem:[%s3244_s27 + $0x2d0] sm:$0xff] %v3036_v16  ;;  %v1623_v47 = vmax.f32 %v1335_v11, 0.0  ;;  %v1337_v58 = vadd.f32 %v4308_v4, %v923_v61  ;;  %v1338_v33 = vadd.f32 %v4309_v3, %v924_v25  ;;  %v513_v50 = vunpack.c.l.bf16 %v274_v5  ;;  %v276_v11 = vld [vmem:[%s3189_s22 + $0x308] sm:$0xff] }
  0xf0   : > { %v3037_v49 = vpack.c.bf16 %v1622_v59, %v1621_v1  ;;  %v1624_v24 = vmax.f32 %v1336_v18, 0.0  ;;  %v926_v60 = vmul.f32 %v3373_v26, %v512_v36  ;;  %v1339_v10 = vadd.f32 %v4259_v6, %v925_v8  ;;  %v277_v18 = vld [vmem:[%s3189_s22 + $0x310] sm:$0xff] }
  0xf1   : > { %v1625_v41 = vmax.f32 %v1337_v58, 0.0  ;;  %v1626_v9 = vmax.f32 %v1338_v33, 0.0  ;;  %v514_v52 = vunpack.c.h.bf16 %v274_v5  ;;  %v927_v16 = vmul.f32 %v4260_v62, %v513_v50 }
  0xf2   : > { %2682 = vst [vmem:[%s3244_s27 + $0x2d8] sm:$0xff] %v3037_v49  ;;  %v3038_v61 = vpack.c.bf16 %v1624_v24, %v1623_v47  ;;  %v1340_v25 = vadd.f32 %v4261_v53, %v926_v60  ;;  %v1627_v3 = vmax.f32 %v1339_v10, 0.0  ;;  %v515_v4 = vunpack.c.l.bf16 %v275_v42  ;;  %v278_v10 = vld [vmem:[%s3189_s22 + $0x318] sm:$0xff] }
  0xf3   : > { %v3039_v1 = vpack.c.bf16 %v1626_v9, %v1625_v41  ;;  %v928_v59 = vmul.f32 %v3396_v0, %v514_v52  ;;  %v1341_v36 = vadd.f32 %v3400_v51, %v927_v16  ;;  %v516_v8 = vunpack.c.h.bf16 %v275_v42  ;;  %v4310_v42 = vld [vmem:[#allocation2_spill] sm:$0xff] }
  0xf4   : > { %2683 = vst [vmem:[%s3244_s27 + $0x2e0] sm:$0xff] %v3038_v61  ;;  %v1628_v5 = vmax.f32 %v1340_v25, 0.0  ;;  %v929_v58 = vmul.f32 %v3161_v12, %v515_v4  ;;  %v517_v33 = vunpack.c.l.bf16 %v276_v11  ;;  %v518_v50 = vunpack.c.h.bf16 %v276_v11 }
  0xf5   : > { %2684 = vst [vmem:[%s3244_s27 + $0x2e8] sm:$0xff] %v3039_v1  ;;  %v1342_v24 = vadd.f32 %v3406_v7, %v928_v59  ;;  %v1629_v47 = vmax.f32 %v1341_v36, 0.0  ;;  %v930_v49 = vmul.f32 %v3164_v13, %v516_v8  ;;  %v519_v60 = vunpack.c.l.bf16 %v277_v18  ;;  %v4311_v59 = vld [vmem:[#allocation3_spill] sm:$0xff]  ;;  %v4312_v8 = vld [vmem:[#allocation4_spill] sm:$0xff] }
  0xf6   : > { %v3040_v41 = vpack.c.bf16 %v1628_v5, %v1627_v3  ;;  %v1343_v9 = vadd.f32 %v3167_v14, %v929_v58  ;;  %v931_v52 = vmul.f32 %v4310_v42, %v517_v33  ;;  %v932_v16 = vmul.f32 %v3176_v17, %v518_v50  ;;  %v279_v58 = vld [vmem:[%s3189_s22 + $0x320] sm:$0xff] }
  0xf7   : > { %v1630_v4 = vmax.f32 %v1342_v24, 0.0  ;;  %v1344_v61 = vadd.f32 %v3170_v15, %v930_v49  ;;  %v520_v11 = vunpack.c.h.bf16 %v277_v18  ;;  %v933_v25 = vmul.f32 %v3192_v20, %v519_v60 }
  0xf8   : > { %2685 = vst [vmem:[%s3244_s27 + $0x2f0] sm:$0xff] %v3040_v41  ;;  %v1631_v1 = vmax.f32 %v1343_v9, 0.0  ;;  %v1345_v36 = vadd.f32 %v4311_v59, %v931_v52  ;;  %v1346_v3 = vadd.f32 %v4312_v8, %v932_v16  ;;  %v521_v5 = vunpack.c.l.bf16 %v278_v10  ;;  %v280_v9 = vld [vmem:[%s3189_s22 + $0x328] sm:$0xff] }
  0xf9   : > { %v3041_v33 = vpack.c.bf16 %v1630_v4, %v1629_v47  ;;  %v1632_v42 = vmax.f32 %v1344_v61, 0.0  ;;  %v934_v50 = vmul.f32 %v3195_v21, %v520_v11  ;;  %v1347_v24 = vadd.f32 %v3198_v22, %v933_v25  ;;  %v281_v47 = vld [vmem:[%s3189_s22 + $0x330] sm:$0xff] }
  0xfa   : > { %v1633_v18 = vmax.f32 %v1345_v36, 0.0  ;;  %v1634_v49 = vmax.f32 %v1346_v3, 0.0  ;;  %v522_v60 = vunpack.c.h.bf16 %v278_v10  ;;  %v935_v41 = vmul.f32 %v3207_v27, %v521_v5 }
  0xfb   : > { %2686 = vst [vmem:[%s3244_s27 + $0x2f8] sm:$0xff] %v3041_v33  ;;  %v3042_v52 = vpack.c.bf16 %v1632_v42, %v1631_v1  ;;  %v1348_v16 = vadd.f32 %v3201_v23, %v934_v50  ;;  %v1635_v8 = vmax.f32 %v1347_v24, 0.0  ;;  %v523_v59 = vunpack.c.l.bf16 %v279_v58  ;;  %v282_v24 = vld [vmem:[%s3189_s22 + $0x338] sm:$0xff] }
  0xfc   : > { %v3043_v4 = vpack.c.bf16 %v1634_v49, %v1633_v18  ;;  %v936_v61 = vmul.f32 %v3210_v28, %v522_v60  ;;  %v1349_v11 = vadd.f32 %v3213_v29, %v935_v41  ;;  %v524_v25 = vunpack.c.h.bf16 %v279_v58 }
  0xfd   : > { %2687 = vst [vmem:[%s3244_s27 + $0x300] sm:$0xff] %v3042_v52  ;;  %v1636_v10 = vmax.f32 %v1348_v16, 0.0  ;;  %v937_v36 = vmul.f32 %v3251_v34, %v523_v59  ;;  %v525_v3 = vunpack.c.l.bf16 %v280_v9  ;;  %v526_v5 = vunpack.c.h.bf16 %v280_v9 }
  0xfe   : > { %2688 = vst [vmem:[%s3244_s27 + $0x308] sm:$0xff] %v3043_v4  ;;  %v1350_v42 = vadd.f32 %v3216_v30, %v936_v61  ;;  %v1637_v1 = vmax.f32 %v1349_v11, 0.0  ;;  %v938_v33 = vmul.f32 %v3254_v35, %v524_v25  ;;  %v527_v50 = vunpack.c.l.bf16 %v281_v47  ;;  %v283_v11 = vld [vmem:[%s3189_s22 + $0x340] sm:$0xff] }
  0xff   : > { %v3044_v18 = vpack.c.bf16 %v1636_v10, %v1635_v8  ;;  %v1351_v49 = vadd.f32 %v3260_v37, %v937_v36  ;;  %v939_v58 = vmul.f32 %v3270_v43, %v525_v3  ;;  %v940_v60 = vmul.f32 %v3273_v44, %v526_v5 }
 0x100   : > { %v1638_v59 = vmax.f32 %v1350_v42, 0.0  ;;  %v1352_v41 = vadd.f32 %v3263_v38, %v938_v33  ;;  %v528_v9 = vunpack.c.h.bf16 %v281_v47  ;;  %v941_v52 = vmul.f32 %v3287_v54, %v527_v50  ;;  %v284_v50 = vld [vmem:[%s3189_s22 + $0x348] sm:$0xff] }
 0x101   : > { %2689 = vst [vmem:[%s3244_s27 + $0x310] sm:$0xff] %v3044_v18  ;;  %v1639_v16 = vmax.f32 %v1351_v49, 0.0  ;;  %v1353_v4 = vadd.f32 %v3276_v45, %v939_v58  ;;  %v1354_v8 = vadd.f32 %v3279_v46, %v940_v60  ;;  %v529_v61 = vunpack.c.l.bf16 %v282_v24 }
 0x102   : > { %v3045_v25 = vpack.c.bf16 %v1638_v59, %v1637_v1  ;;  %v1640_v10 = vmax.f32 %v1352_v41, 0.0  ;;  %v942_v36 = vmul.f32 %v3290_v55, %v528_v9  ;;  %v1355_v3 = vadd.f32 %v3293_v56, %v941_v52  ;;  %v285_v1 = vld [vmem:[%s3189_s22 + $0x350] sm:$0xff] }
 0x103   : > { %v1641_v47 = vmax.f32 %v1353_v4, 0.0  ;;  %v1642_v5 = vmax.f32 %v1354_v8, 0.0  ;;  %v530_v42 = vunpack.c.h.bf16 %v282_v24  ;;  %v943_v33 = vmul.f32 %v3304_v32, %v529_v61  ;;  %v4313_v4 = vld [vmem:[#allocation6_spill] sm:$0xff] }
 0x104   : > { %2690 = vst [vmem:[%s3244_s27 + $0x318] sm:$0xff] %v3045_v25  ;;  %v3046_v18 = vpack.c.bf16 %v1640_v10, %v1639_v16  ;;  %v1356_v49 = vadd.f32 %v3296_v57, %v942_v36  ;;  %v1643_v58 = vmax.f32 %v1355_v3, 0.0  ;;  %v531_v60 = vunpack.c.l.bf16 %v283_v11  ;;  %v4314_v36 = vld [vmem:[#allocation7_spill] sm:$0xff] }
 0x105   : > { %v3047_v59 = vpack.c.bf16 %v1642_v5, %v1641_v47  ;;  %v944_v41 = vmul.f32 %v3309_v39, %v530_v42  ;;  %v1357_v9 = vadd.f32 %v3312_v40, %v943_v33  ;;  %v532_v52 = vunpack.c.h.bf16 %v283_v11  ;;  %v286_v5 = vld [vmem:[%s3189_s22 + $0x358] sm:$0xff] }
 0x106   : > { %2691 = vst [vmem:[%s3244_s27 + $0x320] sm:$0xff] %v3046_v18  ;;  %v1644_v24 = vmax.f32 %v1356_v49, 0.0  ;;  %v945_v8 = vmul.f32 %v4313_v4, %v531_v60  ;;  %v533_v61 = vunpack.c.l.bf16 %v284_v50  ;;  %v534_v25 = vunpack.c.h.bf16 %v284_v50  ;;  %v4315_v11 = vld [vmem:[#allocation9_spill] sm:$0xff] }
 0x107   : > { %2692 = vst [vmem:[%s3244_s27 + $0x328] sm:$0xff] %v3047_v59  ;;  %v1358_v16 = vadd.f32 %v4273_v63, %v944_v41  ;;  %v1645_v10 = vmax.f32 %v1357_v9, 0.0  ;;  %v946_v3 = vmul.f32 %v4314_v36, %v532_v52  ;;  %v535_v47 = vunpack.c.l.bf16 %v285_v1  ;;  %v4316_v9 = vld [vmem:[#allocation11_spill] sm:$0xff]  ;;  %v4317_v36 = vld [vmem:[#allocation12_spill] sm:$0xff] }
 0x108   : > { %v3048_v42 = vpack.c.bf16 %v1644_v24, %v1643_v58  ;;  %v1359_v33 = vadd.f32 %v3339_v2, %v945_v8  ;;  %v947_v18 = vmul.f32 %v4315_v11, %v533_v61  ;;  %v948_v49 = vmul.f32 %v4265_v48, %v534_v25  ;;  %v287_v8 = vld [vmem:[%s3189_s22 + $0x360] sm:$0xff] }
 0x109   : > { %v1646_v60 = vmax.f32 %v1358_v16, 0.0  ;;  %v1360_v4 = vadd.f32 %v4266_v19, %v946_v3  ;;  %v536_v50 = vunpack.c.h.bf16 %v285_v1  ;;  %v949_v59 = vmul.f32 %v4267_v31, %v535_v47 }
 0x10a   : > { %2693 = vst [vmem:[%s3244_s27 + $0x330] sm:$0xff] %v3048_v42  ;;  %v1647_v41 = vmax.f32 %v1359_v33, 0.0  ;;  %v1361_v52 = vadd.f32 %v4316_v9, %v947_v18  ;;  %v1362_v58 = vadd.f32 %v4317_v36, %v948_v49  ;;  %v537_v24 = vunpack.c.l.bf16 %v286_v5  ;;  %v288_v33 = vld [vmem:[%s3189_s22 + $0x368] sm:$0xff] }
 0x10b   : > { %v3049_v61 = vpack.c.bf16 %v1646_v60, %v1645_v10  ;;  %v1648_v11 = vmax.f32 %v1360_v4, 0.0  ;;  %v950_v25 = vmul.f32 %v3373_v26, %v536_v50  ;;  %v1363_v16 = vadd.f32 %v4259_v6, %v949_v59  ;;  %v289_v4 = vld [vmem:[%s3189_s22 + $0x370] sm:$0xff] }
 0x10c   : > { %v1649_v1 = vmax.f32 %v1361_v52, 0.0  ;;  %v1650_v3 = vmax.f32 %v1362_v58, 0.0  ;;  %v538_v47 = vunpack.c.h.bf16 %v286_v5  ;;  %v951_v42 = vmul.f32 %v4260_v62, %v537_v24 }
 0x10d   : > { %2694 = vst [vmem:[%s3244_s27 + $0x338] sm:$0xff] %v3049_v61  ;;  %v3050_v18 = vpack.c.bf16 %v1648_v11, %v1647_v41  ;;  %v1364_v49 = vadd.f32 %v4261_v53, %v950_v25  ;;  %v1651_v36 = vmax.f32 %v1363_v16, 0.0  ;;  %v539_v9 = vunpack.c.l.bf16 %v287_v8  ;;  %v290_v16 = vld [vmem:[%s3189_s22 + $0x378] sm:$0xff] }
 0x10e   : > { %v3051_v10 = vpack.c.bf16 %v1650_v3, %v1649_v1  ;;  %v952_v60 = vmul.f32 %v3396_v0, %v538_v47  ;;  %v1365_v50 = vadd.f32 %v3400_v51, %v951_v42  ;;  %v540_v59 = vunpack.c.h.bf16 %v287_v8  ;;  %v4318_v8 = vld [vmem:[#allocation2_spill] sm:$0xff] }
 0x10f   : > { %2695 = vst [vmem:[%s3244_s27 + $0x340] sm:$0xff] %v3050_v18  ;;  %v1652_v5 = vmax.f32 %v1364_v49, 0.0  ;;  %v953_v52 = vmul.f32 %v3161_v12, %v539_v9  ;;  %v541_v58 = vunpack.c.l.bf16 %v288_v33  ;;  %v542_v24 = vunpack.c.h.bf16 %v288_v33 }
 0x110   : > { %2696 = vst [vmem:[%s3244_s27 + $0x348] sm:$0xff] %v3051_v10  ;;  %v1366_v11 = vadd.f32 %v3406_v7, %v952_v60  ;;  %v1653_v41 = vmax.f32 %v1365_v50, 0.0  ;;  %v954_v61 = vmul.f32 %v3164_v13, %v540_v59  ;;  %v543_v25 = vunpack.c.l.bf16 %v289_v4  ;;  %v4319_v60 = vld [vmem:[#allocation3_spill] sm:$0xff]  ;;  %v4320_v59 = vld [vmem:[#allocation4_spill] sm:$0xff] }
 0x111   : > { %v3052_v1 = vpack.c.bf16 %v1652_v5, %v1651_v36  ;;  %v1367_v3 = vadd.f32 %v3167_v14, %v953_v52  ;;  %v955_v47 = vmul.f32 %v4318_v8, %v541_v58  ;;  %v956_v42 = vmul.f32 %v3176_v17, %v542_v24  ;;  %v291_v52 = vld [vmem:[%s3189_s22 + $0x380] sm:$0xff] }
 0x112   : > { %v1654_v9 = vmax.f32 %v1366_v11, 0.0  ;;  %v1368_v18 = vadd.f32 %v3170_v15, %v954_v61  ;;  %v544_v33 = vunpack.c.h.bf16 %v289_v4  ;;  %v957_v49 = vmul.f32 %v3192_v20, %v543_v25 }
 0x113   : > { %2697 = vst [vmem:[%s3244_s27 + $0x350] sm:$0xff] %v3052_v1  ;;  %v1655_v10 = vmax.f32 %v1367_v3, 0.0  ;;  %v1369_v50 = vadd.f32 %v4319_v60, %v955_v47  ;;  %v1370_v36 = vadd.f32 %v4320_v59, %v956_v42  ;;  %v545_v5 = vunpack.c.l.bf16 %v290_v16  ;;  %v292_v3 = vld [vmem:[%s3189_s22 + $0x388] sm:$0xff] }
 0x114   : > { %v3053_v58 = vpack.c.bf16 %v1654_v9, %v1653_v41  ;;  %v1656_v8 = vmax.f32 %v1368_v18, 0.0  ;;  %v958_v24 = vmul.f32 %v3195_v21, %v544_v33  ;;  %v1371_v11 = vadd.f32 %v3198_v22, %v957_v49  ;;  %v293_v41 = vld [vmem:[%s3189_s22 + $0x390] sm:$0xff] }
 0x115   : > { %v1657_v4 = vmax.f32 %v1369_v50, 0.0  ;;  %v1658_v61 = vmax.f32 %v1370_v36, 0.0  ;;  %v546_v25 = vunpack.c.h.bf16 %v290_v16  ;;  %v959_v1 = vmul.f32 %v3207_v27, %v545_v5 }
 0x116   : > { %2698 = vst [vmem:[%s3244_s27 + $0x358] sm:$0xff] %v3053_v58  ;;  %v3054_v47 = vpack.c.bf16 %v1656_v8, %v1655_v10  ;;  %v1372_v42 = vadd.f32 %v3201_v23, %v958_v24  ;;  %v1659_v59 = vmax.f32 %v1371_v11, 0.0  ;;  %v547_v60 = vunpack.c.l.bf16 %v291_v52  ;;  %v294_v11 = vld [vmem:[%s3189_s22 + $0x398] sm:$0xff] }
 0x117   : > { %v3055_v9 = vpack.c.bf16 %v1658_v61, %v1657_v4  ;;  %v960_v18 = vmul.f32 %v3210_v28, %v546_v25  ;;  %v1373_v33 = vadd.f32 %v3213_v29, %v959_v1  ;;  %v548_v49 = vunpack.c.h.bf16 %v291_v52 }
 0x118   : > { %2699 = vst [vmem:[%s3244_s27 + $0x360] sm:$0xff] %v3054_v47  ;;  %v1660_v16 = vmax.f32 %v1372_v42, 0.0  ;;  %v961_v50 = vmul.f32 %v3251_v34, %v547_v60  ;;  %v549_v36 = vunpack.c.l.bf16 %v292_v3  ;;  %v550_v5 = vunpack.c.h.bf16 %v292_v3 }
 0x119   : > { %2700 = vst [vmem:[%s3244_s27 + $0x368] sm:$0xff] %v3055_v9  ;;  %v1374_v8 = vadd.f32 %v3216_v30, %v960_v18  ;;  %v1661_v10 = vmax.f32 %v1373_v33, 0.0  ;;  %v962_v58 = vmul.f32 %v3254_v35, %v548_v49  ;;  %v551_v24 = vunpack.c.l.bf16 %v293_v41  ;;  %v295_v33 = vld [vmem:[%s3189_s22 + $0x3a0] sm:$0xff] }
 0x11a   : > { %v3056_v4 = vpack.c.bf16 %v1660_v16, %v1659_v59  ;;  %v1375_v61 = vadd.f32 %v3260_v37, %v961_v50  ;;  %v963_v52 = vmul.f32 %v3270_v43, %v549_v36  ;;  %v964_v25 = vmul.f32 %v3273_v44, %v550_v5 }
 0x11b   : > { %v1662_v60 = vmax.f32 %v1374_v8, 0.0  ;;  %v1376_v1 = vadd.f32 %v3263_v38, %v962_v58  ;;  %v552_v3 = vunpack.c.h.bf16 %v293_v41  ;;  %v965_v47 = vmul.f32 %v3287_v54, %v551_v24  ;;  %v296_v24 = vld [vmem:[%s3189_s22 + $0x3a8] sm:$0xff] }
 0x11c   : > { %2701 = vst [vmem:[%s3244_s27 + $0x370] sm:$0xff] %v3056_v4  ;;  %v1663_v42 = vmax.f32 %v1375_v61, 0.0  ;;  %v1377_v9 = vadd.f32 %v3276_v45, %v963_v52  ;;  %v1378_v59 = vadd.f32 %v3279_v46, %v964_v25  ;;  %v553_v18 = vunpack.c.l.bf16 %v294_v11 }
 0x11d   : > { %v3057_v49 = vpack.c.bf16 %v1662_v60, %v1661_v10  ;;  %v1664_v16 = vmax.f32 %v1376_v1, 0.0  ;;  %v966_v50 = vmul.f32 %v3290_v55, %v552_v3  ;;  %v1379_v36 = vadd.f32 %v3293_v56, %v965_v47  ;;  %v297_v10 = vld [vmem:[%s3189_s22 + $0x3b0] sm:$0xff] }
 0x11e   : > { %v1665_v41 = vmax.f32 %v1377_v9, 0.0  ;;  %v1666_v5 = vmax.f32 %v1378_v59, 0.0  ;;  %v554_v8 = vunpack.c.h.bf16 %v294_v11  ;;  %v967_v58 = vmul.f32 %v3304_v32, %v553_v18  ;;  %v4321_v9 = vld [vmem:[#allocation6_spill] sm:$0xff] }
 0x11f   : > { %2702 = vst [vmem:[%s3244_s27 + $0x378] sm:$0xff] %v3057_v49  ;;  %v3058_v4 = vpack.c.bf16 %v1664_v16, %v1663_v42  ;;  %v1380_v61 = vadd.f32 %v3296_v57, %v966_v50  ;;  %v1667_v52 = vmax.f32 %v1379_v36, 0.0  ;;  %v555_v25 = vunpack.c.l.bf16 %v295_v33  ;;  %v4322_v50 = vld [vmem:[#allocation7_spill] sm:$0xff] }
 0x120   : > { %v3059_v60 = vpack.c.bf16 %v1666_v5, %v1665_v41  ;;  %v968_v1 = vmul.f32 %v3309_v39, %v554_v8  ;;  %v1381_v3 = vadd.f32 %v3312_v40, %v967_v58  ;;  %v556_v47 = vunpack.c.h.bf16 %v295_v33  ;;  %v298_v5 = vld [vmem:[%s3189_s22 + $0x3b8] sm:$0xff] }
 0x121   : > { %2703 = vst [vmem:[%s3244_s27 + $0x380] sm:$0xff] %v3058_v4  ;;  %v1668_v11 = vmax.f32 %v1380_v61, 0.0  ;;  %v969_v59 = vmul.f32 %v4321_v9, %v555_v25  ;;  %v557_v18 = vunpack.c.l.bf16 %v296_v24  ;;  %v558_v49 = vunpack.c.h.bf16 %v296_v24  ;;  %v4323_v33 = vld [vmem:[#allocation9_spill] sm:$0xff] }
 0x122   : > { %2704 = vst [vmem:[%s3244_s27 + $0x388] sm:$0xff] %v3059_v60  ;;  %v1382_v42 = vadd.f32 %v4273_v63, %v968_v1  ;;  %v1669_v16 = vmax.f32 %v1381_v3, 0.0  ;;  %v970_v36 = vmul.f32 %v4322_v50, %v556_v47  ;;  %v559_v41 = vunpack.c.l.bf16 %v297_v10  ;;  %v4324_v3 = vld [vmem:[#allocation11_spill] sm:$0xff]  ;;  %v4325_v50 = vld [vmem:[#allocation12_spill] sm:$0xff] }
 0x123   : > { %v3060_v8 = vpack.c.bf16 %v1668_v11, %v1667_v52  ;;  %v1383_v58 = vadd.f32 %v3339_v2, %v969_v59  ;;  %v971_v4 = vmul.f32 %v4323_v33, %v557_v18  ;;  %v972_v61 = vmul.f32 %v4265_v48, %v558_v49  ;;  %v299_v59 = vld [vmem:[%s3189_s22 + $0x3c0] sm:$0xff] }
 0x124   : > { %v1670_v25 = vmax.f32 %v1382_v42, 0.0  ;;  %v1384_v9 = vadd.f32 %v4266_v19, %v970_v36  ;;  %v560_v24 = vunpack.c.h.bf16 %v297_v10  ;;  %v973_v60 = vmul.f32 %v4267_v31, %v559_v41 }
 0x125   : > { %2705 = vst [vmem:[%s3244_s27 + $0x390] sm:$0xff] %v3060_v8  ;;  %v1671_v1 = vmax.f32 %v1383_v58, 0.0  ;;  %v1385_v47 = vadd.f32 %v4324_v3, %v971_v4  ;;  %v1386_v52 = vadd.f32 %v4325_v50, %v972_v61  ;;  %v561_v11 = vunpack.c.l.bf16 %v298_v5  ;;  %v300_v58 = vld [vmem:[%s3189_s22 + $0x3c8] sm:$0xff] }
 0x126   : > { %v3061_v18 = vpack.c.bf16 %v1670_v25, %v1669_v16  ;;  %v1672_v33 = vmax.f32 %v1384_v9, 0.0  ;;  %v974_v49 = vmul.f32 %v3373_v26, %v560_v24  ;;  %v1387_v42 = vadd.f32 %v4259_v6, %v973_v60  ;;  %v301_v9 = vld [vmem:[%s3189_s22 + $0x3d0] sm:$0xff] }
 0x127   : > { %v1673_v10 = vmax.f32 %v1385_v47, 0.0  ;;  %v1674_v36 = vmax.f32 %v1386_v52, 0.0  ;;  %v562_v41 = vunpack.c.h.bf16 %v298_v5  ;;  %v975_v8 = vmul.f32 %v4260_v62, %v561_v11 }
 0x128   : > { %2706 = vst [vmem:[%s3244_s27 + $0x398] sm:$0xff] %v3061_v18  ;;  %v3062_v4 = vpack.c.bf16 %v1672_v33, %v1671_v1  ;;  %v1388_v61 = vadd.f32 %v4261_v53, %v974_v49  ;;  %v1675_v50 = vmax.f32 %v1387_v42, 0.0  ;;  %v563_v3 = vunpack.c.l.bf16 %v299_v59  ;;  %v302_v42 = vld [vmem:[%s3189_s22 + $0x3d8] sm:$0xff] }
 0x129   : > { %v3063_v16 = vpack.c.bf16 %v1674_v36, %v1673_v10  ;;  %v976_v25 = vmul.f32 %v3396_v0, %v562_v41  ;;  %v1389_v24 = vadd.f32 %v3400_v51, %v975_v8  ;;  %v564_v60 = vunpack.c.h.bf16 %v299_v59  ;;  %v4326_v59 = vld [vmem:[#allocation2_spill] sm:$0xff] }
 0x12a   : > { %2707 = vst [vmem:[%s3244_s27 + $0x3a0] sm:$0xff] %v3062_v4  ;;  %v1676_v5 = vmax.f32 %v1388_v61, 0.0  ;;  %v977_v47 = vmul.f32 %v3161_v12, %v563_v3  ;;  %v565_v52 = vunpack.c.l.bf16 %v300_v58  ;;  %v566_v11 = vunpack.c.h.bf16 %v300_v58 }
 0x12b   : > { %2708 = vst [vmem:[%s3244_s27 + $0x3a8] sm:$0xff] %v3063_v16  ;;  %v1390_v33 = vadd.f32 %v3406_v7, %v976_v25  ;;  %v1677_v1 = vmax.f32 %v1389_v24, 0.0  ;;  %v978_v18 = vmul.f32 %v3164_v13, %v564_v60  ;;  %v567_v49 = vunpack.c.l.bf16 %v301_v9  ;;  %v4327_v25 = vld [vmem:[#allocation3_spill] sm:$0xff]  ;;  %v4328_v60 = vld [vmem:[#allocation4_spill] sm:$0xff] }
 0x12c   : > { %v3064_v10 = vpack.c.bf16 %v1676_v5, %v1675_v50  ;;  %v1391_v36 = vadd.f32 %v3167_v14, %v977_v47  ;;  %v979_v41 = vmul.f32 %v4326_v59, %v565_v52  ;;  %v980_v8 = vmul.f32 %v3176_v17, %v566_v11  ;;  %v303_v47 = vld [vmem:[%s3189_s22 + $0x3e0] sm:$0xff] }
 0x12d   : > { %v1678_v3 = vmax.f32 %v1390_v33, 0.0  ;;  %v1392_v4 = vadd.f32 %v3170_v15, %v978_v18  ;;  %v568_v58 = vunpack.c.h.bf16 %v301_v9  ;;  %v981_v61 = vmul.f32 %v3192_v20, %v567_v49 }
 0x12e   : > { %2709 = vst [vmem:[%s3244_s27 + $0x3b0] sm:$0xff] %v3064_v10  ;;  %v1679_v16 = vmax.f32 %v1391_v36, 0.0  ;;  %v1393_v24 = vadd.f32 %v4327_v25, %v979_v41  ;;  %v1394_v50 = vadd.f32 %v4328_v60, %v980_v8  ;;  %v569_v5 = vunpack.c.l.bf16 %v302_v42  ;;  %v304_v36 = vld [vmem:[%s3189_s22 + $0x3e8] sm:$0xff] }
 0x12f   : > { %v3065_v52 = vpack.c.bf16 %v1678_v3, %v1677_v1  ;;  %v1680_v59 = vmax.f32 %v1392_v4, 0.0  ;;  %v982_v11 = vmul.f32 %v3195_v21, %v568_v58  ;;  %v1395_v33 = vadd.f32 %v3198_v22, %v981_v61  ;;  %v305_v1 = vld [vmem:[%s3189_s22 + $0x3f0] sm:$0xff] }
 0x130   : > { %v1681_v9 = vmax.f32 %v1393_v24, 0.0  ;;  %v1682_v18 = vmax.f32 %v1394_v50, 0.0  ;;  %v570_v49 = vunpack.c.h.bf16 %v302_v42  ;;  %v983_v10 = vmul.f32 %v3207_v27, %v569_v5 }
 0x131   : > { %2710 = vst [vmem:[%s3244_s27 + $0x3b8] sm:$0xff] %v3065_v52  ;;  %v3066_v41 = vpack.c.bf16 %v1680_v59, %v1679_v16  ;;  %v1396_v8 = vadd.f32 %v3201_v23, %v982_v11  ;;  %v1683_v60 = vmax.f32 %v1395_v33, 0.0  ;;  %v571_v25 = vunpack.c.l.bf16 %v303_v47  ;;  %v306_v33 = vld [vmem:[%s3189_s22 + $0x3f8] sm:$0xff] }
 0x132   : > { %v3067_v3 = vpack.c.bf16 %v1682_v18, %v1681_v9  ;;  %v984_v4 = vmul.f32 %v3210_v28, %v570_v49  ;;  %v1397_v58 = vadd.f32 %v3213_v29, %v983_v10  ;;  %v572_v61 = vunpack.c.h.bf16 %v303_v47 }
 0x133   : > { %2711 = vst [vmem:[%s3244_s27 + $0x3c0] sm:$0xff] %v3066_v41  ;;  %v1684_v42 = vmax.f32 %v1396_v8, 0.0  ;;  %v985_v24 = vmul.f32 %v3251_v34, %v571_v25  ;;  %v573_v50 = vunpack.c.l.bf16 %v304_v36  ;;  %v574_v5 = vunpack.c.h.bf16 %v304_v36 }
 0x134   : > { %2712 = vst [vmem:[%s3244_s27 + $0x3c8] sm:$0xff] %v3067_v3  ;;  %v1398_v59 = vadd.f32 %v3216_v30, %v984_v4  ;;  %v1685_v16 = vmax.f32 %v1397_v58, 0.0  ;;  %v986_v52 = vmul.f32 %v3254_v35, %v572_v61  ;;  %v575_v11 = vunpack.c.l.bf16 %v305_v1  ;;  %v307_v58 = vld [vmem:[%s3189_s22 + $0x400] sm:$0xff] }
 0x135   : > { %v3068_v9 = vpack.c.bf16 %v1684_v42, %v1683_v60  ;;  %v1399_v18 = vadd.f32 %v3260_v37, %v985_v24  ;;  %v987_v47 = vmul.f32 %v3270_v43, %v573_v50  ;;  %v988_v49 = vmul.f32 %v3273_v44, %v574_v5 }
 0x136   : > { %v1686_v25 = vmax.f32 %v1398_v59, 0.0  ;;  %v1400_v10 = vadd.f32 %v3263_v38, %v986_v52  ;;  %v576_v36 = vunpack.c.h.bf16 %v305_v1  ;;  %v989_v41 = vmul.f32 %v3287_v54, %v575_v11  ;;  %v308_v11 = vld [vmem:[%s3189_s22 + $0x408] sm:$0xff] }
 0x137   : > { %2713 = vst [vmem:[%s3244_s27 + $0x3d0] sm:$0xff] %v3068_v9  ;;  %v1687_v8 = vmax.f32 %v1399_v18, 0.0  ;;  %v1401_v3 = vadd.f32 %v3276_v45, %v987_v47  ;;  %v1402_v60 = vadd.f32 %v3279_v46, %v988_v49  ;;  %v577_v4 = vunpack.c.l.bf16 %v306_v33 }
 0x138   : > { %v3069_v61 = vpack.c.bf16 %v1686_v25, %v1685_v16  ;;  %v1688_v42 = vmax.f32 %v1400_v10, 0.0  ;;  %v990_v24 = vmul.f32 %v3290_v55, %v576_v36  ;;  %v1403_v50 = vadd.f32 %v3293_v56, %v989_v41  ;;  %v309_v16 = vld [vmem:[%s3189_s22 + $0x410] sm:$0xff] }
 0x139   : > { %v1689_v1 = vmax.f32 %v1401_v3, 0.0  ;;  %v1690_v5 = vmax.f32 %v1402_v60, 0.0  ;;  %v578_v59 = vunpack.c.h.bf16 %v306_v33  ;;  %v991_v52 = vmul.f32 %v3304_v32, %v577_v4  ;;  %v4329_v3 = vld [vmem:[#allocation6_spill] sm:$0xff] }
 0x13a   : > { %2714 = vst [vmem:[%s3244_s27 + $0x3d8] sm:$0xff] %v3069_v61  ;;  %v3070_v9 = vpack.c.bf16 %v1688_v42, %v1687_v8  ;;  %v1404_v18 = vadd.f32 %v3296_v57, %v990_v24  ;;  %v1691_v47 = vmax.f32 %v1403_v50, 0.0  ;;  %v579_v49 = vunpack.c.l.bf16 %v307_v58  ;;  %v4330_v24 = vld [vmem:[#allocation7_spill] sm:$0xff] }
 0x13b   : > { %v3071_v25 = vpack.c.bf16 %v1690_v5, %v1689_v1  ;;  %v992_v10 = vmul.f32 %v3309_v39, %v578_v59  ;;  %v1405_v36 = vadd.f32 %v3312_v40, %v991_v52  ;;  %v580_v41 = vunpack.c.h.bf16 %v307_v58  ;;  %v310_v5 = vld [vmem:[%s3189_s22 + $0x418] sm:$0xff] }
 0x13c   : > { %2715 = vst [vmem:[%s3244_s27 + $0x3e0] sm:$0xff] %v3070_v9  ;;  %v1692_v33 = vmax.f32 %v1404_v18, 0.0  ;;  %v993_v60 = vmul.f32 %v4329_v3, %v579_v49  ;;  %v581_v4 = vunpack.c.l.bf16 %v308_v11  ;;  %v582_v61 = vunpack.c.h.bf16 %v308_v11  ;;  %v4331_v58 = vld [vmem:[#allocation9_spill] sm:$0xff] }
 0x13d   : > { %2716 = vst [vmem:[%s3244_s27 + $0x3e8] sm:$0xff] %v3071_v25  ;;  %v1406_v8 = vadd.f32 %v4273_v63, %v992_v10  ;;  %v1693_v42 = vmax.f32 %v1405_v36, 0.0  ;;  %v994_v50 = vmul.f32 %v4330_v24, %v580_v41  ;;  %v583_v1 = vunpack.c.l.bf16 %v309_v16  ;;  %v4332_v36 = vld [vmem:[#allocation11_spill] sm:$0xff]  ;;  %v4333_v24 = vld [vmem:[#allocation12_spill] sm:$0xff] }
 0x13e   : > { %v3072_v59 = vpack.c.bf16 %v1692_v33, %v1691_v47  ;;  %v1407_v52 = vadd.f32 %v3339_v2, %v993_v60  ;;  %v995_v9 = vmul.f32 %v4331_v58, %v581_v4  ;;  %v996_v18 = vmul.f32 %v4265_v48, %v582_v61  ;;  %v311_v60 = vld [vmem:[%s3189_s22 + $0x420] sm:$0xff] }
 0x13f   : > { %v1694_v49 = vmax.f32 %v1406_v8, 0.0  ;;  %v1408_v3 = vadd.f32 %v4266_v19, %v994_v50  ;;  %v584_v11 = vunpack.c.h.bf16 %v309_v16  ;;  %v997_v25 = vmul.f32 %v4267_v31, %v583_v1 }
 0x140   : > { %2717 = vst [vmem:[%s3244_s27 + $0x3f0] sm:$0xff] %v3072_v59  ;;  %v1695_v10 = vmax.f32 %v1407_v52, 0.0  ;;  %v1409_v41 = vadd.f32 %v4332_v36, %v995_v9  ;;  %v1410_v47 = vadd.f32 %v4333_v24, %v996_v18  ;;  %v585_v33 = vunpack.c.l.bf16 %v310_v5  ;;  %v312_v52 = vld [vmem:[%s3189_s22 + $0x428] sm:$0xff] }
 0x141   : > { %v3073_v4 = vpack.c.bf16 %v1694_v49, %v1693_v42  ;;  %v1696_v58 = vmax.f32 %v1408_v3, 0.0  ;;  %v998_v61 = vmul.f32 %v3373_v26, %v584_v11  ;;  %v1411_v8 = vadd.f32 %v4259_v6, %v997_v25  ;;  %v313_v3 = vld [vmem:[%s3189_s22 + $0x430] sm:$0xff] }
 0x142   : > { %v1697_v16 = vmax.f32 %v1409_v41, 0.0  ;;  %v1698_v50 = vmax.f32 %v1410_v47, 0.0  ;;  %v586_v1 = vunpack.c.h.bf16 %v310_v5  ;;  %v999_v59 = vmul.f32 %v4260_v62, %v585_v33 }
 0x143   : > { %2718 = vst [vmem:[%s3244_s27 + $0x3f8] sm:$0xff] %v3073_v4  ;;  %v3074_v9 = vpack.c.bf16 %v1696_v58, %v1695_v10  ;;  %v1412_v18 = vadd.f32 %v4261_v53, %v998_v61  ;;  %v1699_v24 = vmax.f32 %v1411_v8, 0.0  ;;  %v587_v36 = vunpack.c.l.bf16 %v311_v60  ;;  %v314_v8 = vld [vmem:[%s3189_s22 + $0x438] sm:$0xff] }
 0x144   : > { %v3075_v42 = vpack.c.bf16 %v1698_v50, %v1697_v16  ;;  %v1000_v49 = vmul.f32 %v3396_v0, %v586_v1  ;;  %v1413_v11 = vadd.f32 %v3400_v51, %v999_v59  ;;  %v588_v25 = vunpack.c.h.bf16 %v311_v60  ;;  %v4334_v60 = vld [vmem:[#allocation2_spill] sm:$0xff] }
 0x145   : > { %2719 = vst [vmem:[%s3244_s27 + $0x400] sm:$0xff] %v3074_v9  ;;  %v1700_v5 = vmax.f32 %v1412_v18, 0.0  ;;  %v1001_v41 = vmul.f32 %v3161_v12, %v587_v36  ;;  %v589_v47 = vunpack.c.l.bf16 %v312_v52  ;;  %v590_v33 = vunpack.c.h.bf16 %v312_v52  ;;  %v4335_v18 = vld [vmem:[#allocation3_spill] sm:$0xff] }
 0x146   : > { %2720 = vst [vmem:[%s3244_s27 + $0x408] sm:$0xff] %v3075_v42  ;;  %v1414_v58 = vadd.f32 %v3406_v7, %v1000_v49  ;;  %v1701_v10 = vmax.f32 %v1413_v11, 0.0  ;;  %v1002_v4 = vmul.f32 %v3164_v13, %v588_v25  ;;  %v591_v61 = vunpack.c.l.bf16 %v313_v3  ;;  %v4336_v49 = vld [vmem:[#allocation4_spill] sm:$0xff] }
 0x147   : > { %v3076_v16 = vpack.c.bf16 %v1700_v5, %v1699_v24  ;;  %v1415_v50 = vadd.f32 %v3167_v14, %v1001_v41  ;;  %v1003_v1 = vmul.f32 %v4334_v60, %v589_v47  ;;  %v1004_v59 = vmul.f32 %v3176_v17, %v590_v33  ;;  %v315_v14 = vld [vmem:[%s3189_s22 + $0x440] sm:$0xff]  ;;  %v316_v33 = vld [vmem:[%s3189_s22 + $0x448] sm:$0xff] }
 0x148   : > { %v1702_v12 = vmax.f32 %v1414_v58, 0.0  ;;  %v1416_v36 = vadd.f32 %v3170_v15, %v1002_v4  ;;  %v592_v52 = vunpack.c.h.bf16 %v313_v3  ;;  %v1005_v9 = vmul.f32 %v3192_v20, %v591_v61 }
 0x149   : > { %2721 = vst [vmem:[%s3244_s27 + $0x410] sm:$0xff] %v3076_v16  ;;  %v1703_v13 = vmax.f32 %v1415_v50, 0.0  ;;  %v1417_v42 = vadd.f32 %v4335_v18, %v1003_v1  ;;  %v1418_v24 = vadd.f32 %v4336_v49, %v1004_v59  ;;  %v593_v11 = vunpack.c.l.bf16 %v314_v8 }
 0x14a   : > { %v3077_v25 = vpack.c.bf16 %v1702_v12, %v1701_v10  ;;  %v1704_v5 = vmax.f32 %v1416_v36, 0.0  ;;  %v1006_v17 = vmul.f32 %v3195_v21, %v592_v52  ;;  %v1419_v15 = vadd.f32 %v3198_v22, %v1005_v9  ;;  %v317_v10 = vld [vmem:[%s3189_s22 + $0x450] sm:$0xff]  ;;  %v318_v9 = vld [vmem:[%s3189_s22 + $0x458] sm:$0xff] }
 0x14b   : > { %v1705_v3 = vmax.f32 %v1417_v42, 0.0  ;;  %v1706_v41 = vmax.f32 %v1418_v24, 0.0  ;;  %v594_v20 = vunpack.c.h.bf16 %v314_v8  ;;  %v1007_v47 = vmul.f32 %v3207_v27, %v593_v11 }
 0x14c   : > { %2722 = vst [vmem:[%s3244_s27 + $0x418] sm:$0xff] %v3077_v25  ;;  %v3078_v58 = vpack.c.bf16 %v1704_v5, %v1703_v13  ;;  %v1420_v4 = vadd.f32 %v3201_v23, %v1006_v17  ;;  %v1707_v61 = vmax.f32 %v1419_v15, 0.0  ;;  %v595_v16 = vunpack.c.l.bf16 %v315_v14 }
 0x14d   : > { %v3079_v50 = vpack.c.bf16 %v1706_v41, %v1705_v3  ;;  %v1008_v21 = vmul.f32 %v3210_v28, %v594_v20  ;;  %v1421_v22 = vadd.f32 %v3213_v29, %v1007_v47  ;;  %v596_v60 = vunpack.c.h.bf16 %v315_v14  ;;  %v320_v3 = vld [vmem:[%s3189_s22 + $0x468] sm:$0xff]  ;;  %v321_v47 = vld [vmem:[%s3189_s22 + $0x470] sm:$0xff] }
 0x14e   : > { %2723 = vst [vmem:[%s3244_s27 + $0x420] sm:$0xff] %v3078_v58  ;;  %v1708_v8 = vmax.f32 %v1420_v4, 0.0  ;;  %v1009_v27 = vmul.f32 %v3251_v34, %v595_v16  ;;  %v597_v1 = vunpack.c.l.bf16 %v316_v33  ;;  %v598_v59 = vunpack.c.h.bf16 %v316_v33 }
 0x14f   : > { %2724 = vst [vmem:[%s3244_s27 + $0x428] sm:$0xff] %v3079_v50  ;;  %v1422_v23 = vadd.f32 %v3216_v30, %v1008_v21  ;;  %v1709_v12 = vmax.f32 %v1421_v22, 0.0  ;;  %v1010_v36 = vmul.f32 %v3254_v35, %v596_v60  ;;  %v599_v52 = vunpack.c.l.bf16 %v317_v10  ;;  %v4338_v21 = vld [vmem:[#allocation7_spill] sm:$0xff] }
 0x150   : > { %v3080_v28 = vpack.c.bf16 %v1708_v8, %v1707_v61  ;;  %v1423_v29 = vadd.f32 %v3260_v37, %v1009_v27  ;;  %v1011_v13 = vmul.f32 %v3270_v43, %v597_v1  ;;  %v1012_v18 = vmul.f32 %v3273_v44, %v598_v59  ;;  %v319_v37 = vld [vmem:[%s3189_s22 + $0x460] sm:$0xff]  ;;  %v322_v8 = vld [vmem:[%s3189_s22 + $0x478] sm:$0xff] }
 0x151   : > { %v1710_v34 = vmax.f32 %v1422_v23, 0.0  ;;  %v1424_v42 = vadd.f32 %v3263_v38, %v1010_v36  ;;  %v600_v49 = vunpack.c.h.bf16 %v317_v10  ;;  %v1013_v30 = vmul.f32 %v3287_v54, %v599_v52  ;;  %v4337_v61 = vld [vmem:[#allocation6_spill] sm:$0xff] }
 0x152   : > { %2725 = vst [vmem:[%s3244_s27 + $0x430] sm:$0xff] %v3080_v28  ;;  %v1711_v35 = vmax.f32 %v1423_v29, 0.0  ;;  %v1425_v24 = vadd.f32 %v3276_v45, %v1011_v13  ;;  %v1426_v11 = vadd.f32 %v3279_v46, %v1012_v18  ;;  %v601_v14 = vunpack.c.l.bf16 %v318_v9  ;;  %v4341_v29 = vld [vmem:[#allocation12_spill] sm:$0xff] }
 0x153   : > { %v3081_v43 = vpack.c.bf16 %v1710_v34, %v1709_v12  ;;  %v1712_v25 = vmax.f32 %v1424_v42, 0.0  ;;  %v1014_v44 = vmul.f32 %v3290_v55, %v600_v49  ;;  %v1427_v38 = vadd.f32 %v3293_v56, %v1013_v30 }
 0x154   : > { %v1713_v5 = vmax.f32 %v1425_v24, 0.0  ;;  %v1714_v17 = vmax.f32 %v1426_v11, 0.0  ;;  %v602_v54 = vunpack.c.h.bf16 %v318_v9  ;;  %v1015_v15 = vmul.f32 %v3304_v32, %v601_v14  ;;  %v4340_v9 = vld [vmem:[#allocation11_spill] sm:$0xff] }
 0x155   : > { %2726 = vst [vmem:[%s3244_s27 + $0x438] sm:$0xff] %v3081_v43  ;;  %v3082_v45 = vpack.c.bf16 %v1712_v25, %v1711_v35  ;;  %v1428_v46 = vadd.f32 %v3296_v57, %v1014_v44  ;;  %v1715_v41 = vmax.f32 %v1427_v38, 0.0  ;;  %v603_v20 = vunpack.c.l.bf16 %v319_v37 }
 0x156   : > { %v3083_v33 = vpack.c.bf16 %v1714_v17, %v1713_v5  ;;  %v1016_v55 = vmul.f32 %v3309_v39, %v602_v54  ;;  %v1429_v56 = vadd.f32 %v3312_v40, %v1015_v15  ;;  %v604_v58 = vunpack.c.h.bf16 %v319_v37  ;;  %v4339_v40 = vld [vmem:[#allocation9_spill] sm:$0xff] }
 0x157   : > { %2727 = vst [vmem:[%s3244_s27 + $0x440] sm:$0xff] %v3082_v45  ;;  %v1716_v4 = vmax.f32 %v1428_v46, 0.0  ;;  %v1017_v32 = vmul.f32 %v4337_v61, %v603_v20  ;;  %v605_v16 = vunpack.c.l.bf16 %v320_v3  ;;  %v606_v10 = vunpack.c.h.bf16 %v320_v3 }
 0x158   : > { %2728 = vst [vmem:[%s3244_s27 + $0x448] sm:$0xff] %v3083_v33  ;;  %v1430_v57 = vadd.f32 %v4273_v63, %v1016_v55  ;;  %v1717_v50 = vmax.f32 %v1429_v56, 0.0  ;;  %v1018_v22 = vmul.f32 %v4338_v21, %v604_v58  ;;  %v607_v60 = vunpack.c.l.bf16 %v321_v47 }
 0x159   : > { %v3084_v27 = vpack.c.bf16 %v1716_v4, %v1715_v41  ;;  %v1431_v39 = vadd.f32 %v3339_v2, %v1017_v32  ;;  %v1019_v1 = vmul.f32 %v4339_v40, %v605_v16  ;;  %v1020_v59 = vmul.f32 %v4265_v48, %v606_v10 }
 0x15a   : > { %v1718_v23 = vmax.f32 %v1430_v57, 0.0  ;;  %v1432_v12 = vadd.f32 %v4266_v19, %v1018_v22  ;;  %v608_v36 = vunpack.c.h.bf16 %v321_v47  ;;  %v1021_v52 = vmul.f32 %v4267_v31, %v607_v60 }
 0x15b   : > { %2729 = vst [vmem:[%s3244_s27 + $0x450] sm:$0xff] %v3084_v27  ;;  %v1719_v63 = vmax.f32 %v1431_v39, 0.0  ;;  %v1433_v28 = vadd.f32 %v4340_v9, %v1019_v1  ;;  %v1434_v13 = vadd.f32 %v4341_v29, %v1020_v59  ;;  %v609_v18 = vunpack.c.l.bf16 %v322_v8 }
 0x15c   : > { %v3085_v2 = vpack.c.bf16 %v1718_v23, %v1717_v50  ;;  %v1720_v34 = vmax.f32 %v1432_v12, 0.0  ;;  %v1022_v48 = vmul.f32 %v3373_v26, %v608_v36  ;;  %v1435_v42 = vadd.f32 %v4259_v6, %v1021_v52 }
 0x15d   : > { %v1721_v19 = vmax.f32 %v1433_v28, 0.0  ;;  %v1722_v49 = vmax.f32 %v1434_v13, 0.0  ;;  %v610_v30 = vunpack.c.h.bf16 %v322_v8  ;;  %v1023_v31 = vmul.f32 %v4260_v62, %v609_v18 }
 0x15e   : > { %2730 = vst [vmem:[%s3244_s27 + $0x458] sm:$0xff] %v3085_v2  ;;  %v3086_v35 = vpack.c.bf16 %v1720_v34, %v1719_v63  ;;  %v1436_v24 = vadd.f32 %v4261_v53, %v1022_v48  ;;  %v1723_v11 = vmax.f32 %v1435_v42, 0.0 }
 0x15f   : > { %v3087_v14 = vpack.c.bf16 %v1722_v49, %v1721_v19  ;;  %v1024_v37 = vmul.f32 %v3396_v0, %v610_v30  ;;  %v1437_v43 = vadd.f32 %v3400_v51, %v1023_v31 }
 0x160   : > { %2731 = vst [vmem:[%s3244_s27 + $0x460] sm:$0xff] %v3086_v35  ;;  %v1724_v26 = vmax.f32 %v1436_v24, 0.0 }
 0x161   : > { %2732 = vst [vmem:[%s3244_s27 + $0x468] sm:$0xff] %v3087_v14  ;;  %v1438_v6 = vadd.f32 %v3406_v7, %v1024_v37  ;;  %v1725_v25 = vmax.f32 %v1437_v43, 0.0 }
 0x162   : > { %v3088_v44 = vpack.c.bf16 %v1724_v26, %v1723_v11 }
 0x163   : > { %v1726_v38 = vmax.f32 %v1438_v6, 0.0 }
 0x164   : > { %2733 = vst [vmem:[%s3244_s27 + $0x470] sm:$0xff] %v3088_v44 }
 0x165   : > { %v3089_v62 = vpack.c.bf16 %v1726_v38, %v1725_v25 }
 0x167   : > { %2734 = vst [vmem:[%s3244_s27 + $0x478] sm:$0xff] %v3089_v62 }
 0x168 PF: > { %s13_s12 = sadd.s32 1, %s3105_s12  }
 0x169   : > { %p10_p4 = scmp.ge.s32.totalorder %s13_s12, 4  }
 0x16b   :  { %12 = sbr.rel (!%p10_p4) target bundleno = 1 (0x1), region = 62 }

// kernel: forward.7
= control target key start
LH: loop header
LB: loop body
LE: loop exit
PB: predicated region body
PF: predicated region fallthrough
CT: control target
= control target key end

     0   :  { %s2525_s9 = smov 0   ;;  %s2527_s10 = smov 0   ;;  %s2973_s0 = inlined_call_operand.vmem [shape: bf16[576,576], index: 0, kind: input, shape index: {}]   ;;  %s2974_s1 = inlined_call_operand.vmem [shape: bf16[576,128], index: 1, kind: input, shape index: {}]   ;;  %s2975_s2 = inlined_call_operand.vmem [shape: bf16[576,128], index: 2, kind: output, shape index: {}]  }
   0x1   :  { %s2529_s11 = smov 0  }
   0x2 LB: > { %s24_s12 = sadd.s32 1, %s2503_s10  ;;  %p1895_p0 = scmp.ge.s32.totalorder %s2507_s11, 1  ;;  %s2507_s11 = sphi %s2529_s11, %s12_s11   ;;  %s2503_s10 = sphi %s2527_s10, %s2977_s10   ;;  %s2499_s9 = sphi %s2525_s9, %s2976_s9  }
   0x3   : > { %p26_p1 = scmp.ge.s32.totalorder %s24_s12, 2  ;;  %p137_p2 = scmp.lt.s32.totalorder %s2507_s11, 3 }
   0x5   : > { %s2979_s12 = smov (%p26_p1, %s24_s12), 0  ;;  %p138_p3 = pnand %p1895_p0, %p137_p2 }
   0x6   : > { %s167_s3 = smul.u32 (!%p138_p3), 36, %s2499_s9 }
   0x7   : > { %141 = sbr.rel (%p138_p3) target bundleno = 457 (0x1c9), region = 28 }
   0x8   : > { %p168_p4 = scmp.lt.s32.totalorder (!%p138_p3), %s167_s3, 71 }
   0xc   : > { %v2323_v0 = vld [vmem:[%s2974_s1 + $0x38] sm:$0xff]   ;;  %v2509_v1 = vmov 0   ;;  %v2325_v3 = vld [vmem:[%s2974_s1 + $0x30] sm:$0xff]   ;;  %v2327_v5 = vld [vmem:[%s2974_s1 + $0x28] sm:$0xff]   ;;  %s2981_s3 = smov (!%p168_p4, %s167_s3), 71  ;;  %vm1034_vm0 = vcmask 523264  }
   0xd   : > { %1089 = vmatprep.subr.bf16.mxu0 %v2509_v1  ;;  %1266 = vmatprep.subr.bf16.mxu1 %v2509_v1  ;;  %v2324_v2 = vld [vmem:[%s2974_s1 + $0xb8] sm:$0xff]   ;;  %v2326_v4 = vld [vmem:[%s2974_s1 + $0xb0] sm:$0xff]   ;;  %v2328_v6 = vld [vmem:[%s2974_s1 + $0xa8] sm:$0xff]   ;;  %s2297_s19 = smul.u32 20, %s2981_s3 }
   0xe   : > { %1090 = vmatpush1.bf16.msra.mxu0 %v2323_v0  ;;  %1267 = vmatpush1.bf16.msra.mxu1 %v2324_v2  ;;  %v2329_v7 = vld [vmem:[%s2974_s1 + $0x20] sm:$0xff]   ;;  %v2331_v9 = vld [vmem:[%s2974_s1 + $0x18] sm:$0xff]   ;;  %v2333_v11 = vld [vmem:[%s2974_s1 + $0x10] sm:$0xff]  }
   0xf   : > { %1091 = vmatprep.subr.bf16.mxu0 %v2509_v1  ;;  %1268 = vmatprep.subr.bf16.mxu1 %v2509_v1  ;;  %v2330_v8 = vld [vmem:[%s2974_s1 + $0xa0] sm:$0xff]   ;;  %v2332_v10 = vld [vmem:[%s2974_s1 + $0x98] sm:$0xff]   ;;  %v2334_v12 = vld [vmem:[%s2974_s1 + $0x90] sm:$0xff]   ;;  %s2619_s26 = scalar_lea.vmem %s2973_s0, %s2297_s19 }
  0x10   : > { %v2335_v13 = vld [vmem:[%s2974_s1 + $0x8] sm:$0xff]   ;;  %v2337_v15 = vld [vmem:[%s2974_s1] sm:$0xff]   ;;  %v2339_v17 = vld [vmem:[%s2974_s1 + $0x78] sm:$0xff]  }
  0x11   : > { %v2336_v14 = vld [vmem:[%s2974_s1 + $0x88] sm:$0xff]   ;;  %v2338_v16 = vld [vmem:[%s2974_s1 + $0x80] sm:$0xff]   ;;  %v2340_v18 = vld [vmem:[%s2974_s1 + $0xf8] sm:$0xff]  }
  0x12   : > { %1092 = vmatpush1.bf16.msra.mxu0 %v2325_v3  ;;  %1269 = vmatpush1.bf16.msra.mxu1 %v2326_v4  ;;  %v2357_v19 = vld [vmem:[%s2619_s26 + $0x4] ss:$20 sps:$4 sm:$0xff]   ;;  %v2341_v20 = vld [vmem:[%s2974_s1 + $0x70] sm:$0xff]   ;;  %v2360_v21 = vld [vmem:[%s2619_s26 + $0xc] ss:$20 sps:$4 sm:$0xff]  }
  0x13   : > { %1093 = vmatprep.subr.bf16.mxu0 %v2509_v1  ;;  %1270 = vmatprep.subr.bf16.mxu1 %v2509_v1  ;;  %v2342_v22 = vld [vmem:[%s2974_s1 + $0xf0] sm:$0xff]   ;;  %v2343_v23 = vld [vmem:[%s2974_s1 + $0x68] sm:$0xff]   ;;  %v2345_v25 = vld [vmem:[%s2974_s1 + $0x60] sm:$0xff]  }
  0x14   : > { %1121 = vmatprep.mubr.bf16.mxu0 %v2357_v19  ;;  %1298 = vmatprep.mubr.bf16.mxu1 %v2360_v21  ;;  %v2344_v24 = vld [vmem:[%s2974_s1 + $0xe8] sm:$0xff]   ;;  %v2346_v26 = vld [vmem:[%s2974_s1 + $0xe0] sm:$0xff]   ;;  %v2347_v27 = vld [vmem:[%s2974_s1 + $0x58] sm:$0xff]  }
  0x15   : > { %v2348_v28 = vld [vmem:[%s2974_s1 + $0xd8] sm:$0xff]   ;;  %v2349_v29 = vld [vmem:[%s2974_s1 + $0x50] sm:$0xff]   ;;  %v2351_v31 = vld [vmem:[%s2974_s1 + $0x48] sm:$0xff]  }
  0x16   : > { %1094 = vmatpush1.bf16.msra.mxu0 %v2327_v5  ;;  %1271 = vmatpush1.bf16.msra.mxu1 %v2328_v6  ;;  %v2350_v30 = vld [vmem:[%s2974_s1 + $0xd0] sm:$0xff]   ;;  %v2352_v32 = vld [vmem:[%s2974_s1 + $0xc8] sm:$0xff]   ;;  %v2353_v33 = vld [vmem:[%s2974_s1 + $0x40] sm:$0xff]  }
  0x17   : > { %1095 = vmatprep.subr.bf16.mxu0 %v2509_v1  ;;  %1272 = vmatprep.subr.bf16.mxu1 %v2509_v1  ;;  %v2354_v34 = vld [vmem:[%s2974_s1 + $0xc0] sm:$0xff]   ;;  %v2361_v35 = vld [vmem:[%s2974_s1 + $0x118] sm:$0xff]   ;;  %v2364_v39 = vld [vmem:[%s2619_s26 + $0x34] ss:$20 sps:$4 sm:$0xff]  }
  0x18   : > { %v2355_v36 = vld [vmem:[%s2619_s26] ss:$20 sps:$4 sm:$0xff]   ;;  %v2358_v37 = vld [vmem:[%s2619_s26 + $0x8] ss:$20 sps:$4 sm:$0xff]   ;;  %v2367_v43 = vld [vmem:[%s2619_s26 + $0x30] ss:$20 sps:$4 sm:$0xff]  }
  0x19   : > { %v2362_v38 = vld [vmem:[%s2619_s26 + $0x2c] ss:$20 sps:$4 sm:$0xff]   ;;  %v2386_v40 = vld [vmem:[%s2974_s1 + $0x110] sm:$0xff]   ;;  %v2366_v42 = vld [vmem:[%s2619_s26 + $0x28] ss:$20 sps:$4 sm:$0xff]  }
  0x1a   : > { %1096 = vmatpush1.bf16.msra.mxu0 %v2329_v7  ;;  %1273 = vmatpush1.bf16.msra.mxu1 %v2330_v8  ;;  %v2417_v41 = vld [vmem:[%s2974_s1 + $0x108] sm:$0xff]   ;;  %v2370_v45 = vld [vmem:[%s2619_s26 + $0x5c] ss:$20 sps:$4 sm:$0xff]   ;;  %v2442_v46 = vld [vmem:[%s2974_s1 + $0x100] sm:$0xff]  }
  0x1b   : > { %1097 = vmatprep.subr.bf16.mxu0 %v2509_v1  ;;  %1274 = vmatprep.subr.bf16.mxu1 %v2509_v1  ;;  %v2368_v44 = vld [vmem:[%s2619_s26 + $0x54] ss:$20 sps:$4 sm:$0xff]   ;;  %v2372_v47 = vld [vmem:[%s2619_s26 + $0x50] ss:$20 sps:$4 sm:$0xff]   ;;  %v2373_v48 = vld [vmem:[%s2619_s26 + $0x58] ss:$20 sps:$4 sm:$0xff]  }
  0x1c   : > { %v2374_v49 = vld [vmem:[%s2619_s26 + $0x7c] ss:$20 sps:$4 sm:$0xff]   ;;  %v2376_v50 = vld [vmem:[%s2619_s26 + $0x84] ss:$20 sps:$4 sm:$0xff]   ;;  %v2379_v52 = vld [vmem:[%s2619_s26 + $0x80] ss:$20 sps:$4 sm:$0xff]  }
  0x1d   : > { %v2378_v51 = vld [vmem:[%s2619_s26 + $0x78] ss:$20 sps:$4 sm:$0xff]   ;;  %v2384_v55 = vld [vmem:[%s2619_s26 + $0xa0] ss:$20 sps:$4 sm:$0xff]   ;;  %v2385_v56 = vld [vmem:[%s2619_s26 + $0xa8] ss:$20 sps:$4 sm:$0xff]  }
  0x1e   : > { %1098 = vmatpush1.bf16.msra.mxu0 %v2331_v9  ;;  %1275 = vmatpush1.bf16.msra.mxu1 %v2332_v10  ;;  %v2380_v53 = vld [vmem:[%s2619_s26 + $0xa4] ss:$20 sps:$4 sm:$0xff]   ;;  %v2382_v54 = vld [vmem:[%s2619_s26 + $0xac] ss:$20 sps:$4 sm:$0xff]   ;;  %v2389_v58 = vld [vmem:[%s2619_s26 + $0xd4] ss:$20 sps:$4 sm:$0xff]  }
  0x1f   : > { %1099 = vmatprep.subr.bf16.mxu0 %v2509_v1  ;;  %1276 = vmatprep.subr.bf16.mxu1 %v2509_v1  ;;  %v2387_v57 = vld [vmem:[%s2619_s26 + $0xcc] ss:$20 sps:$4 sm:$0xff]   ;;  %v2391_v59 = vld [vmem:[%s2619_s26 + $0xc8] ss:$20 sps:$4 sm:$0xff]   ;;  %v2392_v60 = vld [vmem:[%s2619_s26 + $0xd0] ss:$20 sps:$4 sm:$0xff]  }
  0x20   : > { %v2393_v61 = vld [vmem:[%s2619_s26 + $0xf4] ss:$20 sps:$4 sm:$0xff]   ;;  %v2395_v62 = vld [vmem:[%s2619_s26 + $0xfc] ss:$20 sps:$4 sm:$0xff]   ;;  %v2398_v0 = vld [vmem:[%s2619_s26 + $0xf8] ss:$20 sps:$4 sm:$0xff]  }
  0x21   : > { %v2397_v63 = vld [vmem:[%s2619_s26 + $0xf0] ss:$20 sps:$4 sm:$0xff]   ;;  %v2403_v3 = vld [vmem:[%s2619_s26 + $0x118] ss:$20 sps:$4 sm:$0xff]   ;;  %v2404_v4 = vld [vmem:[%s2619_s26 + $0x120] ss:$20 sps:$4 sm:$0xff]  }
  0x22   : > { %1100 = vmatpush1.bf16.msra.mxu0 %v2333_v11  ;;  %1277 = vmatpush1.bf16.msra.mxu1 %v2334_v12  ;;  %v2401_v2 = vld [vmem:[%s2619_s26 + $0x124] ss:$20 sps:$4 sm:$0xff]   ;;  %v2407_v6 = vld [vmem:[%s2619_s26 + $0x14c] ss:$20 sps:$4 sm:$0xff]   ;;  %v2410_v8 = vld [vmem:[%s2619_s26 + $0x148] ss:$20 sps:$4 sm:$0xff]  }
  0x23   : > { %1101 = vmatprep.subr.bf16.mxu0 %v2509_v1  ;;  %1278 = vmatprep.subr.bf16.mxu1 %v2509_v1  ;;  %v2405_v5 = vld [vmem:[%s2619_s26 + $0x144] ss:$20 sps:$4 sm:$0xff]   ;;  %v2409_v7 = vld [vmem:[%s2619_s26 + $0x140] ss:$20 sps:$4 sm:$0xff]   ;;  %v2415_v11 = vld [vmem:[%s2619_s26 + $0x168] ss:$20 sps:$4 sm:$0xff]  }
  0x24   : > { %v2411_v9 = vld [vmem:[%s2619_s26 + $0x16c] ss:$20 sps:$4 sm:$0xff]   ;;  %v2413_v10 = vld [vmem:[%s2619_s26 + $0x174] ss:$20 sps:$4 sm:$0xff]   ;;  %v2416_v12 = vld [vmem:[%s2619_s26 + $0x170] ss:$20 sps:$4 sm:$0xff]  }
  0x25   : > { %v2428_v19 = vld [vmem:[%s2619_s26 + $0x1b8] ss:$20 sps:$4 sm:$0xff]  }
  0x26   : > { %1102 = vmatpush1.bf16.msra.mxu0 %v2335_v13  ;;  %1279 = vmatpush1.bf16.msra.mxu1 %v2336_v14  ;;  %v2418_v13 = vld [vmem:[%s2619_s26 + $0x194] ss:$20 sps:$4 sm:$0xff]   ;;  %v2420_v14 = vld [vmem:[%s2619_s26 + $0x19c] ss:$20 sps:$4 sm:$0xff]   ;;  %v2430_v21 = vld [vmem:[%s2619_s26 + $0x1e4] ss:$20 sps:$4 sm:$0xff]  }
  0x27   : > { %1103 = vmatprep.subr.bf16.mxu0 %v2509_v1  ;;  %1280 = vmatprep.subr.bf16.mxu1 %v2509_v1 }
  0x2a   : > { %1104 = vmatpush1.bf16.msra.mxu0 %v2337_v15  ;;  %1281 = vmatpush1.bf16.msra.mxu1 %v2338_v16  ;;  %v2422_v15 = vld [vmem:[%s2619_s26 + $0x190] ss:$20 sps:$4 sm:$0xff]   ;;  %v2423_v16 = vld [vmem:[%s2619_s26 + $0x198] ss:$20 sps:$4 sm:$0xff]  }
  0x2b   : > { %1105 = vmatprep.subr.bf16.mxu0 %v2509_v1  ;;  %1282 = vmatprep.subr.bf16.mxu1 %v2509_v1 }
  0x2e   : > { %1106 = vmatpush2.bf16.msra.mxu0 %v2339_v17  ;;  %1283 = vmatpush2.bf16.msra.mxu1 %v2340_v18  ;;  %v2424_v17 = vld [vmem:[%s2619_s26 + $0x1bc] ss:$20 sps:$4 sm:$0xff]   ;;  %v2426_v18 = vld [vmem:[%s2619_s26 + $0x1c4] ss:$20 sps:$4 sm:$0xff]  }
  0x2f   : > { %1107 = vmatprep.subr.bf16.mxu0 %v2509_v1  ;;  %1284 = vmatprep.subr.bf16.mxu1 %v2509_v1 }
  0x32   : > { %1108 = vmatpush2.bf16.msra.mxu0 %v2341_v20  ;;  %1285 = vmatpush2.bf16.msra.mxu1 %v2342_v22  ;;  %v2429_v20 = vld [vmem:[%s2619_s26 + $0x1c0] ss:$20 sps:$4 sm:$0xff]  }
  0x33   : > { %1109 = vmatprep.subr.bf16.mxu0 %v2509_v1  ;;  %1286 = vmatprep.subr.bf16.mxu1 %v2509_v1  ;;  %v2432_v22 = vld [vmem:[%s2619_s26 + $0x1ec] ss:$20 sps:$4 sm:$0xff]  }
  0x36   : > { %1110 = vmatpush2.bf16.msra.mxu0 %v2343_v23  ;;  %1287 = vmatpush2.bf16.msra.mxu1 %v2344_v24  ;;  %v2434_v23 = vld [vmem:[%s2619_s26 + $0x1e0] ss:$20 sps:$4 sm:$0xff]   ;;  %v2435_v24 = vld [vmem:[%s2619_s26 + $0x1e8] ss:$20 sps:$4 sm:$0xff]  }
  0x37   : > { %1111 = vmatprep.subr.bf16.mxu0 %v2509_v1  ;;  %1288 = vmatprep.subr.bf16.mxu1 %v2509_v1 }
  0x3a   : > { %1112 = vmatpush2.bf16.msra.mxu0 %v2345_v25  ;;  %1289 = vmatpush2.bf16.msra.mxu1 %v2346_v26  ;;  %v2436_v25 = vld [vmem:[%s2619_s26 + $0x20c] ss:$20 sps:$4 sm:$0xff]   ;;  %v2438_v26 = vld [vmem:[%s2619_s26 + $0x214] ss:$20 sps:$4 sm:$0xff]  }
  0x3b   : > { %1113 = vmatprep.subr.bf16.mxu0 %v2509_v1  ;;  %1290 = vmatprep.subr.bf16.mxu1 %v2509_v1 }
  0x3e   : > { %1114 = vmatpush2.bf16.msra.mxu0 %v2347_v27  ;;  %1291 = vmatpush2.bf16.msra.mxu1 %v2348_v28  ;;  %v2440_v27 = vld [vmem:[%s2619_s26 + $0x208] ss:$20 sps:$4 sm:$0xff]   ;;  %v2441_v28 = vld [vmem:[%s2619_s26 + $0x210] ss:$20 sps:$4 sm:$0xff]  }
  0x3f   : > { %1115 = vmatprep.subr.bf16.mxu0 %v2509_v1  ;;  %1292 = vmatprep.subr.bf16.mxu1 %v2509_v1 }
  0x42   : > { %1116 = vmatpush2.bf16.msra.mxu0 %v2349_v29  ;;  %1293 = vmatpush2.bf16.msra.mxu1 %v2350_v30  ;;  %v2443_v29 = vld [vmem:[%s2619_s26 + $0x234] ss:$20 sps:$4 sm:$0xff]   ;;  %v2445_v30 = vld [vmem:[%s2619_s26 + $0x23c] ss:$20 sps:$4 sm:$0xff]  }
  0x43   : > { %1117 = vmatprep.subr.bf16.mxu0 %v2509_v1  ;;  %1294 = vmatprep.subr.bf16.mxu1 %v2509_v1 }
  0x46   : > { %1118 = vmatpush2.bf16.msra.mxu0 %v2351_v31  ;;  %1295 = vmatpush2.bf16.msra.mxu1 %v2352_v32  ;;  %v2447_v31 = vld [vmem:[%s2619_s26 + $0x230] ss:$20 sps:$4 sm:$0xff]   ;;  %v2448_v32 = vld [vmem:[%s2619_s26 + $0x238] ss:$20 sps:$4 sm:$0xff]  }
  0x47   : > { %1119 = vmatprep.subr.bf16.mxu0 %v2509_v1  ;;  %1296 = vmatprep.subr.bf16.mxu1 %v2509_v1  ;;  %v2399_v1 = vld [vmem:[%s2619_s26 + $0x11c] ss:$20 sps:$4 sm:$0xff]  }
  0x4a   : > { %1120 = vmatpush2.bf16.msra.mxu0 %v2353_v33  ;;  %1297 = vmatpush2.bf16.msra.mxu1 %v2354_v34  ;;  %v2449_v33 = vld [vmem:[%s2619_s26 + $0x25c] ss:$20 sps:$4 sm:$0xff]   ;;  %v2451_v34 = vld [vmem:[%s2619_s26 + $0x264] ss:$20 sps:$4 sm:$0xff]  }
  0x4b   : > { %2245 = vmatprep.subr.bf16.mxu0 %v2361_v35  ;;  %2289 = vmatprep.subr.bf16.mxu1 %v2361_v35 }
  0x4d   : > { %1122 = vmatmul.mubr.bf16.vlgmr.msra.gmra.mxu0 %v2355_v36  ;;  %1299 = vmatmul.mubr.bf16.vlgmr.msra.gmra.mxu1 %v2358_v37  ;;  %v2454_v36 = vld [vmem:[%s2619_s26 + $0x260] ss:$20 sps:$4 sm:$0xff]   ;;  %v2455_v37 = vld [vmem:[%s2619_s26 + $0x284] ss:$20 sps:$4 sm:$0xff]  }
  0x4e   : > { %2246 = vmatpush3.bf16.msra.mxu0 %v2361_v35  ;;  %1129 = vmatprep.mubr.bf16.mxu0 %v2362_v38  ;;  %v2457_v38 = vld [vmem:[%s2619_s26 + $0x28c] ss:$20 sps:$4 sm:$0xff]  }
  0x4f   : > { %1306 = vmatprep.mubr.bf16.mxu1 %v2364_v39  ;;  %2293 = vmatpush3.bf16.msra.mxu1 %v2361_v35  ;;  %v2453_v35 = vld [vmem:[%s2619_s26 + $0x258] ss:$20 sps:$4 sm:$0xff]   ;;  %v2459_v39 = vld [vmem:[%s2619_s26 + $0x280] ss:$20 sps:$4 sm:$0xff]  }
  0x50   : > { %2247 = vmatprep.subr.bf16.mxu0 %v2386_v40  ;;  %2290 = vmatprep.subr.bf16.mxu1 %v2386_v40 }
  0x52   : > { %2248 = vmatpush3.bf16.msra.mxu0 %v2386_v40 }
  0x53   : > { %2249 = vmatprep.subr.bf16.mxu0 %v2417_v41  ;;  %2294 = vmatpush3.bf16.msra.mxu1 %v2386_v40  ;;  %v2460_v40 = vld [vmem:[%s2619_s26 + $0x288] ss:$20 sps:$4 sm:$0xff]  }
  0x54   : > { %2291 = vmatprep.subr.bf16.mxu1 %v2417_v41 }
  0x55   : > { %1130 = vmatmul.mubr.bf16.gmra.mxu0 %v2366_v42  ;;  %1307 = vmatmul.mubr.bf16.gmra.mxu1 %v2367_v43  ;;  %v2463_v42 = vld [vmem:[%s2619_s26 + $0x2b4] ss:$20 sps:$4 sm:$0xff]  }
  0x56   : > { %1137 = vmatprep.mubr.bf16.mxu0 %v2368_v44  ;;  %1314 = vmatprep.mubr.bf16.mxu1 %v2370_v45  ;;  %v2465_v43 = vld [vmem:[%s2619_s26 + $0x2a8] ss:$20 sps:$4 sm:$0xff]   ;;  %v2466_v44 = vld [vmem:[%s2619_s26 + $0x2b0] ss:$20 sps:$4 sm:$0xff]  }
  0x57   : > { %2250 = vmatpush3.bf16.msra.mxu0 %v2417_v41  ;;  %2295 = vmatpush3.bf16.msra.mxu1 %v2417_v41  ;;  %v2461_v41 = vld [vmem:[%s2619_s26 + $0x2ac] ss:$20 sps:$4 sm:$0xff]   ;;  %v2467_v45 = vld [vmem:[%s2619_s26 + $0x10] ss:$20 sps:$4 sm:$0xff]  }
  0x58   : > { %2251 = vmatprep.subr.bf16.mxu0 %v2442_v46  ;;  %2292 = vmatprep.subr.bf16.mxu1 %v2442_v46 }
  0x5b   : > { %2252 = vmatpush3.bf16.msra.mxu0 %v2442_v46  ;;  %2296 = vmatpush3.bf16.msra.mxu1 %v2442_v46  ;;  %v2468_v46 = vld [vmem:[%s2619_s26 + $0x1a0] ss:$20 sps:$4 sm:$0xff]  }
  0x5d   : > { %1138 = vmatmul.mubr.bf16.gmra.mxu0 %v2372_v47  ;;  %1315 = vmatmul.mubr.bf16.gmra.mxu1 %v2373_v48  ;;  %v2469_v47 = vld [vmem:[%s2619_s26 + $0x38] ss:$20 sps:$4 sm:$0xff]   ;;  %v2470_v48 = vld [vmem:[%s2619_s26 + $0x1c8] ss:$20 sps:$4 sm:$0xff]  }
  0x5e   : > { %1145 = vmatprep.mubr.bf16.mxu0 %v2374_v49  ;;  %1322 = vmatprep.mubr.bf16.mxu1 %v2376_v50  ;;  %v2471_v49 = vld [vmem:[%s2619_s26 + $0x60] ss:$20 sps:$4 sm:$0xff]   ;;  %v2472_v50 = vld [vmem:[%s2619_s26 + $0x1f0] ss:$20 sps:$4 sm:$0xff]  }
  0x65   : > { %1146 = vmatmul.mubr.bf16.gmra.mxu0 %v2378_v51  ;;  %1323 = vmatmul.mubr.bf16.gmra.mxu1 %v2379_v52  ;;  %v2473_v51 = vld [vmem:[%s2619_s26 + $0x88] ss:$20 sps:$4 sm:$0xff]   ;;  %v2474_v52 = vld [vmem:[%s2619_s26 + $0x218] ss:$20 sps:$4 sm:$0xff]  }
  0x66   : > { %1153 = vmatprep.mubr.bf16.mxu0 %v2380_v53  ;;  %1330 = vmatprep.mubr.bf16.mxu1 %v2382_v54  ;;  %v2475_v53 = vld [vmem:[%s2619_s26 + $0xb0] ss:$20 sps:$4 sm:$0xff]   ;;  %v2476_v54 = vld [vmem:[%s2619_s26 + $0x240] ss:$20 sps:$4 sm:$0xff]  }
  0x6d   : > { %1154 = vmatmul.mubr.bf16.gmra.mxu0 %v2384_v55  ;;  %1331 = vmatmul.mubr.bf16.gmra.mxu1 %v2385_v56  ;;  %v2477_v55 = vld [vmem:[%s2619_s26 + $0xd8] ss:$20 sps:$4 sm:$0xff]   ;;  %v2478_v56 = vld [vmem:[%s2619_s26 + $0x268] ss:$20 sps:$4 sm:$0xff]  }
  0x6e   : > { %1161 = vmatprep.mubr.bf16.mxu0 %v2387_v57  ;;  %1338 = vmatprep.mubr.bf16.mxu1 %v2389_v58  ;;  %v2479_v57 = vld [vmem:[%s2619_s26 + $0x100] ss:$20 sps:$4 sm:$0xff]   ;;  %v2480_v58 = vld [vmem:[%s2619_s26 + $0x290] ss:$20 sps:$4 sm:$0xff]  }
  0x75   : > { %1162 = vmatmul.mubr.bf16.gmra.mxu0 %v2391_v59  ;;  %1339 = vmatmul.mubr.bf16.gmra.mxu1 %v2392_v60  ;;  %v2481_v59 = vld [vmem:[%s2619_s26 + $0x128] ss:$20 sps:$4 sm:$0xff]   ;;  %v2482_v60 = vld [vmem:[%s2619_s26 + $0x2b8] ss:$20 sps:$4 sm:$0xff]  }
  0x76   : > { %1169 = vmatprep.mubr.bf16.mxu0 %v2393_v61  ;;  %1346 = vmatprep.mubr.bf16.mxu1 %v2395_v62  ;;  %v2483_v61 = vld [vmem:[%s2619_s26 + $0x150] ss:$20 sps:$4 sm:$0xff]   ;;  %v2484_v62 = vld [vmem:[%s2619_s26 + $0x178] ss:$20 sps:$4 sm:$0xff]   ;;  %s1897_s26 = sshll.u32 %s2981_s3, 2 }
  0x77   : > { %s2900_s20 = scalar_lea.vmem %s2975_s2, %s1897_s26 }
  0x7d   : > { %1170 = vmatmul.mubr.bf16.gmra.mxu0 %v2397_v63  ;;  %1347 = vmatmul.mubr.bf16.gmra.mxu1 %v2398_v0 }
  0x7e   : > { %1177 = vmatprep.mubr.bf16.mxu0 %v2399_v1  ;;  %1354 = vmatprep.mubr.bf16.mxu1 %v2401_v2 }
  0x85   : > { %1178 = vmatmul.mubr.bf16.gmra.mxu0 %v2403_v3  ;;  %1355 = vmatmul.mubr.bf16.gmra.mxu1 %v2404_v4 }
  0x86   : > { %1185 = vmatprep.mubr.bf16.mxu0 %v2405_v5  ;;  %1362 = vmatprep.mubr.bf16.mxu1 %v2407_v6 }
  0x8d   : > { %1186 = vmatmul.mubr.bf16.gmra.mxu0 %v2409_v7  ;;  %1363 = vmatmul.mubr.bf16.gmra.mxu1 %v2410_v8 }
  0x8e   : > { %1193 = vmatprep.mubr.bf16.mxu0 %v2411_v9  ;;  %1370 = vmatprep.mubr.bf16.mxu1 %v2413_v10 }
  0x95   : > { %1194 = vmatmul.mubr.bf16.gmra.mxu0 %v2415_v11  ;;  %1371 = vmatmul.mubr.bf16.gmra.mxu1 %v2416_v12 }
  0x96   : > { %1201 = vmatprep.mubr.bf16.mxu0 %v2418_v13  ;;  %1378 = vmatprep.mubr.bf16.mxu1 %v2420_v14 }
  0x9d   : > { %1202 = vmatmul.mubr.bf16.gmra.mxu0 %v2422_v15  ;;  %1379 = vmatmul.mubr.bf16.gmra.mxu1 %v2423_v16 }
  0x9e   : > { %1209 = vmatprep.mubr.bf16.mxu0 %v2424_v17  ;;  %1386 = vmatprep.mubr.bf16.mxu1 %v2426_v18 }
  0xa5   : > { %1210 = vmatmul.mubr.bf16.gmra.mxu0 %v2428_v19  ;;  %1387 = vmatmul.mubr.bf16.gmra.mxu1 %v2429_v20 }
  0xa6   : > { %1217 = vmatprep.mubr.bf16.mxu0 %v2430_v21  ;;  %1394 = vmatprep.mubr.bf16.mxu1 %v2432_v22 }
  0xad   : > { %1218 = vmatmul.mubr.bf16.gmra.mxu0 %v2434_v23  ;;  %1395 = vmatmul.mubr.bf16.gmra.mxu1 %v2435_v24 }
  0xae   : > { %1225 = vmatprep.mubr.bf16.mxu0 %v2436_v25  ;;  %1402 = vmatprep.mubr.bf16.mxu1 %v2438_v26 }
  0xb5   : > { %1226 = vmatmul.mubr.bf16.gmra.mxu0 %v2440_v27  ;;  %1403 = vmatmul.mubr.bf16.gmra.mxu1 %v2441_v28 }
  0xb6   : > { %1233 = vmatprep.mubr.bf16.mxu0 %v2443_v29  ;;  %1410 = vmatprep.mubr.bf16.mxu1 %v2445_v30 }
  0xbd   : > { %1234 = vmatmul.mubr.bf16.gmra.mxu0 %v2447_v31  ;;  %1411 = vmatmul.mubr.bf16.gmra.mxu1 %v2448_v32 }
  0xbe   : > { %1241 = vmatprep.mubr.bf16.mxu0 %v2449_v33  ;;  %1418 = vmatprep.mubr.bf16.mxu1 %v2451_v34 }
  0xc5   : > { %1242 = vmatmul.mubr.bf16.gmra.mxu0 %v2453_v35  ;;  %1419 = vmatmul.mubr.bf16.gmra.mxu1 %v2454_v36 }
  0xc6   : > { %1249 = vmatprep.mubr.bf16.mxu0 %v2455_v37  ;;  %1426 = vmatprep.mubr.bf16.mxu1 %v2457_v38 }
  0xcd   : > { %1250 = vmatmul.mubr.bf16.gmra.mxu0 %v2459_v39  ;;  %1427 = vmatmul.mubr.bf16.gmra.mxu1 %v2460_v40 }
  0xce   : > { %1257 = vmatprep.mubr.bf16.mxu0 %v2461_v41  ;;  %1434 = vmatprep.mubr.bf16.mxu1 %v2463_v42 }
  0xd5   : > { %1258 = vmatmul.mubr.bf16.gmra.mxu0 %v2465_v43  ;;  %1435 = vmatmul.mubr.bf16.gmra.mxu1 %v2466_v44 }
  0xd6   : > { %2253 = vmatprep.mubr.msk.bf16.mxu0 %vm1034_vm0, %v2467_v45  ;;  %2273 = vmatprep.mubr.msk.bf16.mxu1 %vm1034_vm0, %v2468_v46 }
  0xdd   : > { %2254 = vmatmul.mubr.msk.bf16.vlgmr.msra.gmra.mxu0 %vm1034_vm0, %v2469_v47  ;;  %2274 = vmatmul.mubr.msk.bf16.vlgmr.msra.gmra.mxu1 %vm1034_vm0, %v2470_v48 }
  0xde   : > { %2257 = vmatprep.mubr.msk.bf16.mxu0 %vm1034_vm0, %v2471_v49  ;;  %2277 = vmatprep.mubr.msk.bf16.mxu1 %vm1034_vm0, %v2472_v50 }
  0xe5   : > { %2258 = vmatmul.mubr.msk.bf16.gmra.mxu0 %vm1034_vm0, %v2473_v51  ;;  %2278 = vmatmul.mubr.msk.bf16.gmra.mxu1 %vm1034_vm0, %v2474_v52 }
  0xe6   : > { %2261 = vmatprep.mubr.msk.bf16.mxu0 %vm1034_vm0, %v2475_v53  ;;  %2281 = vmatprep.mubr.msk.bf16.mxu1 %vm1034_vm0, %v2476_v54 }
  0xed   : > { %2262 = vmatmul.mubr.msk.bf16.gmra.mxu0 %vm1034_vm0, %v2477_v55  ;;  %2282 = vmatmul.mubr.msk.bf16.gmra.mxu1 %vm1034_vm0, %v2478_v56 }
  0xee   : > { %2265 = vmatprep.mubr.msk.bf16.mxu0 %vm1034_vm0, %v2479_v57  ;;  %2285 = vmatprep.mubr.msk.bf16.mxu1 %vm1034_vm0, %v2480_v58 }
  0xf5   : > { %2266 = vmatmul.mubr.msk.bf16.gmra.mxu0 %vm1034_vm0, %v2481_v59  ;;  %2286 = vmatmul.mubr.msk.bf16.gmra.mxu1 %vm1034_vm0, %v2482_v60 }
  0xf6   : > { %2269 = vmatprep.mubr.msk.bf16.mxu0 %vm1034_vm0, %v2483_v61 }
  0xfd   : > { %2270 = vmatmul.mubr.msk.bf16.gmra.mxu0 %vm1034_vm0, %v2484_v62 }
 0x10d   : > { %v1123_v63 = vpop.f32.mrf.mxu0  ;;  %v1300_v0 = vpop.f32.mrf.mxu1 }
 0x10e   : > { %v2802_v1 = vadd.f32 %v1300_v0, %v1123_v63 }
 0x10f   : > { %v1125_v2 = vpop.f32.mrf.mxu0  ;;  %v1302_v3 = vpop.f32.mrf.mxu1 }
 0x111   : > { %v1126_v4 = vpop.f32.mrf.mxu0  ;;  %v1303_v5 = vpop.f32.mrf.mxu1 }
 0x112   : > { %v2804_v6 = vadd.f32 %v1303_v5, %v1126_v4 }
 0x113   : > { %v1128_v7 = vpop.f32.mrf.mxu0  ;;  %v1305_v8 = vpop.f32.mrf.mxu1 }
 0x115   : > { %v1131_v9 = vpop.f32.mrf.mxu0  ;;  %v1308_v10 = vpop.f32.mrf.mxu1 }
 0x116   : > { %v2806_v11 = vadd.f32 %v1308_v10, %v1131_v9 }
 0x117   : > { %v1133_v12 = vpop.f32.mrf.mxu0  ;;  %v1310_v13 = vpop.f32.mrf.mxu1 }
 0x119   : > { %v1134_v14 = vpop.f32.mrf.mxu0  ;;  %v1311_v15 = vpop.f32.mrf.mxu1 }
 0x11a   : > { %v2808_v16 = vadd.f32 %v1311_v15, %v1134_v14 }
 0x11b   : > { %v1136_v17 = vpop.f32.mrf.mxu0  ;;  %v1313_v18 = vpop.f32.mrf.mxu1 }
 0x11d   : > { %v1139_v19 = vpop.f32.mrf.mxu0  ;;  %v1316_v20 = vpop.f32.mrf.mxu1 }
 0x11e   : > { %v2810_v21 = vadd.f32 %v1316_v20, %v1139_v19 }
 0x11f   : > { %v1141_v22 = vpop.f32.mrf.mxu0  ;;  %v1318_v23 = vpop.f32.mrf.mxu1 }
 0x121   : > { %v1142_v24 = vpop.f32.mrf.mxu0  ;;  %v1319_v25 = vpop.f32.mrf.mxu1 }
 0x122   : > { %v2812_v26 = vadd.f32 %v1319_v25, %v1142_v24 }
 0x123   : > { %v1144_v27 = vpop.f32.mrf.mxu0  ;;  %v1321_v28 = vpop.f32.mrf.mxu1 }
 0x125   : > { %v1147_v29 = vpop.f32.mrf.mxu0  ;;  %v1324_v30 = vpop.f32.mrf.mxu1 }
 0x126   : > { %v2814_v31 = vadd.f32 %v1324_v30, %v1147_v29 }
 0x127   : > { %v1149_v32 = vpop.f32.mrf.mxu0  ;;  %v1326_v33 = vpop.f32.mrf.mxu1 }
 0x129   : > { %v1150_v34 = vpop.f32.mrf.mxu0  ;;  %v1327_v35 = vpop.f32.mrf.mxu1 }
 0x12a   : > { %v2816_v36 = vadd.f32 %v1327_v35, %v1150_v34 }
 0x12b   : > { %v1152_v37 = vpop.f32.mrf.mxu0  ;;  %v1329_v38 = vpop.f32.mrf.mxu1 }
 0x12d   : > { %v1155_v39 = vpop.f32.mrf.mxu0  ;;  %v1332_v40 = vpop.f32.mrf.mxu1 }
 0x12e   : > { %v2818_v41 = vadd.f32 %v1332_v40, %v1155_v39 }
 0x12f   : > { %v1157_v42 = vpop.f32.mrf.mxu0  ;;  %v1334_v43 = vpop.f32.mrf.mxu1 }
 0x131   : > { %v1158_v44 = vpop.f32.mrf.mxu0  ;;  %v1335_v45 = vpop.f32.mrf.mxu1 }
 0x132   : > { %v2820_v46 = vadd.f32 %v1335_v45, %v1158_v44 }
 0x133   : > { %v1160_v47 = vpop.f32.mrf.mxu0  ;;  %v1337_v48 = vpop.f32.mrf.mxu1 }
 0x135   : > { %v1163_v49 = vpop.f32.mrf.mxu0  ;;  %v1340_v50 = vpop.f32.mrf.mxu1 }
 0x136   : > { %v2822_v51 = vadd.f32 %v1340_v50, %v1163_v49 }
 0x137   : > { %v1165_v52 = vpop.f32.mrf.mxu0  ;;  %v1342_v53 = vpop.f32.mrf.mxu1 }
 0x139   : > { %v1166_v54 = vpop.f32.mrf.mxu0  ;;  %v1343_v55 = vpop.f32.mrf.mxu1 }
 0x13a   : > { %v2824_v56 = vadd.f32 %v1343_v55, %v1166_v54 }
 0x13b   : > { %v1168_v57 = vpop.f32.mrf.mxu0  ;;  %v1345_v58 = vpop.f32.mrf.mxu1 }
 0x13d   : > { %v1171_v59 = vpop.f32.mrf.mxu0  ;;  %v1348_v60 = vpop.f32.mrf.mxu1 }
 0x13e   : > { %v2826_v61 = vadd.f32 %v1348_v60, %v1171_v59 }
 0x13f   : > { %v1173_v62 = vpop.f32.mrf.mxu0  ;;  %v1350_v63 = vpop.f32.mrf.mxu1 }
 0x141   : > { %v1174_v0 = vpop.f32.mrf.mxu0  ;;  %v1351_v2 = vpop.f32.mrf.mxu1 }
 0x142   : > { %v2828_v3 = vadd.f32 %v1351_v2, %v1174_v0 }
 0x143   : > { %v1176_v4 = vpop.f32.mrf.mxu0  ;;  %v1353_v5 = vpop.f32.mrf.mxu1 }
 0x145   : > { %v1179_v7 = vpop.f32.mrf.mxu0  ;;  %v1356_v8 = vpop.f32.mrf.mxu1 }
 0x146   : > { %v2830_v9 = vadd.f32 %v1356_v8, %v1179_v7 }
 0x147   : > { %v1181_v10 = vpop.f32.mrf.mxu0  ;;  %v1358_v12 = vpop.f32.mrf.mxu1 }
 0x149   : > { %v1182_v13 = vpop.f32.mrf.mxu0  ;;  %v1359_v14 = vpop.f32.mrf.mxu1 }
 0x14a   : > { %v2832_v15 = vadd.f32 %v1359_v14, %v1182_v13 }
 0x14b   : > { %v1184_v17 = vpop.f32.mrf.mxu0  ;;  %v1361_v18 = vpop.f32.mrf.mxu1 }
 0x14d   : > { %v1187_v19 = vpop.f32.mrf.mxu0  ;;  %v1364_v20 = vpop.f32.mrf.mxu1 }
 0x14e   : > { %v2834_v22 = vadd.f32 %v1364_v20, %v1187_v19 }
 0x14f   : > { %v1189_v23 = vpop.f32.mrf.mxu0  ;;  %v1366_v24 = vpop.f32.mrf.mxu1 }
 0x151   : > { %v1190_v25 = vpop.f32.mrf.mxu0  ;;  %v1367_v27 = vpop.f32.mrf.mxu1 }
 0x152   : > { %v2836_v28 = vadd.f32 %v1367_v27, %v1190_v25 }
 0x153   : > { %v1192_v29 = vpop.f32.mrf.mxu0  ;;  %v1369_v30 = vpop.f32.mrf.mxu1 }
 0x155   : > { %v1195_v32 = vpop.f32.mrf.mxu0  ;;  %v1372_v33 = vpop.f32.mrf.mxu1 }
 0x156   : > { %v2838_v34 = vadd.f32 %v1372_v33, %v1195_v32 }
 0x157   : > { %v1197_v35 = vpop.f32.mrf.mxu0  ;;  %v1374_v37 = vpop.f32.mrf.mxu1 }
 0x159   : > { %v1198_v38 = vpop.f32.mrf.mxu0  ;;  %v1375_v39 = vpop.f32.mrf.mxu1 }
 0x15a   : > { %v2840_v40 = vadd.f32 %v1375_v39, %v1198_v38 }
 0x15b   : > { %v1200_v42 = vpop.f32.mrf.mxu0  ;;  %v1377_v43 = vpop.f32.mrf.mxu1 }
 0x15d   : > { %v1203_v44 = vpop.f32.mrf.mxu0  ;;  %v1380_v45 = vpop.f32.mrf.mxu1 }
 0x15e   : > { %v2842_v47 = vadd.f32 %v1380_v45, %v1203_v44 }
 0x15f   : > { %v1205_v48 = vpop.f32.mrf.mxu0  ;;  %v1382_v49 = vpop.f32.mrf.mxu1 }
 0x161   : > { %v1206_v50 = vpop.f32.mrf.mxu0  ;;  %v1383_v52 = vpop.f32.mrf.mxu1 }
 0x162   : > { %v2844_v53 = vadd.f32 %v1383_v52, %v1206_v50 }
 0x163   : > { %v1208_v54 = vpop.f32.mrf.mxu0  ;;  %v1385_v55 = vpop.f32.mrf.mxu1 }
 0x165   : > { %v1211_v57 = vpop.f32.mrf.mxu0  ;;  %v1388_v58 = vpop.f32.mrf.mxu1 }
 0x167   : > { %v1213_v59 = vpop.f32.mrf.mxu0  ;;  %v1390_v60 = vpop.f32.mrf.mxu1 }
 0x169   : > { %v1214_v62 = vpop.f32.mrf.mxu0  ;;  %v1391_v63 = vpop.f32.mrf.mxu1 }
 0x16b   : > { %v1216_v0 = vpop.f32.mrf.mxu0  ;;  %v1393_v2 = vpop.f32.mrf.mxu1 }
 0x16d   : > { %v2846_v4 = vpop.f32.mrf.mxu0  ;;  %v2848_v5 = vpop.f32.mrf.mxu1 }
 0x16f   : > { %v1221_v7 = vpop.f32.mrf.mxu0  ;;  %v1398_v8 = vpop.f32.mrf.mxu1 }
 0x171   : > { %v2850_v10 = vpop.f32.mrf.mxu0  ;;  %v2852_v12 = vpop.f32.mrf.mxu1 }
 0x173   : > { %v1224_v13 = vpop.f32.mrf.mxu0  ;;  %v1401_v14 = vpop.f32.mrf.mxu1 }
 0x175   : > { %v2854_v17 = vpop.f32.mrf.mxu0  ;;  %v2856_v18 = vpop.f32.mrf.mxu1 }
 0x177   : > { %v1229_v19 = vpop.f32.mrf.mxu0  ;;  %v1406_v20 = vpop.f32.mrf.mxu1 }
 0x179   : > { %v2858_v23 = vpop.f32.mrf.mxu0  ;;  %v2860_v24 = vpop.f32.mrf.mxu1 }
 0x17b   : > { %v1232_v25 = vpop.f32.mrf.mxu0  ;;  %v1409_v27 = vpop.f32.mrf.mxu1 }
 0x17d   : > { %v2862_v29 = vpop.f32.mrf.mxu0  ;;  %v2864_v30 = vpop.f32.mrf.mxu1 }
 0x17f   : > { %v1237_v32 = vpop.f32.mrf.mxu0  ;;  %v1414_v33 = vpop.f32.mrf.mxu1 }
 0x181   : > { %v2866_v35 = vpop.f32.mrf.mxu0  ;;  %v2868_v37 = vpop.f32.mrf.mxu1 }
 0x183   : > { %v1240_v38 = vpop.f32.mrf.mxu0  ;;  %v1417_v39 = vpop.f32.mrf.mxu1 }
 0x185   : > { %v2870_v42 = vpop.f32.mrf.mxu0  ;;  %v2872_v43 = vpop.f32.mrf.mxu1 }
 0x187   : > { %v1245_v44 = vpop.f32.mrf.mxu0  ;;  %v1422_v45 = vpop.f32.mrf.mxu1 }
 0x189   : > { %v2874_v48 = vpop.f32.mrf.mxu0  ;;  %v2876_v49 = vpop.f32.mrf.mxu1 }
 0x18b   : > { %v1248_v50 = vpop.f32.mrf.mxu0  ;;  %v1425_v52 = vpop.f32.mrf.mxu1 }
 0x18c   : > { %v1389_v50 = vadd.f32 %v1388_v58, %v1211_v57  ;;  %v1392_v52 = vadd.f32 %v1391_v63, %v1214_v62 }
 0x18d   : > { %v2878_v54 = vpop.f32.mrf.mxu0  ;;  %v2880_v55 = vpop.f32.mrf.mxu1 }
 0x18f   : > { %v1253_v59 = vpop.f32.mrf.mxu0  ;;  %v1430_v60 = vpop.f32.mrf.mxu1 }
 0x191   : > { %v2882_v0 = vpop.f32.mrf.mxu0  ;;  %v2884_v2 = vpop.f32.mrf.mxu1 }
 0x193   : > { %v1256_v7 = vpop.f32.mrf.mxu0  ;;  %v1433_v8 = vpop.f32.mrf.mxu1 }
 0x195   : > { %v2886_v13 = vpop.f32.mrf.mxu0  ;;  %v2888_v14 = vpop.f32.mrf.mxu1 }
 0x197   : > { %v1261_v19 = vpop.f32.mrf.mxu0  ;;  %v1438_v20 = vpop.f32.mrf.mxu1 }
 0x199   : > { %v2890_v25 = vpop.f32.mrf.mxu0  ;;  %v2892_v27 = vpop.f32.mrf.mxu1 }
 0x19b   : > { %v1264_v32 = vpop.f32.mrf.mxu0  ;;  %v1441_v33 = vpop.f32.mrf.mxu1 }
 0x19d   : > { %v2255_v38 = vpop.f32.mrf.mxu0  ;;  %v2275_v39 = vpop.f32.mrf.mxu1 }
 0x19e   : > { %v1486_v60 = vadd.f32 %v2255_v38, %v2806_v11  ;;  %v1566_v19 = vadd.f32 %v2275_v39, %v1389_v50 }
 0x19f   : > { %v1477_v44 = vpop.f32.mrf.mxu0  ;;  %v1557_v45 = vpop.f32.mrf.mxu1 }
 0x1a0   : > { %v1478_v57 = vadd.f32 %v1477_v44, %v2802_v1  ;;  %v1405_v1 = vadd.f32 %v2856_v18, %v2854_v17 }
 0x1a1   : > { %v2256_v59 = vpop.f32.mrf.mxu0  ;;  %v2276_v8 = vpop.f32.mrf.mxu1 }
 0x1a2   : > { %v1489_v7 = vadd.f32 %v2256_v59, %v2808_v16  ;;  %v1569_v20 = vadd.f32 %v2276_v8, %v1392_v52  ;;  %v1558_v16 = vadd.f32 %v1557_v45, %v2842_v47 }
 0x1a3   : > { %v1480_v32 = vpop.f32.mrf.mxu0  ;;  %v1560_v11 = vpop.f32.mrf.mxu1 }
 0x1a4   : > { %v2124_v58 = vpack.c.bf16 %v1489_v7, %v1486_v60  ;;  %v1481_v62 = vadd.f32 %v1480_v32, %v2804_v6  ;;  %v2174_v63 = vpack.c.bf16 %v1569_v20, %v1566_v19  ;;  %v1561_v33 = vadd.f32 %v1560_v11, %v2844_v53 }
 0x1a5   : > { %v2259_v38 = vpop.f32.mrf.mxu0  ;;  %v2279_v50 = vpop.f32.mrf.mxu1  ;;  %v1408_v6 = vadd.f32 %v2860_v24, %v2858_v23  ;;  %v1397_v60 = vadd.f32 %v2848_v5, %v2846_v4  ;;  %v1400_v7 = vadd.f32 %v2852_v12, %v2850_v10 }
 0x1a6   : > { %2206 = vst [vmem:[%s2900_s20 + $0x8] sm:$0xff] %v2124_v58   ;;  %v2119_v39 = vpack.c.bf16 %v1481_v62, %v1478_v57  ;;  %2216 = vst [vmem:[%s2900_s20 + $0x58] sm:$0xff] %v2174_v63   ;;  %v2169_v52 = vpack.c.bf16 %v1561_v33, %v1558_v16  ;;  %v1502_v44 = vadd.f32 %v2259_v38, %v2814_v31 }
 0x1a7   : > { %v1493_v59 = vpop.f32.mrf.mxu0  ;;  %v1573_v8 = vpop.f32.mrf.mxu1  ;;  %v1582_v19 = vadd.f32 %v2279_v50, %v1405_v1  ;;  %v1413_v38 = vadd.f32 %v2864_v30, %v2862_v29 }
 0x1a8   : > { %2120 = vst [vmem:[%s2900_s20] sm:$0xff] %v2119_v39   ;;  %2215 = vst [vmem:[%s2900_s20 + $0x50] sm:$0xff] %v2169_v52   ;;  %v1494_v23 = vadd.f32 %v1493_v59, %v2810_v21  ;;  %v1421_v21 = vadd.f32 %v2872_v43, %v2870_v42  ;;  %v1416_v39 = vadd.f32 %v2868_v37, %v2866_v35 }
 0x1a9   : > { %v2260_v47 = vpop.f32.mrf.mxu0  ;;  %v2280_v45 = vpop.f32.mrf.mxu1 }
 0x1aa   : > { %v1505_v53 = vadd.f32 %v2260_v47, %v2816_v36  ;;  %v1585_v17 = vadd.f32 %v2280_v45, %v1408_v6  ;;  %v1574_v36 = vadd.f32 %v1573_v8, %v1397_v60  ;;  %v1429_v60 = vadd.f32 %v2880_v55, %v2878_v54 }
 0x1ab   : > { %v1496_v18 = vpop.f32.mrf.mxu0  ;;  %v1576_v20 = vpop.f32.mrf.mxu1 }
 0x1ac   : > { %v2134_v24 = vpack.c.bf16 %v1505_v53, %v1502_v44  ;;  %v1497_v31 = vadd.f32 %v1496_v18, %v2812_v26  ;;  %v2184_v32 = vpack.c.bf16 %v1585_v17, %v1582_v19  ;;  %v1577_v57 = vadd.f32 %v1576_v20, %v1400_v7 }
 0x1ad   : > { %v2263_v58 = vpop.f32.mrf.mxu0  ;;  %v2283_v5 = vpop.f32.mrf.mxu1  ;;  %v1424_v26 = vadd.f32 %v2876_v49, %v2874_v48  ;;  %v1432_v7 = vadd.f32 %v2884_v2, %v2882_v0 }
 0x1ae   : > { %2208 = vst [vmem:[%s2900_s20 + $0x18] sm:$0xff] %v2134_v24   ;;  %v2129_v4 = vpack.c.bf16 %v1497_v31, %v1494_v23  ;;  %2218 = vst [vmem:[%s2900_s20 + $0x68] sm:$0xff] %v2184_v32   ;;  %v2179_v10 = vpack.c.bf16 %v1577_v57, %v1574_v36  ;;  %v1518_v16 = vadd.f32 %v2263_v58, %v2822_v51 }
 0x1af   : > { %v1509_v12 = vpop.f32.mrf.mxu0  ;;  %v1589_v62 = vpop.f32.mrf.mxu1  ;;  %v1598_v50 = vadd.f32 %v2283_v5, %v1421_v21 }
 0x1b0   : > { %2207 = vst [vmem:[%s2900_s20 + $0x10] sm:$0xff] %v2129_v4   ;;  %2217 = vst [vmem:[%s2900_s20 + $0x60] sm:$0xff] %v2179_v10   ;;  %v1510_v48 = vadd.f32 %v1509_v12, %v2818_v41  ;;  %v1437_v41 = vadd.f32 %v2888_v14, %v2886_v13 }
 0x1b1   : > { %v2264_v11 = vpop.f32.mrf.mxu0  ;;  %v2284_v33 = vpop.f32.mrf.mxu1 }
 0x1b2   : > { %v1521_v63 = vadd.f32 %v2264_v11, %v2824_v56  ;;  %v1601_v42 = vadd.f32 %v2284_v33, %v1424_v26  ;;  %v1590_v56 = vadd.f32 %v1589_v62, %v1413_v38 }
 0x1b3   : > { %v1512_v43 = vpop.f32.mrf.mxu0  ;;  %v1592_v52 = vpop.f32.mrf.mxu1 }
 0x1b4   : > { %v2144_v49 = vpack.c.bf16 %v1521_v63, %v1518_v16  ;;  %v1513_v51 = vadd.f32 %v1512_v43, %v2820_v46  ;;  %v2194_v59 = vpack.c.bf16 %v1601_v42, %v1598_v50  ;;  %v1593_v8 = vadd.f32 %v1592_v52, %v1416_v39 }
 0x1b5   : > { %v2267_v1 = vpop.f32.mrf.mxu0  ;;  %v2287_v30 = vpop.f32.mrf.mxu1  ;;  %v1440_v46 = vadd.f32 %v2892_v27, %v2890_v25 }
 0x1b6   : > { %2210 = vst [vmem:[%s2900_s20 + $0x28] sm:$0xff] %v2144_v49   ;;  %v2139_v29 = vpack.c.bf16 %v1513_v51, %v1510_v48  ;;  %2220 = vst [vmem:[%s2900_s20 + $0x78] sm:$0xff] %v2194_v59   ;;  %v2189_v35 = vpack.c.bf16 %v1593_v8, %v1590_v56  ;;  %v1534_v44 = vadd.f32 %v2267_v1, %v2830_v9 }
 0x1b7   : > { %v1525_v37 = vpop.f32.mrf.mxu0  ;;  %v1605_v6 = vpop.f32.mrf.mxu1  ;;  %v1614_v19 = vadd.f32 %v2287_v30, %v1437_v41 }
 0x1b8   : > { %2209 = vst [vmem:[%s2900_s20 + $0x20] sm:$0xff] %v2139_v29   ;;  %2219 = vst [vmem:[%s2900_s20 + $0x70] sm:$0xff] %v2189_v35   ;;  %v1526_v25 = vadd.f32 %v1525_v37, %v2826_v61 }
 0x1b9   : > { %v2268_v47 = vpop.f32.mrf.mxu0  ;;  %v2288_v45 = vpop.f32.mrf.mxu1 }
 0x1ba   : > { %v1537_v53 = vadd.f32 %v2268_v47, %v2832_v15  ;;  %v1617_v13 = vadd.f32 %v2288_v45, %v1440_v46  ;;  %v1606_v15 = vadd.f32 %v1605_v6, %v1429_v60 }
 0x1bb   : > { %v1528_v14 = vpop.f32.mrf.mxu0  ;;  %v1608_v17 = vpop.f32.mrf.mxu1 }
 0x1bc   : > { %v2154_v27 = vpack.c.bf16 %v1537_v53, %v1534_v44  ;;  %v1529_v9 = vadd.f32 %v1528_v14, %v2828_v3  ;;  %v2204_v18 = vpack.c.bf16 %v1617_v13, %v1614_v19  ;;  %v1609_v23 = vadd.f32 %v1608_v17, %v1432_v7 }
 0x1bd   : > { %v2271_v24 = vpop.f32.mrf.mxu0 }
 0x1be   : > { %2212 = vst [vmem:[%s2900_s20 + $0x38] sm:$0xff] %v2154_v27   ;;  %v2149_v54 = vpack.c.bf16 %v1529_v9, %v1526_v25  ;;  %2222 = vst [vmem:[%s2900_s20 + $0x88] sm:$0xff] %v2204_v18   ;;  %v2199_v55 = vpack.c.bf16 %v1609_v23, %v1606_v15  ;;  %v1550_v61 = vadd.f32 %v2271_v24, %v2838_v34 }
 0x1bf   : > { %v1541_v0 = vpop.f32.mrf.mxu0 }
 0x1c0   : > { %2211 = vst [vmem:[%s2900_s20 + $0x30] sm:$0xff] %v2149_v54   ;;  %2221 = vst [vmem:[%s2900_s20 + $0x80] sm:$0xff] %v2199_v55   ;;  %v1542_v20 = vadd.f32 %v1541_v0, %v2834_v22 }
 0x1c1   : > { %v2272_v2 = vpop.f32.mrf.mxu0 }
 0x1c2   : > { %v1553_v31 = vadd.f32 %v2272_v2, %v2840_v40 }
 0x1c3   : > { %v1544_v3 = vpop.f32.mrf.mxu0 }
 0x1c4   : > { %v2164_v36 = vpack.c.bf16 %v1553_v31, %v1550_v61  ;;  %v1545_v32 = vadd.f32 %v1544_v3, %v2836_v28 }
 0x1c6   : > { %2214 = vst [vmem:[%s2900_s20 + $0x48] sm:$0xff] %v2164_v36   ;;  %v2159_v57 = vpack.c.bf16 %v1545_v32, %v1542_v20 }
 0x1c8   : > { %2213 = vst [vmem:[%s2900_s20 + $0x40] sm:$0xff] %v2159_v57  }
 0x1c9 PF: > { %s12_s11 = sadd.s32 1, %s2507_s11   ;;  %s2976_s9 = smov %s2503_s10 }
 0x1ca   : > { %p9_p5 = scmp.ge.s32.totalorder %s12_s11, 4   ;;  %s2977_s10 = smov %s2979_s12 }
 0x1cc   :  { %11 = sbr.rel (!%p9_p5) target bundleno = 2 (0x2), region = 61 }

// kernel: forward.8
= control target key start
LH: loop header
LB: loop body
LE: loop exit
PB: predicated region body
PF: predicated region fallthrough
CT: control target
= control target key end

     0   :  { %s747_s12 = smov 0   ;;  %s967_s0 = inlined_call_operand.vmem [shape: bf16[48,1536], index: 0, kind: input, shape index: {}]   ;;  %s968_s1 = inlined_call_operand.vmem [shape: f32[1,1536], index: 1, kind: input, shape index: {}]   ;;  %s969_s2 = inlined_call_operand.vmem [shape: f32[1,1536], index: 2, kind: input, shape index: {}]   ;;  %s970_s3 = inlined_call_operand.vmem [shape: bf16[48,1536], index: 3, kind: output, shape index: {}]  }
   0x1 LB: > { %s665_s13 = sadd.s32 4294967295, %s725_s12   ;;  %p669_p0 = scmp.ge.s32.totalorder %s725_s12, 1  ;;  %s725_s12 = sphi %s747_s12, %s13_s12  }
   0x2   : > { %p139_p1 = scmp.lt.s32.totalorder %s725_s12, 3 }
   0x4   : > { %p140_p2 = pnand %p669_p0, %p139_p1 }
   0x5   : > { %s165_s14 = smul.u32 (!%p140_p2), 3, %s665_s13 }
   0x6   : > { %143 = sbr.rel (%p140_p2) target bundleno = 70 (0x46), region = 32 }
   0x7   : > { %p166_p3 = scmp.lt.s32.totalorder (!%p140_p2), %s165_s14, 5 }
   0xb   : > { %v237_v0 = vlaneseq  ;;  %v233_v2 = vld [vmem:[%s968_s1] sm:$0xff]  ;;  %s972_s14 = smov (!%p166_p3, %s165_s14), 5  ;;  %v234_v57 = vld [vmem:[%s968_s1 + $0x8] sm:$0xf] }
   0xc   : > { %v333_v3 = vld [vmem:[%s969_s2] sm:$0xff]  ;;  %s710_s19 = smul.u32 48, %s972_s14  ;;  %v334_v62 = vld [vmem:[%s969_s2 + $0x8] sm:$0xf] }
   0xd   : > { %v238_v1 = vshrl.u32 %v237_v0, 7 }
   0xe   : > { %s801_s22 = scalar_lea.vmem %s967_s0, %s710_s19  ;;  %s851_s29 = scalar_lea.vmem %s970_s3, %s710_s19 }
   0xf   : > { %v763_v4 = vsub.s32 0, %v238_v1  ;;  %v765_v5 = vsub.s32 1, %v238_v1  ;;  %v767_v6 = vsub.s32 2, %v238_v1  ;;  %v769_v7 = vsub.s32 3, %v238_v1  ;;  %v179_v24 = vld [vmem:[%s801_s22] sm:$0xff]  ;;  %v180_v25 = vld [vmem:[%s801_s22 + $0x8] sm:$0xff] }
  0x10   : > { %v255_v8 = vsub.s32 4, %v238_v1  ;;  %v259_v9 = vsub.s32 5, %v238_v1  ;;  %v263_v10 = vsub.s32 6, %v238_v1  ;;  %v267_v11 = vsub.s32 7, %v238_v1  ;;  %v181_v26 = vld [vmem:[%s801_s22 + $0x10] sm:$0xff]  ;;  %v182_v35 = vld [vmem:[%s801_s22 + $0x18] sm:$0xff] }
  0x11   : > { %v773_v12 = vrot.slane %v233_v2, %v763_v4  ;;  %v776_v13 = vrot.slane %v233_v2, %v765_v5  ;;  %v779_v14 = vrot.slane %v333_v3, %v763_v4  ;;  %v782_v15 = vrot.slane %v333_v3, %v765_v5  ;;  %v183_v56 = vld [vmem:[%s801_s22 + $0x20] sm:$0xff] }
  0x12   : > { %v785_v16 = vrot.slane %v233_v2, %v767_v6  ;;  %v788_v17 = vrot.slane %v233_v2, %v769_v7  ;;  %v791_v18 = vrot.slane %v333_v3, %v767_v6  ;;  %v794_v19 = vrot.slane %v333_v3, %v769_v7 }
  0x13   : > { %v803_v20 = vrot.slane %v233_v2, %v255_v8  ;;  %v805_v21 = vrot.slane %v233_v2, %v259_v9  ;;  %v807_v22 = vrot.slane %v333_v3, %v255_v8  ;;  %v809_v23 = vrot.slane %v333_v3, %v259_v9 }
  0x14   : > { %v814_v27 = vrot.slane %v233_v2, %v263_v10  ;;  %v816_v28 = vrot.slane %v233_v2, %v267_v11  ;;  %v818_v29 = vrot.slane %v333_v3, %v263_v10  ;;  %v820_v30 = vrot.slane %v333_v3, %v267_v11  ;;  %v184_v3 = vld [vmem:[%s801_s22 + $0x28] sm:$0xff] }
  0x15   : > { %v197_v31 = vunpack.c.l.bf16 %v179_v24  ;;  %v198_v32 = vunpack.c.h.bf16 %v179_v24  ;;  %v199_v33 = vunpack.c.l.bf16 %v180_v25  ;;  %v200_v34 = vunpack.c.h.bf16 %v180_v25 }
  0x16   : > { %v201_v36 = vunpack.c.l.bf16 %v181_v26  ;;  %v202_v37 = vunpack.c.h.bf16 %v181_v26  ;;  %v203_v38 = vunpack.c.l.bf16 %v182_v35  ;;  %v204_v39 = vunpack.c.h.bf16 %v182_v35 }
  0x17   : > { %v297_v40 = vmul.f32 %v773_v12, %v197_v31  ;;  %v298_v41 = vmul.f32 %v776_v13, %v198_v32  ;;  %v299_v42 = vmul.f32 %v785_v16, %v199_v33  ;;  %v300_v43 = vmul.f32 %v788_v17, %v200_v34  ;;  %v185_v32 = vld [vmem:[%s801_s22 + $0x30] sm:$0xff] }
  0x18   : > { %v301_v44 = vmul.f32 %v803_v20, %v201_v36  ;;  %v302_v45 = vmul.f32 %v805_v21, %v202_v37  ;;  %v303_v46 = vmul.f32 %v814_v27, %v203_v38  ;;  %v304_v47 = vmul.f32 %v816_v28, %v204_v39 }
  0x19   : > { %v397_v48 = vadd.f32 %v779_v14, %v297_v40  ;;  %v398_v49 = vadd.f32 %v782_v15, %v298_v41  ;;  %v399_v50 = vadd.f32 %v791_v18, %v299_v42  ;;  %v400_v51 = vadd.f32 %v794_v19, %v300_v43 }
  0x1a   : > { %v401_v52 = vadd.f32 %v807_v22, %v301_v44  ;;  %v402_v53 = vadd.f32 %v809_v23, %v302_v45  ;;  %v403_v54 = vadd.f32 %v818_v29, %v303_v46  ;;  %v404_v55 = vadd.f32 %v820_v30, %v304_v47 }
  0x1b   : > { %v433_v58 = vmax.f32 %v397_v48, 0.0  ;;  %v434_v59 = vmax.f32 %v398_v49, 0.0  ;;  %v435_v60 = vmax.f32 %v399_v50, 0.0  ;;  %v436_v61 = vmax.f32 %v400_v51, 0.0  ;;  %v187_v51 = vld [vmem:[%s801_s22 + $0x40] sm:$0xff] }
  0x1c   : > { %v437_v63 = vmax.f32 %v401_v52, 0.0  ;;  %v438_v0 = vmax.f32 %v402_v53, 0.0  ;;  %v439_v1 = vmax.f32 %v403_v54, 0.0  ;;  %v440_v2 = vmax.f32 %v404_v55, 0.0 }
  0x1d   : > { %v692_v8 = vpack.c.bf16 %v434_v59, %v433_v58  ;;  %v693_v9 = vpack.c.bf16 %v436_v61, %v435_v60  ;;  %v205_v10 = vunpack.c.l.bf16 %v183_v56  ;;  %v206_v11 = vunpack.c.h.bf16 %v183_v56  ;;  %v188_v59 = vld [vmem:[%s801_s22 + $0x48] sm:$0xff] }
  0x1e   : > { %v694_v24 = vpack.c.bf16 %v438_v0, %v437_v63  ;;  %v695_v25 = vpack.c.bf16 %v440_v2, %v439_v1  ;;  %v855_v26 = vrot.slane %v234_v57, %v763_v4  ;;  %v858_v31 = vrot.slane %v234_v57, %v765_v5 }
  0x1f   : > { %589 = vst [vmem:[%s851_s29] sm:$0xff] %v692_v8  ;;  %590 = vst [vmem:[%s851_s29 + $0x8] sm:$0xff] %v693_v9  ;;  %v864_v33 = vrot.slane %v334_v62, %v763_v4  ;;  %v867_v34 = vrot.slane %v334_v62, %v765_v5  ;;  %v207_v35 = vunpack.c.l.bf16 %v184_v3  ;;  %v208_v36 = vunpack.c.h.bf16 %v184_v3  ;;  %v186_v4 = vld [vmem:[%s801_s22 + $0x38] sm:$0xff]  ;;  %v189_v8 = vld [vmem:[%s801_s22 + $0x50] sm:$0xff] }
  0x20   : > { %591 = vst [vmem:[%s851_s29 + $0x10] sm:$0xff] %v694_v24  ;;  %592 = vst [vmem:[%s851_s29 + $0x18] sm:$0xff] %v695_v25  ;;  %v305_v37 = vmul.f32 %v855_v26, %v205_v10  ;;  %v306_v38 = vmul.f32 %v858_v31, %v206_v11  ;;  %v874_v39 = vrot.slane %v234_v57, %v767_v6  ;;  %v209_v42 = vunpack.c.l.bf16 %v185_v32  ;;  %v190_v25 = vld [vmem:[%s801_s22 + $0x58] sm:$0xff] }
  0x21   : > { %v877_v40 = vrot.slane %v234_v57, %v769_v7  ;;  %v881_v41 = vrot.slane %v334_v62, %v767_v6  ;;  %v884_v5 = vrot.slane %v334_v62, %v769_v7  ;;  %v210_v43 = vunpack.c.h.bf16 %v185_v32 }
  0x22   : > { %v405_v44 = vadd.f32 %v864_v33, %v305_v37  ;;  %v406_v45 = vadd.f32 %v867_v34, %v306_v38  ;;  %v307_v46 = vmul.f32 %v874_v39, %v207_v35  ;;  %v309_v48 = vmul.f32 %v773_v12, %v209_v42 }
  0x23   : > { %v308_v47 = vmul.f32 %v877_v40, %v208_v36  ;;  %v310_v49 = vmul.f32 %v776_v13, %v210_v43  ;;  %v211_v6 = vunpack.c.l.bf16 %v186_v4  ;;  %v212_v50 = vunpack.c.h.bf16 %v186_v4 }
  0x24   : > { %v441_v7 = vmax.f32 %v405_v44, 0.0  ;;  %v442_v52 = vmax.f32 %v406_v45, 0.0  ;;  %v407_v53 = vadd.f32 %v881_v41, %v307_v46  ;;  %v409_v55 = vadd.f32 %v779_v14, %v309_v48  ;;  %v191_v48 = vld [vmem:[%s801_s22 + $0x60] sm:$0xff] }
  0x25   : > { %v408_v54 = vadd.f32 %v884_v5, %v308_v47  ;;  %v410_v56 = vadd.f32 %v782_v15, %v310_v49  ;;  %v311_v57 = vmul.f32 %v785_v16, %v211_v6  ;;  %v312_v58 = vmul.f32 %v788_v17, %v212_v50 }
  0x26   : > { %v696_v60 = vpack.c.bf16 %v442_v52, %v441_v7  ;;  %v443_v61 = vmax.f32 %v407_v53, 0.0  ;;  %v213_v63 = vunpack.c.l.bf16 %v187_v51  ;;  %v445_v0 = vmax.f32 %v409_v55, 0.0 }
  0x27   : > { %v444_v62 = vmax.f32 %v408_v54, 0.0  ;;  %v446_v1 = vmax.f32 %v410_v56, 0.0  ;;  %v411_v2 = vadd.f32 %v791_v18, %v311_v57  ;;  %v412_v3 = vadd.f32 %v794_v19, %v312_v58 }
  0x28   : > { %593 = vst [vmem:[%s851_s29 + $0x20] sm:$0xff] %v696_v60  ;;  %v214_v10 = vunpack.c.h.bf16 %v187_v51  ;;  %v313_v11 = vmul.f32 %v803_v20, %v213_v63  ;;  %v215_v24 = vunpack.c.l.bf16 %v188_v59  ;;  %v216_v37 = vunpack.c.h.bf16 %v188_v59  ;;  %v192_v63 = vld [vmem:[%s801_s22 + $0x68] sm:$0xff] }
  0x29   : > { %v697_v9 = vpack.c.bf16 %v444_v62, %v443_v61  ;;  %v698_v32 = vpack.c.bf16 %v446_v1, %v445_v0  ;;  %v447_v35 = vmax.f32 %v411_v2, 0.0  ;;  %v448_v36 = vmax.f32 %v412_v3, 0.0 }
  0x2a   : > { %v314_v38 = vmul.f32 %v805_v21, %v214_v10  ;;  %v413_v4 = vadd.f32 %v807_v22, %v313_v11  ;;  %v315_v42 = vmul.f32 %v814_v27, %v215_v24  ;;  %v217_v43 = vunpack.c.l.bf16 %v189_v8 }
  0x2b   : > { %594 = vst [vmem:[%s851_s29 + $0x28] sm:$0xff] %v697_v9  ;;  %595 = vst [vmem:[%s851_s29 + $0x30] sm:$0xff] %v698_v32  ;;  %v699_v44 = vpack.c.bf16 %v448_v36, %v447_v35  ;;  %v316_v45 = vmul.f32 %v816_v28, %v216_v37  ;;  %v218_v46 = vunpack.c.h.bf16 %v189_v8  ;;  %v219_v47 = vunpack.c.l.bf16 %v190_v25  ;;  %v193_v8 = vld [vmem:[%s801_s22 + $0x70] sm:$0xff]  ;;  %v194_v37 = vld [vmem:[%s801_s22 + $0x78] sm:$0xff] }
  0x2c   : > { %v414_v49 = vadd.f32 %v809_v23, %v314_v38  ;;  %v449_v6 = vmax.f32 %v413_v4, 0.0  ;;  %v415_v50 = vadd.f32 %v818_v29, %v315_v42  ;;  %v317_v51 = vmul.f32 %v855_v26, %v217_v43 }
  0x2d   : > { %596 = vst [vmem:[%s851_s29 + $0x38] sm:$0xff] %v699_v44  ;;  %v416_v7 = vadd.f32 %v820_v30, %v316_v45  ;;  %v318_v52 = vmul.f32 %v858_v31, %v218_v46  ;;  %v220_v53 = vunpack.c.h.bf16 %v190_v25  ;;  %v319_v54 = vmul.f32 %v874_v39, %v219_v47 }
  0x2e   : > { %v450_v55 = vmax.f32 %v414_v49, 0.0  ;;  %v451_v56 = vmax.f32 %v415_v50, 0.0  ;;  %v417_v57 = vadd.f32 %v864_v33, %v317_v51  ;;  %v221_v58 = vunpack.c.l.bf16 %v191_v48 }
  0x2f   : > { %v452_v59 = vmax.f32 %v416_v7, 0.0  ;;  %v418_v60 = vadd.f32 %v867_v34, %v318_v52  ;;  %v320_v61 = vmul.f32 %v877_v40, %v220_v53  ;;  %v419_v62 = vadd.f32 %v881_v41, %v319_v54  ;;  %v196_v53 = vld [vmem:[%s801_s22 + $0x88] sm:$0xff] }
  0x30   : > { %v700_v0 = vpack.c.bf16 %v450_v55, %v449_v6  ;;  %v453_v1 = vmax.f32 %v417_v57, 0.0  ;;  %v222_v2 = vunpack.c.h.bf16 %v191_v48  ;;  %v321_v3 = vmul.f32 %v773_v12, %v221_v58 }
  0x31   : > { %v701_v9 = vpack.c.bf16 %v452_v59, %v451_v56  ;;  %v454_v10 = vmax.f32 %v418_v60, 0.0  ;;  %v420_v11 = vadd.f32 %v884_v5, %v320_v61  ;;  %v455_v24 = vmax.f32 %v419_v62, 0.0 }
  0x32   : > { %597 = vst [vmem:[%s851_s29 + $0x40] sm:$0xff] %v700_v0  ;;  %v322_v25 = vmul.f32 %v776_v13, %v222_v2  ;;  %v421_v32 = vadd.f32 %v779_v14, %v321_v3  ;;  %v223_v35 = vunpack.c.l.bf16 %v192_v63  ;;  %v224_v36 = vunpack.c.h.bf16 %v192_v63  ;;  %v195_v13 = vld [vmem:[%s801_s22 + $0x80] sm:$0xff] }
  0x33   : > { %598 = vst [vmem:[%s851_s29 + $0x48] sm:$0xff] %v701_v9  ;;  %v702_v38 = vpack.c.bf16 %v454_v10, %v453_v1  ;;  %v456_v4 = vmax.f32 %v420_v11, 0.0  ;;  %v225_v12 = vunpack.c.l.bf16 %v193_v8  ;;  %v226_v42 = vunpack.c.h.bf16 %v193_v8 }
  0x34   : > { %v422_v43 = vadd.f32 %v782_v15, %v322_v25  ;;  %v457_v44 = vmax.f32 %v421_v32, 0.0  ;;  %v323_v45 = vmul.f32 %v785_v16, %v223_v35  ;;  %v324_v46 = vmul.f32 %v788_v17, %v224_v36 }
  0x35   : > { %599 = vst [vmem:[%s851_s29 + $0x50] sm:$0xff] %v702_v38  ;;  %v703_v14 = vpack.c.bf16 %v456_v4, %v455_v24  ;;  %v325_v47 = vmul.f32 %v803_v20, %v225_v12  ;;  %v326_v48 = vmul.f32 %v805_v21, %v226_v42  ;;  %v227_v49 = vunpack.c.l.bf16 %v194_v37 }
  0x36   : > { %v458_v6 = vmax.f32 %v422_v43, 0.0  ;;  %v423_v50 = vadd.f32 %v791_v18, %v323_v45  ;;  %v424_v51 = vadd.f32 %v794_v19, %v324_v46  ;;  %v228_v15 = vunpack.c.h.bf16 %v194_v37 }
  0x37   : > { %600 = vst [vmem:[%s851_s29 + $0x58] sm:$0xff] %v703_v14  ;;  %v425_v16 = vadd.f32 %v807_v22, %v325_v47  ;;  %v426_v17 = vadd.f32 %v809_v23, %v326_v48  ;;  %v327_v7 = vmul.f32 %v814_v27, %v227_v49  ;;  %v229_v52 = vunpack.c.l.bf16 %v195_v13 }
  0x38   : > { %v704_v20 = vpack.c.bf16 %v458_v6, %v457_v44  ;;  %v459_v54 = vmax.f32 %v423_v50, 0.0  ;;  %v460_v21 = vmax.f32 %v424_v51, 0.0  ;;  %v328_v55 = vmul.f32 %v816_v28, %v228_v15 }
  0x39   : > { %v461_v18 = vmax.f32 %v425_v16, 0.0  ;;  %v462_v56 = vmax.f32 %v426_v17, 0.0  ;;  %v427_v19 = vadd.f32 %v818_v29, %v327_v7  ;;  %v230_v57 = vunpack.c.h.bf16 %v195_v13 }
  0x3a   : > { %601 = vst [vmem:[%s851_s29 + $0x60] sm:$0xff] %v704_v20  ;;  %v705_v22 = vpack.c.bf16 %v460_v21, %v459_v54  ;;  %v428_v23 = vadd.f32 %v820_v30, %v328_v55  ;;  %v329_v27 = vmul.f32 %v855_v26, %v229_v52  ;;  %v231_v58 = vunpack.c.l.bf16 %v196_v53 }
  0x3b   : > { %v706_v59 = vpack.c.bf16 %v462_v56, %v461_v18  ;;  %v463_v60 = vmax.f32 %v427_v19, 0.0  ;;  %v330_v61 = vmul.f32 %v858_v31, %v230_v57  ;;  %v232_v62 = vunpack.c.h.bf16 %v196_v53 }
  0x3c   : > { %602 = vst [vmem:[%s851_s29 + $0x68] sm:$0xff] %v705_v22  ;;  %v464_v28 = vmax.f32 %v428_v23, 0.0  ;;  %v429_v63 = vadd.f32 %v864_v33, %v329_v27  ;;  %v331_v29 = vmul.f32 %v874_v39, %v231_v58 }
  0x3d   : > { %603 = vst [vmem:[%s851_s29 + $0x70] sm:$0xff] %v706_v59  ;;  %v430_v30 = vadd.f32 %v867_v34, %v330_v61  ;;  %v332_v26 = vmul.f32 %v877_v40, %v232_v62 }
  0x3e   : > { %v707_v0 = vpack.c.bf16 %v464_v28, %v463_v60  ;;  %v465_v1 = vmax.f32 %v429_v63, 0.0  ;;  %v431_v2 = vadd.f32 %v881_v41, %v331_v29 }
  0x3f   : > { %v466_v3 = vmax.f32 %v430_v30, 0.0  ;;  %v432_v31 = vadd.f32 %v884_v5, %v332_v26 }
  0x40   : > { %604 = vst [vmem:[%s851_s29 + $0x78] sm:$0xff] %v707_v0  ;;  %v467_v8 = vmax.f32 %v431_v2, 0.0 }
  0x41   : > { %v708_v9 = vpack.c.bf16 %v466_v3, %v465_v1  ;;  %v468_v10 = vmax.f32 %v432_v31, 0.0 }
  0x43   : > { %605 = vst [vmem:[%s851_s29 + $0x80] sm:$0xff] %v708_v9  ;;  %v709_v33 = vpack.c.bf16 %v468_v10, %v467_v8 }
  0x45   : > { %606 = vst [vmem:[%s851_s29 + $0x88] sm:$0xff] %v709_v33 }
  0x46 PF: > { %s13_s12 = sadd.s32 1, %s725_s12  }
  0x47   : > { %p10_p4 = scmp.ge.s32.totalorder %s13_s12, 4  }
  0x49   :  { %12 = sbr.rel (!%p10_p4) target bundleno = 1 (0x1), region = 62 }

// kernel: forward.9
= control target key start
LH: loop header
LB: loop body
LE: loop exit
PB: predicated region body
PF: predicated region fallthrough
CT: control target
= control target key end

     0   :  { %12 = vsyncpa [#allocation4], 0  ;;  %s7998_s24 = smov 0   ;;  %s9281_s0 = inlined_call_operand.vmem [shape: bf16[2,9216], index: 0, kind: input, shape index: {}]   ;;  %s9282_s1 = inlined_call_operand.vmem [shape: bf16[9216,512], index: 1, kind: input, shape index: {}]   ;;  %s9283_s2 = inlined_call_operand.vmem [shape: bf16[512,512], index: 2, kind: input, shape index: {}]   ;;  %s9284_s3 = inlined_call_operand.vmem [shape: f32[1,512], index: 3, kind: input, shape index: {}, may-alias: {3,5}]   ;;  %s9285_s4 = inlined_call_operand.vmem [shape: f32[1,512], index: 4, kind: input, shape index: {}, may-alias: {4,6}]   ;;  %s9286_s5 = inlined_call_operand.vmem [shape: f32[1,512], index: 5, kind: input, shape index: {}, may-alias: {3,5}]   ;;  %s9287_s6 = inlined_call_operand.vmem [shape: f32[1,512], index: 6, kind: input, shape index: {}, may-alias: {4,6}]   ;;  %s9288_s7 = inlined_call_operand.hbm [shape: f32[2,512], index: 7, kind: output, shape index: {}]  }
   0x1 LB: > { %s8004_s25 = sadd.s32 4294967295, %s7952_s24   ;;  %p6110_p0 = scmp.ge.s32.totalorder %s7952_s24, 1  ;;  %s7952_s24 = sphi %s7998_s24, %s18_s24  }
   0x2   : > { %p245_p1 = scmp.lt.s32.totalorder %s7952_s24, 5 }
   0x4   : > { %p246_p2 = pnand %p6110_p0, %p245_p1 }
   0x5   : > { %s277_s26 = smul.u32 (!%p246_p2), 18, %s8004_s25  ;;  %p6113_p5 = scmp.ne.s32.totalorder (!%p246_p2), %s8004_s25, 0 }
   0x6   : > { %249 = sbr.rel (%p246_p2) target bundleno = 1280 (0x500), region = 48 }
   0x7   : > { %s282_s27 = smul.u32 (!%p246_p2), 288, %s8004_s25  ;;  %p278_p3 = scmp.lt.s32.totalorder (!%p246_p2), %s277_s26, 71 }
   0x9   : > { %p283_p4 = scmp.lt.s32.totalorder (!%p246_p2), %s282_s27, 1151 }
   0xb   : > { %s9290_s26 = smov (!%p278_p3, %s277_s26), 71  ;;  %s9292_s27 = smov (!%p283_p4, %s282_s27), 1151 }
   0xc   : > { %s8013_s30 = scalar_lea.vmem %s9281_s0, %s9290_s26  ;;  %s6824_s8 = sshll.u32 %s9292_s27, 4 }
   0xd   : > { %s8018_s11 = scalar_lea.vmem %s9282_s1, %s6824_s8  ;;  %292 = sbr.rel (%p6113_p5) target bundleno = 20 (0x14), region = 52 }
  0x12   : > { %v7954_v0 = vmov 0.0  }
  0x13   : > { %293 = vst [vmem:[#allocation2] sm:$0xff] %v7954_v0 }
  0x14 PF: > { %v6843_v1 = vld [vmem:[%s8018_s11 + $0xe4] ss:$16 sps:$4 sm:$0xff]   ;;  %v6847_v3 = vld [vmem:[%s8018_s11 + $0xe0] ss:$16 sps:$4 sm:$0xff]   ;;  %v7955_v37 = vmov 1966171168   ;;  %v881_v39 = vlaneseq }
  0x15   : > { %v6845_v2 = vld [vmem:[%s8018_s11 + $0x2e4] ss:$16 sps:$4 sm:$0xff]   ;;  %3895 = vmatprep.subr.bf16.mxu0 %v6843_v1  ;;  %v6848_v4 = vld [vmem:[%s8018_s11 + $0x2e0] ss:$16 sps:$4 sm:$0xff]   ;;  %v879_v38 = vunpack.c.l.s4 %v7955_v37  ;;  %p6691_p6 = scmp.ne.s32.totalorder %s8004_s25, 3 }
  0x16   : > { %3936 = vmatprep.subr.bf16.mxu1 %v6845_v2  ;;  %v6849_v5 = vld [vmem:[%s8018_s11 + $0xc4] ss:$16 sps:$4 sm:$0xff]   ;;  %3896 = vmatpush1.bf16.msra.mxu0 %v6847_v3  ;;  %v6853_v7 = vld [vmem:[%s8018_s11 + $0xc0] ss:$16 sps:$4 sm:$0xff]   ;;  %v8060_v44 = vshrl.u32 %v881_v39, 7 }
  0x17   : > { %3937 = vmatpush1.bf16.msra.mxu1 %v6848_v4  ;;  %v6851_v6 = vld [vmem:[%s8018_s11 + $0x2c4] ss:$16 sps:$4 sm:$0xff]   ;;  %3897 = vmatprep.subr.bf16.mxu0 %v6849_v5  ;;  %v6854_v8 = vld [vmem:[%s8018_s11 + $0x2c0] ss:$16 sps:$4 sm:$0xff]   ;;  %v880_v43 = vunpack.c.0.s8 %v879_v38 }
  0x18   : > { %3938 = vmatprep.subr.bf16.mxu1 %v6851_v6  ;;  %v6855_v9 = vld [vmem:[%s8018_s11 + $0xa4] ss:$16 sps:$4 sm:$0xff]   ;;  %v6859_v11 = vld [vmem:[%s8018_s11 + $0xa0] ss:$16 sps:$4 sm:$0xff]  }
  0x19   : > { %v6857_v10 = vld [vmem:[%s8018_s11 + $0x2a4] ss:$16 sps:$4 sm:$0xff]   ;;  %v6860_v12 = vld [vmem:[%s8018_s11 + $0x2a0] ss:$16 sps:$4 sm:$0xff]   ;;  %v8068_v50 = vsub.s32 %v880_v43, %v8060_v44 }
  0x1a   : > { %3898 = vmatpush1.bf16.msra.mxu0 %v6853_v7  ;;  %v6861_v13 = vld [vmem:[%s8018_s11 + $0x84] ss:$16 sps:$4 sm:$0xff]   ;;  %v6865_v15 = vld [vmem:[%s8018_s11 + $0x80] ss:$16 sps:$4 sm:$0xff]  }
  0x1b   : > { %3939 = vmatpush1.bf16.msra.mxu1 %v6854_v8  ;;  %3899 = vmatprep.subr.bf16.mxu0 %v6855_v9  ;;  %v6863_v14 = vld [vmem:[%s8018_s11 + $0x284] ss:$16 sps:$4 sm:$0xff]   ;;  %v6866_v16 = vld [vmem:[%s8018_s11 + $0x280] ss:$16 sps:$4 sm:$0xff]  }
  0x1c   : > { %3940 = vmatprep.subr.bf16.mxu1 %v6857_v10  ;;  %v6867_v17 = vld [vmem:[%s8018_s11 + $0x64] ss:$16 sps:$4 sm:$0xff]   ;;  %v6871_v19 = vld [vmem:[%s8018_s11 + $0x60] ss:$16 sps:$4 sm:$0xff]  }
  0x1d   : > { %v6869_v18 = vld [vmem:[%s8018_s11 + $0x264] ss:$16 sps:$4 sm:$0xff]   ;;  %v6872_v20 = vld [vmem:[%s8018_s11 + $0x260] ss:$16 sps:$4 sm:$0xff]  }
  0x1e   : > { %3900 = vmatpush1.bf16.msra.mxu0 %v6859_v11  ;;  %v6873_v21 = vld [vmem:[%s8018_s11 + $0x44] ss:$16 sps:$4 sm:$0xff]   ;;  %v6877_v23 = vld [vmem:[%s8018_s11 + $0x40] ss:$16 sps:$4 sm:$0xff]  }
  0x1f   : > { %3941 = vmatpush1.bf16.msra.mxu1 %v6860_v12  ;;  %3901 = vmatprep.subr.bf16.mxu0 %v6861_v13  ;;  %v6875_v22 = vld [vmem:[%s8018_s11 + $0x244] ss:$16 sps:$4 sm:$0xff]   ;;  %v6878_v24 = vld [vmem:[%s8018_s11 + $0x240] ss:$16 sps:$4 sm:$0xff]  }
  0x20   : > { %3942 = vmatprep.subr.bf16.mxu1 %v6863_v14  ;;  %v6879_v25 = vld [vmem:[%s8018_s11 + $0x24] ss:$16 sps:$4 sm:$0xff]   ;;  %v6883_v27 = vld [vmem:[%s8018_s11 + $0x20] ss:$16 sps:$4 sm:$0xff]  }
  0x21   : > { %v6881_v26 = vld [vmem:[%s8018_s11 + $0x224] ss:$16 sps:$4 sm:$0xff]   ;;  %v6884_v28 = vld [vmem:[%s8018_s11 + $0x220] ss:$16 sps:$4 sm:$0xff]  }
  0x22   : > { %3902 = vmatpush1.bf16.msra.mxu0 %v6865_v15  ;;  %v6885_v29 = vld [vmem:[%s8018_s11 + $0x4] ss:$16 sps:$4 sm:$0xff]   ;;  %v6889_v31 = vld [vmem:[%s8018_s11] ss:$16 sps:$4 sm:$0xff]  }
  0x23   : > { %3943 = vmatpush1.bf16.msra.mxu1 %v6866_v16  ;;  %3903 = vmatprep.subr.bf16.mxu0 %v6867_v17  ;;  %v6887_v30 = vld [vmem:[%s8018_s11 + $0x204] ss:$16 sps:$4 sm:$0xff]   ;;  %v6890_v32 = vld [vmem:[%s8018_s11 + $0x200] ss:$16 sps:$4 sm:$0xff]  }
  0x24   : > { %3944 = vmatprep.subr.bf16.mxu1 %v6869_v18  ;;  %v6891_v33 = vld [vmem:[%s8018_s11 + $0x1e4] ss:$16 sps:$4 sm:$0xff]   ;;  %v6895_v35 = vld [vmem:[%s8018_s11 + $0x1e0] ss:$16 sps:$4 sm:$0xff]  }
  0x25   : > { %v6893_v34 = vld [vmem:[%s8018_s11 + $0x3e4] ss:$16 sps:$4 sm:$0xff]   ;;  %v6896_v36 = vld [vmem:[%s8018_s11 + $0x3e0] ss:$16 sps:$4 sm:$0xff]  }
  0x26   : > { %3904 = vmatpush1.bf16.msra.mxu0 %v6871_v19  ;;  %v6897_v40 = vld [vmem:[%s8018_s11 + $0x1c4] ss:$16 sps:$4 sm:$0xff]   ;;  %v6901_v42 = vld [vmem:[%s8018_s11 + $0x1c0] ss:$16 sps:$4 sm:$0xff]  }
  0x27   : > { %3945 = vmatpush1.bf16.msra.mxu1 %v6872_v20  ;;  %3905 = vmatprep.subr.bf16.mxu0 %v6873_v21  ;;  %v6899_v41 = vld [vmem:[%s8018_s11 + $0x3c4] ss:$16 sps:$4 sm:$0xff]   ;;  %v6902_v45 = vld [vmem:[%s8018_s11 + $0x3c0] ss:$16 sps:$4 sm:$0xff]  }
  0x28   : > { %3946 = vmatprep.subr.bf16.mxu1 %v6875_v22  ;;  %v6903_v46 = vld [vmem:[%s8018_s11 + $0x1a4] ss:$16 sps:$4 sm:$0xff]   ;;  %v6907_v48 = vld [vmem:[%s8018_s11 + $0x1a0] ss:$16 sps:$4 sm:$0xff]  }
  0x29   : > { %v6905_v47 = vld [vmem:[%s8018_s11 + $0x3a4] ss:$16 sps:$4 sm:$0xff]   ;;  %v6908_v49 = vld [vmem:[%s8018_s11 + $0x3a0] ss:$16 sps:$4 sm:$0xff]  }
  0x2a   : > { %3906 = vmatpush1.bf16.msra.mxu0 %v6877_v23  ;;  %v6909_v51 = vld [vmem:[%s8018_s11 + $0x184] ss:$16 sps:$4 sm:$0xff]   ;;  %v6913_v54 = vld [vmem:[%s8018_s11 + $0x180] ss:$16 sps:$4 sm:$0xff]  }
  0x2b   : > { %3947 = vmatpush1.bf16.msra.mxu1 %v6878_v24  ;;  %3907 = vmatprep.subr.bf16.mxu0 %v6879_v25  ;;  %v6911_v52 = vld [vmem:[%s8018_s11 + $0x384] ss:$16 sps:$4 sm:$0xff]   ;;  %v6914_v56 = vld [vmem:[%s8018_s11 + $0x380] ss:$16 sps:$4 sm:$0xff]  }
  0x2c   : > { %3948 = vmatprep.subr.bf16.mxu1 %v6881_v26  ;;  %v295_v53 = vld [vmem:[%s8013_s30] sm:$0xff] }
  0x2d   : > { %v884_v55 = vrot.slane %v295_v53, %v8068_v50  ;;  %v6915_v57 = vld [vmem:[%s8018_s11 + $0x164] ss:$16 sps:$4 sm:$0xff]   ;;  %v6919_v60 = vld [vmem:[%s8018_s11 + $0x160] ss:$16 sps:$4 sm:$0xff]   ;;  %v877_v2 = vcombine.high %v295_v53, %v295_v53 }
  0x2e   : > { %3908 = vmatpush1.bf16.msra.mxu0 %v6883_v27  ;;  %v6917_v58 = vld [vmem:[%s8018_s11 + $0x364] ss:$16 sps:$4 sm:$0xff]   ;;  %v6920_v62 = vld [vmem:[%s8018_s11 + $0x360] ss:$16 sps:$4 sm:$0xff]  }
  0x2f   : > { %3949 = vmatpush1.bf16.msra.mxu1 %v6884_v28  ;;  %3909 = vmatprep.subr.bf16.mxu0 %v6885_v29  ;;  %v892_v59 = vcombine.high %v884_v55, %v884_v55  ;;  %v6921_v63 = vld [vmem:[%s8018_s11 + $0x144] ss:$16 sps:$4 sm:$0xff]   ;;  %v6925_v3 = vld [vmem:[%s8018_s11 + $0x140] ss:$16 sps:$4 sm:$0xff]   ;;  %v8096_v7 = vrot.slane %v877_v2, %v8068_v50  ;;  %v8106_v14 = vrot.slane %v884_v55, %v8068_v50 }
  0x30   : > { %3950 = vmatprep.subr.bf16.mxu1 %v6887_v30  ;;  %v6923_v0 = vld [vmem:[%s8018_s11 + $0x344] ss:$16 sps:$4 sm:$0xff]   ;;  %v6926_v4 = vld [vmem:[%s8018_s11 + $0x340] ss:$16 sps:$4 sm:$0xff]  }
  0x31   : > { %v8080_v61 = vrot.slane %v892_v59, %v8068_v50  ;;  %v6927_v5 = vld [vmem:[%s8018_s11 + $0x124] ss:$16 sps:$4 sm:$0xff]   ;;  %v6931_v8 = vld [vmem:[%s8018_s11 + $0x120] ss:$16 sps:$4 sm:$0xff]   ;;  %v893_v12 = vcombine.high %v8096_v7, %v8096_v7  ;;  %v8116_v19 = vcombine.high %v8106_v14, %v8106_v14 }
  0x32   : > { %3910 = vmatpush1.bf16.msra.mxu0 %v6889_v31  ;;  %v6929_v6 = vld [vmem:[%s8018_s11 + $0x324] ss:$16 sps:$4 sm:$0xff]   ;;  %v6932_v9 = vld [vmem:[%s8018_s11 + $0x320] ss:$16 sps:$4 sm:$0xff]  }
  0x33   : > { %3951 = vmatpush1.bf16.msra.mxu1 %v6890_v32  ;;  %3911 = vmatprep.subr.bf16.mxu0 %v6891_v33  ;;  %v8087_v1 = vcombine.high %v8080_v61, %v8080_v61  ;;  %v6933_v10 = vld [vmem:[%s8018_s11 + $0x104] ss:$16 sps:$4 sm:$0xff]   ;;  %v6937_v13 = vld [vmem:[%s8018_s11 + $0x100] ss:$16 sps:$4 sm:$0xff]   ;;  %v8112_v18 = vrot.slane %v893_v12, %v8068_v50 }
  0x34   : > { %3952 = vmatprep.subr.bf16.mxu1 %v6893_v34  ;;  %3927 = vmatprep.mubr.bf16.mxu0 %v8080_v61  ;;  %v6935_v11 = vld [vmem:[%s8018_s11 + $0x304] ss:$16 sps:$4 sm:$0xff]   ;;  %v6938_v15 = vld [vmem:[%s8018_s11 + $0x300] ss:$16 sps:$4 sm:$0xff]  }
  0x35   : > { %3968 = vmatprep.mubr.bf16.mxu1 %v8087_v1  ;;  %v6941_v16 = vld [vmem:[%s8018_s11 + $0x4e4] ss:$16 sps:$4 sm:$0xff]   ;;  %v6939_v20 = vld [vmem:[%s8018_s11 + $0x4e0] ss:$16 sps:$4 sm:$0xff]   ;;  %v8124_v24 = vcombine.high %v8112_v18, %v8112_v18 }
  0x36   : > { %3912 = vmatpush2.bf16.msra.mxu0 %v6895_v35  ;;  %v6944_v17 = vld [vmem:[%s8018_s11 + $0x6e4] ss:$16 sps:$4 sm:$0xff]   ;;  %v6942_v21 = vld [vmem:[%s8018_s11 + $0x6e0] ss:$16 sps:$4 sm:$0xff]  }
  0x37   : > { %3953 = vmatpush2.bf16.msra.mxu1 %v6896_v36  ;;  %3913 = vmatprep.subr.bf16.mxu0 %v6897_v40  ;;  %v6947_v22 = vld [vmem:[%s8018_s11 + $0x4c4] ss:$16 sps:$4 sm:$0xff]   ;;  %v6945_v25 = vld [vmem:[%s8018_s11 + $0x4c0] ss:$16 sps:$4 sm:$0xff]  }
  0x38   : > { %3954 = vmatprep.subr.bf16.mxu1 %v6899_v41  ;;  %v6950_v23 = vld [vmem:[%s8018_s11 + $0x6c4] ss:$16 sps:$4 sm:$0xff]   ;;  %v6948_v26 = vld [vmem:[%s8018_s11 + $0x6c0] ss:$16 sps:$4 sm:$0xff]  }
  0x39   : > { %v6953_v27 = vld [vmem:[%s8018_s11 + $0x4a4] ss:$16 sps:$4 sm:$0xff]   ;;  %v6951_v29 = vld [vmem:[%s8018_s11 + $0x4a0] ss:$16 sps:$4 sm:$0xff]  }
  0x3a   : > { %3914 = vmatpush2.bf16.msra.mxu0 %v6901_v42  ;;  %v6956_v28 = vld [vmem:[%s8018_s11 + $0x6a4] ss:$16 sps:$4 sm:$0xff]   ;;  %v6954_v30 = vld [vmem:[%s8018_s11 + $0x6a0] ss:$16 sps:$4 sm:$0xff]  }
  0x3b   : > { %3955 = vmatpush2.bf16.msra.mxu1 %v6902_v45  ;;  %3915 = vmatprep.subr.bf16.mxu0 %v6903_v46  ;;  %v6959_v31 = vld [vmem:[%s8018_s11 + $0x484] ss:$16 sps:$4 sm:$0xff]   ;;  %v6957_v33 = vld [vmem:[%s8018_s11 + $0x480] ss:$16 sps:$4 sm:$0xff]  }
  0x3c   : > { %3956 = vmatprep.subr.bf16.mxu1 %v6905_v47  ;;  %v6962_v32 = vld [vmem:[%s8018_s11 + $0x684] ss:$16 sps:$4 sm:$0xff]   ;;  %v6960_v34 = vld [vmem:[%s8018_s11 + $0x680] ss:$16 sps:$4 sm:$0xff]  }
  0x3d   : > { %v6965_v35 = vld [vmem:[%s8018_s11 + $0x464] ss:$16 sps:$4 sm:$0xff]   ;;  %v6963_v37 = vld [vmem:[%s8018_s11 + $0x460] ss:$16 sps:$4 sm:$0xff]  }
  0x3e   : > { %3916 = vmatpush2.bf16.msra.mxu0 %v6907_v48  ;;  %v6968_v36 = vld [vmem:[%s8018_s11 + $0x664] ss:$16 sps:$4 sm:$0xff]   ;;  %v6966_v38 = vld [vmem:[%s8018_s11 + $0x660] ss:$16 sps:$4 sm:$0xff]  }
  0x3f   : > { %3957 = vmatpush2.bf16.msra.mxu1 %v6908_v49  ;;  %3917 = vmatprep.subr.bf16.mxu0 %v6909_v51  ;;  %v6971_v39 = vld [vmem:[%s8018_s11 + $0x444] ss:$16 sps:$4 sm:$0xff]   ;;  %v6969_v41 = vld [vmem:[%s8018_s11 + $0x440] ss:$16 sps:$4 sm:$0xff]  }
  0x40   : > { %3958 = vmatprep.subr.bf16.mxu1 %v6911_v52  ;;  %v6974_v40 = vld [vmem:[%s8018_s11 + $0x644] ss:$16 sps:$4 sm:$0xff]   ;;  %v6972_v42 = vld [vmem:[%s8018_s11 + $0x640] ss:$16 sps:$4 sm:$0xff]  }
  0x41   : > { %v6977_v43 = vld [vmem:[%s8018_s11 + $0x424] ss:$16 sps:$4 sm:$0xff]   ;;  %v6975_v46 = vld [vmem:[%s8018_s11 + $0x420] ss:$16 sps:$4 sm:$0xff]  }
  0x42   : > { %3918 = vmatpush2.bf16.msra.mxu0 %v6913_v54  ;;  %v6980_v45 = vld [vmem:[%s8018_s11 + $0x624] ss:$16 sps:$4 sm:$0xff]   ;;  %v6978_v47 = vld [vmem:[%s8018_s11 + $0x620] ss:$16 sps:$4 sm:$0xff]  }
  0x43   : > { %3959 = vmatpush2.bf16.msra.mxu1 %v6914_v56  ;;  %3919 = vmatprep.subr.bf16.mxu0 %v6915_v57  ;;  %v6983_v48 = vld [vmem:[%s8018_s11 + $0x404] ss:$16 sps:$4 sm:$0xff]   ;;  %v6981_v51 = vld [vmem:[%s8018_s11 + $0x400] ss:$16 sps:$4 sm:$0xff]  }
  0x44   : > { %3960 = vmatprep.subr.bf16.mxu1 %v6917_v58  ;;  %v6986_v49 = vld [vmem:[%s8018_s11 + $0x604] ss:$16 sps:$4 sm:$0xff]   ;;  %v6984_v52 = vld [vmem:[%s8018_s11 + $0x600] ss:$16 sps:$4 sm:$0xff]  }
  0x45   : > { %v6989_v53 = vld [vmem:[%s8018_s11 + $0x5e4] ss:$16 sps:$4 sm:$0xff]   ;;  %v6987_v55 = vld [vmem:[%s8018_s11 + $0x5e0] ss:$16 sps:$4 sm:$0xff]  }
  0x46   : > { %3920 = vmatpush2.bf16.msra.mxu0 %v6919_v60  ;;  %v6992_v54 = vld [vmem:[%s8018_s11 + $0x7e4] ss:$16 sps:$4 sm:$0xff]   ;;  %v6990_v56 = vld [vmem:[%s8018_s11 + $0x7e0] ss:$16 sps:$4 sm:$0xff]  }
  0x47   : > { %3961 = vmatpush2.bf16.msra.mxu1 %v6920_v62  ;;  %3921 = vmatprep.subr.bf16.mxu0 %v6921_v63  ;;  %v6995_v57 = vld [vmem:[%s8018_s11 + $0x5c4] ss:$16 sps:$4 sm:$0xff]   ;;  %v6993_v59 = vld [vmem:[%s8018_s11 + $0x5c0] ss:$16 sps:$4 sm:$0xff]  }
  0x48   : > { %3962 = vmatprep.subr.bf16.mxu1 %v6923_v0  ;;  %v6998_v58 = vld [vmem:[%s8018_s11 + $0x7c4] ss:$16 sps:$4 sm:$0xff]   ;;  %v6996_v60 = vld [vmem:[%s8018_s11 + $0x7c0] ss:$16 sps:$4 sm:$0xff]  }
  0x49   : > { %v7001_v62 = vld [vmem:[%s8018_s11 + $0x5a4] ss:$16 sps:$4 sm:$0xff]   ;;  %v6999_v0 = vld [vmem:[%s8018_s11 + $0x5a0] ss:$16 sps:$4 sm:$0xff]  }
  0x4a   : > { %3922 = vmatpush2.bf16.msra.mxu0 %v6925_v3  ;;  %v7004_v63 = vld [vmem:[%s8018_s11 + $0x7a4] ss:$16 sps:$4 sm:$0xff]   ;;  %v7002_v2 = vld [vmem:[%s8018_s11 + $0x7a0] ss:$16 sps:$4 sm:$0xff]  }
  0x4b   : > { %3963 = vmatpush2.bf16.msra.mxu1 %v6926_v4  ;;  %3923 = vmatprep.subr.bf16.mxu0 %v6927_v5  ;;  %v7007_v3 = vld [vmem:[%s8018_s11 + $0x584] ss:$16 sps:$4 sm:$0xff]   ;;  %v7005_v5 = vld [vmem:[%s8018_s11 + $0x580] ss:$16 sps:$4 sm:$0xff]  }
  0x4c   : > { %3964 = vmatprep.subr.bf16.mxu1 %v6929_v6  ;;  %v7010_v4 = vld [vmem:[%s8018_s11 + $0x784] ss:$16 sps:$4 sm:$0xff]   ;;  %v7008_v6 = vld [vmem:[%s8018_s11 + $0x780] ss:$16 sps:$4 sm:$0xff]  }
  0x4d   : > { %v7019_v12 = vld [vmem:[%s8018_s11 + $0x544] ss:$16 sps:$4 sm:$0xff]  }
  0x4e   : > { %3924 = vmatpush2.bf16.msra.mxu0 %v6931_v8  ;;  %v7013_v8 = vld [vmem:[%s8018_s11 + $0x564] ss:$16 sps:$4 sm:$0xff]  }
  0x4f   : > { %3965 = vmatpush2.bf16.msra.mxu1 %v6932_v9  ;;  %3925 = vmatprep.subr.bf16.mxu0 %v6933_v10  ;;  %v7016_v9 = vld [vmem:[%s8018_s11 + $0x764] ss:$16 sps:$4 sm:$0xff]   ;;  %v7011_v10 = vld [vmem:[%s8018_s11 + $0x560] ss:$16 sps:$4 sm:$0xff]  }
  0x50   : > { %3966 = vmatprep.subr.bf16.mxu1 %v6935_v11  ;;  %v7014_v11 = vld [vmem:[%s8018_s11 + $0x760] ss:$16 sps:$4 sm:$0xff]  }
  0x52   : > { %3926 = vmatpush2.bf16.msra.mxu0 %v6937_v13  ;;  %v7022_v13 = vld [vmem:[%s8018_s11 + $0x744] ss:$16 sps:$4 sm:$0xff]  }
  0x53   : > { %3967 = vmatpush2.bf16.msra.mxu1 %v6938_v15  ;;  %3977 = vmatprep.subr.bf16.mxu0 %v6941_v16  ;;  %v7017_v15 = vld [vmem:[%s8018_s11 + $0x540] ss:$16 sps:$4 sm:$0xff]  }
  0x54   : > { %4018 = vmatprep.subr.bf16.mxu1 %v6944_v17  ;;  %v7020_v16 = vld [vmem:[%s8018_s11 + $0x740] ss:$16 sps:$4 sm:$0xff]   ;;  %v7025_v17 = vld [vmem:[%s8018_s11 + $0x524] ss:$16 sps:$4 sm:$0xff]  }
  0x55   : > { %3928 = vmatmul.mubr.bf16.vlgmr.msra.gmra.mxu0 %v8106_v14 }
  0x56   : > { %3969 = vmatmul.mubr.bf16.vlgmr.msra.gmra.mxu1 %v8116_v19  ;;  %3978 = vmatpush1.bf16.msra.mxu0 %v6939_v20  ;;  %v7028_v20 = vld [vmem:[%s8018_s11 + $0x724] ss:$16 sps:$4 sm:$0xff]  }
  0x57   : > { %4019 = vmatpush1.bf16.msra.mxu1 %v6942_v21  ;;  %3979 = vmatprep.subr.bf16.mxu0 %v6947_v22  ;;  %v7023_v21 = vld [vmem:[%s8018_s11 + $0x520] ss:$16 sps:$4 sm:$0xff]  }
  0x58   : > { %4020 = vmatprep.subr.bf16.mxu1 %v6950_v23  ;;  %4009 = vmatprep.mubr.bf16.mxu0 %v8112_v18  ;;  %v7026_v22 = vld [vmem:[%s8018_s11 + $0x720] ss:$16 sps:$4 sm:$0xff]   ;;  %v7031_v23 = vld [vmem:[%s8018_s11 + $0x504] ss:$16 sps:$4 sm:$0xff]  }
  0x59   : > { %4050 = vmatprep.mubr.bf16.mxu1 %v8124_v24 }
  0x5a   : > { %3980 = vmatpush1.bf16.msra.mxu0 %v6945_v25  ;;  %v7034_v25 = vld [vmem:[%s8018_s11 + $0x704] ss:$16 sps:$4 sm:$0xff]  }
  0x5b   : > { %4021 = vmatpush1.bf16.msra.mxu1 %v6948_v26  ;;  %3981 = vmatprep.subr.bf16.mxu0 %v6953_v27  ;;  %v7029_v26 = vld [vmem:[%s8018_s11 + $0x500] ss:$16 sps:$4 sm:$0xff]   ;;  %v8189_v27 = vrot.slane %v8096_v7, %v8068_v50 }
  0x5c   : > { %4022 = vmatprep.subr.bf16.mxu1 %v6956_v28  ;;  %v7032_v28 = vld [vmem:[%s8018_s11 + $0x700] ss:$16 sps:$4 sm:$0xff]  }
  0x5d   : > { %v7039_v7 = vld [vmem:[%s8018_s11 + $0xae0] ss:$16 sps:$4 sm:$0xff]  }
  0x5e   : > { %3982 = vmatpush1.bf16.msra.mxu0 %v6951_v29  ;;  %v7038_v29 = vld [vmem:[%s8018_s11 + $0x8e4] ss:$16 sps:$4 sm:$0xff]  }
  0x5f   : > { %4023 = vmatpush1.bf16.msra.mxu1 %v6954_v30  ;;  %3983 = vmatprep.subr.bf16.mxu0 %v6959_v31  ;;  %v7041_v30 = vld [vmem:[%s8018_s11 + $0xae4] ss:$16 sps:$4 sm:$0xff]   ;;  %v8196_v31 = vcombine.high %v8189_v27, %v8189_v27 }
  0x60   : > { %4024 = vmatprep.subr.bf16.mxu1 %v6962_v32  ;;  %v7036_v32 = vld [vmem:[%s8018_s11 + $0x8e0] ss:$16 sps:$4 sm:$0xff]  }
  0x62   : > { %3984 = vmatpush1.bf16.msra.mxu0 %v6957_v33  ;;  %v8201_v33 = vld [vmem:[%s8013_s30 + $0x8] sm:$0xff] }
  0x63   : > { %4025 = vmatpush1.bf16.msra.mxu1 %v6960_v34  ;;  %3985 = vmatprep.subr.bf16.mxu0 %v6965_v35  ;;  %v7044_v34 = vld [vmem:[%s8018_s11 + $0x8c4] ss:$16 sps:$4 sm:$0xff]  }
  0x64   : > { %4026 = vmatprep.subr.bf16.mxu1 %v6968_v36  ;;  %v7047_v35 = vld [vmem:[%s8018_s11 + $0xac4] ss:$16 sps:$4 sm:$0xff]   ;;  %v8207_v36 = vrot.slane %v8201_v33, %v8068_v50 }
  0x66   : > { %3986 = vmatpush1.bf16.msra.mxu0 %v6963_v37  ;;  %v941_v37 = vcombine.high %v8207_v36, %v8207_v36 }
  0x67   : > { %4027 = vmatpush1.bf16.msra.mxu1 %v6966_v38  ;;  %3987 = vmatprep.subr.bf16.mxu0 %v6971_v39  ;;  %v7042_v38 = vld [vmem:[%s8018_s11 + $0x8c0] ss:$16 sps:$4 sm:$0xff]  }
  0x68   : > { %4028 = vmatprep.subr.bf16.mxu1 %v6974_v40  ;;  %v7045_v39 = vld [vmem:[%s8018_s11 + $0xac0] ss:$16 sps:$4 sm:$0xff]   ;;  %v7050_v40 = vld [vmem:[%s8018_s11 + $0x8a4] ss:$16 sps:$4 sm:$0xff]  }
  0x6a   : > { %3988 = vmatpush1.bf16.msra.mxu0 %v6969_v41  ;;  %v7053_v41 = vld [vmem:[%s8018_s11 + $0xaa4] ss:$16 sps:$4 sm:$0xff]  }
  0x6b   : > { %4029 = vmatpush1.bf16.msra.mxu1 %v6972_v42  ;;  %3989 = vmatprep.subr.bf16.mxu0 %v6977_v43  ;;  %v8218_v42 = vrot.slane %v941_v37, %v8068_v50  ;;  %v7114_v37 = vld [vmem:[%s8018_s11 + $0x940] ss:$16 sps:$4 sm:$0xff]  }
  0x6c   : > { %4030 = vmatprep.subr.bf16.mxu1 %v6980_v45  ;;  %v7048_v45 = vld [vmem:[%s8018_s11 + $0x8a0] ss:$16 sps:$4 sm:$0xff]  }
  0x6d   : > { %v8223_v43 = vcombine.high %v8218_v42, %v8218_v42 }
  0x6e   : > { %3990 = vmatpush1.bf16.msra.mxu0 %v6975_v46  ;;  %v7051_v46 = vld [vmem:[%s8018_s11 + $0xaa0] ss:$16 sps:$4 sm:$0xff]  }
  0x6f   : > { %4031 = vmatpush1.bf16.msra.mxu1 %v6978_v47  ;;  %3991 = vmatprep.subr.bf16.mxu0 %v6983_v48  ;;  %v7056_v47 = vld [vmem:[%s8018_s11 + $0x884] ss:$16 sps:$4 sm:$0xff]  }
  0x70   : > { %4032 = vmatprep.subr.bf16.mxu1 %v6986_v49  ;;  %v7059_v48 = vld [vmem:[%s8018_s11 + $0xa84] ss:$16 sps:$4 sm:$0xff]   ;;  %v7054_v49 = vld [vmem:[%s8018_s11 + $0x880] ss:$16 sps:$4 sm:$0xff]  }
  0x72   : > { %3992 = vmatpush1.bf16.msra.mxu0 %v6981_v51  ;;  %v7057_v51 = vld [vmem:[%s8018_s11 + $0xa80] ss:$16 sps:$4 sm:$0xff]  }
  0x73   : > { %4033 = vmatpush1.bf16.msra.mxu1 %v6984_v52  ;;  %3993 = vmatprep.subr.bf16.mxu0 %v6989_v53  ;;  %v7062_v52 = vld [vmem:[%s8018_s11 + $0x864] ss:$16 sps:$4 sm:$0xff]  }
  0x74   : > { %4034 = vmatprep.subr.bf16.mxu1 %v6992_v54  ;;  %v7065_v53 = vld [vmem:[%s8018_s11 + $0xa64] ss:$16 sps:$4 sm:$0xff]   ;;  %v7060_v54 = vld [vmem:[%s8018_s11 + $0x860] ss:$16 sps:$4 sm:$0xff]  }
  0x76   : > { %3994 = vmatpush2.bf16.msra.mxu0 %v6987_v55  ;;  %v7063_v55 = vld [vmem:[%s8018_s11 + $0xa60] ss:$16 sps:$4 sm:$0xff]  }
  0x77   : > { %4035 = vmatpush2.bf16.msra.mxu1 %v6990_v56  ;;  %3995 = vmatprep.subr.bf16.mxu0 %v6995_v57  ;;  %v7068_v56 = vld [vmem:[%s8018_s11 + $0x844] ss:$16 sps:$4 sm:$0xff]  }
  0x78   : > { %4036 = vmatprep.subr.bf16.mxu1 %v6998_v58  ;;  %v7071_v57 = vld [vmem:[%s8018_s11 + $0xa44] ss:$16 sps:$4 sm:$0xff]   ;;  %v7066_v58 = vld [vmem:[%s8018_s11 + $0x840] ss:$16 sps:$4 sm:$0xff]  }
  0x7a   : > { %3996 = vmatpush2.bf16.msra.mxu0 %v6993_v59  ;;  %v7069_v59 = vld [vmem:[%s8018_s11 + $0xa40] ss:$16 sps:$4 sm:$0xff]  }
  0x7b   : > { %4037 = vmatpush2.bf16.msra.mxu1 %v6996_v60  ;;  %3997 = vmatprep.subr.bf16.mxu0 %v7001_v62  ;;  %v7074_v60 = vld [vmem:[%s8018_s11 + $0x824] ss:$16 sps:$4 sm:$0xff]  }
  0x7c   : > { %4038 = vmatprep.subr.bf16.mxu1 %v7004_v63  ;;  %v7077_v62 = vld [vmem:[%s8018_s11 + $0xa24] ss:$16 sps:$4 sm:$0xff]   ;;  %v7072_v63 = vld [vmem:[%s8018_s11 + $0x820] ss:$16 sps:$4 sm:$0xff]  }
  0x7e   : > { %3998 = vmatpush2.bf16.msra.mxu0 %v6999_v0  ;;  %v7075_v0 = vld [vmem:[%s8018_s11 + $0xa20] ss:$16 sps:$4 sm:$0xff]  }
  0x7f   : > { %4039 = vmatpush2.bf16.msra.mxu1 %v7002_v2  ;;  %3999 = vmatprep.subr.bf16.mxu0 %v7007_v3  ;;  %v7080_v2 = vld [vmem:[%s8018_s11 + $0x804] ss:$16 sps:$4 sm:$0xff]  }
  0x80   : > { %4040 = vmatprep.subr.bf16.mxu1 %v7010_v4  ;;  %v7083_v3 = vld [vmem:[%s8018_s11 + $0xa04] ss:$16 sps:$4 sm:$0xff]   ;;  %v7078_v4 = vld [vmem:[%s8018_s11 + $0x800] ss:$16 sps:$4 sm:$0xff]  }
  0x82   : > { %4000 = vmatpush2.bf16.msra.mxu0 %v7005_v5  ;;  %v7081_v5 = vld [vmem:[%s8018_s11 + $0xa00] ss:$16 sps:$4 sm:$0xff]  }
  0x83   : > { %4041 = vmatpush2.bf16.msra.mxu1 %v7008_v6  ;;  %4001 = vmatprep.subr.bf16.mxu0 %v7013_v8  ;;  %v7086_v6 = vld [vmem:[%s8018_s11 + $0x9e4] ss:$16 sps:$4 sm:$0xff]  }
  0x84   : > { %4042 = vmatprep.subr.bf16.mxu1 %v7016_v9  ;;  %v7089_v8 = vld [vmem:[%s8018_s11 + $0xbe4] ss:$16 sps:$4 sm:$0xff]   ;;  %v7084_v9 = vld [vmem:[%s8018_s11 + $0x9e0] ss:$16 sps:$4 sm:$0xff]  }
  0x86   : > { %4002 = vmatpush2.bf16.msra.mxu0 %v7011_v10  ;;  %v7087_v10 = vld [vmem:[%s8018_s11 + $0xbe0] ss:$16 sps:$4 sm:$0xff]  }
  0x87   : > { %4043 = vmatpush2.bf16.msra.mxu1 %v7014_v11  ;;  %4003 = vmatprep.subr.bf16.mxu0 %v7019_v12  ;;  %v7092_v11 = vld [vmem:[%s8018_s11 + $0x9c4] ss:$16 sps:$4 sm:$0xff]  }
  0x88   : > { %4044 = vmatprep.subr.bf16.mxu1 %v7022_v13  ;;  %v7095_v12 = vld [vmem:[%s8018_s11 + $0xbc4] ss:$16 sps:$4 sm:$0xff]   ;;  %v7090_v13 = vld [vmem:[%s8018_s11 + $0x9c0] ss:$16 sps:$4 sm:$0xff]  }
  0x8a   : > { %4004 = vmatpush2.bf16.msra.mxu0 %v7017_v15  ;;  %v7093_v15 = vld [vmem:[%s8018_s11 + $0xbc0] ss:$16 sps:$4 sm:$0xff]  }
  0x8b   : > { %4045 = vmatpush2.bf16.msra.mxu1 %v7020_v16  ;;  %4005 = vmatprep.subr.bf16.mxu0 %v7025_v17  ;;  %v7098_v16 = vld [vmem:[%s8018_s11 + $0x9a4] ss:$16 sps:$4 sm:$0xff]  }
  0x8c   : > { %4046 = vmatprep.subr.bf16.mxu1 %v7028_v20  ;;  %v7101_v17 = vld [vmem:[%s8018_s11 + $0xba4] ss:$16 sps:$4 sm:$0xff]   ;;  %v7096_v20 = vld [vmem:[%s8018_s11 + $0x9a0] ss:$16 sps:$4 sm:$0xff]  }
  0x8e   : > { %4006 = vmatpush2.bf16.msra.mxu0 %v7023_v21  ;;  %v7099_v21 = vld [vmem:[%s8018_s11 + $0xba0] ss:$16 sps:$4 sm:$0xff]  }
  0x8f   : > { %4047 = vmatpush2.bf16.msra.mxu1 %v7026_v22  ;;  %4007 = vmatprep.subr.bf16.mxu0 %v7031_v23  ;;  %v7104_v22 = vld [vmem:[%s8018_s11 + $0x984] ss:$16 sps:$4 sm:$0xff]  }
  0x90   : > { %4048 = vmatprep.subr.bf16.mxu1 %v7034_v25  ;;  %v7107_v23 = vld [vmem:[%s8018_s11 + $0xb84] ss:$16 sps:$4 sm:$0xff]   ;;  %v7102_v25 = vld [vmem:[%s8018_s11 + $0x980] ss:$16 sps:$4 sm:$0xff]  }
  0x92   : > { %4008 = vmatpush2.bf16.msra.mxu0 %v7029_v26  ;;  %v7105_v26 = vld [vmem:[%s8018_s11 + $0xb80] ss:$16 sps:$4 sm:$0xff]  }
  0x93   : > { %4049 = vmatpush2.bf16.msra.mxu1 %v7032_v28  ;;  %4059 = vmatprep.subr.bf16.mxu0 %v7038_v29  ;;  %v7110_v28 = vld [vmem:[%s8018_s11 + $0x964] ss:$16 sps:$4 sm:$0xff]  }
  0x94   : > { %4100 = vmatprep.subr.bf16.mxu1 %v7041_v30  ;;  %v7113_v29 = vld [vmem:[%s8018_s11 + $0xb64] ss:$16 sps:$4 sm:$0xff]   ;;  %v7108_v30 = vld [vmem:[%s8018_s11 + $0x960] ss:$16 sps:$4 sm:$0xff]  }
  0x95   : > { %4010 = vmatmul.mubr.bf16.vlgmr.msra.gmra.mxu0 %v8189_v27 }
  0x96   : > { %4051 = vmatmul.mubr.bf16.vlgmr.msra.gmra.mxu1 %v8196_v31  ;;  %4060 = vmatpush1.bf16.msra.mxu0 %v7036_v32  ;;  %v7111_v32 = vld [vmem:[%s8018_s11 + $0xb60] ss:$16 sps:$4 sm:$0xff]  }
  0x97   : > { %4101 = vmatpush1.bf16.msra.mxu1 %v7039_v7  ;;  %4061 = vmatprep.subr.bf16.mxu0 %v7044_v34  ;;  %v7116_v7 = vld [vmem:[%s8018_s11 + $0x944] ss:$16 sps:$4 sm:$0xff]  }
  0x98   : > { %4102 = vmatprep.subr.bf16.mxu1 %v7047_v35  ;;  %4091 = vmatprep.mubr.bf16.mxu0 %v8218_v42  ;;  %v7119_v34 = vld [vmem:[%s8018_s11 + $0xb44] ss:$16 sps:$4 sm:$0xff]   ;;  %v926_v35 = vcombine.high %v8201_v33, %v8201_v33  ;;  %v7120_v33 = vld [vmem:[%s8018_s11 + $0x920] ss:$16 sps:$4 sm:$0xff]  }
  0x99   : > { %4132 = vmatprep.mubr.bf16.mxu1 %v8223_v43 }
  0x9a   : > { %4062 = vmatpush1.bf16.msra.mxu0 %v7042_v38  ;;  %v7117_v38 = vld [vmem:[%s8018_s11 + $0xb40] ss:$16 sps:$4 sm:$0xff]  }
  0x9b   : > { %4103 = vmatpush1.bf16.msra.mxu1 %v7045_v39  ;;  %4063 = vmatprep.subr.bf16.mxu0 %v7050_v40  ;;  %v7122_v39 = vld [vmem:[%s8018_s11 + $0x924] ss:$16 sps:$4 sm:$0xff]  }
  0x9c   : > { %4104 = vmatprep.subr.bf16.mxu1 %v7053_v41  ;;  %v7125_v40 = vld [vmem:[%s8018_s11 + $0xb24] ss:$16 sps:$4 sm:$0xff]   ;;  %v8277_v41 = vrot.slane %v926_v35, %v8068_v50  ;;  %v7183_v35 = vld [vmem:[%s8018_s11 + $0xfe0] ss:$16 sps:$4 sm:$0xff]  }
  0x9e   : > { %4064 = vmatpush1.bf16.msra.mxu0 %v7048_v45  ;;  %v7123_v45 = vld [vmem:[%s8018_s11 + $0xb20] ss:$16 sps:$4 sm:$0xff]  }
  0x9f   : > { %4105 = vmatpush1.bf16.msra.mxu1 %v7051_v46  ;;  %4065 = vmatprep.subr.bf16.mxu0 %v7056_v47  ;;  %v7128_v46 = vld [vmem:[%s8018_s11 + $0x904] ss:$16 sps:$4 sm:$0xff]  }
  0xa0   : > { %4106 = vmatprep.subr.bf16.mxu1 %v7059_v48  ;;  %v7131_v47 = vld [vmem:[%s8018_s11 + $0xb04] ss:$16 sps:$4 sm:$0xff]   ;;  %v942_v48 = vcombine.high %v8277_v41, %v8277_v41 }
  0xa2   : > { %4066 = vmatpush1.bf16.msra.mxu0 %v7054_v49  ;;  %v8287_v49 = vrot.slane %v8207_v36, %v8068_v50  ;;  %v7132_v36 = vld [vmem:[%s8018_s11 + $0xce0] ss:$16 sps:$4 sm:$0xff]  }
  0xa3   : > { %4107 = vmatpush1.bf16.msra.mxu1 %v7057_v51  ;;  %4067 = vmatprep.subr.bf16.mxu0 %v7062_v52  ;;  %v7126_v51 = vld [vmem:[%s8018_s11 + $0x900] ss:$16 sps:$4 sm:$0xff]  }
  0xa4   : > { %4108 = vmatprep.subr.bf16.mxu1 %v7065_v53  ;;  %v7129_v52 = vld [vmem:[%s8018_s11 + $0xb00] ss:$16 sps:$4 sm:$0xff]   ;;  %v7134_v53 = vld [vmem:[%s8018_s11 + $0xce4] ss:$16 sps:$4 sm:$0xff]  }
  0xa6   : > { %4068 = vmatpush1.bf16.msra.mxu0 %v7060_v54  ;;  %v7137_v54 = vld [vmem:[%s8018_s11 + $0xee4] ss:$16 sps:$4 sm:$0xff]  }
  0xa7   : > { %4109 = vmatpush1.bf16.msra.mxu1 %v7063_v55  ;;  %4069 = vmatprep.subr.bf16.mxu0 %v7068_v56  ;;  %v8294_v55 = vrot.slane %v942_v48, %v8068_v50  ;;  %v8298_v56 = vcombine.high %v8287_v49, %v8287_v49  ;;  %v7200_v48 = vld [vmem:[%s8018_s11 + $0xd84] ss:$16 sps:$4 sm:$0xff]  }
  0xa8   : > { %4110 = vmatprep.subr.bf16.mxu1 %v7071_v57  ;;  %v7135_v57 = vld [vmem:[%s8018_s11 + $0xee0] ss:$16 sps:$4 sm:$0xff]  }
  0xaa   : > { %4070 = vmatpush1.bf16.msra.mxu0 %v7066_v58  ;;  %v7140_v58 = vld [vmem:[%s8018_s11 + $0xcc4] ss:$16 sps:$4 sm:$0xff]  }
  0xab   : > { %4111 = vmatpush1.bf16.msra.mxu1 %v7069_v59  ;;  %4071 = vmatprep.subr.bf16.mxu0 %v7074_v60  ;;  %v7143_v59 = vld [vmem:[%s8018_s11 + $0xec4] ss:$16 sps:$4 sm:$0xff]   ;;  %v8306_v60 = vcombine.high %v8294_v55, %v8294_v55 }
  0xac   : > { %4112 = vmatprep.subr.bf16.mxu1 %v7077_v62  ;;  %v7138_v62 = vld [vmem:[%s8018_s11 + $0xcc0] ss:$16 sps:$4 sm:$0xff]  }
  0xae   : > { %4072 = vmatpush1.bf16.msra.mxu0 %v7072_v63  ;;  %v7141_v63 = vld [vmem:[%s8018_s11 + $0xec0] ss:$16 sps:$4 sm:$0xff]  }
  0xaf   : > { %4113 = vmatpush1.bf16.msra.mxu1 %v7075_v0  ;;  %4073 = vmatprep.subr.bf16.mxu0 %v7080_v2  ;;  %v7146_v0 = vld [vmem:[%s8018_s11 + $0xca4] ss:$16 sps:$4 sm:$0xff]  }
  0xb0   : > { %4114 = vmatprep.subr.bf16.mxu1 %v7083_v3  ;;  %v7149_v2 = vld [vmem:[%s8018_s11 + $0xea4] ss:$16 sps:$4 sm:$0xff]   ;;  %v7144_v3 = vld [vmem:[%s8018_s11 + $0xca0] ss:$16 sps:$4 sm:$0xff]  }
  0xb2   : > { %4074 = vmatpush1.bf16.msra.mxu0 %v7078_v4  ;;  %v7147_v4 = vld [vmem:[%s8018_s11 + $0xea0] ss:$16 sps:$4 sm:$0xff]  }
  0xb3   : > { %4115 = vmatpush1.bf16.msra.mxu1 %v7081_v5  ;;  %4075 = vmatprep.subr.bf16.mxu0 %v7086_v6  ;;  %v7152_v5 = vld [vmem:[%s8018_s11 + $0xc84] ss:$16 sps:$4 sm:$0xff]  }
  0xb4   : > { %4116 = vmatprep.subr.bf16.mxu1 %v7089_v8  ;;  %v7155_v6 = vld [vmem:[%s8018_s11 + $0xe84] ss:$16 sps:$4 sm:$0xff]   ;;  %v7150_v8 = vld [vmem:[%s8018_s11 + $0xc80] ss:$16 sps:$4 sm:$0xff]  }
  0xb6   : > { %4076 = vmatpush2.bf16.msra.mxu0 %v7084_v9  ;;  %v7153_v9 = vld [vmem:[%s8018_s11 + $0xe80] ss:$16 sps:$4 sm:$0xff]  }
  0xb7   : > { %4117 = vmatpush2.bf16.msra.mxu1 %v7087_v10  ;;  %4077 = vmatprep.subr.bf16.mxu0 %v7092_v11  ;;  %v7158_v10 = vld [vmem:[%s8018_s11 + $0xc64] ss:$16 sps:$4 sm:$0xff]  }
  0xb8   : > { %4118 = vmatprep.subr.bf16.mxu1 %v7095_v12  ;;  %v7161_v11 = vld [vmem:[%s8018_s11 + $0xe64] ss:$16 sps:$4 sm:$0xff]   ;;  %v7156_v12 = vld [vmem:[%s8018_s11 + $0xc60] ss:$16 sps:$4 sm:$0xff]  }
  0xba   : > { %4078 = vmatpush2.bf16.msra.mxu0 %v7090_v13  ;;  %v7159_v13 = vld [vmem:[%s8018_s11 + $0xe60] ss:$16 sps:$4 sm:$0xff]  }
  0xbb   : > { %4119 = vmatpush2.bf16.msra.mxu1 %v7093_v15  ;;  %4079 = vmatprep.subr.bf16.mxu0 %v7098_v16  ;;  %v7164_v15 = vld [vmem:[%s8018_s11 + $0xc44] ss:$16 sps:$4 sm:$0xff]  }
  0xbc   : > { %4120 = vmatprep.subr.bf16.mxu1 %v7101_v17  ;;  %v7167_v16 = vld [vmem:[%s8018_s11 + $0xe44] ss:$16 sps:$4 sm:$0xff]   ;;  %v7162_v17 = vld [vmem:[%s8018_s11 + $0xc40] ss:$16 sps:$4 sm:$0xff]  }
  0xbe   : > { %4080 = vmatpush2.bf16.msra.mxu0 %v7096_v20  ;;  %v7165_v20 = vld [vmem:[%s8018_s11 + $0xe40] ss:$16 sps:$4 sm:$0xff]  }
  0xbf   : > { %4121 = vmatpush2.bf16.msra.mxu1 %v7099_v21  ;;  %4081 = vmatprep.subr.bf16.mxu0 %v7104_v22  ;;  %v7170_v21 = vld [vmem:[%s8018_s11 + $0xc24] ss:$16 sps:$4 sm:$0xff]  }
  0xc0   : > { %4122 = vmatprep.subr.bf16.mxu1 %v7107_v23  ;;  %v7173_v22 = vld [vmem:[%s8018_s11 + $0xe24] ss:$16 sps:$4 sm:$0xff]   ;;  %v7168_v23 = vld [vmem:[%s8018_s11 + $0xc20] ss:$16 sps:$4 sm:$0xff]  }
  0xc2   : > { %4082 = vmatpush2.bf16.msra.mxu0 %v7102_v25  ;;  %v7171_v25 = vld [vmem:[%s8018_s11 + $0xe20] ss:$16 sps:$4 sm:$0xff]  }
  0xc3   : > { %4123 = vmatpush2.bf16.msra.mxu1 %v7105_v26  ;;  %4083 = vmatprep.subr.bf16.mxu0 %v7110_v28  ;;  %v7176_v26 = vld [vmem:[%s8018_s11 + $0xc04] ss:$16 sps:$4 sm:$0xff]  }
  0xc4   : > { %4124 = vmatprep.subr.bf16.mxu1 %v7113_v29  ;;  %v7179_v28 = vld [vmem:[%s8018_s11 + $0xe04] ss:$16 sps:$4 sm:$0xff]   ;;  %v7174_v29 = vld [vmem:[%s8018_s11 + $0xc00] ss:$16 sps:$4 sm:$0xff]  }
  0xc6   : > { %4084 = vmatpush2.bf16.msra.mxu0 %v7108_v30  ;;  %v7177_v30 = vld [vmem:[%s8018_s11 + $0xe00] ss:$16 sps:$4 sm:$0xff]  }
  0xc7   : > { %4125 = vmatpush2.bf16.msra.mxu1 %v7111_v32  ;;  %4085 = vmatprep.subr.bf16.mxu0 %v7116_v7  ;;  %v7182_v32 = vld [vmem:[%s8018_s11 + $0xde4] ss:$16 sps:$4 sm:$0xff]  }
  0xc8   : > { %4126 = vmatprep.subr.bf16.mxu1 %v7119_v34  ;;  %v7185_v7 = vld [vmem:[%s8018_s11 + $0xfe4] ss:$16 sps:$4 sm:$0xff]   ;;  %v7180_v34 = vld [vmem:[%s8018_s11 + $0xde0] ss:$16 sps:$4 sm:$0xff]  }
  0xca   : > { %4086 = vmatpush2.bf16.msra.mxu0 %v7114_v37  ;;  %v7188_v37 = vld [vmem:[%s8018_s11 + $0xdc4] ss:$16 sps:$4 sm:$0xff]  }
  0xcb   : > { %4127 = vmatpush2.bf16.msra.mxu1 %v7117_v38  ;;  %4087 = vmatprep.subr.bf16.mxu0 %v7122_v39  ;;  %v7191_v38 = vld [vmem:[%s8018_s11 + $0xfc4] ss:$16 sps:$4 sm:$0xff]   ;;  %v7186_v39 = vld [vmem:[%s8018_s11 + $0xdc0] ss:$16 sps:$4 sm:$0xff]  }
  0xcc   : > { %4128 = vmatprep.subr.bf16.mxu1 %v7125_v40  ;;  %v7189_v40 = vld [vmem:[%s8018_s11 + $0xfc0] ss:$16 sps:$4 sm:$0xff]  }
  0xce   : > { %4088 = vmatpush2.bf16.msra.mxu0 %v7120_v33  ;;  %v7194_v33 = vld [vmem:[%s8018_s11 + $0xda4] ss:$16 sps:$4 sm:$0xff]  }
  0xcf   : > { %4129 = vmatpush2.bf16.msra.mxu1 %v7123_v45  ;;  %4089 = vmatprep.subr.bf16.mxu0 %v7128_v46  ;;  %v7197_v45 = vld [vmem:[%s8018_s11 + $0xfa4] ss:$16 sps:$4 sm:$0xff]   ;;  %v7192_v46 = vld [vmem:[%s8018_s11 + $0xda0] ss:$16 sps:$4 sm:$0xff]  }
  0xd0   : > { %4130 = vmatprep.subr.bf16.mxu1 %v7131_v47  ;;  %v7195_v47 = vld [vmem:[%s8018_s11 + $0xfa0] ss:$16 sps:$4 sm:$0xff]  }
  0xd2   : > { %4090 = vmatpush2.bf16.msra.mxu0 %v7126_v51  ;;  %v7203_v51 = vld [vmem:[%s8018_s11 + $0xf84] ss:$16 sps:$4 sm:$0xff]  }
  0xd3   : > { %4131 = vmatpush2.bf16.msra.mxu1 %v7129_v52  ;;  %4141 = vmatprep.subr.bf16.mxu0 %v7134_v53  ;;  %v7198_v52 = vld [vmem:[%s8018_s11 + $0xd80] ss:$16 sps:$4 sm:$0xff]  }
  0xd4   : > { %4182 = vmatprep.subr.bf16.mxu1 %v7137_v54  ;;  %v7201_v53 = vld [vmem:[%s8018_s11 + $0xf80] ss:$16 sps:$4 sm:$0xff]   ;;  %v7206_v54 = vld [vmem:[%s8018_s11 + $0xd64] ss:$16 sps:$4 sm:$0xff]  }
  0xd5   : > { %4092 = vmatmul.mubr.bf16.vlgmr.msra.gmra.mxu0 %v8287_v49 }
  0xd6   : > { %4133 = vmatmul.mubr.bf16.vlgmr.msra.gmra.mxu1 %v8298_v56  ;;  %4142 = vmatpush1.bf16.msra.mxu0 %v7132_v36  ;;  %v7209_v36 = vld [vmem:[%s8018_s11 + $0xf64] ss:$16 sps:$4 sm:$0xff]  }
  0xd7   : > { %4183 = vmatpush1.bf16.msra.mxu1 %v7135_v57  ;;  %4143 = vmatprep.subr.bf16.mxu0 %v7140_v58  ;;  %v7204_v57 = vld [vmem:[%s8018_s11 + $0xd60] ss:$16 sps:$4 sm:$0xff]  }
  0xd8   : > { %4184 = vmatprep.subr.bf16.mxu1 %v7143_v59  ;;  %4173 = vmatprep.mubr.bf16.mxu0 %v8294_v55  ;;  %v7207_v58 = vld [vmem:[%s8018_s11 + $0xf60] ss:$16 sps:$4 sm:$0xff]   ;;  %v7212_v59 = vld [vmem:[%s8018_s11 + $0xd44] ss:$16 sps:$4 sm:$0xff]  }
  0xd9   : > { %4214 = vmatprep.mubr.bf16.mxu1 %v8306_v60 }
  0xda   : > { %4144 = vmatpush1.bf16.msra.mxu0 %v7138_v62  ;;  %v7215_v62 = vld [vmem:[%s8018_s11 + $0xf44] ss:$16 sps:$4 sm:$0xff]  }
  0xdb   : > { %4185 = vmatpush1.bf16.msra.mxu1 %v7141_v63  ;;  %4145 = vmatprep.subr.bf16.mxu0 %v7146_v0  ;;  %v7210_v63 = vld [vmem:[%s8018_s11 + $0xd40] ss:$16 sps:$4 sm:$0xff]  }
  0xdc   : > { %4186 = vmatprep.subr.bf16.mxu1 %v7149_v2  ;;  %v7213_v0 = vld [vmem:[%s8018_s11 + $0xf40] ss:$16 sps:$4 sm:$0xff]   ;;  %v7218_v2 = vld [vmem:[%s8018_s11 + $0xd24] ss:$16 sps:$4 sm:$0xff]  }
  0xde   : > { %4146 = vmatpush1.bf16.msra.mxu0 %v7144_v3  ;;  %v7221_v3 = vld [vmem:[%s8018_s11 + $0xf24] ss:$16 sps:$4 sm:$0xff]  }
  0xdf   : > { %4187 = vmatpush1.bf16.msra.mxu1 %v7147_v4  ;;  %4147 = vmatprep.subr.bf16.mxu0 %v7152_v5  ;;  %v7216_v4 = vld [vmem:[%s8018_s11 + $0xd20] ss:$16 sps:$4 sm:$0xff]  }
  0xe0   : > { %4188 = vmatprep.subr.bf16.mxu1 %v7155_v6  ;;  %v7219_v5 = vld [vmem:[%s8018_s11 + $0xf20] ss:$16 sps:$4 sm:$0xff]   ;;  %v7224_v6 = vld [vmem:[%s8018_s11 + $0xd04] ss:$16 sps:$4 sm:$0xff]  }
  0xe2   : > { %4148 = vmatpush1.bf16.msra.mxu0 %v7150_v8  ;;  %v7227_v8 = vld [vmem:[%s8018_s11 + $0xf04] ss:$16 sps:$4 sm:$0xff]  }
  0xe3   : > { %4189 = vmatpush1.bf16.msra.mxu1 %v7153_v9  ;;  %4149 = vmatprep.subr.bf16.mxu0 %v7158_v10  ;;  %v7222_v9 = vld [vmem:[%s8018_s11 + $0xd00] ss:$16 sps:$4 sm:$0xff]   ;;  %v8371_v10 = vrot.slane %v8277_v41, %v8068_v50 }
  0xe4   : > { %4190 = vmatprep.subr.bf16.mxu1 %v7161_v11  ;;  %v8374_v11 = vld.sshfl [vmem:[%s8013_s30 + $0x10] sm:$0x11 pattern:$0x75316420] }
  0xe5   : > { %v7229_v41 = vld [vmem:[%s8018_s11 + $0x10e0] ss:$16 sps:$4 sm:$0xff]  }
  0xe6   : > { %4150 = vmatpush1.bf16.msra.mxu0 %v7156_v12  ;;  %v7225_v12 = vld [vmem:[%s8018_s11 + $0xf00] ss:$16 sps:$4 sm:$0xff]  }
  0xe7   : > { %4191 = vmatpush1.bf16.msra.mxu1 %v7159_v13  ;;  %4151 = vmatprep.subr.bf16.mxu0 %v7164_v15  ;;  %v7231_v13 = vld [vmem:[%s8018_s11 + $0x10e4] ss:$16 sps:$4 sm:$0xff]   ;;  %v7234_v15 = vld [vmem:[%s8018_s11 + $0xec] ss:$16 sps:$4 sm:$0xff]  }
  0xe8   : > { %4192 = vmatprep.subr.bf16.mxu1 %v7167_v16  ;;  %v982_v16 = vcombine.high %v8374_v11, %v8374_v11 }
  0xea   : > { %4152 = vmatpush1.bf16.msra.mxu0 %v7162_v17  ;;  %v8383_v17 = vcombine.high %v8371_v10, %v8371_v10 }
  0xeb   : > { %4193 = vmatpush1.bf16.msra.mxu1 %v7165_v20  ;;  %4153 = vmatprep.subr.bf16.mxu0 %v7170_v21  ;;  %v7232_v20 = vld [vmem:[%s8018_s11 + $0xe8] ss:$16 sps:$4 sm:$0xff]   ;;  %v7237_v21 = vld [vmem:[%s8018_s11 + $0x10c4] ss:$16 sps:$4 sm:$0xff]  }
  0xec   : > { %4194 = vmatprep.subr.bf16.mxu1 %v7173_v22  ;;  %v7240_v22 = vld [vmem:[%s8018_s11 + $0xcc] ss:$16 sps:$4 sm:$0xff]  }
  0xee   : > { %4154 = vmatpush1.bf16.msra.mxu0 %v7168_v23  ;;  %v8390_v23 = vrot.slane %v982_v16, %v8068_v50  ;;  %v7285_v16 = vld [vmem:[%s8018_s11 + $0x11c4] ss:$16 sps:$4 sm:$0xff]  }
  0xef   : > { %4195 = vmatpush1.bf16.msra.mxu1 %v7171_v25  ;;  %4155 = vmatprep.subr.bf16.mxu0 %v7176_v26 }
  0xf0   : > { %4196 = vmatprep.subr.bf16.mxu1 %v7179_v28  ;;  %v7235_v28 = vld [vmem:[%s8018_s11 + $0x10c0] ss:$16 sps:$4 sm:$0xff]  }
  0xf2   : > { %4156 = vmatpush1.bf16.msra.mxu0 %v7174_v29  ;;  %v7238_v29 = vld [vmem:[%s8018_s11 + $0xc8] ss:$16 sps:$4 sm:$0xff]  }
  0xf3   : > { %4197 = vmatpush1.bf16.msra.mxu1 %v7177_v30  ;;  %4157 = vmatprep.subr.bf16.mxu0 %v7182_v32 }
  0xf4   : > { %4198 = vmatprep.subr.bf16.mxu1 %v7185_v7 }
  0xf6   : > { %4158 = vmatpush2.bf16.msra.mxu0 %v7180_v34  ;;  %v7243_v34 = vld [vmem:[%s8018_s11 + $0x10a4] ss:$16 sps:$4 sm:$0xff]  }
  0xf7   : > { %4199 = vmatpush2.bf16.msra.mxu1 %v7183_v35  ;;  %4159 = vmatprep.subr.bf16.mxu0 %v7188_v37  ;;  %v7246_v35 = vld [vmem:[%s8018_s11 + $0xac] ss:$16 sps:$4 sm:$0xff]  }
  0xf8   : > { %4200 = vmatprep.subr.bf16.mxu1 %v7191_v38  ;;  %v7241_v38 = vld [vmem:[%s8018_s11 + $0x10a0] ss:$16 sps:$4 sm:$0xff]  }
  0xfa   : > { %4160 = vmatpush2.bf16.msra.mxu0 %v7186_v39  ;;  %v7244_v39 = vld [vmem:[%s8018_s11 + $0xa8] ss:$16 sps:$4 sm:$0xff]  }
  0xfb   : > { %4201 = vmatpush2.bf16.msra.mxu1 %v7189_v40  ;;  %4161 = vmatprep.subr.bf16.mxu0 %v7194_v33 }
  0xfc   : > { %4202 = vmatprep.subr.bf16.mxu1 %v7197_v45 }
  0xfe   : > { %4162 = vmatpush2.bf16.msra.mxu0 %v7192_v46 }
  0xff   : > { %4203 = vmatpush2.bf16.msra.mxu1 %v7195_v47  ;;  %4163 = vmatprep.subr.bf16.mxu0 %v7200_v48  ;;  %v7249_v47 = vld [vmem:[%s8018_s11 + $0x1084] ss:$16 sps:$4 sm:$0xff]   ;;  %v7252_v48 = vld [vmem:[%s8018_s11 + $0x8c] ss:$16 sps:$4 sm:$0xff]  }
 0x100   : > { %4204 = vmatprep.subr.bf16.mxu1 %v7203_v51  ;;  %v7247_v51 = vld [vmem:[%s8018_s11 + $0x1080] ss:$16 sps:$4 sm:$0xff]  }
 0x102   : > { %4164 = vmatpush2.bf16.msra.mxu0 %v7198_v52  ;;  %v7255_v52 = vld [vmem:[%s8018_s11 + $0x1064] ss:$16 sps:$4 sm:$0xff]  }
 0x103   : > { %4205 = vmatpush2.bf16.msra.mxu1 %v7201_v53  ;;  %4165 = vmatprep.subr.bf16.mxu0 %v7206_v54  ;;  %v7258_v53 = vld [vmem:[%s8018_s11 + $0x6c] ss:$16 sps:$4 sm:$0xff]   ;;  %v7253_v54 = vld [vmem:[%s8018_s11 + $0x1060] ss:$16 sps:$4 sm:$0xff]  }
 0x104   : > { %4206 = vmatprep.subr.bf16.mxu1 %v7209_v36  ;;  %v7256_v36 = vld [vmem:[%s8018_s11 + $0x68] ss:$16 sps:$4 sm:$0xff]  }
 0x106   : > { %4166 = vmatpush2.bf16.msra.mxu0 %v7204_v57  ;;  %v7261_v57 = vld [vmem:[%s8018_s11 + $0x1044] ss:$16 sps:$4 sm:$0xff]  }
 0x107   : > { %4207 = vmatpush2.bf16.msra.mxu1 %v7207_v58  ;;  %4167 = vmatprep.subr.bf16.mxu0 %v7212_v59  ;;  %v7264_v58 = vld [vmem:[%s8018_s11 + $0x4c] ss:$16 sps:$4 sm:$0xff]   ;;  %v7259_v59 = vld [vmem:[%s8018_s11 + $0x1040] ss:$16 sps:$4 sm:$0xff]  }
 0x108   : > { %4208 = vmatprep.subr.bf16.mxu1 %v7215_v62  ;;  %v7262_v62 = vld [vmem:[%s8018_s11 + $0x48] ss:$16 sps:$4 sm:$0xff]  }
 0x10a   : > { %4168 = vmatpush2.bf16.msra.mxu0 %v7210_v63  ;;  %v7267_v63 = vld [vmem:[%s8018_s11 + $0x1024] ss:$16 sps:$4 sm:$0xff]  }
 0x10b   : > { %4209 = vmatpush2.bf16.msra.mxu1 %v7213_v0  ;;  %4169 = vmatprep.subr.bf16.mxu0 %v7218_v2  ;;  %v7270_v0 = vld [vmem:[%s8018_s11 + $0x2c] ss:$16 sps:$4 sm:$0xff]   ;;  %v7265_v2 = vld [vmem:[%s8018_s11 + $0x1020] ss:$16 sps:$4 sm:$0xff]  }
 0x10c   : > { %4210 = vmatprep.subr.bf16.mxu1 %v7221_v3  ;;  %v7268_v3 = vld [vmem:[%s8018_s11 + $0x28] ss:$16 sps:$4 sm:$0xff]  }
 0x10e   : > { %4170 = vmatpush2.bf16.msra.mxu0 %v7216_v4  ;;  %v7273_v4 = vld [vmem:[%s8018_s11 + $0x1004] ss:$16 sps:$4 sm:$0xff]  }
 0x10f   : > { %4211 = vmatpush2.bf16.msra.mxu1 %v7219_v5  ;;  %4171 = vmatprep.subr.bf16.mxu0 %v7224_v6  ;;  %v7276_v5 = vld [vmem:[%s8018_s11 + $0xc] ss:$16 sps:$4 sm:$0xff]   ;;  %v7271_v6 = vld [vmem:[%s8018_s11 + $0x1000] ss:$16 sps:$4 sm:$0xff]  }
 0x110   : > { %4212 = vmatprep.subr.bf16.mxu1 %v7227_v8  ;;  %v7274_v8 = vld [vmem:[%s8018_s11 + $0x8] ss:$16 sps:$4 sm:$0xff]  }
 0x112   : > { %4172 = vmatpush2.bf16.msra.mxu0 %v7222_v9  ;;  %v7279_v9 = vld [vmem:[%s8018_s11 + $0x11e4] ss:$16 sps:$4 sm:$0xff]  }
 0x113   : > { %4213 = vmatpush2.bf16.msra.mxu1 %v7225_v12  ;;  %4223 = vmatprep.subr.bf16.mxu0 %v7231_v13  ;;  %v7282_v12 = vld [vmem:[%s8018_s11 + $0x1ec] ss:$16 sps:$4 sm:$0xff]   ;;  %v7277_v13 = vld [vmem:[%s8018_s11 + $0x11e0] ss:$16 sps:$4 sm:$0xff]  }
 0x114   : > { %4264 = vmatprep.subr.bf16.mxu1 %v7234_v15  ;;  %v7280_v15 = vld [vmem:[%s8018_s11 + $0x1e8] ss:$16 sps:$4 sm:$0xff]  }
 0x115   : > { %v3929_v25 = vpop.f32.mrf.mxu0  ;;  %4174 = vmatmul.mubr.bf16.vlgmr.msra.gmra.mxu0 %v8371_v10 }
 0x116   : > { %v3970_v26 = vpop.f32.mrf.mxu1  ;;  %4215 = vmatmul.mubr.bf16.vlgmr.msra.gmra.mxu1 %v8383_v17  ;;  %4224 = vmatpush1.bf16.msra.mxu0 %v7229_v41  ;;  %v7288_v41 = vld [vmem:[%s8018_s11 + $0x1cc] ss:$16 sps:$4 sm:$0xff]  }
 0x117   : > { %v8396_v30 = vadd.f32 %v3970_v26, %v3929_v25  ;;  %4265 = vmatpush1.bf16.msra.mxu1 %v7232_v20  ;;  %v3931_v32 = vpop.f32.mrf.mxu0  ;;  %4225 = vmatprep.subr.bf16.mxu0 %v7237_v21  ;;  %v7283_v20 = vld [vmem:[%s8018_s11 + $0x11c0] ss:$16 sps:$4 sm:$0xff]   ;;  %v7286_v21 = vld [vmem:[%s8018_s11 + $0x1c8] ss:$16 sps:$4 sm:$0xff]   ;;  %v7294_v25 = vld [vmem:[%s8018_s11 + $0x1ac] ss:$16 sps:$4 sm:$0xff]  }
 0x118   : > { %v3972_v7 = vpop.f32.mrf.mxu1  ;;  %4266 = vmatprep.subr.bf16.mxu1 %v7240_v22  ;;  %4255 = vmatprep.mubr.bf16.mxu0 %v8390_v23  ;;  %v7291_v22 = vld [vmem:[%s8018_s11 + $0x11a4] ss:$16 sps:$4 sm:$0xff]   ;;  %v7289_v26 = vld [vmem:[%s8018_s11 + $0x11a0] ss:$16 sps:$4 sm:$0xff]  }
 0x119   : > { %v8400_v37 = vadd.f32 %v3972_v7, %v3931_v32  ;;  %4296 = vmatprep.mubr.bf16.mxu1 %v8080_v61  ;;  %v3933_v40 = vpop.f32.mrf.mxu0  ;;  %v7250_v61 = vld [vmem:[%s8018_s11 + $0x88] ss:$16 sps:$4 sm:$0xff]   ;;  %v7300_v32 = vld [vmem:[%s8018_s11 + $0x18c] ss:$16 sps:$4 sm:$0xff]   ;;  %v7295_v7 = vld [vmem:[%s8018_s11 + $0x1180] ss:$16 sps:$4 sm:$0xff]  }
 0x11a   : > { %v3974_v33 = vpop.f32.mrf.mxu1  ;;  %4226 = vmatpush1.bf16.msra.mxu0 %v7235_v28  ;;  %v7292_v28 = vld [vmem:[%s8018_s11 + $0x1a8] ss:$16 sps:$4 sm:$0xff]  }
 0x11b   : > { %4267 = vmatpush1.bf16.msra.mxu1 %v7238_v29  ;;  %v3934_v45 = vpop.f32.mrf.mxu0  ;;  %4227 = vmatprep.subr.bf16.mxu0 %v7243_v34  ;;  %v7297_v29 = vld [vmem:[%s8018_s11 + $0x1184] ss:$16 sps:$4 sm:$0xff]   ;;  %v7298_v34 = vld [vmem:[%s8018_s11 + $0x188] ss:$16 sps:$4 sm:$0xff]  }
 0x11c   : > { %v3975_v46 = vpop.f32.mrf.mxu1  ;;  %4268 = vmatprep.subr.bf16.mxu1 %v7246_v35  ;;  %v7303_v35 = vld [vmem:[%s8018_s11 + $0x1164] ss:$16 sps:$4 sm:$0xff]   ;;  %v7304_v40 = vld [vmem:[%s8018_s11 + $0x168] ss:$16 sps:$4 sm:$0xff]   ;;  %v7312_v45 = vld [vmem:[%s8018_s11 + $0x14c] ss:$16 sps:$4 sm:$0xff]  }
 0x11d   : > { %v7309_v33 = vld [vmem:[%s8018_s11 + $0x1144] ss:$16 sps:$4 sm:$0xff]   ;;  %v7307_v46 = vld [vmem:[%s8018_s11 + $0x1140] ss:$16 sps:$4 sm:$0xff]  }
 0x11e   : > { %4228 = vmatpush1.bf16.msra.mxu0 %v7241_v38  ;;  %v7306_v38 = vld [vmem:[%s8018_s11 + $0x16c] ss:$16 sps:$4 sm:$0xff]  }
 0x11f   : > { %4269 = vmatpush1.bf16.msra.mxu1 %v7244_v39  ;;  %4229 = vmatprep.subr.bf16.mxu0 %v7249_v47  ;;  %v7301_v39 = vld [vmem:[%s8018_s11 + $0x1160] ss:$16 sps:$4 sm:$0xff]   ;;  %v7310_v47 = vld [vmem:[%s8018_s11 + $0x148] ss:$16 sps:$4 sm:$0xff]  }
 0x120   : > { %4270 = vmatprep.subr.bf16.mxu1 %v7252_v48  ;;  %v7315_v48 = vld [vmem:[%s8018_s11 + $0x1124] ss:$16 sps:$4 sm:$0xff]  }
 0x122   : > { %4230 = vmatpush1.bf16.msra.mxu0 %v7247_v51  ;;  %v7318_v51 = vld [vmem:[%s8018_s11 + $0x12c] ss:$16 sps:$4 sm:$0xff]  }
 0x123   : > { %4271 = vmatpush1.bf16.msra.mxu1 %v7250_v61  ;;  %4231 = vmatprep.subr.bf16.mxu0 %v7255_v52  ;;  %v7313_v61 = vld [vmem:[%s8018_s11 + $0x1120] ss:$16 sps:$4 sm:$0xff]   ;;  %v7316_v52 = vld [vmem:[%s8018_s11 + $0x128] ss:$16 sps:$4 sm:$0xff]  }
 0x124   : > { %4272 = vmatprep.subr.bf16.mxu1 %v7258_v53  ;;  %v7321_v53 = vld [vmem:[%s8018_s11 + $0x1104] ss:$16 sps:$4 sm:$0xff]  }
 0x126   : > { %4232 = vmatpush1.bf16.msra.mxu0 %v7253_v54  ;;  %v7324_v54 = vld [vmem:[%s8018_s11 + $0x10c] ss:$16 sps:$4 sm:$0xff]  }
 0x127   : > { %4273 = vmatpush1.bf16.msra.mxu1 %v7256_v36  ;;  %4233 = vmatprep.subr.bf16.mxu0 %v7261_v57  ;;  %v7319_v36 = vld [vmem:[%s8018_s11 + $0x1100] ss:$16 sps:$4 sm:$0xff]   ;;  %v7322_v57 = vld [vmem:[%s8018_s11 + $0x108] ss:$16 sps:$4 sm:$0xff]  }
 0x128   : > { %4274 = vmatprep.subr.bf16.mxu1 %v7264_v58  ;;  %v7327_v58 = vld [vmem:[%s8018_s11 + $0x2ec] ss:$16 sps:$4 sm:$0xff]  }
 0x12a   : > { %4234 = vmatpush1.bf16.msra.mxu0 %v7259_v59  ;;  %v7330_v59 = vld [vmem:[%s8018_s11 + $0x4ec] ss:$16 sps:$4 sm:$0xff]  }
 0x12b   : > { %4275 = vmatpush1.bf16.msra.mxu1 %v7262_v62  ;;  %4235 = vmatprep.subr.bf16.mxu0 %v7267_v63  ;;  %v7325_v62 = vld [vmem:[%s8018_s11 + $0x2e8] ss:$16 sps:$4 sm:$0xff]  }
 0x12c   : > { %4276 = vmatprep.subr.bf16.mxu1 %v7270_v0  ;;  %v7328_v63 = vld [vmem:[%s8018_s11 + $0x4e8] ss:$16 sps:$4 sm:$0xff]   ;;  %v8464_v0 = vrot.slane %v8374_v11, %v8068_v50 }
 0x12e   : > { %4236 = vmatpush1.bf16.msra.mxu0 %v7265_v2  ;;  %v7333_v2 = vld [vmem:[%s8018_s11 + $0x2cc] ss:$16 sps:$4 sm:$0xff]  }
 0x12f   : > { %4277 = vmatpush1.bf16.msra.mxu1 %v7268_v3  ;;  %4237 = vmatprep.subr.bf16.mxu0 %v7273_v4  ;;  %v7336_v3 = vld [vmem:[%s8018_s11 + $0x4cc] ss:$16 sps:$4 sm:$0xff]   ;;  %v7331_v4 = vld [vmem:[%s8018_s11 + $0x2c8] ss:$16 sps:$4 sm:$0xff]  }
 0x130   : > { %4278 = vmatprep.subr.bf16.mxu1 %v7276_v5  ;;  %v7334_v5 = vld [vmem:[%s8018_s11 + $0x4c8] ss:$16 sps:$4 sm:$0xff]  }
 0x132   : > { %4238 = vmatpush1.bf16.msra.mxu0 %v7271_v6 }
 0x133   : > { %4279 = vmatpush1.bf16.msra.mxu1 %v7274_v8  ;;  %4239 = vmatprep.subr.bf16.mxu0 %v7279_v9 }
 0x134   : > { %4280 = vmatprep.subr.bf16.mxu1 %v7282_v12 }
 0x136   : > { %4240 = vmatpush2.bf16.msra.mxu0 %v7277_v13  ;;  %v7339_v13 = vld [vmem:[%s8018_s11 + $0x2ac] ss:$16 sps:$4 sm:$0xff]  }
 0x137   : > { %4281 = vmatpush2.bf16.msra.mxu1 %v7280_v15  ;;  %4241 = vmatprep.subr.bf16.mxu0 %v7285_v16  ;;  %v7342_v15 = vld [vmem:[%s8018_s11 + $0x4ac] ss:$16 sps:$4 sm:$0xff]  }
 0x138   : > { %4282 = vmatprep.subr.bf16.mxu1 %v7288_v41 }
 0x13a   : > { %4242 = vmatpush2.bf16.msra.mxu0 %v7283_v20  ;;  %v7337_v20 = vld [vmem:[%s8018_s11 + $0x2a8] ss:$16 sps:$4 sm:$0xff]  }
 0x13b   : > { %4283 = vmatpush2.bf16.msra.mxu1 %v7286_v21  ;;  %4243 = vmatprep.subr.bf16.mxu0 %v7291_v22  ;;  %v7340_v21 = vld [vmem:[%s8018_s11 + $0x4a8] ss:$16 sps:$4 sm:$0xff]  }
 0x13c   : > { %4284 = vmatprep.subr.bf16.mxu1 %v7294_v25 }
 0x13e   : > { %4244 = vmatpush2.bf16.msra.mxu0 %v7289_v26 }
 0x13f   : > { %4285 = vmatpush2.bf16.msra.mxu1 %v7292_v28  ;;  %4245 = vmatprep.subr.bf16.mxu0 %v7297_v29  ;;  %v7346_v28 = vld [vmem:[%s8018_s11 + $0x488] ss:$16 sps:$4 sm:$0xff]   ;;  %v7351_v29 = vld [vmem:[%s8018_s11 + $0x26c] ss:$16 sps:$4 sm:$0xff]  }
 0x140   : > { %4286 = vmatprep.subr.bf16.mxu1 %v7300_v32  ;;  %v7354_v32 = vld [vmem:[%s8018_s11 + $0x46c] ss:$16 sps:$4 sm:$0xff]  }
 0x142   : > { %4246 = vmatpush2.bf16.msra.mxu0 %v7295_v7  ;;  %v7349_v7 = vld [vmem:[%s8018_s11 + $0x268] ss:$16 sps:$4 sm:$0xff]  }
 0x143   : > { %4287 = vmatpush2.bf16.msra.mxu1 %v7298_v34  ;;  %4247 = vmatprep.subr.bf16.mxu0 %v7303_v35  ;;  %v7352_v34 = vld [vmem:[%s8018_s11 + $0x468] ss:$16 sps:$4 sm:$0xff]   ;;  %v7357_v35 = vld [vmem:[%s8018_s11 + $0x24c] ss:$16 sps:$4 sm:$0xff]  }
 0x144   : > { %4288 = vmatprep.subr.bf16.mxu1 %v7306_v38  ;;  %v7360_v38 = vld [vmem:[%s8018_s11 + $0x44c] ss:$16 sps:$4 sm:$0xff]  }
 0x146   : > { %4248 = vmatpush2.bf16.msra.mxu0 %v7301_v39  ;;  %v7355_v39 = vld [vmem:[%s8018_s11 + $0x248] ss:$16 sps:$4 sm:$0xff]  }
 0x147   : > { %4289 = vmatpush2.bf16.msra.mxu1 %v7304_v40  ;;  %4249 = vmatprep.subr.bf16.mxu0 %v7309_v33  ;;  %v7358_v40 = vld [vmem:[%s8018_s11 + $0x448] ss:$16 sps:$4 sm:$0xff]   ;;  %v7363_v33 = vld [vmem:[%s8018_s11 + $0x22c] ss:$16 sps:$4 sm:$0xff]  }
 0x148   : > { %4290 = vmatprep.subr.bf16.mxu1 %v7312_v45  ;;  %v7366_v45 = vld [vmem:[%s8018_s11 + $0x42c] ss:$16 sps:$4 sm:$0xff]  }
 0x14a   : > { %4250 = vmatpush2.bf16.msra.mxu0 %v7307_v46  ;;  %v7361_v46 = vld [vmem:[%s8018_s11 + $0x228] ss:$16 sps:$4 sm:$0xff]  }
 0x14b   : > { %4291 = vmatpush2.bf16.msra.mxu1 %v7310_v47  ;;  %4251 = vmatprep.subr.bf16.mxu0 %v7315_v48  ;;  %v7364_v47 = vld [vmem:[%s8018_s11 + $0x428] ss:$16 sps:$4 sm:$0xff]   ;;  %v7369_v48 = vld [vmem:[%s8018_s11 + $0x20c] ss:$16 sps:$4 sm:$0xff]  }
 0x14c   : > { %4292 = vmatprep.subr.bf16.mxu1 %v7318_v51  ;;  %v7372_v51 = vld [vmem:[%s8018_s11 + $0x40c] ss:$16 sps:$4 sm:$0xff]  }
 0x14e   : > { %4252 = vmatpush2.bf16.msra.mxu0 %v7313_v61  ;;  %v7367_v61 = vld [vmem:[%s8018_s11 + $0x208] ss:$16 sps:$4 sm:$0xff]  }
 0x14f   : > { %4293 = vmatpush2.bf16.msra.mxu1 %v7316_v52  ;;  %4253 = vmatprep.subr.bf16.mxu0 %v7321_v53  ;;  %v7370_v52 = vld [vmem:[%s8018_s11 + $0x408] ss:$16 sps:$4 sm:$0xff]   ;;  %v7375_v53 = vld [vmem:[%s8018_s11 + $0x3ec] ss:$16 sps:$4 sm:$0xff]  }
 0x150   : > { %4294 = vmatprep.subr.bf16.mxu1 %v7324_v54  ;;  %v7378_v54 = vld [vmem:[%s8018_s11 + $0x5ec] ss:$16 sps:$4 sm:$0xff]  }
 0x152   : > { %4254 = vmatpush2.bf16.msra.mxu0 %v7319_v36  ;;  %v7373_v36 = vld [vmem:[%s8018_s11 + $0x3e8] ss:$16 sps:$4 sm:$0xff]  }
 0x153   : > { %4295 = vmatpush2.bf16.msra.mxu1 %v7322_v57  ;;  %4305 = vmatprep.subr.bf16.mxu0 %v7327_v58  ;;  %v7376_v57 = vld [vmem:[%s8018_s11 + $0x5e8] ss:$16 sps:$4 sm:$0xff]   ;;  %v7381_v58 = vld [vmem:[%s8018_s11 + $0x3cc] ss:$16 sps:$4 sm:$0xff]  }
 0x154   : > { %4346 = vmatprep.subr.bf16.mxu1 %v7330_v59  ;;  %v7384_v59 = vld [vmem:[%s8018_s11 + $0x5cc] ss:$16 sps:$4 sm:$0xff]  }
 0x155   : > { %v4011_v6 = vpop.f32.mrf.mxu0  ;;  %4256 = vmatmul.mubr.bf16.vlgmr.msra.gmra.mxu0 %v8464_v0 }
 0x156   : > { %v4052_v8 = vpop.f32.mrf.mxu1  ;;  %4297 = vmatmul.mubr.bf16.vlgmr.msra.gmra.mxu1 %v8106_v14  ;;  %v4012_v11 = vadd.f32 %v4011_v6, %v8396_v30  ;;  %4306 = vmatpush1.bf16.msra.mxu0 %v7325_v62  ;;  %v7379_v62 = vld [vmem:[%s8018_s11 + $0x3c8] ss:$16 sps:$4 sm:$0xff]   ;;  %v7393_v6 = vld [vmem:[%s8018_s11 + $0x38c] ss:$16 sps:$4 sm:$0xff]  }
 0x157   : > { %4347 = vmatpush1.bf16.msra.mxu1 %v7328_v63  ;;  %v4013_v9 = vpop.f32.mrf.mxu0  ;;  %4307 = vmatprep.subr.bf16.mxu0 %v7333_v2  ;;  %v7382_v63 = vld [vmem:[%s8018_s11 + $0x5c8] ss:$16 sps:$4 sm:$0xff]   ;;  %v7387_v2 = vld [vmem:[%s8018_s11 + $0x3ac] ss:$16 sps:$4 sm:$0xff]  }
 0x158   : > { %v4054_v12 = vpop.f32.mrf.mxu1  ;;  %4348 = vmatprep.subr.bf16.mxu1 %v7336_v3  ;;  %v8475_v16 = vadd.f32 %v4052_v8, %v4012_v11  ;;  %v4014_v41 = vadd.f32 %v4013_v9, %v8400_v37  ;;  %4337 = vmatprep.mubr.bf16.mxu0 %v8087_v1  ;;  %v7345_v37 = vld [vmem:[%s8018_s11 + $0x28c] ss:$16 sps:$4 sm:$0xff]   ;;  %v7391_v11 = vld [vmem:[%s8018_s11 + $0x388] ss:$16 sps:$4 sm:$0xff]  }
 0x159   : > { %4378 = vmatprep.mubr.bf16.mxu1 %v8112_v18  ;;  %v4015_v14 = vpop.f32.mrf.mxu0  ;;  %v7348_v1 = vld [vmem:[%s8018_s11 + $0x48c] ss:$16 sps:$4 sm:$0xff]   ;;  %v7343_v18 = vld [vmem:[%s8018_s11 + $0x288] ss:$16 sps:$4 sm:$0xff]  }
 0x15a   : > { %v4056_v30 = vpop.f32.mrf.mxu1  ;;  %v8482_v22 = vadd.f32 %v4054_v12, %v4014_v41  ;;  %4308 = vmatpush1.bf16.msra.mxu0 %v7331_v4  ;;  %v7390_v3 = vld [vmem:[%s8018_s11 + $0x5ac] ss:$16 sps:$4 sm:$0xff]   ;;  %v7385_v4 = vld [vmem:[%s8018_s11 + $0x3a8] ss:$16 sps:$4 sm:$0xff]  }
 0x15b   : > { %4349 = vmatpush1.bf16.msra.mxu1 %v7334_v5  ;;  %v4016_v25 = vpop.f32.mrf.mxu0  ;;  %4309 = vmatprep.subr.bf16.mxu0 %v7339_v13  ;;  %v7388_v5 = vld [vmem:[%s8018_s11 + $0x5a8] ss:$16 sps:$4 sm:$0xff]   ;;  %v7396_v8 = vld [vmem:[%s8018_s11 + $0x58c] ss:$16 sps:$4 sm:$0xff]  }
 0x15c   : > { %v4057_v26 = vpop.f32.mrf.mxu1  ;;  %4350 = vmatprep.subr.bf16.mxu1 %v7342_v15  ;;  %v7394_v9 = vld [vmem:[%s8018_s11 + $0x588] ss:$16 sps:$4 sm:$0xff]   ;;  %v7399_v12 = vld [vmem:[%s8018_s11 + $0x36c] ss:$16 sps:$4 sm:$0xff]  }
 0x15d   : > { %v7402_v13 = vld [vmem:[%s8018_s11 + $0x56c] ss:$16 sps:$4 sm:$0xff]   ;;  %v7397_v15 = vld [vmem:[%s8018_s11 + $0x368] ss:$16 sps:$4 sm:$0xff]  }
 0x15e   : > { %4310 = vmatpush1.bf16.msra.mxu0 %v7337_v20  ;;  %v7400_v41 = vld [vmem:[%s8018_s11 + $0x568] ss:$16 sps:$4 sm:$0xff]   ;;  %v7405_v20 = vld [vmem:[%s8018_s11 + $0x34c] ss:$16 sps:$4 sm:$0xff]  }
 0x15f   : > { %4351 = vmatpush1.bf16.msra.mxu1 %v7340_v21  ;;  %4311 = vmatprep.subr.bf16.mxu0 %v7345_v37  ;;  %v7408_v21 = vld [vmem:[%s8018_s11 + $0x54c] ss:$16 sps:$4 sm:$0xff]   ;;  %v7403_v14 = vld [vmem:[%s8018_s11 + $0x348] ss:$16 sps:$4 sm:$0xff]  }
 0x160   : > { %4352 = vmatprep.subr.bf16.mxu1 %v7348_v1  ;;  %v7406_v30 = vld [vmem:[%s8018_s11 + $0x548] ss:$16 sps:$4 sm:$0xff]   ;;  %v7411_v25 = vld [vmem:[%s8018_s11 + $0x32c] ss:$16 sps:$4 sm:$0xff]  }
 0x161   : > { %v7414_v26 = vld [vmem:[%s8018_s11 + $0x52c] ss:$16 sps:$4 sm:$0xff]   ;;  %v7409_v37 = vld [vmem:[%s8018_s11 + $0x328] ss:$16 sps:$4 sm:$0xff]  }
 0x162   : > { %4312 = vmatpush1.bf16.msra.mxu0 %v7343_v18  ;;  %v7412_v1 = vld [vmem:[%s8018_s11 + $0x528] ss:$16 sps:$4 sm:$0xff]   ;;  %v7417_v18 = vld [vmem:[%s8018_s11 + $0x30c] ss:$16 sps:$4 sm:$0xff]  }
 0x163   : > { %4353 = vmatpush1.bf16.msra.mxu1 %v7346_v28  ;;  %4313 = vmatprep.subr.bf16.mxu0 %v7351_v29  ;;  %v7420_v28 = vld [vmem:[%s8018_s11 + $0x50c] ss:$16 sps:$4 sm:$0xff]   ;;  %v7415_v29 = vld [vmem:[%s8018_s11 + $0x308] ss:$16 sps:$4 sm:$0xff]  }
 0x164   : > { %4354 = vmatprep.subr.bf16.mxu1 %v7354_v32  ;;  %v7418_v32 = vld [vmem:[%s8018_s11 + $0x508] ss:$16 sps:$4 sm:$0xff]  }
 0x166   : > { %4314 = vmatpush1.bf16.msra.mxu0 %v7349_v7  ;;  %v7423_v7 = vld [vmem:[%s8018_s11 + $0x6ec] ss:$16 sps:$4 sm:$0xff]  }
 0x167   : > { %4355 = vmatpush1.bf16.msra.mxu1 %v7352_v34  ;;  %4315 = vmatprep.subr.bf16.mxu0 %v7357_v35  ;;  %v7426_v34 = vld [vmem:[%s8018_s11 + $0x8ec] ss:$16 sps:$4 sm:$0xff]   ;;  %v7421_v35 = vld [vmem:[%s8018_s11 + $0x6e8] ss:$16 sps:$4 sm:$0xff]  }
 0x168   : > { %4356 = vmatprep.subr.bf16.mxu1 %v7360_v38  ;;  %v7424_v38 = vld [vmem:[%s8018_s11 + $0x8e8] ss:$16 sps:$4 sm:$0xff]  }
 0x16a   : > { %4316 = vmatpush1.bf16.msra.mxu0 %v7355_v39  ;;  %v7429_v39 = vld [vmem:[%s8018_s11 + $0x6cc] ss:$16 sps:$4 sm:$0xff]  }
 0x16b   : > { %4357 = vmatpush1.bf16.msra.mxu1 %v7358_v40  ;;  %4317 = vmatprep.subr.bf16.mxu0 %v7363_v33  ;;  %v7432_v40 = vld [vmem:[%s8018_s11 + $0x8cc] ss:$16 sps:$4 sm:$0xff]  }
 0x16c   : > { %4358 = vmatprep.subr.bf16.mxu1 %v7366_v45 }
 0x16e   : > { %4318 = vmatpush1.bf16.msra.mxu0 %v7361_v46 }
 0x16f   : > { %4359 = vmatpush1.bf16.msra.mxu1 %v7364_v47  ;;  %4319 = vmatprep.subr.bf16.mxu0 %v7369_v48  ;;  %v7427_v47 = vld [vmem:[%s8018_s11 + $0x6c8] ss:$16 sps:$4 sm:$0xff]  }
 0x170   : > { %4360 = vmatprep.subr.bf16.mxu1 %v7372_v51  ;;  %v7430_v48 = vld [vmem:[%s8018_s11 + $0x8c8] ss:$16 sps:$4 sm:$0xff]  }
 0x172   : > { %4320 = vmatpush1.bf16.msra.mxu0 %v7367_v61 }
 0x173   : > { %4361 = vmatpush1.bf16.msra.mxu1 %v7370_v52  ;;  %4321 = vmatprep.subr.bf16.mxu0 %v7375_v53  ;;  %v7435_v52 = vld [vmem:[%s8018_s11 + $0x6ac] ss:$16 sps:$4 sm:$0xff]  }
 0x174   : > { %4362 = vmatprep.subr.bf16.mxu1 %v7378_v54  ;;  %v7438_v53 = vld [vmem:[%s8018_s11 + $0x8ac] ss:$16 sps:$4 sm:$0xff]  }
 0x176   : > { %4322 = vmatpush2.bf16.msra.mxu0 %v7373_v36 }
 0x177   : > { %4363 = vmatpush2.bf16.msra.mxu1 %v7376_v57  ;;  %4323 = vmatprep.subr.bf16.mxu0 %v7381_v58  ;;  %v7433_v57 = vld [vmem:[%s8018_s11 + $0x6a8] ss:$16 sps:$4 sm:$0xff]  }
 0x178   : > { %4364 = vmatprep.subr.bf16.mxu1 %v7384_v59  ;;  %v7436_v58 = vld [vmem:[%s8018_s11 + $0x8a8] ss:$16 sps:$4 sm:$0xff]  }
 0x17a   : > { %4324 = vmatpush2.bf16.msra.mxu0 %v7379_v62 }
 0x17b   : > { %4365 = vmatpush2.bf16.msra.mxu1 %v7382_v63  ;;  %4325 = vmatprep.subr.bf16.mxu0 %v7387_v2  ;;  %v7442_v63 = vld [vmem:[%s8018_s11 + $0x888] ss:$16 sps:$4 sm:$0xff]   ;;  %v7447_v2 = vld [vmem:[%s8018_s11 + $0x66c] ss:$16 sps:$4 sm:$0xff]  }
 0x17c   : > { %4366 = vmatprep.subr.bf16.mxu1 %v7390_v3  ;;  %v7450_v3 = vld [vmem:[%s8018_s11 + $0x86c] ss:$16 sps:$4 sm:$0xff]  }
 0x17e   : > { %4326 = vmatpush2.bf16.msra.mxu0 %v7385_v4  ;;  %v7445_v4 = vld [vmem:[%s8018_s11 + $0x668] ss:$16 sps:$4 sm:$0xff]  }
 0x17f   : > { %4367 = vmatpush2.bf16.msra.mxu1 %v7388_v5  ;;  %4327 = vmatprep.subr.bf16.mxu0 %v7393_v6  ;;  %v7448_v5 = vld [vmem:[%s8018_s11 + $0x868] ss:$16 sps:$4 sm:$0xff]   ;;  %v7453_v6 = vld [vmem:[%s8018_s11 + $0x64c] ss:$16 sps:$4 sm:$0xff]  }
 0x180   : > { %4368 = vmatprep.subr.bf16.mxu1 %v7396_v8  ;;  %v7456_v8 = vld [vmem:[%s8018_s11 + $0x84c] ss:$16 sps:$4 sm:$0xff]  }
 0x182   : > { %4328 = vmatpush2.bf16.msra.mxu0 %v7391_v11  ;;  %v7451_v11 = vld [vmem:[%s8018_s11 + $0x648] ss:$16 sps:$4 sm:$0xff]  }
 0x183   : > { %4369 = vmatpush2.bf16.msra.mxu1 %v7394_v9  ;;  %4329 = vmatprep.subr.bf16.mxu0 %v7399_v12  ;;  %v7454_v9 = vld [vmem:[%s8018_s11 + $0x848] ss:$16 sps:$4 sm:$0xff]   ;;  %v7459_v12 = vld [vmem:[%s8018_s11 + $0x62c] ss:$16 sps:$4 sm:$0xff]  }
 0x184   : > { %4370 = vmatprep.subr.bf16.mxu1 %v7402_v13  ;;  %v7462_v13 = vld [vmem:[%s8018_s11 + $0x82c] ss:$16 sps:$4 sm:$0xff]  }
 0x186   : > { %4330 = vmatpush2.bf16.msra.mxu0 %v7397_v15  ;;  %v7457_v15 = vld [vmem:[%s8018_s11 + $0x628] ss:$16 sps:$4 sm:$0xff]  }
 0x187   : > { %4371 = vmatpush2.bf16.msra.mxu1 %v7400_v41  ;;  %4331 = vmatprep.subr.bf16.mxu0 %v7405_v20  ;;  %v7460_v41 = vld [vmem:[%s8018_s11 + $0x828] ss:$16 sps:$4 sm:$0xff]   ;;  %v7465_v20 = vld [vmem:[%s8018_s11 + $0x60c] ss:$16 sps:$4 sm:$0xff]  }
 0x188   : > { %4372 = vmatprep.subr.bf16.mxu1 %v7408_v21  ;;  %v7468_v21 = vld [vmem:[%s8018_s11 + $0x80c] ss:$16 sps:$4 sm:$0xff]  }
 0x18a   : > { %4332 = vmatpush2.bf16.msra.mxu0 %v7403_v14  ;;  %v7463_v14 = vld [vmem:[%s8018_s11 + $0x608] ss:$16 sps:$4 sm:$0xff]  }
 0x18b   : > { %4373 = vmatpush2.bf16.msra.mxu1 %v7406_v30  ;;  %4333 = vmatprep.subr.bf16.mxu0 %v7411_v25  ;;  %v7466_v30 = vld [vmem:[%s8018_s11 + $0x808] ss:$16 sps:$4 sm:$0xff]   ;;  %v7471_v25 = vld [vmem:[%s8018_s11 + $0x7ec] ss:$16 sps:$4 sm:$0xff]  }
 0x18c   : > { %4374 = vmatprep.subr.bf16.mxu1 %v7414_v26  ;;  %v7474_v26 = vld [vmem:[%s8018_s11 + $0x9ec] ss:$16 sps:$4 sm:$0xff]  }
 0x18e   : > { %4334 = vmatpush2.bf16.msra.mxu0 %v7409_v37  ;;  %v7469_v37 = vld [vmem:[%s8018_s11 + $0x7e8] ss:$16 sps:$4 sm:$0xff]  }
 0x18f   : > { %4375 = vmatpush2.bf16.msra.mxu1 %v7412_v1  ;;  %4335 = vmatprep.subr.bf16.mxu0 %v7417_v18  ;;  %v7472_v1 = vld [vmem:[%s8018_s11 + $0x9e8] ss:$16 sps:$4 sm:$0xff]   ;;  %v7477_v18 = vld [vmem:[%s8018_s11 + $0x7cc] ss:$16 sps:$4 sm:$0xff]  }
 0x190   : > { %4376 = vmatprep.subr.bf16.mxu1 %v7420_v28  ;;  %v7480_v28 = vld [vmem:[%s8018_s11 + $0x9cc] ss:$16 sps:$4 sm:$0xff]  }
 0x192   : > { %4336 = vmatpush2.bf16.msra.mxu0 %v7415_v29  ;;  %v7475_v29 = vld [vmem:[%s8018_s11 + $0x7c8] ss:$16 sps:$4 sm:$0xff]  }
 0x193   : > { %4377 = vmatpush2.bf16.msra.mxu1 %v7418_v32  ;;  %4387 = vmatprep.subr.bf16.mxu0 %v7423_v7  ;;  %v7478_v32 = vld [vmem:[%s8018_s11 + $0x9c8] ss:$16 sps:$4 sm:$0xff]   ;;  %v7483_v7 = vld [vmem:[%s8018_s11 + $0x7ac] ss:$16 sps:$4 sm:$0xff]  }
 0x194   : > { %4428 = vmatprep.subr.bf16.mxu1 %v7426_v34  ;;  %v7486_v34 = vld [vmem:[%s8018_s11 + $0x9ac] ss:$16 sps:$4 sm:$0xff]  }
 0x195   : > { %v4093_v33 = vpop.f32.mrf.mxu0  ;;  %4338 = vmatmul.mubr.bf16.vlgmr.msra.gmra.mxu0 %v8116_v19 }
 0x196   : > { %v4134_v45 = vpop.f32.mrf.mxu1  ;;  %4379 = vmatmul.mubr.bf16.vlgmr.msra.gmra.mxu1 %v8189_v27  ;;  %v4094_v46 = vadd.f32 %v4093_v33, %v8475_v16  ;;  %4388 = vmatpush1.bf16.msra.mxu0 %v7421_v35  ;;  %v7481_v35 = vld [vmem:[%s8018_s11 + $0x7a8] ss:$16 sps:$4 sm:$0xff]  }
 0x197   : > { %4429 = vmatpush1.bf16.msra.mxu1 %v7424_v38  ;;  %v4095_v51 = vpop.f32.mrf.mxu0  ;;  %4389 = vmatprep.subr.bf16.mxu0 %v7429_v39  ;;  %v7484_v38 = vld [vmem:[%s8018_s11 + $0x9a8] ss:$16 sps:$4 sm:$0xff]   ;;  %v7489_v39 = vld [vmem:[%s8018_s11 + $0x78c] ss:$16 sps:$4 sm:$0xff]  }
 0x198   : > { %v4136_v61 = vpop.f32.mrf.mxu1  ;;  %4430 = vmatprep.subr.bf16.mxu1 %v7432_v40  ;;  %v8549_v54 = vadd.f32 %v4134_v45, %v4094_v46  ;;  %v4096_v19 = vadd.f32 %v4095_v51, %v8482_v22  ;;  %4419 = vmatprep.mubr.bf16.mxu0 %v8124_v24  ;;  %v7441_v24 = vld [vmem:[%s8018_s11 + $0x68c] ss:$16 sps:$4 sm:$0xff]   ;;  %v7439_v22 = vld [vmem:[%s8018_s11 + $0x688] ss:$16 sps:$4 sm:$0xff]  }
 0x199   : > { %4460 = vmatprep.mubr.bf16.mxu1 %v8218_v42  ;;  %v4097_v27 = vpop.f32.mrf.mxu0  ;;  %v7444_v42 = vld [vmem:[%s8018_s11 + $0x88c] ss:$16 sps:$4 sm:$0xff]   ;;  %v7487_v33 = vld [vmem:[%s8018_s11 + $0x788] ss:$16 sps:$4 sm:$0xff]  }
 0x19a   : > { %v4138_v16 = vpop.f32.mrf.mxu1  ;;  %v8554_v36 = vadd.f32 %v4136_v61, %v4096_v19  ;;  %4390 = vmatpush1.bf16.msra.mxu0 %v7427_v47  ;;  %v7492_v40 = vld [vmem:[%s8018_s11 + $0x98c] ss:$16 sps:$4 sm:$0xff]   ;;  %v7490_v45 = vld [vmem:[%s8018_s11 + $0x988] ss:$16 sps:$4 sm:$0xff]  }
 0x19b   : > { %4431 = vmatpush1.bf16.msra.mxu1 %v7430_v48  ;;  %v4098_v59 = vpop.f32.mrf.mxu0  ;;  %4391 = vmatprep.subr.bf16.mxu0 %v7435_v52  ;;  %v7495_v46 = vld [vmem:[%s8018_s11 + $0x76c] ss:$16 sps:$4 sm:$0xff]   ;;  %v7493_v48 = vld [vmem:[%s8018_s11 + $0x768] ss:$16 sps:$4 sm:$0xff]  }
 0x19c   : > { %v4139_v62 = vpop.f32.mrf.mxu1  ;;  %4432 = vmatprep.subr.bf16.mxu1 %v7438_v53  ;;  %v7498_v47 = vld [vmem:[%s8018_s11 + $0x96c] ss:$16 sps:$4 sm:$0xff]   ;;  %v7496_v51 = vld [vmem:[%s8018_s11 + $0x968] ss:$16 sps:$4 sm:$0xff]  }
 0x19d   : > { %v7501_v61 = vld [vmem:[%s8018_s11 + $0x74c] ss:$16 sps:$4 sm:$0xff]   ;;  %v7499_v53 = vld [vmem:[%s8018_s11 + $0x748] ss:$16 sps:$4 sm:$0xff]  }
 0x19e   : > { %4392 = vmatpush1.bf16.msra.mxu0 %v7433_v57  ;;  %v7504_v52 = vld [vmem:[%s8018_s11 + $0x94c] ss:$16 sps:$4 sm:$0xff]   ;;  %v7502_v19 = vld [vmem:[%s8018_s11 + $0x948] ss:$16 sps:$4 sm:$0xff]  }
 0x19f   : > { %4433 = vmatpush1.bf16.msra.mxu1 %v7436_v58  ;;  %4393 = vmatprep.subr.bf16.mxu0 %v7441_v24  ;;  %v7507_v27 = vld [vmem:[%s8018_s11 + $0x72c] ss:$16 sps:$4 sm:$0xff]   ;;  %v7505_v57 = vld [vmem:[%s8018_s11 + $0x728] ss:$16 sps:$4 sm:$0xff]  }
 0x1a0   : > { %4434 = vmatprep.subr.bf16.mxu1 %v7444_v42  ;;  %v7510_v16 = vld [vmem:[%s8018_s11 + $0x92c] ss:$16 sps:$4 sm:$0xff]   ;;  %v7508_v58 = vld [vmem:[%s8018_s11 + $0x928] ss:$16 sps:$4 sm:$0xff]  }
 0x1a1   : > { %v7513_v59 = vld [vmem:[%s8018_s11 + $0x70c] ss:$16 sps:$4 sm:$0xff]   ;;  %v7511_v24 = vld [vmem:[%s8018_s11 + $0x708] ss:$16 sps:$4 sm:$0xff]  }
 0x1a2   : > { %4394 = vmatpush1.bf16.msra.mxu0 %v7439_v22  ;;  %v7516_v62 = vld [vmem:[%s8018_s11 + $0x90c] ss:$16 sps:$4 sm:$0xff]   ;;  %v7514_v42 = vld [vmem:[%s8018_s11 + $0x908] ss:$16 sps:$4 sm:$0xff]  }
 0x1a3   : > { %4435 = vmatpush1.bf16.msra.mxu1 %v7442_v63  ;;  %4395 = vmatprep.subr.bf16.mxu0 %v7447_v2  ;;  %v7519_v22 = vld [vmem:[%s8018_s11 + $0xaec] ss:$16 sps:$4 sm:$0xff]   ;;  %v7517_v2 = vld [vmem:[%s8018_s11 + $0xae8] ss:$16 sps:$4 sm:$0xff]  }
 0x1a4   : > { %4436 = vmatprep.subr.bf16.mxu1 %v7450_v3  ;;  %v7522_v63 = vld [vmem:[%s8018_s11 + $0xcec] ss:$16 sps:$4 sm:$0xff]   ;;  %v7520_v3 = vld [vmem:[%s8018_s11 + $0xce8] ss:$16 sps:$4 sm:$0xff]  }
 0x1a6   : > { %4396 = vmatpush1.bf16.msra.mxu0 %v7445_v4  ;;  %v7525_v4 = vld [vmem:[%s8018_s11 + $0xacc] ss:$16 sps:$4 sm:$0xff]  }
 0x1a7   : > { %4437 = vmatpush1.bf16.msra.mxu1 %v7448_v5  ;;  %4397 = vmatprep.subr.bf16.mxu0 %v7453_v6  ;;  %v7528_v5 = vld [vmem:[%s8018_s11 + $0xccc] ss:$16 sps:$4 sm:$0xff]  }
 0x1a8   : > { %4438 = vmatprep.subr.bf16.mxu1 %v7456_v8 }
 0x1aa   : > { %4398 = vmatpush1.bf16.msra.mxu0 %v7451_v11 }
 0x1ab   : > { %4439 = vmatpush1.bf16.msra.mxu1 %v7454_v9  ;;  %4399 = vmatprep.subr.bf16.mxu0 %v7459_v12  ;;  %v7523_v9 = vld [vmem:[%s8018_s11 + $0xac8] ss:$16 sps:$4 sm:$0xff]  }
 0x1ac   : > { %4440 = vmatprep.subr.bf16.mxu1 %v7462_v13  ;;  %v7526_v12 = vld [vmem:[%s8018_s11 + $0xcc8] ss:$16 sps:$4 sm:$0xff]  }
 0x1ae   : > { %4400 = vmatpush1.bf16.msra.mxu0 %v7457_v15 }
 0x1af   : > { %4441 = vmatpush1.bf16.msra.mxu1 %v7460_v41  ;;  %4401 = vmatprep.subr.bf16.mxu0 %v7465_v20  ;;  %v7531_v41 = vld [vmem:[%s8018_s11 + $0xaac] ss:$16 sps:$4 sm:$0xff]  }
 0x1b0   : > { %4442 = vmatprep.subr.bf16.mxu1 %v7468_v21  ;;  %v7534_v20 = vld [vmem:[%s8018_s11 + $0xcac] ss:$16 sps:$4 sm:$0xff]  }
 0x1b2   : > { %4402 = vmatpush1.bf16.msra.mxu0 %v7463_v14 }
 0x1b3   : > { %4443 = vmatpush1.bf16.msra.mxu1 %v7466_v30  ;;  %4403 = vmatprep.subr.bf16.mxu0 %v7471_v25  ;;  %v7529_v30 = vld [vmem:[%s8018_s11 + $0xaa8] ss:$16 sps:$4 sm:$0xff]  }
 0x1b4   : > { %4444 = vmatprep.subr.bf16.mxu1 %v7474_v26  ;;  %v7532_v25 = vld [vmem:[%s8018_s11 + $0xca8] ss:$16 sps:$4 sm:$0xff]  }
 0x1b6   : > { %4404 = vmatpush2.bf16.msra.mxu0 %v7469_v37 }
 0x1b7   : > { %4445 = vmatpush2.bf16.msra.mxu1 %v7472_v1  ;;  %4405 = vmatprep.subr.bf16.mxu0 %v7477_v18  ;;  %v7538_v1 = vld [vmem:[%s8018_s11 + $0xc88] ss:$16 sps:$4 sm:$0xff]   ;;  %v7543_v18 = vld [vmem:[%s8018_s11 + $0xa6c] ss:$16 sps:$4 sm:$0xff]  }
 0x1b8   : > { %4446 = vmatprep.subr.bf16.mxu1 %v7480_v28  ;;  %v7546_v28 = vld [vmem:[%s8018_s11 + $0xc6c] ss:$16 sps:$4 sm:$0xff]  }
 0x1ba   : > { %4406 = vmatpush2.bf16.msra.mxu0 %v7475_v29  ;;  %v7541_v29 = vld [vmem:[%s8018_s11 + $0xa68] ss:$16 sps:$4 sm:$0xff]  }
 0x1bb   : > { %4447 = vmatpush2.bf16.msra.mxu1 %v7478_v32  ;;  %4407 = vmatprep.subr.bf16.mxu0 %v7483_v7  ;;  %v7544_v32 = vld [vmem:[%s8018_s11 + $0xc68] ss:$16 sps:$4 sm:$0xff]   ;;  %v7549_v7 = vld [vmem:[%s8018_s11 + $0xa4c] ss:$16 sps:$4 sm:$0xff]  }
 0x1bc   : > { %4448 = vmatprep.subr.bf16.mxu1 %v7486_v34  ;;  %v7552_v34 = vld [vmem:[%s8018_s11 + $0xc4c] ss:$16 sps:$4 sm:$0xff]  }
 0x1be   : > { %4408 = vmatpush2.bf16.msra.mxu0 %v7481_v35  ;;  %v7547_v35 = vld [vmem:[%s8018_s11 + $0xa48] ss:$16 sps:$4 sm:$0xff]  }
 0x1bf   : > { %4449 = vmatpush2.bf16.msra.mxu1 %v7484_v38  ;;  %4409 = vmatprep.subr.bf16.mxu0 %v7489_v39  ;;  %v7550_v38 = vld [vmem:[%s8018_s11 + $0xc48] ss:$16 sps:$4 sm:$0xff]   ;;  %v7555_v39 = vld [vmem:[%s8018_s11 + $0xa2c] ss:$16 sps:$4 sm:$0xff]  }
 0x1c0   : > { %4450 = vmatprep.subr.bf16.mxu1 %v7492_v40  ;;  %v7558_v40 = vld [vmem:[%s8018_s11 + $0xc2c] ss:$16 sps:$4 sm:$0xff]  }
 0x1c2   : > { %4410 = vmatpush2.bf16.msra.mxu0 %v7487_v33  ;;  %v7553_v33 = vld [vmem:[%s8018_s11 + $0xa28] ss:$16 sps:$4 sm:$0xff]  }
 0x1c3   : > { %4451 = vmatpush2.bf16.msra.mxu1 %v7490_v45  ;;  %4411 = vmatprep.subr.bf16.mxu0 %v7495_v46  ;;  %v7556_v45 = vld [vmem:[%s8018_s11 + $0xc28] ss:$16 sps:$4 sm:$0xff]   ;;  %v7561_v46 = vld [vmem:[%s8018_s11 + $0xa0c] ss:$16 sps:$4 sm:$0xff]  }
 0x1c4   : > { %4452 = vmatprep.subr.bf16.mxu1 %v7498_v47  ;;  %v7564_v47 = vld [vmem:[%s8018_s11 + $0xc0c] ss:$16 sps:$4 sm:$0xff]  }
 0x1c6   : > { %4412 = vmatpush2.bf16.msra.mxu0 %v7493_v48  ;;  %v7559_v48 = vld [vmem:[%s8018_s11 + $0xa08] ss:$16 sps:$4 sm:$0xff]  }
 0x1c7   : > { %4453 = vmatpush2.bf16.msra.mxu1 %v7496_v51  ;;  %4413 = vmatprep.subr.bf16.mxu0 %v7501_v61  ;;  %v7562_v51 = vld [vmem:[%s8018_s11 + $0xc08] ss:$16 sps:$4 sm:$0xff]   ;;  %v7567_v61 = vld [vmem:[%s8018_s11 + $0xbec] ss:$16 sps:$4 sm:$0xff]  }
 0x1c8   : > { %4454 = vmatprep.subr.bf16.mxu1 %v7504_v52  ;;  %v7570_v52 = vld [vmem:[%s8018_s11 + $0xdec] ss:$16 sps:$4 sm:$0xff]  }
 0x1ca   : > { %4414 = vmatpush2.bf16.msra.mxu0 %v7499_v53  ;;  %v7565_v53 = vld [vmem:[%s8018_s11 + $0xbe8] ss:$16 sps:$4 sm:$0xff]  }
 0x1cb   : > { %4455 = vmatpush2.bf16.msra.mxu1 %v7502_v19  ;;  %4415 = vmatprep.subr.bf16.mxu0 %v7507_v27  ;;  %v7568_v19 = vld [vmem:[%s8018_s11 + $0xde8] ss:$16 sps:$4 sm:$0xff]   ;;  %v7573_v27 = vld [vmem:[%s8018_s11 + $0xbcc] ss:$16 sps:$4 sm:$0xff]  }
 0x1cc   : > { %4456 = vmatprep.subr.bf16.mxu1 %v7510_v16  ;;  %v7576_v16 = vld [vmem:[%s8018_s11 + $0xdcc] ss:$16 sps:$4 sm:$0xff]  }
 0x1ce   : > { %4416 = vmatpush2.bf16.msra.mxu0 %v7505_v57  ;;  %v7571_v57 = vld [vmem:[%s8018_s11 + $0xbc8] ss:$16 sps:$4 sm:$0xff]  }
 0x1cf   : > { %4457 = vmatpush2.bf16.msra.mxu1 %v7508_v58  ;;  %4417 = vmatprep.subr.bf16.mxu0 %v7513_v59  ;;  %v7574_v58 = vld [vmem:[%s8018_s11 + $0xdc8] ss:$16 sps:$4 sm:$0xff]   ;;  %v7579_v59 = vld [vmem:[%s8018_s11 + $0xbac] ss:$16 sps:$4 sm:$0xff]  }
 0x1d0   : > { %4458 = vmatprep.subr.bf16.mxu1 %v7516_v62  ;;  %v7582_v62 = vld [vmem:[%s8018_s11 + $0xdac] ss:$16 sps:$4 sm:$0xff]  }
 0x1d2   : > { %4418 = vmatpush2.bf16.msra.mxu0 %v7511_v24  ;;  %v7577_v24 = vld [vmem:[%s8018_s11 + $0xba8] ss:$16 sps:$4 sm:$0xff]  }
 0x1d3   : > { %4459 = vmatpush2.bf16.msra.mxu1 %v7514_v42  ;;  %4469 = vmatprep.subr.bf16.mxu0 %v7519_v22  ;;  %v7580_v42 = vld [vmem:[%s8018_s11 + $0xda8] ss:$16 sps:$4 sm:$0xff]   ;;  %v7585_v22 = vld [vmem:[%s8018_s11 + $0xb8c] ss:$16 sps:$4 sm:$0xff]  }
 0x1d4   : > { %4510 = vmatprep.subr.bf16.mxu1 %v7522_v63  ;;  %v7588_v63 = vld [vmem:[%s8018_s11 + $0xd8c] ss:$16 sps:$4 sm:$0xff]  }
 0x1d5   : > { %v4175_v6 = vpop.f32.mrf.mxu0  ;;  %4420 = vmatmul.mubr.bf16.vlgmr.msra.gmra.mxu0 %v8196_v31 }
 0x1d6   : > { %v4216_v8 = vpop.f32.mrf.mxu1  ;;  %4461 = vmatmul.mubr.bf16.vlgmr.msra.gmra.mxu1 %v8287_v49  ;;  %v4176_v11 = vadd.f32 %v4175_v6, %v8549_v54  ;;  %4470 = vmatpush1.bf16.msra.mxu0 %v7517_v2  ;;  %v7583_v2 = vld [vmem:[%s8018_s11 + $0xb88] ss:$16 sps:$4 sm:$0xff]  }
 0x1d7   : > { %4511 = vmatpush1.bf16.msra.mxu1 %v7520_v3  ;;  %v4177_v13 = vpop.f32.mrf.mxu0  ;;  %4471 = vmatprep.subr.bf16.mxu0 %v7525_v4  ;;  %v7586_v3 = vld [vmem:[%s8018_s11 + $0xd88] ss:$16 sps:$4 sm:$0xff]   ;;  %v7591_v4 = vld [vmem:[%s8018_s11 + $0xb6c] ss:$16 sps:$4 sm:$0xff]  }
 0x1d8   : > { %v4218_v15 = vpop.f32.mrf.mxu1  ;;  %4512 = vmatprep.subr.bf16.mxu1 %v7528_v5  ;;  %v8623_v21 = vadd.f32 %v4216_v8, %v4176_v11  ;;  %v4178_v31 = vadd.f32 %v4177_v13, %v8554_v36  ;;  %4501 = vmatprep.mubr.bf16.mxu0 %v8223_v43  ;;  %v7537_v43 = vld [vmem:[%s8018_s11 + $0xa8c] ss:$16 sps:$4 sm:$0xff]   ;;  %v7535_v36 = vld [vmem:[%s8018_s11 + $0xa88] ss:$16 sps:$4 sm:$0xff]  }
 0x1d9   : > { %4542 = vmatprep.mubr.bf16.mxu1 %v8294_v55  ;;  %v4179_v49 = vpop.f32.mrf.mxu0  ;;  %v7540_v55 = vld [vmem:[%s8018_s11 + $0xc8c] ss:$16 sps:$4 sm:$0xff]   ;;  %v7589_v6 = vld [vmem:[%s8018_s11 + $0xb68] ss:$16 sps:$4 sm:$0xff]  }
 0x1da   : > { %v4220_v54 = vpop.f32.mrf.mxu1  ;;  %v8628_v14 = vadd.f32 %v4218_v15, %v4178_v31  ;;  %4472 = vmatpush1.bf16.msra.mxu0 %v7523_v9  ;;  %v7594_v5 = vld [vmem:[%s8018_s11 + $0xd6c] ss:$16 sps:$4 sm:$0xff]   ;;  %v7592_v8 = vld [vmem:[%s8018_s11 + $0xd68] ss:$16 sps:$4 sm:$0xff]  }
 0x1db   : > { %4513 = vmatpush1.bf16.msra.mxu1 %v7526_v12  ;;  %v4180_v26 = vpop.f32.mrf.mxu0  ;;  %4473 = vmatprep.subr.bf16.mxu0 %v7531_v41  ;;  %v7597_v11 = vld [vmem:[%s8018_s11 + $0xb4c] ss:$16 sps:$4 sm:$0xff]   ;;  %v7595_v12 = vld [vmem:[%s8018_s11 + $0xb48] ss:$16 sps:$4 sm:$0xff]  }
 0x1dc   : > { %v4221_v37 = vpop.f32.mrf.mxu1  ;;  %4514 = vmatprep.subr.bf16.mxu1 %v7534_v20  ;;  %v7600_v9 = vld [vmem:[%s8018_s11 + $0xd4c] ss:$16 sps:$4 sm:$0xff]   ;;  %v7598_v13 = vld [vmem:[%s8018_s11 + $0xd48] ss:$16 sps:$4 sm:$0xff]  }
 0x1dd   : > { %v7603_v15 = vld [vmem:[%s8018_s11 + $0xb2c] ss:$16 sps:$4 sm:$0xff]   ;;  %v7601_v20 = vld [vmem:[%s8018_s11 + $0xb28] ss:$16 sps:$4 sm:$0xff]  }
 0x1de   : > { %4474 = vmatpush1.bf16.msra.mxu0 %v7529_v30  ;;  %v7606_v41 = vld [vmem:[%s8018_s11 + $0xd2c] ss:$16 sps:$4 sm:$0xff]   ;;  %v7604_v31 = vld [vmem:[%s8018_s11 + $0xd28] ss:$16 sps:$4 sm:$0xff]  }
 0x1df   : > { %4515 = vmatpush1.bf16.msra.mxu1 %v7532_v25  ;;  %4475 = vmatprep.subr.bf16.mxu0 %v7537_v43  ;;  %v7609_v49 = vld [vmem:[%s8018_s11 + $0xb0c] ss:$16 sps:$4 sm:$0xff]   ;;  %v7607_v30 = vld [vmem:[%s8018_s11 + $0xb08] ss:$16 sps:$4 sm:$0xff]  }
 0x1e0   : > { %4516 = vmatprep.subr.bf16.mxu1 %v7540_v55  ;;  %v7612_v54 = vld [vmem:[%s8018_s11 + $0xd0c] ss:$16 sps:$4 sm:$0xff]   ;;  %v7610_v25 = vld [vmem:[%s8018_s11 + $0xd08] ss:$16 sps:$4 sm:$0xff]  }
 0x1e1   : > { %v7615_v26 = vld [vmem:[%s8018_s11 + $0xeec] ss:$16 sps:$4 sm:$0xff]   ;;  %v7613_v43 = vld [vmem:[%s8018_s11 + $0xee8] ss:$16 sps:$4 sm:$0xff]  }
 0x1e2   : > { %4476 = vmatpush1.bf16.msra.mxu0 %v7535_v36  ;;  %v7618_v37 = vld [vmem:[%s8018_s11 + $0x10ec] ss:$16 sps:$4 sm:$0xff]   ;;  %v7616_v55 = vld [vmem:[%s8018_s11 + $0x10e8] ss:$16 sps:$4 sm:$0xff]  }
 0x1e3   : > { %4517 = vmatpush1.bf16.msra.mxu1 %v7538_v1  ;;  %4477 = vmatprep.subr.bf16.mxu0 %v7543_v18  ;;  %v7621_v36 = vld [vmem:[%s8018_s11 + $0xecc] ss:$16 sps:$4 sm:$0xff]  }
 0x1e4   : > { %4518 = vmatprep.subr.bf16.mxu1 %v7546_v28  ;;  %v7624_v1 = vld [vmem:[%s8018_s11 + $0x10cc] ss:$16 sps:$4 sm:$0xff]  }
 0x1e6   : > { %4478 = vmatpush1.bf16.msra.mxu0 %v7541_v29 }
 0x1e7   : > { %4519 = vmatpush1.bf16.msra.mxu1 %v7544_v32  ;;  %4479 = vmatprep.subr.bf16.mxu0 %v7549_v7  ;;  %v7619_v32 = vld [vmem:[%s8018_s11 + $0xec8] ss:$16 sps:$4 sm:$0xff]  }
 0x1e8   : > { %4520 = vmatprep.subr.bf16.mxu1 %v7552_v34  ;;  %v7622_v7 = vld [vmem:[%s8018_s11 + $0x10c8] ss:$16 sps:$4 sm:$0xff]  }
 0x1ea   : > { %4480 = vmatpush1.bf16.msra.mxu0 %v7547_v35 }
 0x1eb   : > { %4521 = vmatpush1.bf16.msra.mxu1 %v7550_v38  ;;  %4481 = vmatprep.subr.bf16.mxu0 %v7555_v39  ;;  %v7627_v38 = vld [vmem:[%s8018_s11 + $0xeac] ss:$16 sps:$4 sm:$0xff]  }
 0x1ec   : > { %4522 = vmatprep.subr.bf16.mxu1 %v7558_v40  ;;  %v7630_v39 = vld [vmem:[%s8018_s11 + $0x10ac] ss:$16 sps:$4 sm:$0xff]  }
 0x1ee   : > { %4482 = vmatpush1.bf16.msra.mxu0 %v7553_v33  ;;  %v7625_v33 = vld [vmem:[%s8018_s11 + $0xea8] ss:$16 sps:$4 sm:$0xff]  }
 0x1ef   : > { %4523 = vmatpush1.bf16.msra.mxu1 %v7556_v45  ;;  %4483 = vmatprep.subr.bf16.mxu0 %v7561_v46  ;;  %v7628_v45 = vld [vmem:[%s8018_s11 + $0x10a8] ss:$16 sps:$4 sm:$0xff]  }
 0x1f0   : > { %4524 = vmatprep.subr.bf16.mxu1 %v7564_v47  ;;  %v7631_v47 = vld [vmem:[%s8018_s11 + $0xe88] ss:$16 sps:$4 sm:$0xff]  }
 0x1f2   : > { %4484 = vmatpush1.bf16.msra.mxu0 %v7559_v48  ;;  %v7634_v48 = vld [vmem:[%s8018_s11 + $0x1088] ss:$16 sps:$4 sm:$0xff]  }
 0x1f3   : > { %4525 = vmatpush1.bf16.msra.mxu1 %v7562_v51  ;;  %4485 = vmatprep.subr.bf16.mxu0 %v7567_v61  ;;  %v7639_v51 = vld [vmem:[%s8018_s11 + $0xe6c] ss:$16 sps:$4 sm:$0xff]  }
 0x1f4   : > { %4526 = vmatprep.subr.bf16.mxu1 %v7570_v52  ;;  %v7642_v61 = vld [vmem:[%s8018_s11 + $0x106c] ss:$16 sps:$4 sm:$0xff]   ;;  %v7637_v52 = vld [vmem:[%s8018_s11 + $0xe68] ss:$16 sps:$4 sm:$0xff]  }
 0x1f6   : > { %4486 = vmatpush2.bf16.msra.mxu0 %v7565_v53  ;;  %v7640_v53 = vld [vmem:[%s8018_s11 + $0x1068] ss:$16 sps:$4 sm:$0xff]  }
 0x1f7   : > { %4527 = vmatpush2.bf16.msra.mxu1 %v7568_v19  ;;  %4487 = vmatprep.subr.bf16.mxu0 %v7573_v27  ;;  %v7645_v19 = vld [vmem:[%s8018_s11 + $0xe4c] ss:$16 sps:$4 sm:$0xff]  }
 0x1f8   : > { %4528 = vmatprep.subr.bf16.mxu1 %v7576_v16  ;;  %v7648_v27 = vld [vmem:[%s8018_s11 + $0x104c] ss:$16 sps:$4 sm:$0xff]   ;;  %v7643_v16 = vld [vmem:[%s8018_s11 + $0xe48] ss:$16 sps:$4 sm:$0xff]  }
 0x1fa   : > { %4488 = vmatpush2.bf16.msra.mxu0 %v7571_v57  ;;  %v7646_v57 = vld [vmem:[%s8018_s11 + $0x1048] ss:$16 sps:$4 sm:$0xff]  }
 0x1fb   : > { %4529 = vmatpush2.bf16.msra.mxu1 %v7574_v58  ;;  %4489 = vmatprep.subr.bf16.mxu0 %v7579_v59  ;;  %v7651_v58 = vld [vmem:[%s8018_s11 + $0xe2c] ss:$16 sps:$4 sm:$0xff]  }
 0x1fc   : > { %4530 = vmatprep.subr.bf16.mxu1 %v7582_v62  ;;  %v7654_v59 = vld [vmem:[%s8018_s11 + $0x102c] ss:$16 sps:$4 sm:$0xff]   ;;  %v7649_v62 = vld [vmem:[%s8018_s11 + $0xe28] ss:$16 sps:$4 sm:$0xff]  }
 0x1fe   : > { %4490 = vmatpush2.bf16.msra.mxu0 %v7577_v24  ;;  %v7652_v24 = vld [vmem:[%s8018_s11 + $0x1028] ss:$16 sps:$4 sm:$0xff]  }
 0x1ff   : > { %4531 = vmatpush2.bf16.msra.mxu1 %v7580_v42  ;;  %4491 = vmatprep.subr.bf16.mxu0 %v7585_v22  ;;  %v7657_v42 = vld [vmem:[%s8018_s11 + $0xe0c] ss:$16 sps:$4 sm:$0xff]  }
 0x200   : > { %4532 = vmatprep.subr.bf16.mxu1 %v7588_v63  ;;  %v7660_v22 = vld [vmem:[%s8018_s11 + $0x100c] ss:$16 sps:$4 sm:$0xff]   ;;  %v7655_v63 = vld [vmem:[%s8018_s11 + $0xe08] ss:$16 sps:$4 sm:$0xff]  }
 0x202   : > { %4492 = vmatpush2.bf16.msra.mxu0 %v7583_v2  ;;  %v7658_v2 = vld [vmem:[%s8018_s11 + $0x1008] ss:$16 sps:$4 sm:$0xff]  }
 0x203   : > { %4533 = vmatpush2.bf16.msra.mxu1 %v7586_v3  ;;  %4493 = vmatprep.subr.bf16.mxu0 %v7591_v4  ;;  %v7663_v3 = vld [vmem:[%s8018_s11 + $0xfec] ss:$16 sps:$4 sm:$0xff]  }
 0x204   : > { %4534 = vmatprep.subr.bf16.mxu1 %v7594_v5  ;;  %v7666_v4 = vld [vmem:[%s8018_s11 + $0x11ec] ss:$16 sps:$4 sm:$0xff]   ;;  %v7661_v5 = vld [vmem:[%s8018_s11 + $0xfe8] ss:$16 sps:$4 sm:$0xff]  }
 0x206   : > { %4494 = vmatpush2.bf16.msra.mxu0 %v7589_v6  ;;  %v7664_v6 = vld [vmem:[%s8018_s11 + $0x11e8] ss:$16 sps:$4 sm:$0xff]  }
 0x207   : > { %4535 = vmatpush2.bf16.msra.mxu1 %v7592_v8  ;;  %4495 = vmatprep.subr.bf16.mxu0 %v7597_v11  ;;  %v7669_v8 = vld [vmem:[%s8018_s11 + $0xfcc] ss:$16 sps:$4 sm:$0xff]  }
 0x208   : > { %4536 = vmatprep.subr.bf16.mxu1 %v7600_v9  ;;  %v7672_v11 = vld [vmem:[%s8018_s11 + $0x11cc] ss:$16 sps:$4 sm:$0xff]   ;;  %v7667_v9 = vld [vmem:[%s8018_s11 + $0xfc8] ss:$16 sps:$4 sm:$0xff]  }
 0x20a   : > { %4496 = vmatpush2.bf16.msra.mxu0 %v7595_v12  ;;  %v7670_v12 = vld [vmem:[%s8018_s11 + $0x11c8] ss:$16 sps:$4 sm:$0xff]  }
 0x20b   : > { %4537 = vmatpush2.bf16.msra.mxu1 %v7598_v13  ;;  %4497 = vmatprep.subr.bf16.mxu0 %v7603_v15  ;;  %v7675_v13 = vld [vmem:[%s8018_s11 + $0xfac] ss:$16 sps:$4 sm:$0xff]  }
 0x20c   : > { %4538 = vmatprep.subr.bf16.mxu1 %v7606_v41  ;;  %v7678_v15 = vld [vmem:[%s8018_s11 + $0x11ac] ss:$16 sps:$4 sm:$0xff]   ;;  %v7673_v41 = vld [vmem:[%s8018_s11 + $0xfa8] ss:$16 sps:$4 sm:$0xff]  }
 0x20e   : > { %4498 = vmatpush2.bf16.msra.mxu0 %v7601_v20  ;;  %v7676_v20 = vld [vmem:[%s8018_s11 + $0x11a8] ss:$16 sps:$4 sm:$0xff]  }
 0x20f   : > { %4539 = vmatpush2.bf16.msra.mxu1 %v7604_v31  ;;  %4499 = vmatprep.subr.bf16.mxu0 %v7609_v49  ;;  %v7681_v31 = vld [vmem:[%s8018_s11 + $0xf8c] ss:$16 sps:$4 sm:$0xff]  }
 0x210   : > { %4540 = vmatprep.subr.bf16.mxu1 %v7612_v54  ;;  %v7684_v49 = vld [vmem:[%s8018_s11 + $0x118c] ss:$16 sps:$4 sm:$0xff]   ;;  %v7679_v54 = vld [vmem:[%s8018_s11 + $0xf88] ss:$16 sps:$4 sm:$0xff]  }
 0x212   : > { %4500 = vmatpush2.bf16.msra.mxu0 %v7607_v30  ;;  %v7682_v30 = vld [vmem:[%s8018_s11 + $0x1188] ss:$16 sps:$4 sm:$0xff]  }
 0x213   : > { %4541 = vmatpush2.bf16.msra.mxu1 %v7610_v25  ;;  %4551 = vmatprep.subr.bf16.mxu0 %v7615_v26  ;;  %v7687_v25 = vld [vmem:[%s8018_s11 + $0xf6c] ss:$16 sps:$4 sm:$0xff]  }
 0x214   : > { %4592 = vmatprep.subr.bf16.mxu1 %v7618_v37  ;;  %v7690_v26 = vld [vmem:[%s8018_s11 + $0x116c] ss:$16 sps:$4 sm:$0xff]   ;;  %v7685_v37 = vld [vmem:[%s8018_s11 + $0xf68] ss:$16 sps:$4 sm:$0xff]  }
 0x215   : > { %v4257_v18 = vpop.f32.mrf.mxu0  ;;  %4502 = vmatmul.mubr.bf16.vlgmr.msra.gmra.mxu0 %v8298_v56 }
 0x216   : > { %v8690_v28 = vpop.f32.mrf.mxu1  ;;  %4543 = vmatmul.mubr.bf16.vlgmr.msra.gmra.mxu1 %v8371_v10  ;;  %v8695_v29 = vadd.f32 %v4257_v18, %v8623_v21  ;;  %4552 = vmatpush1.bf16.msra.mxu0 %v7613_v43  ;;  %v7688_v43 = vld [vmem:[%s8018_s11 + $0x1168] ss:$16 sps:$4 sm:$0xff]  }
 0x217   : > { %4593 = vmatpush1.bf16.msra.mxu1 %v7616_v55  ;;  %v4259_v34 = vpop.f32.mrf.mxu0  ;;  %4553 = vmatprep.subr.bf16.mxu0 %v7621_v36  ;;  %v7693_v55 = vld [vmem:[%s8018_s11 + $0xf4c] ss:$16 sps:$4 sm:$0xff]   ;;  %v7694_v18 = vld [vmem:[%s8018_s11 + $0x1148] ss:$16 sps:$4 sm:$0xff]  }
 0x218   : > { %v8699_v35 = vpop.f32.mrf.mxu1  ;;  %4594 = vmatprep.subr.bf16.mxu1 %v7624_v1  ;;  %v8704_v56 = vadd.f32 %v4259_v34, %v8628_v14  ;;  %4583 = vmatprep.mubr.bf16.mxu0 %v8306_v60  ;;  %v7633_v60 = vld [vmem:[%s8018_s11 + $0xe8c] ss:$16 sps:$4 sm:$0xff]   ;;  %v7691_v1 = vld [vmem:[%s8018_s11 + $0xf48] ss:$16 sps:$4 sm:$0xff]  }
 0x219   : > { %4624 = vmatprep.mubr.bf16.mxu1 %v8390_v23  ;;  %v4261_v10 = vpop.f32.mrf.mxu0  ;;  %v7636_v23 = vld [vmem:[%s8018_s11 + $0x108c] ss:$16 sps:$4 sm:$0xff]   ;;  %v7697_v34 = vld [vmem:[%s8018_s11 + $0xf28] ss:$16 sps:$4 sm:$0xff]  }
 0x21a   : > { %v4302_v21 = vpop.f32.mrf.mxu1  ;;  %v4637_v40 = vcombine.low %v8695_v29, %v8704_v56  ;;  %4554 = vmatpush1.bf16.msra.mxu0 %v7619_v32  ;;  %v7696_v36 = vld [vmem:[%s8018_s11 + $0x114c] ss:$16 sps:$4 sm:$0xff]  }
 0x21b   : > { %4595 = vmatpush1.bf16.msra.mxu1 %v7622_v7  ;;  %v4262_v46 = vpop.f32.mrf.mxu0  ;;  %4555 = vmatprep.subr.bf16.mxu0 %v7627_v38  ;;  %v7699_v32 = vld [vmem:[%s8018_s11 + $0xf2c] ss:$16 sps:$4 sm:$0xff]   ;;  %v7700_v38 = vld [vmem:[%s8018_s11 + $0x1128] ss:$16 sps:$4 sm:$0xff]  }
 0x21c   : > { %v4303_v14 = vpop.f32.mrf.mxu1  ;;  %4596 = vmatprep.subr.bf16.mxu1 %v7630_v39  ;;  %v7702_v7 = vld [vmem:[%s8018_s11 + $0x112c] ss:$16 sps:$4 sm:$0xff]   ;;  %v7703_v21 = vld [vmem:[%s8018_s11 + $0xf08] ss:$16 sps:$4 sm:$0xff]  }
 0x21d   : > { %v7705_v39 = vld [vmem:[%s8018_s11 + $0xf0c] ss:$16 sps:$4 sm:$0xff]  }
 0x21e   : > { %4556 = vmatpush1.bf16.msra.mxu0 %v7625_v33  ;;  %v7708_v10 = vld [vmem:[%s8018_s11 + $0x110c] ss:$16 sps:$4 sm:$0xff]   ;;  %v7706_v33 = vld [vmem:[%s8018_s11 + $0x1108] ss:$16 sps:$4 sm:$0xff]  }
 0x21f   : > { %4597 = vmatpush1.bf16.msra.mxu1 %v7628_v45  ;;  %4557 = vmatprep.subr.bf16.mxu0 %v7633_v60 }
 0x220   : > { %4598 = vmatprep.subr.bf16.mxu1 %v7636_v23 }
 0x222   : > { %4558 = vmatpush1.bf16.msra.mxu0 %v7631_v47 }
 0x223   : > { %4599 = vmatpush1.bf16.msra.mxu1 %v7634_v48  ;;  %4559 = vmatprep.subr.bf16.mxu0 %v7639_v51 }
 0x224   : > { %4600 = vmatprep.subr.bf16.mxu1 %v7642_v61 }
 0x226   : > { %4560 = vmatpush1.bf16.msra.mxu0 %v7637_v52 }
 0x227   : > { %4601 = vmatpush1.bf16.msra.mxu1 %v7640_v53  ;;  %4561 = vmatprep.subr.bf16.mxu0 %v7645_v19 }
 0x228   : > { %4602 = vmatprep.subr.bf16.mxu1 %v7648_v27 }
 0x22a   : > { %4562 = vmatpush1.bf16.msra.mxu0 %v7643_v16 }
 0x22b   : > { %4603 = vmatpush1.bf16.msra.mxu1 %v7646_v57  ;;  %4563 = vmatprep.subr.bf16.mxu0 %v7651_v58 }
 0x22c   : > { %4604 = vmatprep.subr.bf16.mxu1 %v7654_v59 }
 0x22e   : > { %4564 = vmatpush1.bf16.msra.mxu0 %v7649_v62 }
 0x22f   : > { %4605 = vmatpush1.bf16.msra.mxu1 %v7652_v24  ;;  %4565 = vmatprep.subr.bf16.mxu0 %v7657_v42 }
 0x230   : > { %4606 = vmatprep.subr.bf16.mxu1 %v7660_v22 }
 0x232   : > { %4566 = vmatpush1.bf16.msra.mxu0 %v7655_v63 }
 0x233   : > { %4607 = vmatpush1.bf16.msra.mxu1 %v7658_v2  ;;  %4567 = vmatprep.subr.bf16.mxu0 %v7663_v3 }
 0x234   : > { %4608 = vmatprep.subr.bf16.mxu1 %v7666_v4 }
 0x236   : > { %4568 = vmatpush2.bf16.msra.mxu0 %v7661_v5 }
 0x237   : > { %4609 = vmatpush2.bf16.msra.mxu1 %v7664_v6  ;;  %4569 = vmatprep.subr.bf16.mxu0 %v7669_v8 }
 0x238   : > { %4610 = vmatprep.subr.bf16.mxu1 %v7672_v11 }
 0x23a   : > { %4570 = vmatpush2.bf16.msra.mxu0 %v7667_v9 }
 0x23b   : > { %4611 = vmatpush2.bf16.msra.mxu1 %v7670_v12  ;;  %4571 = vmatprep.subr.bf16.mxu0 %v7675_v13  ;;  %v7956_v12 = vmov 1983009808  }
 0x23c   : > { %4612 = vmatprep.subr.bf16.mxu1 %v7678_v15  ;;  %v4640_v13 = vunpack.c.l.s4 %v7956_v12 }
 0x23e   : > { %4572 = vmatpush2.bf16.msra.mxu0 %v7673_v41 }
 0x23f   : > { %4613 = vmatpush2.bf16.msra.mxu1 %v7676_v20  ;;  %4573 = vmatprep.subr.bf16.mxu0 %v7681_v31  ;;  %v4641_v31 = vunpack.c.0.s8 %v4640_v13 }
 0x240   : > { %4614 = vmatprep.subr.bf16.mxu1 %v7684_v49 }
 0x242   : > { %4574 = vmatpush2.bf16.msra.mxu0 %v7679_v54 }
 0x243   : > { %4615 = vmatpush2.bf16.msra.mxu1 %v7682_v30  ;;  %4575 = vmatprep.subr.bf16.mxu0 %v7687_v25 }
 0x244   : > { %4616 = vmatprep.subr.bf16.mxu1 %v7690_v26 }
 0x246   : > { %4576 = vmatpush2.bf16.msra.mxu0 %v7685_v37 }
 0x247   : > { %4617 = vmatpush2.bf16.msra.mxu1 %v7688_v43  ;;  %4577 = vmatprep.subr.bf16.mxu0 %v7693_v55  ;;  %v8769_v55 = vsub.s32 %v4641_v31, %v8060_v44 }
 0x248   : > { %4618 = vmatprep.subr.bf16.mxu1 %v7696_v36 }
 0x24a   : > { %4578 = vmatpush2.bf16.msra.mxu0 %v7691_v1 }
 0x24b   : > { %4619 = vmatpush2.bf16.msra.mxu1 %v7694_v18  ;;  %4579 = vmatprep.subr.bf16.mxu0 %v7699_v32 }
 0x24c   : > { %4620 = vmatprep.subr.bf16.mxu1 %v7702_v7 }
 0x24e   : > { %4580 = vmatpush2.bf16.msra.mxu0 %v7697_v34  ;;  %v4645_v34 = vrot.slane %v4637_v40, %v8769_v55 }
 0x24f   : > { %4621 = vmatpush2.bf16.msra.mxu1 %v7700_v38  ;;  %4581 = vmatprep.subr.bf16.mxu0 %v7705_v39  ;;  %v294_v39 = vld [vmem:[#allocation2] sm:$0xff] }
 0x250   : > { %4622 = vmatprep.subr.bf16.mxu1 %v7708_v10 }
 0x252   : > { %4582 = vmatpush2.bf16.msra.mxu0 %v7703_v21 }
 0x253   : > { %4623 = vmatpush2.bf16.msra.mxu1 %v7706_v33 }
 0x255   : > { %v4339_v45 = vpop.f32.mrf.mxu0  ;;  %4584 = vmatmul.mubr.bf16.vlgmr.msra.gmra.mxu0 %v8383_v17 }
 0x256   : > { %v4380_v46 = vpop.f32.mrf.mxu1  ;;  %4625 = vmatmul.mubr.bf16.vlgmr.msra.gmra.mxu1 %v8464_v0  ;;  %v4340_v14 = vadd.f32 %v4339_v45, %v8690_v28 }
 0x257   : > { %v4341_v60 = vpop.f32.mrf.mxu0 }
 0x258   : > { %v4382_v23 = vpop.f32.mrf.mxu1  ;;  %v4381_v47 = vadd.f32 %v4380_v46, %v4340_v14  ;;  %v4342_v48 = vadd.f32 %v4341_v60, %v8699_v35 }
 0x259   : > { %v4343_v51 = vpop.f32.mrf.mxu0 }
 0x25a   : > { %v4384_v61 = vpop.f32.mrf.mxu1  ;;  %v4383_v52 = vadd.f32 %v4382_v23, %v4342_v48 }
 0x25b   : > { %v4344_v53 = vpop.f32.mrf.mxu0 }
 0x25c   : > { %v4385_v19 = vpop.f32.mrf.mxu1 }
 0x295   : > { %v4421_v27 = vpop.f32.mrf.mxu0 }
 0x296   : > { %v4462_v16 = vpop.f32.mrf.mxu1  ;;  %v4422_v57 = vadd.f32 %v4421_v27, %v4381_v47 }
 0x297   : > { %v4423_v58 = vpop.f32.mrf.mxu0 }
 0x298   : > { %v4464_v59 = vpop.f32.mrf.mxu1  ;;  %v4463_v17 = vadd.f32 %v4462_v16, %v4422_v57  ;;  %v4424_v62 = vadd.f32 %v4423_v58, %v4383_v52 }
 0x299   : > { %v4425_v0 = vpop.f32.mrf.mxu0 }
 0x29a   : > { %v4466_v24 = vpop.f32.mrf.mxu1  ;;  %v4465_v28 = vadd.f32 %v4464_v59, %v4424_v62 }
 0x29b   : > { %v4426_v42 = vpop.f32.mrf.mxu0 }
 0x29c   : > { %v4467_v22 = vpop.f32.mrf.mxu1 }
 0x2d5   : > { %v4503_v63 = vpop.f32.mrf.mxu0 }
 0x2d6   : > { %v4544_v2 = vpop.f32.mrf.mxu1  ;;  %v4504_v35 = vadd.f32 %v4503_v63, %v4463_v17 }
 0x2d7   : > { %v4505_v3 = vpop.f32.mrf.mxu0 }
 0x2d8   : > { %v4546_v4 = vpop.f32.mrf.mxu1  ;;  %v4545_v5 = vadd.f32 %v4544_v2, %v4504_v35  ;;  %v4506_v15 = vadd.f32 %v4505_v3, %v4465_v28 }
 0x2d9   : > { %v4507_v6 = vpop.f32.mrf.mxu0 }
 0x2da   : > { %v4548_v8 = vpop.f32.mrf.mxu1  ;;  %v4547_v49 = vadd.f32 %v4546_v4, %v4506_v15 }
 0x2db   : > { %v4508_v11 = vpop.f32.mrf.mxu0 }
 0x2dc   : > { %v4549_v9 = vpop.f32.mrf.mxu1 }
 0x315   : > { %v4585_v41 = vpop.f32.mrf.mxu0 }
 0x316   : > { %v4626_v20 = vpop.f32.mrf.mxu1  ;;  %v4586_v54 = vadd.f32 %v4585_v41, %v4545_v5 }
 0x317   : > { %v4587_v30 = vpop.f32.mrf.mxu0 }
 0x318   : > { %v4628_v25 = vpop.f32.mrf.mxu1  ;;  %v4588_v26 = vadd.f32 %v4587_v30, %v4547_v49  ;;  %v4627_v36 = vadd.f32 %v4626_v20, %v4586_v54 }
 0x319   : > { %v4589_v37 = vpop.f32.mrf.mxu0 }
 0x31a   : > { %v4630_v43 = vpop.f32.mrf.mxu1  ;;  %v4629_v1 = vadd.f32 %v4628_v25, %v4588_v26 }
 0x31b   : > { %v4590_v18 = vpop.f32.mrf.mxu0 }
 0x31c   : > { %v4631_v32 = vpop.f32.mrf.mxu1  ;;  %v4638_v7 = vcombine.low %v4627_v36, %v4629_v1 }
 0x31e   : > { %v4652_v38 = vrot.slane %v4638_v7, %v8769_v55 }
 0x320   : > { %v4653_v10 = vcombine.low %v4645_v34, %v4652_v38  ;;  %4660 = sbr.rel (%p6691_p6) target bundleno = 1265 (0x4f1), region = 56 }
 0x322   : > { %v4655_v21 = vadd.f32 %v4653_v10, %v294_v39 }
 0x324   : > { %4656 = vst [vmem:[#allocation2] sm:$0xff] %v4655_v21 }
 0x325   : > { %v7709_v33 = vld [vmem:[%s9283_s2 + $0xe4] ss:$16 sps:$4 sm:$0xff]   ;;  %v7711_v45 = vld [vmem:[%s9283_s2 + $0xe0] ss:$16 sps:$4 sm:$0xff]   ;;  %vm4684_vm0 = vcmask 1041408  }
 0x326   : > { %5703 = vmatprep.subr.bf16.mxu0 %v7709_v33  ;;  %v7712_v29 = vld [vmem:[%s9283_s2 + $0x2e4] ss:$16 sps:$4 sm:$0xff]   ;;  %v7714_v56 = vld [vmem:[%s9283_s2 + $0x2e0] ss:$16 sps:$4 sm:$0xff]  }
 0x327   : > { %5704 = vmatpush1.bf16.msra.mxu0 %v7711_v45  ;;  %v7715_v40 = vld [vmem:[%s9283_s2 + $0xc4] ss:$16 sps:$4 sm:$0xff]   ;;  %v7717_v46 = vld [vmem:[%s9283_s2 + $0xc0] ss:$16 sps:$4 sm:$0xff]   ;;  %5744 = vmatprep.subr.bf16.mxu1 %v7712_v29 }
 0x328   : > { %v7718_v14 = vld [vmem:[%s9283_s2 + $0x2c4] ss:$16 sps:$4 sm:$0xff]   ;;  %5745 = vmatpush1.bf16.msra.mxu1 %v7714_v56  ;;  %5705 = vmatprep.subr.bf16.mxu0 %v7715_v40  ;;  %v7720_v60 = vld [vmem:[%s9283_s2 + $0x2c0] ss:$16 sps:$4 sm:$0xff]  }
 0x329   : > { %5746 = vmatprep.subr.bf16.mxu1 %v7718_v14  ;;  %v7721_v23 = vld [vmem:[%s9283_s2 + $0xa4] ss:$16 sps:$4 sm:$0xff]   ;;  %v7723_v47 = vld [vmem:[%s9283_s2 + $0xa0] ss:$16 sps:$4 sm:$0xff]  }
 0x32a   : > { %v7724_v48 = vld [vmem:[%s9283_s2 + $0x2a4] ss:$16 sps:$4 sm:$0xff]   ;;  %v7726_v61 = vld [vmem:[%s9283_s2 + $0x2a0] ss:$16 sps:$4 sm:$0xff]  }
 0x32b   : > { %5706 = vmatpush1.bf16.msra.mxu0 %v7717_v46  ;;  %v7727_v51 = vld [vmem:[%s9283_s2 + $0x84] ss:$16 sps:$4 sm:$0xff]   ;;  %v7729_v53 = vld [vmem:[%s9283_s2 + $0x80] ss:$16 sps:$4 sm:$0xff]  }
 0x32c   : > { %5707 = vmatprep.subr.bf16.mxu0 %v7721_v23  ;;  %5747 = vmatpush1.bf16.msra.mxu1 %v7720_v60  ;;  %v7730_v52 = vld [vmem:[%s9283_s2 + $0x284] ss:$16 sps:$4 sm:$0xff]   ;;  %v7732_v27 = vld [vmem:[%s9283_s2 + $0x280] ss:$16 sps:$4 sm:$0xff]  }
 0x32d   : > { %5748 = vmatprep.subr.bf16.mxu1 %v7724_v48  ;;  %v7733_v19 = vld [vmem:[%s9283_s2 + $0x64] ss:$16 sps:$4 sm:$0xff]   ;;  %v7735_v57 = vld [vmem:[%s9283_s2 + $0x60] ss:$16 sps:$4 sm:$0xff]  }
 0x32e   : > { %v7736_v16 = vld [vmem:[%s9283_s2 + $0x264] ss:$16 sps:$4 sm:$0xff]   ;;  %v7738_v59 = vld [vmem:[%s9283_s2 + $0x260] ss:$16 sps:$4 sm:$0xff]  }
 0x32f   : > { %5708 = vmatpush1.bf16.msra.mxu0 %v7723_v47  ;;  %v7739_v58 = vld [vmem:[%s9283_s2 + $0x44] ss:$16 sps:$4 sm:$0xff]   ;;  %v7741_v62 = vld [vmem:[%s9283_s2 + $0x40] ss:$16 sps:$4 sm:$0xff]  }
 0x330   : > { %5709 = vmatprep.subr.bf16.mxu0 %v7727_v51  ;;  %5749 = vmatpush1.bf16.msra.mxu1 %v7726_v61  ;;  %v7742_v17 = vld [vmem:[%s9283_s2 + $0x244] ss:$16 sps:$4 sm:$0xff]   ;;  %v7744_v24 = vld [vmem:[%s9283_s2 + $0x240] ss:$16 sps:$4 sm:$0xff]  }
 0x331   : > { %5750 = vmatprep.subr.bf16.mxu1 %v7730_v52  ;;  %v7745_v0 = vld [vmem:[%s9283_s2 + $0x24] ss:$16 sps:$4 sm:$0xff]   ;;  %v7747_v42 = vld [vmem:[%s9283_s2 + $0x20] ss:$16 sps:$4 sm:$0xff]  }
 0x332   : > { %v7748_v28 = vld [vmem:[%s9283_s2 + $0x224] ss:$16 sps:$4 sm:$0xff]   ;;  %v7750_v63 = vld [vmem:[%s9283_s2 + $0x220] ss:$16 sps:$4 sm:$0xff]  }
 0x333   : > { %5710 = vmatpush1.bf16.msra.mxu0 %v7729_v53  ;;  %v7751_v22 = vld [vmem:[%s9283_s2 + $0x4] ss:$16 sps:$4 sm:$0xff]   ;;  %v7753_v35 = vld [vmem:[%s9283_s2] ss:$16 sps:$4 sm:$0xff]  }
 0x334   : > { %5711 = vmatprep.subr.bf16.mxu0 %v7733_v19  ;;  %5751 = vmatpush1.bf16.msra.mxu1 %v7732_v27  ;;  %v7754_v2 = vld [vmem:[%s9283_s2 + $0x204] ss:$16 sps:$4 sm:$0xff]   ;;  %v7756_v4 = vld [vmem:[%s9283_s2 + $0x200] ss:$16 sps:$4 sm:$0xff]  }
 0x335   : > { %5752 = vmatprep.subr.bf16.mxu1 %v7736_v16  ;;  %v7757_v3 = vld [vmem:[%s9283_s2 + $0x1e4] ss:$16 sps:$4 sm:$0xff]   ;;  %v7759_v6 = vld [vmem:[%s9283_s2 + $0x1e0] ss:$16 sps:$4 sm:$0xff]  }
 0x336   : > { %v7760_v5 = vld [vmem:[%s9283_s2 + $0x3e4] ss:$16 sps:$4 sm:$0xff]   ;;  %v7762_v11 = vld [vmem:[%s9283_s2 + $0x3e0] ss:$16 sps:$4 sm:$0xff]  }
 0x337   : > { %5712 = vmatpush1.bf16.msra.mxu0 %v7735_v57  ;;  %v7763_v8 = vld [vmem:[%s9283_s2 + $0x1c4] ss:$16 sps:$4 sm:$0xff]   ;;  %v7765_v12 = vld [vmem:[%s9283_s2 + $0x1c0] ss:$16 sps:$4 sm:$0xff]  }
 0x338   : > { %5713 = vmatprep.subr.bf16.mxu0 %v7739_v58  ;;  %5753 = vmatpush1.bf16.msra.mxu1 %v7738_v59  ;;  %v7766_v9 = vld [vmem:[%s9283_s2 + $0x3c4] ss:$16 sps:$4 sm:$0xff]   ;;  %v7768_v15 = vld [vmem:[%s9283_s2 + $0x3c0] ss:$16 sps:$4 sm:$0xff]  }
 0x339   : > { %5754 = vmatprep.subr.bf16.mxu1 %v7742_v17  ;;  %v7769_v13 = vld [vmem:[%s9283_s2 + $0x1a4] ss:$16 sps:$4 sm:$0xff]   ;;  %v7771_v20 = vld [vmem:[%s9283_s2 + $0x1a0] ss:$16 sps:$4 sm:$0xff]  }
 0x33a   : > { %v7772_v41 = vld [vmem:[%s9283_s2 + $0x3a4] ss:$16 sps:$4 sm:$0xff]   ;;  %v7774_v49 = vld [vmem:[%s9283_s2 + $0x3a0] ss:$16 sps:$4 sm:$0xff]  }
 0x33b   : > { %5714 = vmatpush1.bf16.msra.mxu0 %v7741_v62  ;;  %v7775_v31 = vld [vmem:[%s9283_s2 + $0x184] ss:$16 sps:$4 sm:$0xff]   ;;  %v7777_v25 = vld [vmem:[%s9283_s2 + $0x180] ss:$16 sps:$4 sm:$0xff]  }
 0x33c   : > { %5715 = vmatprep.subr.bf16.mxu0 %v7745_v0  ;;  %5755 = vmatpush1.bf16.msra.mxu1 %v7744_v24  ;;  %v7778_v54 = vld [vmem:[%s9283_s2 + $0x384] ss:$16 sps:$4 sm:$0xff]   ;;  %v7780_v36 = vld [vmem:[%s9283_s2 + $0x380] ss:$16 sps:$4 sm:$0xff]  }
 0x33d   : > { %5756 = vmatprep.subr.bf16.mxu1 %v7748_v28  ;;  %v8915_v30 = vld [vmem:[#allocation2] sm:$0xff] }
 0x33e   : > { %v4663_v26 = vcombine.high %v8915_v30, %v8915_v30  ;;  %v4670_v37 = vrot.slane %v8915_v30, %v8769_v55  ;;  %v7781_v43 = vld [vmem:[%s9283_s2 + $0x164] ss:$16 sps:$4 sm:$0xff]   ;;  %v7783_v38 = vld [vmem:[%s9283_s2 + $0x160] ss:$16 sps:$4 sm:$0xff]  }
 0x33f   : > { %5716 = vmatpush1.bf16.msra.mxu0 %v7747_v42  ;;  %v7784_v7 = vld [vmem:[%s9283_s2 + $0x364] ss:$16 sps:$4 sm:$0xff]   ;;  %v7786_v40 = vld [vmem:[%s9283_s2 + $0x360] ss:$16 sps:$4 sm:$0xff]  }
 0x340   : > { %5717 = vmatprep.subr.bf16.mxu0 %v7751_v22  ;;  %5757 = vmatpush1.bf16.msra.mxu1 %v7750_v63  ;;  %v4677_v1 = vrot.slane %v4663_v26, %v8769_v55  ;;  %v4678_v18 = vcombine.high %v4670_v37, %v4670_v37  ;;  %v4685_v32 = vsel %vm4684_vm0, %v4670_v37, 0.0  ;;  %v7787_v33 = vld [vmem:[%s9283_s2 + $0x144] ss:$16 sps:$4 sm:$0xff]   ;;  %v7789_v51 = vld [vmem:[%s9283_s2 + $0x140] ss:$16 sps:$4 sm:$0xff]  }
 0x341   : > { %5758 = vmatprep.subr.bf16.mxu1 %v7754_v2  ;;  %v4686_v34 = vrot.slane %v4685_v32, 4  ;;  %v7790_v14 = vld [vmem:[%s9283_s2 + $0x344] ss:$16 sps:$4 sm:$0xff]   ;;  %v7792_v16 = vld [vmem:[%s9283_s2 + $0x340] ss:$16 sps:$4 sm:$0xff]  }
 0x342   : > { %v4679_v39 = vcombine.high %v4677_v1, %v4677_v1  ;;  %v4692_v10 = vsel %vm4684_vm0, %v4678_v18, 0.0  ;;  %v4699_v21 = vsel %vm4684_vm0, %v4677_v1, 0.0  ;;  %v7793_v61 = vld [vmem:[%s9283_s2 + $0x124] ss:$16 sps:$4 sm:$0xff]   ;;  %v7795_v0 = vld [vmem:[%s9283_s2 + $0x120] ss:$16 sps:$4 sm:$0xff]  }
 0x343   : > { %5718 = vmatpush1.bf16.msra.mxu0 %v7753_v35  ;;  %v4687_v45 = vadd.f32 %v4686_v34, %v4685_v32  ;;  %v4693_v29 = vrot.slane %v4692_v10, 4  ;;  %v4700_v56 = vrot.slane %v4699_v21, 4  ;;  %v7796_v57 = vld [vmem:[%s9283_s2 + $0x324] ss:$16 sps:$4 sm:$0xff]   ;;  %v7798_v2 = vld [vmem:[%s9283_s2 + $0x320] ss:$16 sps:$4 sm:$0xff]  }
 0x344   : > { %5719 = vmatprep.subr.bf16.mxu0 %v7757_v3  ;;  %5759 = vmatpush1.bf16.msra.mxu1 %v7756_v4  ;;  %v4706_v46 = vsel %vm4684_vm0, %v4679_v39, 0.0  ;;  %v7799_v24 = vld [vmem:[%s9283_s2 + $0x104] ss:$16 sps:$4 sm:$0xff]  }
 0x345   : > { %5760 = vmatprep.subr.bf16.mxu1 %v7760_v5  ;;  %v4688_v60 = vrot.slane %v4687_v45, 2  ;;  %v4694_v23 = vadd.f32 %v4693_v29, %v4692_v10  ;;  %v4701_v47 = vadd.f32 %v4700_v56, %v4699_v21  ;;  %v4707_v48 = vrot.slane %v4706_v46, 4  ;;  %v7802_v35 = vld [vmem:[%s9283_s2 + $0x304] ss:$16 sps:$4 sm:$0xff]  }
 0x347   : > { %5720 = vmatpush2.bf16.msra.mxu0 %v7759_v6  ;;  %v4689_v52 = vadd.f32 %v4688_v60, %v4687_v45  ;;  %v4695_v53 = vrot.slane %v4694_v23, 2  ;;  %v4702_v19 = vrot.slane %v4701_v47, 2  ;;  %v4708_v27 = vadd.f32 %v4707_v48, %v4706_v46 }
 0x348   : > { %5721 = vmatprep.subr.bf16.mxu0 %v7763_v8  ;;  %5761 = vmatpush2.bf16.msra.mxu1 %v7762_v11  ;;  %v7801_v8 = vld [vmem:[%s9283_s2 + $0x100] ss:$16 sps:$4 sm:$0xff]  }
 0x349   : > { %5762 = vmatprep.subr.bf16.mxu1 %v7766_v9  ;;  %v4690_v58 = vrot.slane %v4689_v52, 1  ;;  %v4696_v59 = vadd.f32 %v4695_v53, %v4694_v23  ;;  %v4703_v17 = vadd.f32 %v4702_v19, %v4701_v47  ;;  %v4709_v62 = vrot.slane %v4708_v27, 2 }
 0x34b   : > { %5722 = vmatpush2.bf16.msra.mxu0 %v7765_v12  ;;  %v4691_v28 = vadd.f32 %v4690_v58, %v4689_v52  ;;  %v4697_v42 = vrot.slane %v4696_v59, 1  ;;  %v4704_v22 = vrot.slane %v4703_v17, 1  ;;  %v4710_v63 = vadd.f32 %v4709_v62, %v4708_v27 }
 0x34c   : > { %5723 = vmatprep.subr.bf16.mxu0 %v7769_v13  ;;  %5763 = vmatpush2.bf16.msra.mxu1 %v7768_v15  ;;  %v7808_v13 = vld [vmem:[%s9283_s2 + $0xec] ss:$16 sps:$4 sm:$0xff]   ;;  %v7804_v15 = vld [vmem:[%s9283_s2 + $0x300] ss:$16 sps:$4 sm:$0xff]  }
 0x34d   : > { %5764 = vmatprep.subr.bf16.mxu1 %v7772_v41  ;;  %v4698_v3 = vadd.f32 %v4697_v42, %v4696_v59  ;;  %v4705_v4 = vadd.f32 %v4704_v22, %v4703_v17  ;;  %v4711_v5 = vrot.slane %v4710_v63, 1  ;;  %v4714_v6 = vmul.f32 0.5, %v4691_v28 }
 0x34f   : > { %5724 = vmatpush2.bf16.msra.mxu0 %v7771_v20  ;;  %v4712_v11 = vadd.f32 %v4711_v5, %v4710_v63  ;;  %v4715_v9 = vmul.f32 0.5, %v4698_v3  ;;  %v4716_v12 = vmul.f32 0.5, %v4705_v4 }
 0x350   : > { %5725 = vmatprep.subr.bf16.mxu0 %v7775_v31  ;;  %5765 = vmatpush2.bf16.msra.mxu1 %v7774_v49  ;;  %v7811_v31 = vld [vmem:[%s9283_s2 + $0x2ec] ss:$16 sps:$4 sm:$0xff]  }
 0x351   : > { %5766 = vmatprep.subr.bf16.mxu1 %v7778_v54  ;;  %v4717_v41 = vmul.f32 0.5, %v4712_v11  ;;  %v4722_v20 = vcombine.low %v4714_v6, %v4715_v9  ;;  %v4871_v9 = vld [vmem:[%s9285_s4] sm:$0xf] }
 0x353   : > { %5726 = vmatpush2.bf16.msra.mxu0 %v7777_v25  ;;  %v4723_v49 = vcombine.low %v4716_v12, %v4717_v41  ;;  %v4730_v54 = vrot.slane %v4722_v20, %v8769_v55  ;;  %v9004_v12 = vsub.s32 0, %v8060_v44  ;;  %v9011_v41 = vsub.s32 2, %v8060_v44 }
 0x354   : > { %5727 = vmatprep.subr.bf16.mxu0 %v7781_v43  ;;  %5767 = vmatpush2.bf16.msra.mxu1 %v7780_v36  ;;  %v9014_v20 = vsub.s32 3, %v8060_v44 }
 0x355   : > { %5768 = vmatprep.subr.bf16.mxu1 %v7784_v7  ;;  %v4737_v25 = vrot.slane %v4723_v49, %v8769_v55 }
 0x357   : > { %5728 = vmatpush2.bf16.msra.mxu0 %v7783_v38  ;;  %v4738_v26 = vcombine.low %v4730_v54, %v4737_v25  ;;  %v4884_v25 = vrot.slane %v4871_v9, %v9011_v41 }
 0x358   : > { %5729 = vmatprep.subr.bf16.mxu0 %v7787_v33  ;;  %5769 = vmatpush2.bf16.msra.mxu1 %v7786_v40 }
 0x359   : > { %5770 = vmatprep.subr.bf16.mxu1 %v7790_v14  ;;  %v8989_v37 = vsub.f32 %v8915_v30, %v4738_v26  ;;  %v4888_v26 = vrot.slane %v4871_v9, %v9014_v20 }
 0x35b   : > { %5730 = vmatpush2.bf16.msra.mxu0 %v7789_v51  ;;  %v4741_v43 = vmul.f32 %v8989_v37, %v8989_v37 }
 0x35c   : > { %5731 = vmatprep.subr.bf16.mxu0 %v7793_v61  ;;  %5771 = vmatpush2.bf16.msra.mxu1 %v7792_v16 }
 0x35d   : > { %5772 = vmatprep.subr.bf16.mxu1 %v7796_v57  ;;  %v4743_v36 = vcombine.high %v4741_v43, %v4741_v43  ;;  %v4750_v1 = vrot.slane %v4741_v43, %v8769_v55  ;;  %v4796_v43 = vld [vmem:[%s9284_s3] sm:$0xf] }
 0x35f   : > { %5732 = vmatpush2.bf16.msra.mxu0 %v7795_v0  ;;  %v4757_v18 = vrot.slane %v4743_v36, %v8769_v55  ;;  %v4758_v32 = vcombine.high %v4750_v1, %v4750_v1  ;;  %v4764_v7 = vsel %vm4684_vm0, %v4750_v1, 0.0 }
 0x360   : > { %5733 = vmatprep.subr.bf16.mxu0 %v7799_v24  ;;  %5773 = vmatpush2.bf16.msra.mxu1 %v7798_v2  ;;  %v4765_v34 = vrot.slane %v4764_v7, 4 }
 0x361   : > { %5774 = vmatprep.subr.bf16.mxu1 %v7802_v35  ;;  %v4759_v38 = vcombine.high %v4757_v18, %v4757_v18  ;;  %v4771_v39 = vsel %vm4684_vm0, %v4758_v32, 0.0  ;;  %v4778_v10 = vsel %vm4684_vm0, %v4757_v18, 0.0  ;;  %v4890_v32 = vcombine.low %v4884_v25, %v4888_v26  ;;  %v7853_v25 = vld [vmem:[%s9283_s2 + $0x20c] ss:$16 sps:$4 sm:$0xff]   ;;  %v7848_v26 = vld [vmem:[%s9283_s2 + $0x8] ss:$16 sps:$4 sm:$0xff]  }
 0x362   : > { %v4766_v21 = vadd.f32 %v4765_v34, %v4764_v7  ;;  %v4772_v30 = vrot.slane %v4771_v39, 4  ;;  %v4779_v33 = vrot.slane %v4778_v10, 4 }
 0x363   : > { %5734 = vmatpush2.bf16.msra.mxu0 %v7801_v8  ;;  %v4785_v45 = vsel %vm4684_vm0, %v4759_v38, 0.0 }
 0x364   : > { %5785 = vmatprep.subr.bf16.mxu0 %v7808_v13  ;;  %5775 = vmatpush2.bf16.msra.mxu1 %v7804_v15  ;;  %v4767_v29 = vrot.slane %v4766_v21, 2  ;;  %v4773_v56 = vadd.f32 %v4772_v30, %v4771_v39  ;;  %v4780_v40 = vadd.f32 %v4779_v33, %v4778_v10  ;;  %v4786_v46 = vrot.slane %v4785_v45, 4 }
 0x365   : > { %5826 = vmatprep.subr.bf16.mxu1 %v7811_v31  ;;  %v9008_v15 = vsub.s32 1, %v8060_v44  ;;  %v4876_v31 = vrot.slane %v4871_v9, %v9004_v12  ;;  %v4904_v30 = vrot.slane %v4890_v32, %v8769_v55  ;;  %v7862_v32 = vld [vmem:[%s9283_s2 + $0x1cc] ss:$16 sps:$4 sm:$0xff]  }
 0x366   : > { %v4768_v14 = vadd.f32 %v4767_v29, %v4766_v21  ;;  %v4774_v60 = vrot.slane %v4773_v56, 2  ;;  %v4781_v23 = vrot.slane %v4780_v40, 2  ;;  %v4787_v47 = vadd.f32 %v4786_v46, %v4785_v45 }
 0x367   : > { %v4880_v54 = vrot.slane %v4871_v9, %v9008_v15  ;;  %v7839_v9 = vld [vmem:[%s9283_s2 + $0x248] ss:$16 sps:$4 sm:$0xff]  }
 0x368   : > { %v4769_v48 = vrot.slane %v4768_v14, 1  ;;  %v4775_v51 = vadd.f32 %v4774_v60, %v4773_v56  ;;  %v4782_v61 = vadd.f32 %v4781_v23, %v4780_v40  ;;  %v4788_v52 = vrot.slane %v4787_v47, 2 }
 0x369   : > { %v4889_v18 = vcombine.low %v4876_v31, %v4880_v54  ;;  %v7842_v31 = vld [vmem:[%s9283_s2 + $0x28] ss:$16 sps:$4 sm:$0xff]  }
 0x36a   : > { %v4770_v53 = vadd.f32 %v4769_v48, %v4768_v14  ;;  %v4776_v19 = vrot.slane %v4775_v51, 1  ;;  %v4783_v27 = vrot.slane %v4782_v61, 1  ;;  %v4789_v16 = vadd.f32 %v4788_v52, %v4787_v47  ;;  %v7806_v52 = vld [vmem:[%s9283_s2 + $0xe8] ss:$16 sps:$4 sm:$0xff]  }
 0x36b   : > { %v4897_v21 = vrot.slane %v4889_v18, %v8769_v55  ;;  %v7845_v54 = vld [vmem:[%s9283_s2 + $0x228] ss:$16 sps:$4 sm:$0xff]  }
 0x36c   : > { %v4777_v57 = vadd.f32 %v4776_v19, %v4775_v51  ;;  %v4784_v58 = vadd.f32 %v4783_v27, %v4782_v61  ;;  %v4790_v59 = vrot.slane %v4789_v16, 1  ;;  %v4792_v17 = vmul.f32 0.5, %v4770_v53  ;;  %v7854_v18 = vld [vmem:[%s9283_s2 + $0x1e8] ss:$16 sps:$4 sm:$0xff]  }
 0x36d   : > { %v4905_v56 = vcombine.low %v4897_v21, %v4904_v30  ;;  %v7866_v21 = vld [vmem:[%s9283_s2 + $0x1a8] ss:$16 sps:$4 sm:$0xff]   ;;  %v7874_v30 = vld [vmem:[%s9283_s2 + $0x18c] ss:$16 sps:$4 sm:$0xff]  }
 0x36e   : > { %v4791_v62 = vadd.f32 %v4790_v59, %v4789_v16  ;;  %v4793_v0 = vmul.f32 0.5, %v4777_v57  ;;  %v4794_v24 = vmul.f32 0.5, %v4784_v58  ;;  %v4797_v28 = vadd.f32 1e-05, %v4792_v17  ;;  %v7809_v16 = vld [vmem:[%s9283_s2 + $0x2e8] ss:$16 sps:$4 sm:$0xff]  }
 0x36f   : > { %v7817_v57 = vld [vmem:[%s9283_s2 + $0x2cc] ss:$16 sps:$4 sm:$0xff]   ;;  %v7812_v58 = vld [vmem:[%s9283_s2 + $0xc8] ss:$16 sps:$4 sm:$0xff]  }
 0x370   : > { %v4795_v42 = vmul.f32 0.5, %v4791_v62  ;;  %v4798_v22 = vadd.f32 1e-05, %v4793_v0  ;;  %v4799_v63 = vadd.f32 1e-05, %v4794_v24  ;;  %7902 = vrsqrt.f32 %v4797_v28 }
 0x371   : > { %v7820_v59 = vld [vmem:[%s9283_s2 + $0xac] ss:$16 sps:$4 sm:$0xff]   ;;  %v7815_v17 = vld [vmem:[%s9283_s2 + $0x2c8] ss:$16 sps:$4 sm:$0xff]  }
 0x372   : > { %v4800_v2 = vadd.f32 1e-05, %v4795_v42  ;;  %7904 = vrsqrt.f32 %v4798_v22  ;;  %v7823_v62 = vld [vmem:[%s9283_s2 + $0x2ac] ss:$16 sps:$4 sm:$0xff]   ;;  %v7818_v0 = vld [vmem:[%s9283_s2 + $0xa8] ss:$16 sps:$4 sm:$0xff]  }
 0x373   : > { %7906 = vrsqrt.f32 %v4799_v63  ;;  %v7826_v24 = vld [vmem:[%s9283_s2 + $0x8c] ss:$16 sps:$4 sm:$0xff]   ;;  %v7821_v28 = vld [vmem:[%s9283_s2 + $0x2a8] ss:$16 sps:$4 sm:$0xff]  }
 0x374   : > { %7908 = vrsqrt.f32 %v4800_v2  ;;  %v7829_v42 = vld [vmem:[%s9283_s2 + $0x28c] ss:$16 sps:$4 sm:$0xff]   ;;  %v7824_v22 = vld [vmem:[%s9283_s2 + $0x88] ss:$16 sps:$4 sm:$0xff]  }
 0x375   : > { %v7832_v63 = vld [vmem:[%s9283_s2 + $0x6c] ss:$16 sps:$4 sm:$0xff]   ;;  %v7827_v2 = vld [vmem:[%s9283_s2 + $0x288] ss:$16 sps:$4 sm:$0xff]  }
 0x37d   : > { %v7903_v35 = vpop.eup %7902 }
 0x37f   : > { %v7905_v3 = vpop.eup %7904 }
 0x380   : > { %v7907_v4 = vpop.eup %7906  ;;  %v4809_v5 = vcombine.low %v7903_v35, %v7905_v3  ;;  %v7835_v35 = vld [vmem:[%s9283_s2 + $0x26c] ss:$16 sps:$4 sm:$0xff]   ;;  %v7830_v3 = vld [vmem:[%s9283_s2 + $0x68] ss:$16 sps:$4 sm:$0xff]  }
 0x381   : > { %v7909_v6 = vpop.eup %7908 }
 0x382   : > { %v4810_v8 = vcombine.low %v7907_v4, %v7909_v6  ;;  %v4817_v11 = vrot.slane %v4809_v5, %v8068_v50  ;;  %v7838_v4 = vld [vmem:[%s9283_s2 + $0x4c] ss:$16 sps:$4 sm:$0xff]   ;;  %v7833_v5 = vld [vmem:[%s9283_s2 + $0x268] ss:$16 sps:$4 sm:$0xff]  }
 0x383   : > { %v7841_v6 = vld [vmem:[%s9283_s2 + $0x24c] ss:$16 sps:$4 sm:$0xff]  }
 0x384   : > { %v4824_v13 = vrot.slane %v4810_v8, %v8068_v50  ;;  %v7836_v8 = vld [vmem:[%s9283_s2 + $0x48] ss:$16 sps:$4 sm:$0xff]  }
 0x386   : > { %v4825_v49 = vcombine.low %v4817_v11, %v4824_v13  ;;  %v7844_v11 = vld [vmem:[%s9283_s2 + $0x2c] ss:$16 sps:$4 sm:$0xff]  }
 0x387   : > { %v7847_v13 = vld [vmem:[%s9283_s2 + $0x22c] ss:$16 sps:$4 sm:$0xff]  }
 0x388   : > { %v4832_v36 = vrot.slane %v4825_v49, %v8068_v50  ;;  %v7850_v49 = vld [vmem:[%s9283_s2 + $0xc] ss:$16 sps:$4 sm:$0xff]  }
 0x38a   : > { %v4834_v1 = vmul.f32 %v4832_v36, %v4796_v43  ;;  %v7856_v43 = vld [vmem:[%s9283_s2 + $0x1ec] ss:$16 sps:$4 sm:$0xff]   ;;  %v7851_v36 = vld [vmem:[%s9283_s2 + $0x208] ss:$16 sps:$4 sm:$0xff]  }
 0x38c   : > { %v4839_v44 = vrot.slane %v4834_v1, %v9004_v12  ;;  %v4843_v7 = vrot.slane %v4834_v1, %v9008_v15  ;;  %v4847_v34 = vrot.slane %v4834_v1, %v9011_v41  ;;  %v4851_v38 = vrot.slane %v4834_v1, %v9014_v20  ;;  %v7859_v1 = vld [vmem:[%s9283_s2 + $0x3ec] ss:$16 sps:$4 sm:$0xff]  }
 0x38e   : > { %v4852_v39 = vcombine.low %v4839_v44, %v4843_v7  ;;  %v4853_v10 = vcombine.low %v4847_v34, %v4851_v38  ;;  %v7857_v44 = vld [vmem:[%s9283_s2 + $0x3e8] ss:$16 sps:$4 sm:$0xff]   ;;  %v7865_v7 = vld [vmem:[%s9283_s2 + $0x3cc] ss:$16 sps:$4 sm:$0xff]  }
 0x38f   : > { %v7860_v34 = vld [vmem:[%s9283_s2 + $0x1c8] ss:$16 sps:$4 sm:$0xff]   ;;  %v7868_v38 = vld [vmem:[%s9283_s2 + $0x1ac] ss:$16 sps:$4 sm:$0xff]  }
 0x390   : > { %v4860_v33 = vrot.slane %v4852_v39, %v8769_v55  ;;  %v4867_v45 = vrot.slane %v4853_v10, %v8769_v55  ;;  %v7863_v39 = vld [vmem:[%s9283_s2 + $0x3c8] ss:$16 sps:$4 sm:$0xff]   ;;  %v7871_v10 = vld [vmem:[%s9283_s2 + $0x3ac] ss:$16 sps:$4 sm:$0xff]  }
 0x392   : > { %v4868_v29 = vcombine.low %v4860_v33, %v4867_v45  ;;  %v7869_v33 = vld [vmem:[%s9283_s2 + $0x3a8] ss:$16 sps:$4 sm:$0xff]   ;;  %v7877_v45 = vld [vmem:[%s9283_s2 + $0x38c] ss:$16 sps:$4 sm:$0xff]  }
 0x394   : > { %v4870_v40 = vmul.f32 %v4868_v29, %v8989_v37  ;;  %v7814_v37 = vld [vmem:[%s9283_s2 + $0xcc] ss:$16 sps:$4 sm:$0xff]   ;;  %v7872_v29 = vld [vmem:[%s9283_s2 + $0x188] ss:$16 sps:$4 sm:$0xff]  }
 0x396   : > { %v4907_v46 = vadd.f32 %v4905_v56, %v4870_v40  ;;  %v7880_v56 = vld [vmem:[%s9283_s2 + $0x16c] ss:$16 sps:$4 sm:$0xff]   ;;  %v7875_v40 = vld [vmem:[%s9283_s2 + $0x388] ss:$16 sps:$4 sm:$0xff]  }
 0x398   : > { %v4908_v14 = vmax.f32 %v4907_v46, 0.0  ;;  %v7883_v46 = vld [vmem:[%s9283_s2 + $0x36c] ss:$16 sps:$4 sm:$0xff]  }
 0x39a   : > { %v4917_v60 = vrot.slane %v4908_v14, %v8769_v55  ;;  %v4910_v23 = vcombine.high %v4908_v14, %v4908_v14  ;;  %v7878_v14 = vld [vmem:[%s9283_s2 + $0x168] ss:$16 sps:$4 sm:$0xff]  }
 0x39c   : > { %v4925_v47 = vcombine.high %v4917_v60, %v4917_v60  ;;  %v4924_v48 = vrot.slane %v4910_v23, %v8769_v55  ;;  %v9035_v51 = vpack.c.bf16 %v4917_v60, %v4917_v60  ;;  %v7886_v60 = vld [vmem:[%s9283_s2 + $0x14c] ss:$16 sps:$4 sm:$0xff]   ;;  %v7881_v23 = vld [vmem:[%s9283_s2 + $0x368] ss:$16 sps:$4 sm:$0xff]  }
 0x39e   : > { %v4932_v61 = vpack.c.bf16 %v4925_v47, %v4925_v47  ;;  %v4926_v53 = vcombine.high %v4924_v48, %v4924_v48  ;;  %v9040_v19 = vpack.c.bf16 %v4924_v48, %v4924_v48  ;;  %v7889_v47 = vld [vmem:[%s9283_s2 + $0x34c] ss:$16 sps:$4 sm:$0xff]   ;;  %v7884_v48 = vld [vmem:[%s9283_s2 + $0x148] ss:$16 sps:$4 sm:$0xff]  }
 0x3a0   : > { %5735 = vmatprep.mubr.bf16.mxu0 %v4932_v61  ;;  %v4934_v27 = vpack.c.bf16 %v4926_v53, %v4926_v53  ;;  %v7895_v53 = vld [vmem:[%s9283_s2 + $0x32c] ss:$16 sps:$4 sm:$0xff]  }
 0x3a1   : > { %5736 = vmatmul.mubr.bf16.vlgmr.msra.gmra.mxu0 %v9035_v51 }
 0x3a2   : > { %5786 = vmatpush1.bf16.msra.mxu0 %v7806_v52  ;;  %5776 = vmatprep.mubr.bf16.mxu1 %v4934_v27  ;;  %v7887_v52 = vld [vmem:[%s9283_s2 + $0x348] ss:$16 sps:$4 sm:$0xff]  }
 0x3a3   : > { %5777 = vmatmul.mubr.bf16.vlgmr.msra.gmra.mxu1 %v9040_v19  ;;  %5787 = vmatprep.subr.bf16.mxu0 %v7814_v37  ;;  %v7890_v37 = vld [vmem:[%s9283_s2 + $0x128] ss:$16 sps:$4 sm:$0xff]  }
 0x3a4   : > { %5827 = vmatpush1.bf16.msra.mxu1 %v7809_v16  ;;  %5817 = vmatprep.mubr.bf16.mxu0 %v4932_v61  ;;  %v7892_v61 = vld [vmem:[%s9283_s2 + $0x12c] ss:$16 sps:$4 sm:$0xff]   ;;  %v7893_v16 = vld [vmem:[%s9283_s2 + $0x328] ss:$16 sps:$4 sm:$0xff]  }
 0x3a5   : > { %5828 = vmatprep.subr.bf16.mxu1 %v7817_v57  ;;  %5858 = vmatprep.mubr.bf16.mxu1 %v4934_v27  ;;  %v7898_v27 = vld [vmem:[%s9283_s2 + $0x10c] ss:$16 sps:$4 sm:$0xff]  }
 0x3a6   : > { %5788 = vmatpush1.bf16.msra.mxu0 %v7812_v58  ;;  %v7901_v57 = vld [vmem:[%s9283_s2 + $0x30c] ss:$16 sps:$4 sm:$0xff]   ;;  %v7896_v58 = vld [vmem:[%s9283_s2 + $0x108] ss:$16 sps:$4 sm:$0xff]  }
 0x3a7   : > { %5789 = vmatprep.subr.bf16.mxu0 %v7820_v59  ;;  %v7899_v59 = vld [vmem:[%s9283_s2 + $0x308] ss:$16 sps:$4 sm:$0xff]  }
 0x3a8   : > { %5829 = vmatpush1.bf16.msra.mxu1 %v7815_v17 }
 0x3a9   : > { %5830 = vmatprep.subr.bf16.mxu1 %v7823_v62 }
 0x3aa   : > { %5790 = vmatpush1.bf16.msra.mxu0 %v7818_v0 }
 0x3ab   : > { %5791 = vmatprep.subr.bf16.mxu0 %v7826_v24 }
 0x3ac   : > { %5831 = vmatpush1.bf16.msra.mxu1 %v7821_v28 }
 0x3ad   : > { %5832 = vmatprep.subr.bf16.mxu1 %v7829_v42 }
 0x3ae   : > { %5792 = vmatpush1.bf16.msra.mxu0 %v7824_v22 }
 0x3af   : > { %5793 = vmatprep.subr.bf16.mxu0 %v7832_v63 }
 0x3b0   : > { %5833 = vmatpush1.bf16.msra.mxu1 %v7827_v2 }
 0x3b1   : > { %5834 = vmatprep.subr.bf16.mxu1 %v7835_v35 }
 0x3b2   : > { %5794 = vmatpush1.bf16.msra.mxu0 %v7830_v3 }
 0x3b3   : > { %5795 = vmatprep.subr.bf16.mxu0 %v7838_v4 }
 0x3b4   : > { %5835 = vmatpush1.bf16.msra.mxu1 %v7833_v5 }
 0x3b5   : > { %5836 = vmatprep.subr.bf16.mxu1 %v7841_v6 }
 0x3b6   : > { %5796 = vmatpush1.bf16.msra.mxu0 %v7836_v8 }
 0x3b7   : > { %5797 = vmatprep.subr.bf16.mxu0 %v7844_v11 }
 0x3b8   : > { %5837 = vmatpush1.bf16.msra.mxu1 %v7839_v9 }
 0x3b9   : > { %5838 = vmatprep.subr.bf16.mxu1 %v7847_v13 }
 0x3ba   : > { %5798 = vmatpush1.bf16.msra.mxu0 %v7842_v31 }
 0x3bb   : > { %5799 = vmatprep.subr.bf16.mxu0 %v7850_v49 }
 0x3bc   : > { %5839 = vmatpush1.bf16.msra.mxu1 %v7845_v54 }
 0x3bd   : > { %5840 = vmatprep.subr.bf16.mxu1 %v7853_v25 }
 0x3be   : > { %5800 = vmatpush1.bf16.msra.mxu0 %v7848_v26 }
 0x3bf   : > { %5801 = vmatprep.subr.bf16.mxu0 %v7856_v43 }
 0x3c0   : > { %5841 = vmatpush1.bf16.msra.mxu1 %v7851_v36 }
 0x3c1   : > { %5842 = vmatprep.subr.bf16.mxu1 %v7859_v1 }
 0x3c2   : > { %5802 = vmatpush2.bf16.msra.mxu0 %v7854_v18 }
 0x3c3   : > { %5803 = vmatprep.subr.bf16.mxu0 %v7862_v32 }
 0x3c4   : > { %5843 = vmatpush2.bf16.msra.mxu1 %v7857_v44 }
 0x3c5   : > { %5844 = vmatprep.subr.bf16.mxu1 %v7865_v7 }
 0x3c6   : > { %5804 = vmatpush2.bf16.msra.mxu0 %v7860_v34 }
 0x3c7   : > { %5805 = vmatprep.subr.bf16.mxu0 %v7868_v38 }
 0x3c8   : > { %5845 = vmatpush2.bf16.msra.mxu1 %v7863_v39 }
 0x3c9   : > { %5846 = vmatprep.subr.bf16.mxu1 %v7871_v10 }
 0x3ca   : > { %5806 = vmatpush2.bf16.msra.mxu0 %v7866_v21 }
 0x3cb   : > { %5807 = vmatprep.subr.bf16.mxu0 %v7874_v30 }
 0x3cc   : > { %5847 = vmatpush2.bf16.msra.mxu1 %v7869_v33 }
 0x3cd   : > { %5848 = vmatprep.subr.bf16.mxu1 %v7877_v45 }
 0x3ce   : > { %5808 = vmatpush2.bf16.msra.mxu0 %v7872_v29 }
 0x3cf   : > { %5809 = vmatprep.subr.bf16.mxu0 %v7880_v56 }
 0x3d0   : > { %5849 = vmatpush2.bf16.msra.mxu1 %v7875_v40 }
 0x3d1   : > { %5850 = vmatprep.subr.bf16.mxu1 %v7883_v46 }
 0x3d2   : > { %5810 = vmatpush2.bf16.msra.mxu0 %v7878_v14 }
 0x3d3   : > { %5811 = vmatprep.subr.bf16.mxu0 %v7886_v60 }
 0x3d4   : > { %5851 = vmatpush2.bf16.msra.mxu1 %v7881_v23 }
 0x3d5   : > { %5852 = vmatprep.subr.bf16.mxu1 %v7889_v47 }
 0x3d6   : > { %5812 = vmatpush2.bf16.msra.mxu0 %v7884_v48 }
 0x3d7   : > { %5813 = vmatprep.subr.bf16.mxu0 %v7892_v61 }
 0x3d8   : > { %5853 = vmatpush2.bf16.msra.mxu1 %v7887_v52 }
 0x3d9   : > { %5854 = vmatprep.subr.bf16.mxu1 %v7895_v53 }
 0x3da   : > { %5814 = vmatpush2.bf16.msra.mxu0 %v7890_v37 }
 0x3db   : > { %5815 = vmatprep.subr.bf16.mxu0 %v7898_v27 }
 0x3dc   : > { %5855 = vmatpush2.bf16.msra.mxu1 %v7893_v16 }
 0x3dd   : > { %5856 = vmatprep.subr.bf16.mxu1 %v7901_v57 }
 0x3de   : > { %5816 = vmatpush2.bf16.msra.mxu0 %v7896_v58 }
 0x3e0   : > { %5857 = vmatpush2.bf16.msra.mxu1 %v7899_v59 }
 0x3e1   : > { %5818 = vmatmul.mubr.bf16.vlgmr.msra.gmra.mxu0 %v9035_v51 }
 0x3e3   : > { %5859 = vmatmul.mubr.bf16.vlgmr.msra.gmra.mxu1 %v9040_v19 }
 0x461   : > { %v5737_v17 = vpop.f32.mrf.mxu0 }
 0x463   : > { %v5739_v62 = vpop.f32.mrf.mxu0  ;;  %v5778_v0 = vpop.f32.mrf.mxu1 }
 0x464   : > { %v5779_v24 = vadd.f32 %v5778_v0, %v5737_v17 }
 0x465   : > { %v5741_v28 = vpop.f32.mrf.mxu0  ;;  %v5780_v42 = vpop.f32.mrf.mxu1 }
 0x466   : > { %v5867_v22 = vsel %vm4684_vm0, %v5779_v24, 0.0  ;;  %v5781_v63 = vadd.f32 %v5780_v42, %v5739_v62 }
 0x467   : > { %v5868_v2 = vrot.slane %v5867_v22, 4  ;;  %v5742_v35 = vpop.f32.mrf.mxu0  ;;  %v5782_v3 = vpop.f32.mrf.mxu1 }
 0x468   : > { %v5874_v4 = vsel %vm4684_vm0, %v5781_v63, 0.0 }
 0x469   : > { %v5869_v5 = vadd.f32 %v5868_v2, %v5867_v22  ;;  %v5875_v6 = vrot.slane %v5874_v4, 4  ;;  %v5783_v8 = vpop.f32.mrf.mxu1 }
 0x46b   : > { %v5870_v51 = vrot.slane %v5869_v5, 2  ;;  %v5876_v11 = vadd.f32 %v5875_v6, %v5874_v4 }
 0x46d   : > { %v5871_v19 = vadd.f32 %v5870_v51, %v5869_v5  ;;  %v5877_v9 = vrot.slane %v5876_v11, 2 }
 0x46f   : > { %v5872_v13 = vrot.slane %v5871_v19, 1  ;;  %v5878_v31 = vadd.f32 %v5877_v9, %v5876_v11 }
 0x471   : > { %v5873_v49 = vadd.f32 %v5872_v13, %v5871_v19  ;;  %v5879_v54 = vrot.slane %v5878_v31, 1 }
 0x473   : > { %v5895_v25 = vmul.f32 0.5, %v5873_v49  ;;  %v5880_v26 = vadd.f32 %v5879_v54, %v5878_v31 }
 0x475   : > { %v9231_v43 = vsub.f32 %v5779_v24, %v5895_v25  ;;  %v5896_v36 = vmul.f32 0.5, %v5880_v26 }
 0x477   : > { %v5903_v1 = vmul.f32 %v9231_v43, %v9231_v43  ;;  %v9235_v18 = vsub.f32 %v5781_v63, %v5896_v36 }
 0x479   : > { %v5907_v32 = vsel %vm4684_vm0, %v5903_v1, 0.0  ;;  %v5904_v44 = vmul.f32 %v9235_v18, %v9235_v18 }
 0x47a   : > { %v5908_v7 = vrot.slane %v5907_v32, 4 }
 0x47b   : > { %v5914_v34 = vsel %vm4684_vm0, %v5904_v44, 0.0 }
 0x47c   : > { %v5909_v38 = vadd.f32 %v5908_v7, %v5907_v32  ;;  %v5915_v39 = vrot.slane %v5914_v34, 4 }
 0x47e   : > { %v5910_v10 = vrot.slane %v5909_v38, 2  ;;  %v5916_v21 = vadd.f32 %v5915_v39, %v5914_v34 }
 0x480   : > { %v5911_v30 = vadd.f32 %v5910_v10, %v5909_v38  ;;  %v5917_v33 = vrot.slane %v5916_v21, 2 }
 0x482   : > { %v5912_v45 = vrot.slane %v5911_v30, 1  ;;  %v5918_v29 = vadd.f32 %v5917_v33, %v5916_v21 }
 0x484   : > { %v5913_v56 = vadd.f32 %v5912_v45, %v5911_v30  ;;  %v5919_v40 = vrot.slane %v5918_v29, 1 }
 0x486   : > { %v5935_v46 = vmul.f32 0.5, %v5913_v56  ;;  %v5920_v14 = vadd.f32 %v5919_v40, %v5918_v29 }
 0x488   : > { %v5940_v60 = vadd.f32 1e-05, %v5935_v46  ;;  %v5936_v23 = vmul.f32 0.5, %v5920_v14 }
 0x48a   : > { %v5941_v47 = vadd.f32 1e-05, %v5936_v23  ;;  %7910 = vrsqrt.f32 %v5940_v60 }
 0x48c   : > { %7912 = vrsqrt.f32 %v5941_v47 }
 0x497   : > { %v7911_v48 = vpop.eup %7910 }
 0x499   : > { %v7913_v61 = vpop.eup %7912 }
 0x49a   : > { %v5952_v52 = vcombine.low %v7911_v48, %v7913_v61  ;;  %v5939_v61 = vld [vmem:[%s9286_s5] sm:$0xf] }
 0x49c   : > { %v5960_v23 = vrot.slane %v5952_v52, %v8068_v50 }
 0x4a1   : > { %v5819_v53 = vpop.f32.mrf.mxu0 }
 0x4a3   : > { %v5821_v37 = vpop.f32.mrf.mxu0  ;;  %v5860_v27 = vpop.f32.mrf.mxu1 }
 0x4a4   : > { %v5861_v16 = vadd.f32 %v5860_v27, %v5819_v53 }
 0x4a5   : > { %v5823_v57 = vpop.f32.mrf.mxu0  ;;  %v5862_v58 = vpop.f32.mrf.mxu1 }
 0x4a6   : > { %v5881_v59 = vsel %vm4684_vm0, %v5861_v16, 0.0  ;;  %v5863_v17 = vadd.f32 %v5862_v58, %v5821_v37  ;;  %v6003_v37 = vld [vmem:[%s9287_s6] sm:$0xf] }
 0x4a7   : > { %v5882_v62 = vrot.slane %v5881_v59, 4  ;;  %v5824_v0 = vpop.f32.mrf.mxu0  ;;  %v5864_v24 = vpop.f32.mrf.mxu1  ;;  %v6012_v57 = vrot.slane %v6003_v37, %v9008_v15  ;;  %v6016_v52 = vrot.slane %v6003_v37, %v9011_v41  ;;  %v6020_v58 = vrot.slane %v6003_v37, %v9014_v20 }
 0x4a8   : > { %v5888_v28 = vsel %vm4684_vm0, %v5863_v17, 0.0 }
 0x4a9   : > { %v5883_v42 = vadd.f32 %v5882_v62, %v5881_v59  ;;  %v5889_v22 = vrot.slane %v5888_v28, 4  ;;  %v5865_v63 = vpop.f32.mrf.mxu1 }
 0x4ab   : > { %v5884_v2 = vrot.slane %v5883_v42, 2  ;;  %v5890_v35 = vadd.f32 %v5889_v22, %v5888_v28 }
 0x4ad   : > { %v5885_v3 = vadd.f32 %v5884_v2, %v5883_v42  ;;  %v5891_v4 = vrot.slane %v5890_v35, 2 }
 0x4af   : > { %v5886_v5 = vrot.slane %v5885_v3, 1  ;;  %v5892_v6 = vadd.f32 %v5891_v4, %v5890_v35 }
 0x4b1   : > { %v5887_v8 = vadd.f32 %v5886_v5, %v5885_v3  ;;  %v5893_v51 = vrot.slane %v5892_v6, 1 }
 0x4b3   : > { %v5897_v11 = vmul.f32 0.5, %v5887_v8  ;;  %v5894_v19 = vadd.f32 %v5893_v51, %v5892_v6 }
 0x4b5   : > { %v5901_v9 = vsub.f32 %v5861_v16, %v5897_v11  ;;  %v5898_v13 = vmul.f32 0.5, %v5894_v19  ;;  %v6008_v16 = vrot.slane %v6003_v37, %v9004_v12 }
 0x4b7   : > { %v5905_v31 = vmul.f32 %v5901_v9, %v5901_v9  ;;  %v5902_v49 = vsub.f32 %v5863_v17, %v5898_v13 }
 0x4b9   : > { %v5921_v54 = vsel %vm4684_vm0, %v5905_v31, 0.0  ;;  %v5906_v25 = vmul.f32 %v5902_v49, %v5902_v49 }
 0x4ba   : > { %v5922_v26 = vrot.slane %v5921_v54, 4 }
 0x4bb   : > { %v5928_v36 = vsel %vm4684_vm0, %v5906_v25, 0.0 }
 0x4bc   : > { %v5923_v1 = vadd.f32 %v5922_v26, %v5921_v54  ;;  %v5929_v32 = vrot.slane %v5928_v36, 4 }
 0x4be   : > { %v5924_v44 = vrot.slane %v5923_v1, 2  ;;  %v5930_v7 = vadd.f32 %v5929_v32, %v5928_v36 }
 0x4c0   : > { %v5925_v34 = vadd.f32 %v5924_v44, %v5923_v1  ;;  %v5931_v38 = vrot.slane %v5930_v7, 2 }
 0x4c2   : > { %v5926_v39 = vrot.slane %v5925_v34, 1  ;;  %v5932_v10 = vadd.f32 %v5931_v38, %v5930_v7 }
 0x4c4   : > { %v5927_v21 = vadd.f32 %v5926_v39, %v5925_v34  ;;  %v5933_v30 = vrot.slane %v5932_v10, 1 }
 0x4c6   : > { %v5937_v33 = vmul.f32 0.5, %v5927_v21  ;;  %v5934_v45 = vadd.f32 %v5933_v30, %v5932_v10 }
 0x4c8   : > { %v5942_v29 = vadd.f32 1e-05, %v5937_v33  ;;  %v5938_v56 = vmul.f32 0.5, %v5934_v45 }
 0x4ca   : > { %v5943_v40 = vadd.f32 1e-05, %v5938_v56  ;;  %7914 = vrsqrt.f32 %v5942_v29 }
 0x4cc   : > { %7916 = vrsqrt.f32 %v5943_v40 }
 0x4d7   : > { %v7915_v46 = vpop.eup %7914 }
 0x4d9   : > { %v7917_v14 = vpop.eup %7916 }
 0x4da   : > { %v5953_v60 = vcombine.low %v7915_v46, %v7917_v14 }
 0x4dc   : > { %v5967_v47 = vrot.slane %v5953_v60, %v8068_v50 }
 0x4de   : > { %v5968_v48 = vcombine.low %v5960_v23, %v5967_v47 }
 0x4e0   : > { %v5975_v53 = vrot.slane %v5968_v48, %v8068_v50 }
 0x4e2   : > { %v5977_v27 = vmul.f32 %v5975_v53, %v5939_v61 }
 0x4e4   : > { %v5982_v59 = vrot.slane %v5977_v27, %v9004_v12  ;;  %v5986_v17 = vrot.slane %v5977_v27, %v9008_v15  ;;  %v5990_v62 = vrot.slane %v5977_v27, %v9011_v41  ;;  %v5994_v50 = vrot.slane %v5977_v27, %v9014_v20 }
 0x4e6   : > { %v5999_v0 = vmul.f32 %v5982_v59, %v9231_v43  ;;  %v6000_v24 = vmul.f32 %v5986_v17, %v9235_v18  ;;  %v6001_v28 = vmul.f32 %v5990_v62, %v5901_v9  ;;  %v6002_v42 = vmul.f32 %v5994_v50, %v5902_v49 }
 0x4e8   : > { %v6025_v22 = vadd.f32 %v6008_v16, %v5999_v0  ;;  %v6026_v63 = vadd.f32 %v6012_v57, %v6000_v24  ;;  %v6027_v2 = vadd.f32 %v6016_v52, %v6001_v28  ;;  %v6028_v35 = vadd.f32 %v6020_v58, %v6002_v42 }
 0x4ea   : > { %v6033_v3 = vcombine.low %v6025_v22, %v6026_v63  ;;  %v6034_v4 = vcombine.low %v6027_v2, %v6028_v35 }
 0x4ec   : > { %v6041_v12 = vrot.slane %v6033_v3, %v8769_v55  ;;  %v6048_v15 = vrot.slane %v6034_v4, %v8769_v55 }
 0x4ee   : > { %v6049_v5 = vcombine.low %v6041_v12, %v6048_v15 }
 0x4f0   : > { %6051 = vst [vmem:[#allocation3] sm:$0xff] %v6049_v5 }
 0x4f1 PF: > { %p6829_p7 = scmp.eq.s32.totalorder %s8004_s25, 3  ;;  %s7957_s26 = smov [#allocation3]  }
 0x4f2   : > { %s6059_s27 = sshll.u32 %s7957_s26, 4  ;;  %s6060_s27 = int_to_ptr.vmem [resolvable:$true] %s6059_s27 }
 0x4f3   : > { %s7918_s28 = scalar_lea.vmem %s6060_s27, 128  ;;  %p7925_p11 = scmp.lt.s32.totalorder %s6060_s27, %s6060_s27 }
 0x4f4   : > { %p7919_p8 = scmp.ne.s32.totalorder %s6060_s27, %s7918_s28  ;;  %p7926_p12 = scmp.lt.s32.totalorder %s7918_s28, %s7918_s28 }
 0x4f6   : > { %p7920_p9 = pnand %p7919_p8, %p6829_p7  ;;  %p7927_p13 = por %p7926_p12, %p7925_p11 }
 0x4f8   : > { %p7921_p10 = pneg %p7920_p9 }
 0x4fa   : > { %p7928_p0 = pnand %p7927_p13, %p7921_p10 }
 0x4fc   : > { %7931 = shalt.err (!%p7928_p0)
}
 0x4fd   : > { %6826 = dma.vmem_to_hbm [thread:$0]  (%p6829_p7), %s6060_s27, 128, %s9288_s7, [#allocation4]  }
 0x4fe   : > { %7947 = dma.done.wait (%p6829_p7), [#allocation4], 128  }
 0x4ff   : > { %7949 = vsyncadd (%p6829_p7), [#allocation4], 4294967168 }
 0x500 PF: > { %s18_s24 = sadd.s32 1, %s7952_s24  }
 0x501   : > { %p15_p1 = scmp.ge.s32.totalorder %s18_s24, 6  }
 0x503   :  { %17 = sbr.rel (!%p15_p1) target bundleno = 1 (0x1), region = 86 }
 0x508   :  { %6072 = vsyncpa [#allocation4], 1 }
 0x509   :  { %6074 = vsyncpa [#allocation4 + $0x1], 1 }

</bundles_post_ra>
